<compile_context>
chip_gen: v6e
topology: v6e:2x2x1
jax: 0.10.0
libtpu: 0.0.40
codegen_flags: <defaults>
</compile_context>

<pallas_src>
import math
import functools

import jax
import jax.numpy as jnp
from jax.experimental import pallas as pl
from jax.experimental.pallas import tpu as pltpu

# ----- synthetic hyperparameters (small, consistent with the module __init__) -----
ALPHABET_SIZE = 32
TF_D_MODEL = 32
TF_N_HEADS = 4
TF_ENC_LAYERS = 2
TF_DEC_LAYERS = 2
TF_DIM_FEEDFORWARD = 64
D_STROKE = 4
MAX_CHAR_LEN = 16
MAX_STROKE_LEN = 16
TF_DROPOUT = 0.0          # eval-mode semantics: dropout == identity
ADD_NOISE = False         # noise branch disabled (no self.noise defined when False)
NEG_INF = -1e30
LN_EPS = 1e-5


# ============================ in-kernel helpers (operate on values) ============================

def _layernorm(x, g, b):
    mu = jnp.mean(x, axis=-1, keepdims=True)
    xc = x - mu
    var = jnp.mean(xc * xc, axis=-1, keepdims=True)
    return xc * jax.lax.rsqrt(var + LN_EPS) * g + b


def _attention(q_all, k_all, v_all, masks, B, Lq, Lk, H, Dh, scale):
    """q_all:(B*Lq,D), k_all/v_all:(B*Lk,D), masks: list of (Lq,Lk) additive masks."""
    rows = []
    for b in range(B):
        qb = q_all[b * Lq:(b + 1) * Lq, :]
        kb = k_all[b * Lk:(b + 1) * Lk, :]
        vb = v_all[b * Lk:(b + 1) * Lk, :]
        mb = masks[b]
        heads = []
        for h in range(H):
            qh = qb[:, h * Dh:(h + 1) * Dh]
            kh = kb[:, h * Dh:(h + 1) * Dh]
            vh = vb[:, h * Dh:(h + 1) * Dh]
            s = jax.lax.dot_general(
                qh, kh, (((1,), (1,)), ((), ())),
                preferred_element_type=jnp.float32) * scale + mb
            s = s - jnp.max(s, axis=-1, keepdims=True)
            p = jnp.exp(s)
            p = p * pl.reciprocal(jnp.sum(p, axis=-1, keepdims=True), approx=True)
            heads.append(jnp.dot(p, vh, preferred_element_type=jnp.float32))
        rows.append(jnp.concatenate(heads, axis=-1))          # (Lq, D)
    return jnp.concatenate(rows, axis=0)                       # (B*Lq, D)


# ============================ fused Pallas kernels ============================

def _encoder_stack_kernel(c_len_ref,
                          src_ref,
                          wqkv_ref, bqkv_ref, wo_ref, bo_ref,
                          w1_ref, b1_ref, w2_ref, b2_ref,
                          ln1g_ref, ln1b_ref, ln2g_ref, ln2b_ref,
                          fng_ref, fnb_ref,
                          mem_ref,
                          *, n_layers, B, L, H):
    D = src_ref.shape[-1]
    Dh = D // H
    scale = 1.0 / math.sqrt(Dh)

    # key-padding masks built in-kernel from SMEM-prefetched lengths
    key_j = jax.lax.broadcasted_iota(jnp.int32, (L, L), 1)
    masks = [jnp.where(key_j >= c_len_ref[b], NEG_INF, 0.0) for b in range(B)]

    x = src_ref[...]                                            # (B*L, D)

    for l in range(n_layers):
        # fused QKV projection
        qkv = jnp.dot(x, wqkv_ref[l], preferred_element_type=jnp.float32) + bqkv_ref[l]
        attn = _attention(qkv[:, :D], qkv[:, D:2 * D], qkv[:, 2 * D:],
                          masks, B, L, L, H, Dh, scale)
        attn = jnp.dot(attn, wo_ref[l], preferred_element_type=jnp.float32) + bo_ref[l]
        x = _layernorm(x + attn, ln1g_ref[l], ln1b_ref[l])
        # fused FFN
        ff = jnp.maximum(
            jnp.dot(x, w1_ref[l], preferred_element_type=jnp.float32) + b1_ref[l], 0.0)
        ff = jnp.dot(ff, w2_ref[l], preferred_element_type=jnp.float32) + b2_ref[l]
        x = _layernorm(x + ff, ln2g_ref[l], ln2b_ref[l])

    # final encoder LayerNorm (plain, no residual)
    mem_ref[...] = _layernorm(x, fng_ref[...], fnb_ref[...])


def _decoder_stack_kernel(c_len_ref, x_len_ref,
                          x_ref, pe_ref, tgtw_ref, tgtb_ref, mem_in_ref,
                          swqkv_ref, sbqkv_ref, swo_ref, sbo_ref,
                          cwq_ref, cbq_ref, cwkv_ref, cbkv_ref, cwo_ref, cbo_ref,
                          w1_ref, b1_ref, w2_ref, b2_ref,
                          ln1g_ref, ln1b_ref, ln2g_ref, ln2b_ref, ln3g_ref, ln3b_ref,
                          fng_ref, fnb_ref, genw_ref, genb_ref,
                          out_ref,
                          *, n_layers, B, Lx, Lc, H):
    D = tgtw_ref.shape[-1]
    Dh = D // H
    scale = 1.0 / math.sqrt(Dh)

    # tgt embedding: Linear(D_STROKE -> D) + positional encoding (dropout = identity)
    y = (jnp.dot(x_ref[...], tgtw_ref[...], preferred_element_type=jnp.float32)
         + tgtb_ref[...] + pe_ref[...])                         # (B*Lx, D)
    mem = mem_in_ref[...]                                       # (B*Lc, D)

    # masks built in-kernel from SMEM-prefetched lengths
    row_i = jax.lax.broadcasted_iota(jnp.int32, (Lx, Lx), 0)
    col_j = jax.lax.broadcasted_iota(jnp.int32, (Lx, Lx), 1)
    cross_j = jax.lax.broadcasted_iota(jnp.int32, (Lx, Lc), 1)
    causal = col_j > row_i
    self_masks = [jnp.where(causal | (col_j >= x_len_ref[b]), NEG_INF, 0.0)
                  for b in range(B)]
    cross_masks = [jnp.where(cross_j >= c_len_ref[b], NEG_INF, 0.0)
                   for b in range(B)]

    for l in range(n_layers):
        # self-attention (fused QKV)
        qkv = jnp.dot(y, swqkv_ref[l], preferred_element_type=jnp.float32) + sbqkv_ref[l]
        sa = _attention(qkv[:, :D], qkv[:, D:2 * D], qkv[:, 2 * D:],
                        self_masks, B, Lx, Lx, H, Dh, scale)
        sa = jnp.dot(sa, swo_ref[l], preferred_element_type=jnp.float32) + sbo_ref[l]
        y = _layernorm(y + sa, ln1g_ref[l], ln1b_ref[l])
        # cross-attention (fused KV on memory)
        q = jnp.dot(y, cwq_ref[l], preferred_element_type=jnp.float32) + cbq_ref[l]
        kv = jnp.dot(mem, cwkv_ref[l], preferred_element_type=jnp.float32) + cbkv_ref[l]
        ca = _attention(q, kv[:, :D], kv[:, D:],
                        cross_masks, B, Lx, Lc, H, Dh, scale)
        ca = jnp.dot(ca, cwo_ref[l], preferred_element_type=jnp.float32) + cbo_ref[l]
        y = _layernorm(y + ca, ln2g_ref[l], ln2b_ref[l])
        # fused FFN
        ff = jnp.maximum(
            jnp.dot(y, w1_ref[l], preferred_element_type=jnp.float32) + b1_ref[l], 0.0)
        ff = jnp.dot(ff, w2_ref[l], preferred_element_type=jnp.float32) + b2_ref[l]
        y = _layernorm(y + ff, ln3g_ref[l], ln3b_ref[l])

    # final decoder LayerNorm + generator
    y = _layernorm(y, fng_ref[...], fnb_ref[...])
    # TODO(synk): ADD_NOISE branch (self.noise.sample) omitted — flag is False in this config.
    out_ref[...] = (jnp.dot(y, genw_ref[...], preferred_element_type=jnp.float32)
                    + genb_ref[...])


# ============================ pallas_call wrappers ============================

def _full_spec(shape):
    nd = len(shape)
    return pl.BlockSpec(tuple(shape), lambda i, *prefetch: (0,) * nd)


_COMPILER_PARAMS = pltpu.CompilerParams(
    dimension_semantics=("arbitrary",),
    vmem_limit_bytes=32 * 1024 * 1024,
)


def encoder_stack(c_len, src2d, p, B, Lc):
    D = src2d.shape[-1]
    F = TF_DIM_FEEDFORWARD
    H = TF_N_HEADS
    Dh = D // H
    inputs = [src2d,
              p['enc_wqkv'], p['enc_bqkv'], p['enc_wo'], p['enc_bo'],
              p['enc_w1'], p['enc_b1'], p['enc_w2'], p['enc_b2'],
              p['enc_ln1_g'], p['enc_ln1_b'], p['enc_ln2_g'], p['enc_ln2_b'],
              p['enc_norm_g'], p['enc_norm_b']]
    M = B * Lc
    flops_layer = (2 * M * D * 3 * D + 4 * B * H * Lc * Lc * Dh
                   + 2 * M * D * D + 4 * M * D * F)
    cost = pl.CostEstimate(
        flops=int(TF_ENC_LAYERS * flops_layer + 10 * M * D),
        transcendentals=int(TF_ENC_LAYERS * B * H * Lc * Lc),
        bytes_accessed=int(sum(int(a.size) * a.dtype.itemsize for a in inputs)
                           + M * D * 4 + c_len.size * 4),
    )
    kern = functools.partial(_encoder_stack_kernel,
                             n_layers=TF_ENC_LAYERS, B=B, L=Lc, H=H)
    return pl.pallas_call(
        kern,
        out_shape=jax.ShapeDtypeStruct((M, D), jnp.float32),
        grid_spec=pltpu.PrefetchScalarGridSpec(
            num_scalar_prefetch=1,
            grid=(1,),
            in_specs=[_full_spec(a.shape) for a in inputs],
            out_specs=_full_spec((M, D)),
        ),
        compiler_params=_COMPILER_PARAMS,
        cost_estimate=cost,
    )(c_len, *inputs)


def decoder_stack(c_len, x_len, x2d, pe2d, mem2d, p, B, Lx, Lc):
    D = TF_D_MODEL
    F = TF_DIM_FEEDFORWARD
    H = TF_N_HEADS
    Dh = D // H
    inputs = [x2d, pe2d, p['tgt_w'], p['tgt_b'], mem2d,
              p['dec_swqkv'], p['dec_sbqkv'], p['dec_swo'], p['dec_sbo'],
              p['dec_cwq'], p['dec_cbq'], p['dec_cwkv'], p['dec_cbkv'],
              p['dec_cwo'], p['dec_cbo'],
              p['dec_w1'], p['dec_b1'], p['dec_w2'], p['dec_b2'],
              p['dec_ln1_g'], p['dec_ln1_b'], p['dec_ln2_g'], p['dec_ln2_b'],
              p['dec_ln3_g'], p['dec_ln3_b'],
              p['dec_norm_g'], p['dec_norm_b'], p['gen_w'], p['gen_b']]
    M = B * Lx
    flops_layer = (2 * M * D * 3 * D + 4 * B * H * Lx * Lx * Dh + 2 * M * D * D
                   + 2 * M * D * D + 2 * B * Lc * D * 2 * D
                   + 4 * B * H * Lx * Lc * Dh + 2 * M * D * D
                   + 4 * M * D * F)
    cost = pl.CostEstimate(
        flops=int(TF_DEC_LAYERS * flops_layer
                  + 2 * M * D_STROKE * D + 2 * M * D * D_STROKE + 10 * M * D),
        transcendentals=int(TF_DEC_LAYERS * B * H * (Lx * Lx + Lx * Lc)),
        bytes_accessed=int(sum(int(a.size) * a.dtype.itemsize for a in inputs)
                           + M * D_STROKE * 4 + (c_len.size + x_len.size) * 4),
    )
    kern = functools.partial(_decoder_stack_kernel,
                             n_layers=TF_DEC_LAYERS, B=B, Lx=Lx, Lc=Lc, H=H)
    return pl.pallas_call(
        kern,
        out_shape=jax.ShapeDtypeStruct((M, D_STROKE), jnp.float32),
        grid_spec=pltpu.PrefetchScalarGridSpec(
            num_scalar_prefetch=2,
            grid=(1,),
            in_specs=[_full_spec(a.shape) for a in inputs],
            out_specs=_full_spec((M, D_STROKE)),
        ),
        compiler_params=_COMPILER_PARAMS,
        cost_estimate=cost,
    )(c_len, x_len, *inputs)


# ============================ model (glue + kernels) ============================

def positional_encoding(max_len, d):
    pos = jnp.arange(max_len, dtype=jnp.float32)[:, None]
    div = jnp.exp(jnp.arange(0, d, 2, dtype=jnp.float32) * (-math.log(10000.0) / d))
    pe = jnp.zeros((max_len, d), jnp.float32)
    pe = pe.at[:, 0::2].set(jnp.sin(pos * div))
    pe = pe.at[:, 1::2].set(jnp.cos(pos * div))
    return pe


def init_params(key):
    kit = iter(jax.random.split(key, 32))

    def w(shape):
        return jax.random.normal(next(kit), shape, jnp.float32) / math.sqrt(shape[-2])

    zeros = lambda s: jnp.zeros(s, jnp.float32)
    ones = lambda s: jnp.ones(s, jnp.float32)
    d, f = TF_D_MODEL, TF_DIM_FEEDFORWARD
    Ne, Nd = TF_ENC_LAYERS, TF_DEC_LAYERS

    return dict(
        embed=jax.random.normal(next(kit), (ALPHABET_SIZE, d), jnp.float32),
        pe=positional_encoding(max(MAX_CHAR_LEN, MAX_STROKE_LEN), d),
        tgt_w=w((D_STROKE, d)), tgt_b=zeros((1, d)),
        gen_w=w((d, D_STROKE)), gen_b=zeros((1, D_STROKE)),
        # ----- encoder (per-layer params stacked on a leading layer axis) -----
        enc_wqkv=w((Ne, d, 3 * d)), enc_bqkv=zeros((Ne, 1, 3 * d)),
        enc_wo=w((Ne, d, d)), enc_bo=zeros((Ne, 1, d)),
        enc_w1=w((Ne, d, f)), enc_b1=zeros((Ne, 1, f)),
        enc_w2=w((Ne, f, d)), enc_b2=zeros((Ne, 1, d)),
        enc_ln1_g=ones((Ne, 1, d)), enc_ln1_b=zeros((Ne, 1, d)),
        enc_ln2_g=ones((Ne, 1, d)), enc_ln2_b=zeros((Ne, 1, d)),
        enc_norm_g=ones((1, d)), enc_norm_b=zeros((1, d)),
        # ----- decoder -----
        dec_swqkv=w((Nd, d, 3 * d)), dec_sbqkv=zeros((Nd, 1, 3 * d)),
        dec_swo=w((Nd, d, d)), dec_sbo=zeros((Nd, 1, d)),
        dec_cwq=w((Nd, d, d)), dec_cbq=zeros((Nd, 1, d)),
        dec_cwkv=w((Nd, d, 2 * d)), dec_cbkv=zeros((Nd, 1, 2 * d)),
        dec_cwo=w((Nd, d, d)), dec_cbo=zeros((Nd, 1, d)),
        dec_w1=w((Nd, d, f)), dec_b1=zeros((Nd, 1, f)),
        dec_w2=w((Nd, f, d)), dec_b2=zeros((Nd, 1, d)),
        dec_ln1_g=ones((Nd, 1, d)), dec_ln1_b=zeros((Nd, 1, d)),
        dec_ln2_g=ones((Nd, 1, d)), dec_ln2_b=zeros((Nd, 1, d)),
        dec_ln3_g=ones((Nd, 1, d)), dec_ln3_b=zeros((Nd, 1, d)),
        dec_norm_g=ones((1, d)), dec_norm_b=zeros((1, d)),
    )


def tfhw_forward(params, batch_c, c_len, batch_x, x_len):
    B, Lc = batch_c.shape
    _, Lx, _ = batch_x.shape
    D = TF_D_MODEL
    pe = params['pe']

    # src_embed: Embedding + PositionalEncoding (dropout = identity in eval) — plain-JAX glue
    src2d = (params['embed'][batch_c] + pe[None, :Lc, :]).reshape(B * Lc, D)
    # PE rows for the target side, pre-tiled per batch (tiny), added in-kernel
    pe2d = jnp.tile(pe[:Lx, :], (B, 1))
    x2d = batch_x.reshape(B * Lx, D_STROKE)

    c_len = c_len.astype(jnp.int32)
    x_len = x_len.astype(jnp.int32)

    # fused encoder stack (all layers + final encoder LayerNorm)
    mem2d = encoder_stack(c_len, src2d, params, B, Lc)
    # fused decoder stack (tgt embed + all layers + final LayerNorm + generator)
    out2d = decoder_stack(c_len, x_len, x2d, pe2d, mem2d, params, B, Lx, Lc)
    return out2d.reshape(B, Lx, D_STROKE)


# ============================ driver ============================

if __name__ == "__main__":
    key = jax.random.PRNGKey(0)
    k_par, k_c, k_x = jax.random.split(key, 3)

    params = init_params(k_par)

    B, Lc, Lx = 2, 8, 16
    batch_c = jax.random.randint(k_c, (B, Lc), 0, ALPHABET_SIZE, dtype=jnp.int32)
    c_len = jnp.array([8, 5], dtype=jnp.int32)
    batch_x = jax.random.normal(k_x, (B, Lx, D_STROKE), jnp.float32)
    x_len = jnp.array([16, 11], dtype=jnp.int32)

    fwd = jax.jit(tfhw_forward)
    out = fwd(params, batch_c, c_len, batch_x, x_len)
    out = jax.block_until_ready(out)

    assert out.shape == (B, Lx, D_STROKE)
    assert bool(jnp.all(jnp.isfinite(out)))
    print("KERNEL_OK")
</pallas_src>

<mosaic_0001>
module attributes {stable_mosaic.version = 11 : i64} {
  func.func @_encoder_stack_kernel(%arg0: i32, %arg1: memref<2xi32, #tpu.memory_space<smem>>, %arg2: memref<16x32xf32, #tpu.memory_space<vmem>>, %arg3: memref<2x32x96xf32, #tpu.memory_space<vmem>>, %arg4: memref<2x1x96xf32, #tpu.memory_space<vmem>>, %arg5: memref<2x32x32xf32, #tpu.memory_space<vmem>>, %arg6: memref<2x1x32xf32, #tpu.memory_space<vmem>>, %arg7: memref<2x32x64xf32, #tpu.memory_space<vmem>>, %arg8: memref<2x1x64xf32, #tpu.memory_space<vmem>>, %arg9: memref<2x64x32xf32, #tpu.memory_space<vmem>>, %arg10: memref<2x1x32xf32, #tpu.memory_space<vmem>>, %arg11: memref<2x1x32xf32, #tpu.memory_space<vmem>>, %arg12: memref<2x1x32xf32, #tpu.memory_space<vmem>>, %arg13: memref<2x1x32xf32, #tpu.memory_space<vmem>>, %arg14: memref<2x1x32xf32, #tpu.memory_space<vmem>>, %arg15: memref<1x32xf32, #tpu.memory_space<vmem>>, %arg16: memref<1x32xf32, #tpu.memory_space<vmem>>, %arg17: memref<16x32xf32, #tpu.memory_space<vmem>>) attributes {dimension_semantics = [#tpu.dimension_semantics<arbitrary>], iteration_bounds = array<i64: 1>, scalar_prefetch = 1 : i64, scratch_operands = 0 : i64, tpu.core_type = #tpu.core_type<tc>, window_params = [{pipeline_mode = #tpu.pipeline_mode<synchronous>, transform_indices = @transform_0, window_bounds = array<i64: 16, 32>}, {pipeline_mode = #tpu.pipeline_mode<synchronous>, transform_indices = @transform_1, window_bounds = array<i64: 2, 32, 96>}, {pipeline_mode = #tpu.pipeline_mode<synchronous>, transform_indices = @transform_2, window_bounds = array<i64: 2, 1, 96>}, {pipeline_mode = #tpu.pipeline_mode<synchronous>, transform_indices = @transform_3, window_bounds = array<i64: 2, 32, 32>}, {pipeline_mode = #tpu.pipeline_mode<synchronous>, transform_indices = @transform_4, window_bounds = array<i64: 2, 1, 32>}, {pipeline_mode = #tpu.pipeline_mode<synchronous>, transform_indices = @transform_5, window_bounds = array<i64: 2, 32, 64>}, {pipeline_mode = #tpu.pipeline_mode<synchronous>, transform_indices = @transform_6, window_bounds = array<i64: 2, 1, 64>}, {pipeline_mode = #tpu.pipeline_mode<synchronous>, transform_indices = @transform_7, window_bounds = array<i64: 2, 64, 32>}, {pipeline_mode = #tpu.pipeline_mode<synchronous>, transform_indices = @transform_8, window_bounds = array<i64: 2, 1, 32>}, {pipeline_mode = #tpu.pipeline_mode<synchronous>, transform_indices = @transform_9, window_bounds = array<i64: 2, 1, 32>}, {pipeline_mode = #tpu.pipeline_mode<synchronous>, transform_indices = @transform_10, window_bounds = array<i64: 2, 1, 32>}, {pipeline_mode = #tpu.pipeline_mode<synchronous>, transform_indices = @transform_11, window_bounds = array<i64: 2, 1, 32>}, {pipeline_mode = #tpu.pipeline_mode<synchronous>, transform_indices = @transform_12, window_bounds = array<i64: 2, 1, 32>}, {pipeline_mode = #tpu.pipeline_mode<synchronous>, transform_indices = @transform_13, window_bounds = array<i64: 1, 32>}, {pipeline_mode = #tpu.pipeline_mode<synchronous>, transform_indices = @transform_14, window_bounds = array<i64: 1, 32>}, {pipeline_mode = #tpu.pipeline_mode<synchronous>, transform_indices = @transform_15, window_bounds = array<i64: 16, 32>}]} {
    %0 = tpu.iota {dimensions = array<i32: 1>} : vector<8x8xi32>
    %c0 = arith.constant 0 : index
    %1 = memref.load %arg1[%c0] : memref<2xi32, #tpu.memory_space<smem>>
    %2 = vector.broadcast %1 : i32 to vector<8x8xi32>
    %3 = arith.cmpi sge, %0, %2 : vector<8x8xi32>
    %cst = arith.constant -1.000000e+30 : f32
    %cst_0 = arith.constant 0.000000e+00 : f32
    %4 = vector.broadcast %cst : f32 to vector<8x8xf32>
    %5 = vector.broadcast %cst_0 : f32 to vector<8x8xf32>
    %6 = arith.select %3, %4, %5 : vector<8x8xi1>, vector<8x8xf32>
    %c1 = arith.constant 1 : index
    %7 = memref.load %arg1[%c1] : memref<2xi32, #tpu.memory_space<smem>>
    %8 = vector.broadcast %7 : i32 to vector<8x8xi32>
    %9 = arith.cmpi sge, %0, %8 : vector<8x8xi32>
    %cst_1 = arith.constant -1.000000e+30 : f32
    %cst_2 = arith.constant 0.000000e+00 : f32
    %10 = vector.broadcast %cst_1 : f32 to vector<8x8xf32>
    %11 = vector.broadcast %cst_2 : f32 to vector<8x8xf32>
    %12 = arith.select %9, %10, %11 : vector<8x8xi1>, vector<8x8xf32>
    %c0_3 = arith.constant 0 : index
    %c0_4 = arith.constant 0 : index
    %13 = vector.load %arg2[%c0_3, %c0_4] : memref<16x32xf32, #tpu.memory_space<vmem>>, vector<16x32xf32>
    %c0_5 = arith.constant 0 : index
    %c0_6 = arith.constant 0 : index
    %c0_7 = arith.constant 0 : index
    %14 = vector.load %arg3[%c0_5, %c0_6, %c0_7] : memref<2x32x96xf32, #tpu.memory_space<vmem>>, vector<1x32x96xf32>
    %15 = vector.shape_cast %14 : vector<1x32x96xf32> to vector<32x96xf32>
    %cst_8 = arith.constant dense<0.000000e+00> : vector<16x96xf32>
    %16 = tpu.matmul %13, %15, %cst_8 {dimension_numbers = #tpu.dot_dimension_numbers<[1], [0], [0], [1], [0, 0, 1, 1], [], []>} : vector<16x32xf32>, vector<32x96xf32>, vector<16x96xf32> -> vector<16x96xf32>
    %c0_9 = arith.constant 0 : index
    %c0_10 = arith.constant 0 : index
    %c0_11 = arith.constant 0 : index
    %17 = vector.load %arg4[%c0_9, %c0_10, %c0_11] : memref<2x1x96xf32, #tpu.memory_space<vmem>>, vector<1x1x96xf32>
    %18 = vector.shape_cast %17 : vector<1x1x96xf32> to vector<1x96xf32>
    %19 = vector.broadcast %18 : vector<1x96xf32> to vector<16x96xf32>
    %20 = arith.addf %16, %19 : vector<16x96xf32>
    %21 = vector.extract_strided_slice %20 {offsets = [0, 0], sizes = [16, 32], strides = [1, 1]} : vector<16x96xf32> to vector<16x32xf32>
    %22 = vector.extract_strided_slice %20 {offsets = [0, 32], sizes = [16, 32], strides = [1, 1]} : vector<16x96xf32> to vector<16x32xf32>
    %23 = vector.extract_strided_slice %20 {offsets = [0, 64], sizes = [16, 32], strides = [1, 1]} : vector<16x96xf32> to vector<16x32xf32>
    %24 = vector.extract_strided_slice %21 {offsets = [0, 0], sizes = [8, 32], strides = [1, 1]} : vector<16x32xf32> to vector<8x32xf32>
    %25 = vector.extract_strided_slice %22 {offsets = [0, 0], sizes = [8, 32], strides = [1, 1]} : vector<16x32xf32> to vector<8x32xf32>
    %26 = vector.extract_strided_slice %23 {offsets = [0, 0], sizes = [8, 32], strides = [1, 1]} : vector<16x32xf32> to vector<8x32xf32>
    %27 = vector.extract_strided_slice %24 {offsets = [0, 0], sizes = [8, 8], strides = [1, 1]} : vector<8x32xf32> to vector<8x8xf32>
    %28 = vector.extract_strided_slice %25 {offsets = [0, 0], sizes = [8, 8], strides = [1, 1]} : vector<8x32xf32> to vector<8x8xf32>
    %29 = vector.extract_strided_slice %26 {offsets = [0, 0], sizes = [8, 8], strides = [1, 1]} : vector<8x32xf32> to vector<8x8xf32>
    %cst_12 = arith.constant dense<0.000000e+00> : vector<8x8xf32>
    %30 = tpu.matmul %27, %28, %cst_12 {dimension_numbers = #tpu.dot_dimension_numbers<[1], [1], [0], [0], [0, 0, 1, 0], [], []>} : vector<8x8xf32>, vector<8x8xf32>, vector<8x8xf32> -> vector<8x8xf32>
    %cst_13 = arith.constant 0.353553385 : f32
    %31 = vector.broadcast %cst_13 : f32 to vector<8x8xf32>
    %32 = arith.mulf %30, %31 : vector<8x8xf32>
    %33 = arith.addf %32, %6 : vector<8x8xf32>
    %cst_14 = arith.constant dense<0xFF800000> : vector<8xf32>
    %34 = vector.multi_reduction <maximumf>, %33, %cst_14 [1] : vector<8x8xf32> to vector<8xf32>
    %35 = vector.shape_cast %34 : vector<8xf32> to vector<8x1xf32>
    %36 = vector.broadcast %35 : vector<8x1xf32> to vector<8x8xf32>
    %37 = arith.subf %33, %36 : vector<8x8xf32>
    %38 = math.exp %37 : vector<8x8xf32>
    %cst_15 = arith.constant dense<0.000000e+00> : vector<8xf32>
    %39 = vector.multi_reduction <add>, %38, %cst_15 [1] : vector<8x8xf32> to vector<8xf32>
    %40 = vector.shape_cast %39 : vector<8xf32> to vector<8x1xf32>
    %41 = tpu.reciprocal %40 {approx = true} : vector<8x1xf32> -> vector<8x1xf32>
    %42 = vector.broadcast %41 : vector<8x1xf32> to vector<8x8xf32>
    %43 = arith.mulf %38, %42 : vector<8x8xf32>
    %cst_16 = arith.constant dense<0.000000e+00> : vector<8x8xf32>
    %44 = tpu.matmul %43, %29, %cst_16 {dimension_numbers = #tpu.dot_dimension_numbers<[1], [0], [0], [1], [0, 0, 1, 1], [], []>} : vector<8x8xf32>, vector<8x8xf32>, vector<8x8xf32> -> vector<8x8xf32>
    %45 = vector.extract_strided_slice %24 {offsets = [0, 8], sizes = [8, 8], strides = [1, 1]} : vector<8x32xf32> to vector<8x8xf32>
    %46 = vector.extract_strided_slice %25 {offsets = [0, 8], sizes = [8, 8], strides = [1, 1]} : vector<8x32xf32> to vector<8x8xf32>
    %47 = vector.extract_strided_slice %26 {offsets = [0, 8], sizes = [8, 8], strides = [1, 1]} : vector<8x32xf32> to vector<8x8xf32>
    %cst_17 = arith.constant dense<0.000000e+00> : vector<8x8xf32>
    %48 = tpu.matmul %45, %46, %cst_17 {dimension_numbers = #tpu.dot_dimension_numbers<[1], [1], [0], [0], [0, 0, 1, 0], [], []>} : vector<8x8xf32>, vector<8x8xf32>, vector<8x8xf32> -> vector<8x8xf32>
    %cst_18 = arith.constant 0.353553385 : f32
    %49 = vector.broadcast %cst_18 : f32 to vector<8x8xf32>
    %50 = arith.mulf %48, %49 : vector<8x8xf32>
    %51 = arith.addf %50, %6 : vector<8x8xf32>
    %cst_19 = arith.constant dense<0xFF800000> : vector<8xf32>
    %52 = vector.multi_reduction <maximumf>, %51, %cst_19 [1] : vector<8x8xf32> to vector<8xf32>
    %53 = vector.shape_cast %52 : vector<8xf32> to vector<8x1xf32>
    %54 = vector.broadcast %53 : vector<8x1xf32> to vector<8x8xf32>
    %55 = arith.subf %51, %54 : vector<8x8xf32>
    %56 = math.exp %55 : vector<8x8xf32>
    %cst_20 = arith.constant dense<0.000000e+00> : vector<8xf32>
    %57 = vector.multi_reduction <add>, %56, %cst_20 [1] : vector<8x8xf32> to vector<8xf32>
    %58 = vector.shape_cast %57 : vector<8xf32> to vector<8x1xf32>
    %59 = tpu.reciprocal %58 {approx = true} : vector<8x1xf32> -> vector<8x1xf32>
    %60 = vector.broadcast %59 : vector<8x1xf32> to vector<8x8xf32>
    %61 = arith.mulf %56, %60 : vector<8x8xf32>
    %cst_21 = arith.constant dense<0.000000e+00> : vector<8x8xf32>
    %62 = tpu.matmul %61, %47, %cst_21 {dimension_numbers = #tpu.dot_dimension_numbers<[1], [0], [0], [1], [0, 0, 1, 1], [], []>} : vector<8x8xf32>, vector<8x8xf32>, vector<8x8xf32> -> vector<8x8xf32>
    %63 = vector.extract_strided_slice %24 {offsets = [0, 16], sizes = [8, 8], strides = [1, 1]} : vector<8x32xf32> to vector<8x8xf32>
    %64 = vector.extract_strided_slice %25 {offsets = [0, 16], sizes = [8, 8], strides = [1, 1]} : vector<8x32xf32> to vector<8x8xf32>
    %65 = vector.extract_strided_slice %26 {offsets = [0, 16], sizes = [8, 8], strides = [1, 1]} : vector<8x32xf32> to vector<8x8xf32>
    %cst_22 = arith.constant dense<0.000000e+00> : vector<8x8xf32>
    %66 = tpu.matmul %63, %64, %cst_22 {dimension_numbers = #tpu.dot_dimension_numbers<[1], [1], [0], [0], [0, 0, 1, 0], [], []>} : vector<8x8xf32>, vector<8x8xf32>, vector<8x8xf32> -> vector<8x8xf32>
    %cst_23 = arith.constant 0.353553385 : f32
    %67 = vector.broadcast %cst_23 : f32 to vector<8x8xf32>
    %68 = arith.mulf %66, %67 : vector<8x8xf32>
    %69 = arith.addf %68, %6 : vector<8x8xf32>
    %cst_24 = arith.constant dense<0xFF800000> : vector<8xf32>
    %70 = vector.multi_reduction <maximumf>, %69, %cst_24 [1] : vector<8x8xf32> to vector<8xf32>
    %71 = vector.shape_cast %70 : vector<8xf32> to vector<8x1xf32>
    %72 = vector.broadcast %71 : vector<8x1xf32> to vector<8x8xf32>
    %73 = arith.subf %69, %72 : vector<8x8xf32>
    %74 = math.exp %73 : vector<8x8xf32>
    %cst_25 = arith.constant dense<0.000000e+00> : vector<8xf32>
    %75 = vector.multi_reduction <add>, %74, %cst_25 [1] : vector<8x8xf32> to vector<8xf32>
    %76 = vector.shape_cast %75 : vector<8xf32> to vector<8x1xf32>
    %77 = tpu.reciprocal %76 {approx = true} : vector<8x1xf32> -> vector<8x1xf32>
    %78 = vector.broadcast %77 : vector<8x1xf32> to vector<8x8xf32>
    %79 = arith.mulf %74, %78 : vector<8x8xf32>
    %cst_26 = arith.constant dense<0.000000e+00> : vector<8x8xf32>
    %80 = tpu.matmul %79, %65, %cst_26 {dimension_numbers = #tpu.dot_dimension_numbers<[1], [0], [0], [1], [0, 0, 1, 1], [], []>} : vector<8x8xf32>, vector<8x8xf32>, vector<8x8xf32> -> vector<8x8xf32>
    %81 = vector.extract_strided_slice %24 {offsets = [0, 24], sizes = [8, 8], strides = [1, 1]} : vector<8x32xf32> to vector<8x8xf32>
    %82 = vector.extract_strided_slice %25 {offsets = [0, 24], sizes = [8, 8], strides = [1, 1]} : vector<8x32xf32> to vector<8x8xf32>
    %83 = vector.extract_strided_slice %26 {offsets = [0, 24], sizes = [8, 8], strides = [1, 1]} : vector<8x32xf32> to vector<8x8xf32>
    %cst_27 = arith.constant dense<0.000000e+00> : vector<8x8xf32>
    %84 = tpu.matmul %81, %82, %cst_27 {dimension_numbers = #tpu.dot_dimension_numbers<[1], [1], [0], [0], [0, 0, 1, 0], [], []>} : vector<8x8xf32>, vector<8x8xf32>, vector<8x8xf32> -> vector<8x8xf32>
    %cst_28 = arith.constant 0.353553385 : f32
    %85 = vector.broadcast %cst_28 : f32 to vector<8x8xf32>
    %86 = arith.mulf %84, %85 : vector<8x8xf32>
    %87 = arith.addf %86, %6 : vector<8x8xf32>
    %cst_29 = arith.constant dense<0xFF800000> : vector<8xf32>
    %88 = vector.multi_reduction <maximumf>, %87, %cst_29 [1] : vector<8x8xf32> to vector<8xf32>
    %89 = vector.shape_cast %88 : vector<8xf32> to vector<8x1xf32>
    %90 = vector.broadcast %89 : vector<8x1xf32> to vector<8x8xf32>
    %91 = arith.subf %87, %90 : vector<8x8xf32>
    %92 = math.exp %91 : vector<8x8xf32>
    %cst_30 = arith.constant dense<0.000000e+00> : vector<8xf32>
    %93 = vector.multi_reduction <add>, %92, %cst_30 [1] : vector<8x8xf32> to vector<8xf32>
    %94 = vector.shape_cast %93 : vector<8xf32> to vector<8x1xf32>
    %95 = tpu.reciprocal %94 {approx = true} : vector<8x1xf32> -> vector<8x1xf32>
    %96 = vector.broadcast %95 : vector<8x1xf32> to vector<8x8xf32>
    %97 = arith.mulf %92, %96 : vector<8x8xf32>
    %cst_31 = arith.constant dense<0.000000e+00> : vector<8x8xf32>
    %98 = tpu.matmul %97, %83, %cst_31 {dimension_numbers = #tpu.dot_dimension_numbers<[1], [0], [0], [1], [0, 0, 1, 1], [], []>} : vector<8x8xf32>, vector<8x8xf32>, vector<8x8xf32> -> vector<8x8xf32>
    %99 = tpu.concatenate %44, %62, %80, %98 in 1 : vector<8x8xf32>, vector<8x8xf32>, vector<8x8xf32>, vector<8x8xf32> -> vector<8x32xf32>
    %100 = vector.extract_strided_slice %21 {offsets = [8, 0], sizes = [8, 32], strides = [1, 1]} : vector<16x32xf32> to vector<8x32xf32>
    %101 = vector.extract_strided_slice %22 {offsets = [8, 0], sizes = [8, 32], strides = [1, 1]} : vector<16x32xf32> to vector<8x32xf32>
    %102 = vector.extract_strided_slice %23 {offsets = [8, 0], sizes = [8, 32], strides = [1, 1]} : vector<16x32xf32> to vector<8x32xf32>
    %103 = vector.extract_strided_slice %100 {offsets = [0, 0], sizes = [8, 8], strides = [1, 1]} : vector<8x32xf32> to vector<8x8xf32>
    %104 = vector.extract_strided_slice %101 {offsets = [0, 0], sizes = [8, 8], strides = [1, 1]} : vector<8x32xf32> to vector<8x8xf32>
    %105 = vector.extract_strided_slice %102 {offsets = [0, 0], sizes = [8, 8], strides = [1, 1]} : vector<8x32xf32> to vector<8x8xf32>
    %cst_32 = arith.constant dense<0.000000e+00> : vector<8x8xf32>
    %106 = tpu.matmul %103, %104, %cst_32 {dimension_numbers = #tpu.dot_dimension_numbers<[1], [1], [0], [0], [0, 0, 1, 0], [], []>} : vector<8x8xf32>, vector<8x8xf32>, vector<8x8xf32> -> vector<8x8xf32>
    %cst_33 = arith.constant 0.353553385 : f32
    %107 = vector.broadcast %cst_33 : f32 to vector<8x8xf32>
    %108 = arith.mulf %106, %107 : vector<8x8xf32>
    %109 = arith.addf %108, %12 : vector<8x8xf32>
    %cst_34 = arith.constant dense<0xFF800000> : vector<8xf32>
    %110 = vector.multi_reduction <maximumf>, %109, %cst_34 [1] : vector<8x8xf32> to vector<8xf32>
    %111 = vector.shape_cast %110 : vector<8xf32> to vector<8x1xf32>
    %112 = vector.broadcast %111 : vector<8x1xf32> to vector<8x8xf32>
    %113 = arith.subf %109, %112 : vector<8x8xf32>
    %114 = math.exp %113 : vector<8x8xf32>
    %cst_35 = arith.constant dense<0.000000e+00> : vector<8xf32>
    %115 = vector.multi_reduction <add>, %114, %cst_35 [1] : vector<8x8xf32> to vector<8xf32>
    %116 = vector.shape_cast %115 : vector<8xf32> to vector<8x1xf32>
    %117 = tpu.reciprocal %116 {approx = true} : vector<8x1xf32> -> vector<8x1xf32>
    %118 = vector.broadcast %117 : vector<8x1xf32> to vector<8x8xf32>
    %119 = arith.mulf %114, %118 : vector<8x8xf32>
    %cst_36 = arith.constant dense<0.000000e+00> : vector<8x8xf32>
    %120 = tpu.matmul %119, %105, %cst_36 {dimension_numbers = #tpu.dot_dimension_numbers<[1], [0], [0], [1], [0, 0, 1, 1], [], []>} : vector<8x8xf32>, vector<8x8xf32>, vector<8x8xf32> -> vector<8x8xf32>
    %121 = vector.extract_strided_slice %100 {offsets = [0, 8], sizes = [8, 8], strides = [1, 1]} : vector<8x32xf32> to vector<8x8xf32>
    %122 = vector.extract_strided_slice %101 {offsets = [0, 8], sizes = [8, 8], strides = [1, 1]} : vector<8x32xf32> to vector<8x8xf32>
    %123 = vector.extract_strided_slice %102 {offsets = [0, 8], sizes = [8, 8], strides = [1, 1]} : vector<8x32xf32> to vector<8x8xf32>
    %cst_37 = arith.constant dense<0.000000e+00> : vector<8x8xf32>
    %124 = tpu.matmul %121, %122, %cst_37 {dimension_numbers = #tpu.dot_dimension_numbers<[1], [1], [0], [0], [0, 0, 1, 0], [], []>} : vector<8x8xf32>, vector<8x8xf32>, vector<8x8xf32> -> vector<8x8xf32>
    %cst_38 = arith.constant 0.353553385 : f32
    %125 = vector.broadcast %cst_38 : f32 to vector<8x8xf32>
    %126 = arith.mulf %124, %125 : vector<8x8xf32>
    %127 = arith.addf %126, %12 : vector<8x8xf32>
    %cst_39 = arith.constant dense<0xFF800000> : vector<8xf32>
    %128 = vector.multi_reduction <maximumf>, %127, %cst_39 [1] : vector<8x8xf32> to vector<8xf32>
    %129 = vector.shape_cast %128 : vector<8xf32> to vector<8x1xf32>
    %130 = vector.broadcast %129 : vector<8x1xf32> to vector<8x8xf32>
    %131 = arith.subf %127, %130 : vector<8x8xf32>
    %132 = math.exp %131 : vector<8x8xf32>
    %cst_40 = arith.constant dense<0.000000e+00> : vector<8xf32>
    %133 = vector.multi_reduction <add>, %132, %cst_40 [1] : vector<8x8xf32> to vector<8xf32>
    %134 = vector.shape_cast %133 : vector<8xf32> to vector<8x1xf32>
    %135 = tpu.reciprocal %134 {approx = true} : vector<8x1xf32> -> vector<8x1xf32>
    %136 = vector.broadcast %135 : vector<8x1xf32> to vector<8x8xf32>
    %137 = arith.mulf %132, %136 : vector<8x8xf32>
    %cst_41 = arith.constant dense<0.000000e+00> : vector<8x8xf32>
    %138 = tpu.matmul %137, %123, %cst_41 {dimension_numbers = #tpu.dot_dimension_numbers<[1], [0], [0], [1], [0, 0, 1, 1], [], []>} : vector<8x8xf32>, vector<8x8xf32>, vector<8x8xf32> -> vector<8x8xf32>
    %139 = vector.extract_strided_slice %100 {offsets = [0, 16], sizes = [8, 8], strides = [1, 1]} : vector<8x32xf32> to vector<8x8xf32>
    %140 = vector.extract_strided_slice %101 {offsets = [0, 16], sizes = [8, 8], strides = [1, 1]} : vector<8x32xf32> to vector<8x8xf32>
    %141 = vector.extract_strided_slice %102 {offsets = [0, 16], sizes = [8, 8], strides = [1, 1]} : vector<8x32xf32> to vector<8x8xf32>
    %cst_42 = arith.constant dense<0.000000e+00> : vector<8x8xf32>
    %142 = tpu.matmul %139, %140, %cst_42 {dimension_numbers = #tpu.dot_dimension_numbers<[1], [1], [0], [0], [0, 0, 1, 0], [], []>} : vector<8x8xf32>, vector<8x8xf32>, vector<8x8xf32> -> vector<8x8xf32>
    %cst_43 = arith.constant 0.353553385 : f32
    %143 = vector.broadcast %cst_43 : f32 to vector<8x8xf32>
    %144 = arith.mulf %142, %143 : vector<8x8xf32>
    %145 = arith.addf %144, %12 : vector<8x8xf32>
    %cst_44 = arith.constant dense<0xFF800000> : vector<8xf32>
    %146 = vector.multi_reduction <maximumf>, %145, %cst_44 [1] : vector<8x8xf32> to vector<8xf32>
    %147 = vector.shape_cast %146 : vector<8xf32> to vector<8x1xf32>
    %148 = vector.broadcast %147 : vector<8x1xf32> to vector<8x8xf32>
    %149 = arith.subf %145, %148 : vector<8x8xf32>
    %150 = math.exp %149 : vector<8x8xf32>
    %cst_45 = arith.constant dense<0.000000e+00> : vector<8xf32>
    %151 = vector.multi_reduction <add>, %150, %cst_45 [1] : vector<8x8xf32> to vector<8xf32>
    %152 = vector.shape_cast %151 : vector<8xf32> to vector<8x1xf32>
    %153 = tpu.reciprocal %152 {approx = true} : vector<8x1xf32> -> vector<8x1xf32>
    %154 = vector.broadcast %153 : vector<8x1xf32> to vector<8x8xf32>
    %155 = arith.mulf %150, %154 : vector<8x8xf32>
    %cst_46 = arith.constant dense<0.000000e+00> : vector<8x8xf32>
    %156 = tpu.matmul %155, %141, %cst_46 {dimension_numbers = #tpu.dot_dimension_numbers<[1], [0], [0], [1], [0, 0, 1, 1], [], []>} : vector<8x8xf32>, vector<8x8xf32>, vector<8x8xf32> -> vector<8x8xf32>
    %157 = vector.extract_strided_slice %100 {offsets = [0, 24], sizes = [8, 8], strides = [1, 1]} : vector<8x32xf32> to vector<8x8xf32>
    %158 = vector.extract_strided_slice %101 {offsets = [0, 24], sizes = [8, 8], strides = [1, 1]} : vector<8x32xf32> to vector<8x8xf32>
    %159 = vector.extract_strided_slice %102 {offsets = [0, 24], sizes = [8, 8], strides = [1, 1]} : vector<8x32xf32> to vector<8x8xf32>
    %cst_47 = arith.constant dense<0.000000e+00> : vector<8x8xf32>
    %160 = tpu.matmul %157, %158, %cst_47 {dimension_numbers = #tpu.dot_dimension_numbers<[1], [1], [0], [0], [0, 0, 1, 0], [], []>} : vector<8x8xf32>, vector<8x8xf32>, vector<8x8xf32> -> vector<8x8xf32>
    %cst_48 = arith.constant 0.353553385 : f32
    %161 = vector.broadcast %cst_48 : f32 to vector<8x8xf32>
    %162 = arith.mulf %160, %161 : vector<8x8xf32>
    %163 = arith.addf %162, %12 : vector<8x8xf32>
    %cst_49 = arith.constant dense<0xFF800000> : vector<8xf32>
    %164 = vector.multi_reduction <maximumf>, %163, %cst_49 [1] : vector<8x8xf32> to vector<8xf32>
    %165 = vector.shape_cast %164 : vector<8xf32> to vector<8x1xf32>
    %166 = vector.broadcast %165 : vector<8x1xf32> to vector<8x8xf32>
    %167 = arith.subf %163, %166 : vector<8x8xf32>
    %168 = math.exp %167 : vector<8x8xf32>
    %cst_50 = arith.constant dense<0.000000e+00> : vector<8xf32>
    %169 = vector.multi_reduction <add>, %168, %cst_50 [1] : vector<8x8xf32> to vector<8xf32>
    %170 = vector.shape_cast %169 : vector<8xf32> to vector<8x1xf32>
    %171 = tpu.reciprocal %170 {approx = true} : vector<8x1xf32> -> vector<8x1xf32>
    %172 = vector.broadcast %171 : vector<8x1xf32> to vector<8x8xf32>
    %173 = arith.mulf %168, %172 : vector<8x8xf32>
    %cst_51 = arith.constant dense<0.000000e+00> : vector<8x8xf32>
    %174 = tpu.matmul %173, %159, %cst_51 {dimension_numbers = #tpu.dot_dimension_numbers<[1], [0], [0], [1], [0, 0, 1, 1], [], []>} : vector<8x8xf32>, vector<8x8xf32>, vector<8x8xf32> -> vector<8x8xf32>
    %175 = tpu.concatenate %120, %138, %156, %174 in 1 : vector<8x8xf32>, vector<8x8xf32>, vector<8x8xf32>, vector<8x8xf32> -> vector<8x32xf32>
    %176 = tpu.concatenate %99, %175 in 0 : vector<8x32xf32>, vector<8x32xf32> -> vector<16x32xf32>
    %c0_52 = arith.constant 0 : index
    %c0_53 = arith.constant 0 : index
    %c0_54 = arith.constant 0 : index
    %177 = vector.load %arg5[%c0_52, %c0_53, %c0_54] : memref<2x32x32xf32, #tpu.memory_space<vmem>>, vector<1x32x32xf32>
    %178 = vector.shape_cast %177 : vector<1x32x32xf32> to vector<32x32xf32>
    %cst_55 = arith.constant dense<0.000000e+00> : vector<16x32xf32>
    %179 = tpu.matmul %176, %178, %cst_55 {dimension_numbers = #tpu.dot_dimension_numbers<[1], [0], [0], [1], [0, 0, 1, 1], [], []>} : vector<16x32xf32>, vector<32x32xf32>, vector<16x32xf32> -> vector<16x32xf32>
    %c0_56 = arith.constant 0 : index
    %c0_57 = arith.constant 0 : index
    %c0_58 = arith.constant 0 : index
    %180 = vector.load %arg6[%c0_56, %c0_57, %c0_58] : memref<2x1x32xf32, #tpu.memory_space<vmem>>, vector<1x1x32xf32>
    %181 = vector.shape_cast %180 : vector<1x1x32xf32> to vector<1x32xf32>
    %182 = vector.broadcast %181 : vector<1x32xf32> to vector<16x32xf32>
    %183 = arith.addf %179, %182 : vector<16x32xf32>
    %184 = arith.addf %13, %183 : vector<16x32xf32>
    %c0_59 = arith.constant 0 : index
    %c0_60 = arith.constant 0 : index
    %c0_61 = arith.constant 0 : index
    %185 = vector.load %arg11[%c0_59, %c0_60, %c0_61] : memref<2x1x32xf32, #tpu.memory_space<vmem>>, vector<1x1x32xf32>
    %186 = vector.shape_cast %185 : vector<1x1x32xf32> to vector<1x32xf32>
    %c0_62 = arith.constant 0 : index
    %c0_63 = arith.constant 0 : index
    %c0_64 = arith.constant 0 : index
    %187 = vector.load %arg12[%c0_62, %c0_63, %c0_64] : memref<2x1x32xf32, #tpu.memory_space<vmem>>, vector<1x1x32xf32>
    %188 = vector.shape_cast %187 : vector<1x1x32xf32> to vector<1x32xf32>
    %cst_65 = arith.constant dense<0.000000e+00> : vector<16xf32>
    %189 = vector.multi_reduction <add>, %184, %cst_65 [1] : vector<16x32xf32> to vector<16xf32>
    %190 = vector.shape_cast %189 : vector<16xf32> to vector<16x1xf32>
    %cst_66 = arith.constant 3.200000e+01 : f32
    %191 = vector.broadcast %cst_66 : f32 to vector<16x1xf32>
    %192 = arith.divf %190, %191 : vector<16x1xf32>
    %193 = vector.broadcast %192 : vector<16x1xf32> to vector<16x32xf32>
    %194 = arith.subf %184, %193 : vector<16x32xf32>
    %195 = arith.mulf %194, %194 : vector<16x32xf32>
    %cst_67 = arith.constant dense<0.000000e+00> : vector<16xf32>
    %196 = vector.multi_reduction <add>, %195, %cst_67 [1] : vector<16x32xf32> to vector<16xf32>
    %197 = vector.shape_cast %196 : vector<16xf32> to vector<16x1xf32>
    %cst_68 = arith.constant 3.200000e+01 : f32
    %198 = vector.broadcast %cst_68 : f32 to vector<16x1xf32>
    %199 = arith.divf %197, %198 : vector<16x1xf32>
    %cst_69 = arith.constant 9.99999974E-6 : f32
    %200 = vector.broadcast %cst_69 : f32 to vector<16x1xf32>
    %201 = arith.addf %199, %200 : vector<16x1xf32>
    %202 = math.rsqrt %201 : vector<16x1xf32>
    %203 = vector.broadcast %202 : vector<16x1xf32> to vector<16x32xf32>
    %204 = arith.mulf %194, %203 : vector<16x32xf32>
    %205 = vector.broadcast %186 : vector<1x32xf32> to vector<16x32xf32>
    %206 = arith.mulf %204, %205 : vector<16x32xf32>
    %207 = vector.broadcast %188 : vector<1x32xf32> to vector<16x32xf32>
    %208 = arith.addf %206, %207 : vector<16x32xf32>
    %c0_70 = arith.constant 0 : index
    %c0_71 = arith.constant 0 : index
    %c0_72 = arith.constant 0 : index
    %209 = vector.load %arg7[%c0_70, %c0_71, %c0_72] : memref<2x32x64xf32, #tpu.memory_space<vmem>>, vector<1x32x64xf32>
    %210 = vector.shape_cast %209 : vector<1x32x64xf32> to vector<32x64xf32>
    %cst_73 = arith.constant dense<0.000000e+00> : vector<16x64xf32>
    %211 = tpu.matmul %208, %210, %cst_73 {dimension_numbers = #tpu.dot_dimension_numbers<[1], [0], [0], [1], [0, 0, 1, 1], [], []>} : vector<16x32xf32>, vector<32x64xf32>, vector<16x64xf32> -> vector<16x64xf32>
    %c0_74 = arith.constant 0 : index
    %c0_75 = arith.constant 0 : index
    %c0_76 = arith.constant 0 : index
    %212 = vector.load %arg8[%c0_74, %c0_75, %c0_76] : memref<2x1x64xf32, #tpu.memory_space<vmem>>, vector<1x1x64xf32>
    %213 = vector.shape_cast %212 : vector<1x1x64xf32> to vector<1x64xf32>
    %214 = vector.broadcast %213 : vector<1x64xf32> to vector<16x64xf32>
    %215 = arith.addf %211, %214 : vector<16x64xf32>
    %cst_77 = arith.constant 0.000000e+00 : f32
    %216 = vector.broadcast %cst_77 : f32 to vector<16x64xf32>
    %217 = arith.maximumf %215, %216 : vector<16x64xf32>
    %c0_78 = arith.constant 0 : index
    %c0_79 = arith.constant 0 : index
    %c0_80 = arith.constant 0 : index
    %218 = vector.load %arg9[%c0_78, %c0_79, %c0_80] : memref<2x64x32xf32, #tpu.memory_space<vmem>>, vector<1x64x32xf32>
    %219 = vector.shape_cast %218 : vector<1x64x32xf32> to vector<64x32xf32>
    %cst_81 = arith.constant dense<0.000000e+00> : vector<16x32xf32>
    %220 = tpu.matmul %217, %219, %cst_81 {dimension_numbers = #tpu.dot_dimension_numbers<[1], [0], [0], [1], [0, 0, 1, 1], [], []>} : vector<16x64xf32>, vector<64x32xf32>, vector<16x32xf32> -> vector<16x32xf32>
    %c0_82 = arith.constant 0 : index
    %c0_83 = arith.constant 0 : index
    %c0_84 = arith.constant 0 : index
    %221 = vector.load %arg10[%c0_82, %c0_83, %c0_84] : memref<2x1x32xf32, #tpu.memory_space<vmem>>, vector<1x1x32xf32>
    %222 = vector.shape_cast %221 : vector<1x1x32xf32> to vector<1x32xf32>
    %223 = vector.broadcast %222 : vector<1x32xf32> to vector<16x32xf32>
    %224 = arith.addf %220, %223 : vector<16x32xf32>
    %225 = arith.addf %208, %224 : vector<16x32xf32>
    %c0_85 = arith.constant 0 : index
    %c0_86 = arith.constant 0 : index
    %c0_87 = arith.constant 0 : index
    %226 = vector.load %arg13[%c0_85, %c0_86, %c0_87] : memref<2x1x32xf32, #tpu.memory_space<vmem>>, vector<1x1x32xf32>
    %227 = vector.shape_cast %226 : vector<1x1x32xf32> to vector<1x32xf32>
    %c0_88 = arith.constant 0 : index
    %c0_89 = arith.constant 0 : index
    %c0_90 = arith.constant 0 : index
    %228 = vector.load %arg14[%c0_88, %c0_89, %c0_90] : memref<2x1x32xf32, #tpu.memory_space<vmem>>, vector<1x1x32xf32>
    %229 = vector.shape_cast %228 : vector<1x1x32xf32> to vector<1x32xf32>
    %cst_91 = arith.constant dense<0.000000e+00> : vector<16xf32>
    %230 = vector.multi_reduction <add>, %225, %cst_91 [1] : vector<16x32xf32> to vector<16xf32>
    %231 = vector.shape_cast %230 : vector<16xf32> to vector<16x1xf32>
    %cst_92 = arith.constant 3.200000e+01 : f32
    %232 = vector.broadcast %cst_92 : f32 to vector<16x1xf32>
    %233 = arith.divf %231, %232 : vector<16x1xf32>
    %234 = vector.broadcast %233 : vector<16x1xf32> to vector<16x32xf32>
    %235 = arith.subf %225, %234 : vector<16x32xf32>
    %236 = arith.mulf %235, %235 : vector<16x32xf32>
    %cst_93 = arith.constant dense<0.000000e+00> : vector<16xf32>
    %237 = vector.multi_reduction <add>, %236, %cst_93 [1] : vector<16x32xf32> to vector<16xf32>
    %238 = vector.shape_cast %237 : vector<16xf32> to vector<16x1xf32>
    %cst_94 = arith.constant 3.200000e+01 : f32
    %239 = vector.broadcast %cst_94 : f32 to vector<16x1xf32>
    %240 = arith.divf %238, %239 : vector<16x1xf32>
    %cst_95 = arith.constant 9.99999974E-6 : f32
    %241 = vector.broadcast %cst_95 : f32 to vector<16x1xf32>
    %242 = arith.addf %240, %241 : vector<16x1xf32>
    %243 = math.rsqrt %242 : vector<16x1xf32>
    %244 = vector.broadcast %243 : vector<16x1xf32> to vector<16x32xf32>
    %245 = arith.mulf %235, %244 : vector<16x32xf32>
    %246 = vector.broadcast %227 : vector<1x32xf32> to vector<16x32xf32>
    %247 = arith.mulf %245, %246 : vector<16x32xf32>
    %248 = vector.broadcast %229 : vector<1x32xf32> to vector<16x32xf32>
    %249 = arith.addf %247, %248 : vector<16x32xf32>
    %c1_96 = arith.constant 1 : index
    %c0_97 = arith.constant 0 : index
    %c0_98 = arith.constant 0 : index
    %250 = vector.load %arg3[%c1_96, %c0_97, %c0_98] : memref<2x32x96xf32, #tpu.memory_space<vmem>>, vector<1x32x96xf32>
    %251 = vector.shape_cast %250 : vector<1x32x96xf32> to vector<32x96xf32>
    %cst_99 = arith.constant dense<0.000000e+00> : vector<16x96xf32>
    %252 = tpu.matmul %249, %251, %cst_99 {dimension_numbers = #tpu.dot_dimension_numbers<[1], [0], [0], [1], [0, 0, 1, 1], [], []>} : vector<16x32xf32>, vector<32x96xf32>, vector<16x96xf32> -> vector<16x96xf32>
    %c1_100 = arith.constant 1 : index
    %c0_101 = arith.constant 0 : index
    %c0_102 = arith.constant 0 : index
    %253 = vector.load %arg4[%c1_100, %c0_101, %c0_102] : memref<2x1x96xf32, #tpu.memory_space<vmem>>, vector<1x1x96xf32>
    %254 = vector.shape_cast %253 : vector<1x1x96xf32> to vector<1x96xf32>
    %255 = vector.broadcast %254 : vector<1x96xf32> to vector<16x96xf32>
    %256 = arith.addf %252, %255 : vector<16x96xf32>
    %257 = vector.extract_strided_slice %256 {offsets = [0, 0], sizes = [16, 32], strides = [1, 1]} : vector<16x96xf32> to vector<16x32xf32>
    %258 = vector.extract_strided_slice %256 {offsets = [0, 32], sizes = [16, 32], strides = [1, 1]} : vector<16x96xf32> to vector<16x32xf32>
    %259 = vector.extract_strided_slice %256 {offsets = [0, 64], sizes = [16, 32], strides = [1, 1]} : vector<16x96xf32> to vector<16x32xf32>
    %260 = vector.extract_strided_slice %257 {offsets = [0, 0], sizes = [8, 32], strides = [1, 1]} : vector<16x32xf32> to vector<8x32xf32>
    %261 = vector.extract_strided_slice %258 {offsets = [0, 0], sizes = [8, 32], strides = [1, 1]} : vector<16x32xf32> to vector<8x32xf32>
    %262 = vector.extract_strided_slice %259 {offsets = [0, 0], sizes = [8, 32], strides = [1, 1]} : vector<16x32xf32> to vector<8x32xf32>
    %263 = vector.extract_strided_slice %260 {offsets = [0, 0], sizes = [8, 8], strides = [1, 1]} : vector<8x32xf32> to vector<8x8xf32>
    %264 = vector.extract_strided_slice %261 {offsets = [0, 0], sizes = [8, 8], strides = [1, 1]} : vector<8x32xf32> to vector<8x8xf32>
    %265 = vector.extract_strided_slice %262 {offsets = [0, 0], sizes = [8, 8], strides = [1, 1]} : vector<8x32xf32> to vector<8x8xf32>
    %cst_103 = arith.constant dense<0.000000e+00> : vector<8x8xf32>
    %266 = tpu.matmul %263, %264, %cst_103 {dimension_numbers = #tpu.dot_dimension_numbers<[1], [1], [0], [0], [0, 0, 1, 0], [], []>} : vector<8x8xf32>, vector<8x8xf32>, vector<8x8xf32> -> vector<8x8xf32>
    %cst_104 = arith.constant 0.353553385 : f32
    %267 = vector.broadcast %cst_104 : f32 to vector<8x8xf32>
    %268 = arith.mulf %266, %267 : vector<8x8xf32>
    %269 = arith.addf %268, %6 : vector<8x8xf32>
    %cst_105 = arith.constant dense<0xFF800000> : vector<8xf32>
    %270 = vector.multi_reduction <maximumf>, %269, %cst_105 [1] : vector<8x8xf32> to vector<8xf32>
    %271 = vector.shape_cast %270 : vector<8xf32> to vector<8x1xf32>
    %272 = vector.broadcast %271 : vector<8x1xf32> to vector<8x8xf32>
    %273 = arith.subf %269, %272 : vector<8x8xf32>
    %274 = math.exp %273 : vector<8x8xf32>
    %cst_106 = arith.constant dense<0.000000e+00> : vector<8xf32>
    %275 = vector.multi_reduction <add>, %274, %cst_106 [1] : vector<8x8xf32> to vector<8xf32>
    %276 = vector.shape_cast %275 : vector<8xf32> to vector<8x1xf32>
    %277 = tpu.reciprocal %276 {approx = true} : vector<8x1xf32> -> vector<8x1xf32>
    %278 = vector.broadcast %277 : vector<8x1xf32> to vector<8x8xf32>
    %279 = arith.mulf %274, %278 : vector<8x8xf32>
    %cst_107 = arith.constant dense<0.000000e+00> : vector<8x8xf32>
    %280 = tpu.matmul %279, %265, %cst_107 {dimension_numbers = #tpu.dot_dimension_numbers<[1], [0], [0], [1], [0, 0, 1, 1], [], []>} : vector<8x8xf32>, vector<8x8xf32>, vector<8x8xf32> -> vector<8x8xf32>
    %281 = vector.extract_strided_slice %260 {offsets = [0, 8], sizes = [8, 8], strides = [1, 1]} : vector<8x32xf32> to vector<8x8xf32>
    %282 = vector.extract_strided_slice %261 {offsets = [0, 8], sizes = [8, 8], strides = [1, 1]} : vector<8x32xf32> to vector<8x8xf32>
    %283 = vector.extract_strided_slice %262 {offsets = [0, 8], sizes = [8, 8], strides = [1, 1]} : vector<8x32xf32> to vector<8x8xf32>
    %cst_108 = arith.constant dense<0.000000e+00> : vector<8x8xf32>
    %284 = tpu.matmul %281, %282, %cst_108 {dimension_numbers = #tpu.dot_dimension_numbers<[1], [1], [0], [0], [0, 0, 1, 0], [], []>} : vector<8x8xf32>, vector<8x8xf32>, vector<8x8xf32> -> vector<8x8xf32>
    %cst_109 = arith.constant 0.353553385 : f32
    %285 = vector.broadcast %cst_109 : f32 to vector<8x8xf32>
    %286 = arith.mulf %284, %285 : vector<8x8xf32>
    %287 = arith.addf %286, %6 : vector<8x8xf32>
    %cst_110 = arith.constant dense<0xFF800000> : vector<8xf32>
    %288 = vector.multi_reduction <maximumf>, %287, %cst_110 [1] : vector<8x8xf32> to vector<8xf32>
    %289 = vector.shape_cast %288 : vector<8xf32> to vector<8x1xf32>
    %290 = vector.broadcast %289 : vector<8x1xf32> to vector<8x8xf32>
    %291 = arith.subf %287, %290 : vector<8x8xf32>
    %292 = math.exp %291 : vector<8x8xf32>
    %cst_111 = arith.constant dense<0.000000e+00> : vector<8xf32>
    %293 = vector.multi_reduction <add>, %292, %cst_111 [1] : vector<8x8xf32> to vector<8xf32>
    %294 = vector.shape_cast %293 : vector<8xf32> to vector<8x1xf32>
    %295 = tpu.reciprocal %294 {approx = true} : vector<8x1xf32> -> vector<8x1xf32>
    %296 = vector.broadcast %295 : vector<8x1xf32> to vector<8x8xf32>
    %297 = arith.mulf %292, %296 : vector<8x8xf32>
    %cst_112 = arith.constant dense<0.000000e+00> : vector<8x8xf32>
    %298 = tpu.matmul %297, %283, %cst_112 {dimension_numbers = #tpu.dot_dimension_numbers<[1], [0], [0], [1], [0, 0, 1, 1], [], []>} : vector<8x8xf32>, vector<8x8xf32>, vector<8x8xf32> -> vector<8x8xf32>
    %299 = vector.extract_strided_slice %260 {offsets = [0, 16], sizes = [8, 8], strides = [1, 1]} : vector<8x32xf32> to vector<8x8xf32>
    %300 = vector.extract_strided_slice %261 {offsets = [0, 16], sizes = [8, 8], strides = [1, 1]} : vector<8x32xf32> to vector<8x8xf32>
    %301 = vector.extract_strided_slice %262 {offsets = [0, 16], sizes = [8, 8], strides = [1, 1]} : vector<8x32xf32> to vector<8x8xf32>
    %cst_113 = arith.constant dense<0.000000e+00> : vector<8x8xf32>
    %302 = tpu.matmul %299, %300, %cst_113 {dimension_numbers = #tpu.dot_dimension_numbers<[1], [1], [0], [0], [0, 0, 1, 0], [], []>} : vector<8x8xf32>, vector<8x8xf32>, vector<8x8xf32> -> vector<8x8xf32>
    %cst_114 = arith.constant 0.353553385 : f32
    %303 = vector.broadcast %cst_114 : f32 to vector<8x8xf32>
    %304 = arith.mulf %302, %303 : vector<8x8xf32>
    %305 = arith.addf %304, %6 : vector<8x8xf32>
    %cst_115 = arith.constant dense<0xFF800000> : vector<8xf32>
    %306 = vector.multi_reduction <maximumf>, %305, %cst_115 [1] : vector<8x8xf32> to vector<8xf32>
    %307 = vector.shape_cast %306 : vector<8xf32> to vector<8x1xf32>
    %308 = vector.broadcast %307 : vector<8x1xf32> to vector<8x8xf32>
    %309 = arith.subf %305, %308 : vector<8x8xf32>
    %310 = math.exp %309 : vector<8x8xf32>
    %cst_116 = arith.constant dense<0.000000e+00> : vector<8xf32>
    %311 = vector.multi_reduction <add>, %310, %cst_116 [1] : vector<8x8xf32> to vector<8xf32>
    %312 = vector.shape_cast %311 : vector<8xf32> to vector<8x1xf32>
    %313 = tpu.reciprocal %312 {approx = true} : vector<8x1xf32> -> vector<8x1xf32>
    %314 = vector.broadcast %313 : vector<8x1xf32> to vector<8x8xf32>
    %315 = arith.mulf %310, %314 : vector<8x8xf32>
    %cst_117 = arith.constant dense<0.000000e+00> : vector<8x8xf32>
    %316 = tpu.matmul %315, %301, %cst_117 {dimension_numbers = #tpu.dot_dimension_numbers<[1], [0], [0], [1], [0, 0, 1, 1], [], []>} : vector<8x8xf32>, vector<8x8xf32>, vector<8x8xf32> -> vector<8x8xf32>
    %317 = vector.extract_strided_slice %260 {offsets = [0, 24], sizes = [8, 8], strides = [1, 1]} : vector<8x32xf32> to vector<8x8xf32>
    %318 = vector.extract_strided_slice %261 {offsets = [0, 24], sizes = [8, 8], strides = [1, 1]} : vector<8x32xf32> to vector<8x8xf32>
    %319 = vector.extract_strided_slice %262 {offsets = [0, 24], sizes = [8, 8], strides = [1, 1]} : vector<8x32xf32> to vector<8x8xf32>
    %cst_118 = arith.constant dense<0.000000e+00> : vector<8x8xf32>
    %320 = tpu.matmul %317, %318, %cst_118 {dimension_numbers = #tpu.dot_dimension_numbers<[1], [1], [0], [0], [0, 0, 1, 0], [], []>} : vector<8x8xf32>, vector<8x8xf32>, vector<8x8xf32> -> vector<8x8xf32>
    %cst_119 = arith.constant 0.353553385 : f32
    %321 = vector.broadcast %cst_119 : f32 to vector<8x8xf32>
    %322 = arith.mulf %320, %321 : vector<8x8xf32>
    %323 = arith.addf %322, %6 : vector<8x8xf32>
    %cst_120 = arith.constant dense<0xFF800000> : vector<8xf32>
    %324 = vector.multi_reduction <maximumf>, %323, %cst_120 [1] : vector<8x8xf32> to vector<8xf32>
    %325 = vector.shape_cast %324 : vector<8xf32> to vector<8x1xf32>
    %326 = vector.broadcast %325 : vector<8x1xf32> to vector<8x8xf32>
    %327 = arith.subf %323, %326 : vector<8x8xf32>
    %328 = math.exp %327 : vector<8x8xf32>
    %cst_121 = arith.constant dense<0.000000e+00> : vector<8xf32>
    %329 = vector.multi_reduction <add>, %328, %cst_121 [1] : vector<8x8xf32> to vector<8xf32>
    %330 = vector.shape_cast %329 : vector<8xf32> to vector<8x1xf32>
    %331 = tpu.reciprocal %330 {approx = true} : vector<8x1xf32> -> vector<8x1xf32>
    %332 = vector.broadcast %331 : vector<8x1xf32> to vector<8x8xf32>
    %333 = arith.mulf %328, %332 : vector<8x8xf32>
    %cst_122 = arith.constant dense<0.000000e+00> : vector<8x8xf32>
    %334 = tpu.matmul %333, %319, %cst_122 {dimension_numbers = #tpu.dot_dimension_numbers<[1], [0], [0], [1], [0, 0, 1, 1], [], []>} : vector<8x8xf32>, vector<8x8xf32>, vector<8x8xf32> -> vector<8x8xf32>
    %335 = tpu.concatenate %280, %298, %316, %334 in 1 : vector<8x8xf32>, vector<8x8xf32>, vector<8x8xf32>, vector<8x8xf32> -> vector<8x32xf32>
    %336 = vector.extract_strided_slice %257 {offsets = [8, 0], sizes = [8, 32], strides = [1, 1]} : vector<16x32xf32> to vector<8x32xf32>
    %337 = vector.extract_strided_slice %258 {offsets = [8, 0], sizes = [8, 32], strides = [1, 1]} : vector<16x32xf32> to vector<8x32xf32>
    %338 = vector.extract_strided_slice %259 {offsets = [8, 0], sizes = [8, 32], strides = [1, 1]} : vector<16x32xf32> to vector<8x32xf32>
    %339 = vector.extract_strided_slice %336 {offsets = [0, 0], sizes = [8, 8], strides = [1, 1]} : vector<8x32xf32> to vector<8x8xf32>
    %340 = vector.extract_strided_slice %337 {offsets = [0, 0], sizes = [8, 8], strides = [1, 1]} : vector<8x32xf32> to vector<8x8xf32>
    %341 = vector.extract_strided_slice %338 {offsets = [0, 0], sizes = [8, 8], strides = [1, 1]} : vector<8x32xf32> to vector<8x8xf32>
    %cst_123 = arith.constant dense<0.000000e+00> : vector<8x8xf32>
    %342 = tpu.matmul %339, %340, %cst_123 {dimension_numbers = #tpu.dot_dimension_numbers<[1], [1], [0], [0], [0, 0, 1, 0], [], []>} : vector<8x8xf32>, vector<8x8xf32>, vector<8x8xf32> -> vector<8x8xf32>
    %cst_124 = arith.constant 0.353553385 : f32
    %343 = vector.broadcast %cst_124 : f32 to vector<8x8xf32>
    %344 = arith.mulf %342, %343 : vector<8x8xf32>
    %345 = arith.addf %344, %12 : vector<8x8xf32>
    %cst_125 = arith.constant dense<0xFF800000> : vector<8xf32>
    %346 = vector.multi_reduction <maximumf>, %345, %cst_125 [1] : vector<8x8xf32> to vector<8xf32>
    %347 = vector.shape_cast %346 : vector<8xf32> to vector<8x1xf32>
    %348 = vector.broadcast %347 : vector<8x1xf32> to vector<8x8xf32>
    %349 = arith.subf %345, %348 : vector<8x8xf32>
    %350 = math.exp %349 : vector<8x8xf32>
    %cst_126 = arith.constant dense<0.000000e+00> : vector<8xf32>
    %351 = vector.multi_reduction <add>, %350, %cst_126 [1] : vector<8x8xf32> to vector<8xf32>
    %352 = vector.shape_cast %351 : vector<8xf32> to vector<8x1xf32>
    %353 = tpu.reciprocal %352 {approx = true} : vector<8x1xf32> -> vector<8x1xf32>
    %354 = vector.broadcast %353 : vector<8x1xf32> to vector<8x8xf32>
    %355 = arith.mulf %350, %354 : vector<8x8xf32>
    %cst_127 = arith.constant dense<0.000000e+00> : vector<8x8xf32>
    %356 = tpu.matmul %355, %341, %cst_127 {dimension_numbers = #tpu.dot_dimension_numbers<[1], [0], [0], [1], [0, 0, 1, 1], [], []>} : vector<8x8xf32>, vector<8x8xf32>, vector<8x8xf32> -> vector<8x8xf32>
    %357 = vector.extract_strided_slice %336 {offsets = [0, 8], sizes = [8, 8], strides = [1, 1]} : vector<8x32xf32> to vector<8x8xf32>
    %358 = vector.extract_strided_slice %337 {offsets = [0, 8], sizes = [8, 8], strides = [1, 1]} : vector<8x32xf32> to vector<8x8xf32>
    %359 = vector.extract_strided_slice %338 {offsets = [0, 8], sizes = [8, 8], strides = [1, 1]} : vector<8x32xf32> to vector<8x8xf32>
    %cst_128 = arith.constant dense<0.000000e+00> : vector<8x8xf32>
    %360 = tpu.matmul %357, %358, %cst_128 {dimension_numbers = #tpu.dot_dimension_numbers<[1], [1], [0], [0], [0, 0, 1, 0], [], []>} : vector<8x8xf32>, vector<8x8xf32>, vector<8x8xf32> -> vector<8x8xf32>
    %cst_129 = arith.constant 0.353553385 : f32
    %361 = vector.broadcast %cst_129 : f32 to vector<8x8xf32>
    %362 = arith.mulf %360, %361 : vector<8x8xf32>
    %363 = arith.addf %362, %12 : vector<8x8xf32>
    %cst_130 = arith.constant dense<0xFF800000> : vector<8xf32>
    %364 = vector.multi_reduction <maximumf>, %363, %cst_130 [1] : vector<8x8xf32> to vector<8xf32>
    %365 = vector.shape_cast %364 : vector<8xf32> to vector<8x1xf32>
    %366 = vector.broadcast %365 : vector<8x1xf32> to vector<8x8xf32>
    %367 = arith.subf %363, %366 : vector<8x8xf32>
    %368 = math.exp %367 : vector<8x8xf32>
    %cst_131 = arith.constant dense<0.000000e+00> : vector<8xf32>
    %369 = vector.multi_reduction <add>, %368, %cst_131 [1] : vector<8x8xf32> to vector<8xf32>
    %370 = vector.shape_cast %369 : vector<8xf32> to vector<8x1xf32>
    %371 = tpu.reciprocal %370 {approx = true} : vector<8x1xf32> -> vector<8x1xf32>
    %372 = vector.broadcast %371 : vector<8x1xf32> to vector<8x8xf32>
    %373 = arith.mulf %368, %372 : vector<8x8xf32>
    %cst_132 = arith.constant dense<0.000000e+00> : vector<8x8xf32>
    %374 = tpu.matmul %373, %359, %cst_132 {dimension_numbers = #tpu.dot_dimension_numbers<[1], [0], [0], [1], [0, 0, 1, 1], [], []>} : vector<8x8xf32>, vector<8x8xf32>, vector<8x8xf32> -> vector<8x8xf32>
    %375 = vector.extract_strided_slice %336 {offsets = [0, 16], sizes = [8, 8], strides = [1, 1]} : vector<8x32xf32> to vector<8x8xf32>
    %376 = vector.extract_strided_slice %337 {offsets = [0, 16], sizes = [8, 8], strides = [1, 1]} : vector<8x32xf32> to vector<8x8xf32>
    %377 = vector.extract_strided_slice %338 {offsets = [0, 16], sizes = [8, 8], strides = [1, 1]} : vector<8x32xf32> to vector<8x8xf32>
    %cst_133 = arith.constant dense<0.000000e+00> : vector<8x8xf32>
    %378 = tpu.matmul %375, %376, %cst_133 {dimension_numbers = #tpu.dot_dimension_numbers<[1], [1], [0], [0], [0, 0, 1, 0], [], []>} : vector<8x8xf32>, vector<8x8xf32>, vector<8x8xf32> -> vector<8x8xf32>
    %cst_134 = arith.constant 0.353553385 : f32
    %379 = vector.broadcast %cst_134 : f32 to vector<8x8xf32>
    %380 = arith.mulf %378, %379 : vector<8x8xf32>
    %381 = arith.addf %380, %12 : vector<8x8xf32>
    %cst_135 = arith.constant dense<0xFF800000> : vector<8xf32>
    %382 = vector.multi_reduction <maximumf>, %381, %cst_135 [1] : vector<8x8xf32> to vector<8xf32>
    %383 = vector.shape_cast %382 : vector<8xf32> to vector<8x1xf32>
    %384 = vector.broadcast %383 : vector<8x1xf32> to vector<8x8xf32>
    %385 = arith.subf %381, %384 : vector<8x8xf32>
    %386 = math.exp %385 : vector<8x8xf32>
    %cst_136 = arith.constant dense<0.000000e+00> : vector<8xf32>
    %387 = vector.multi_reduction <add>, %386, %cst_136 [1] : vector<8x8xf32> to vector<8xf32>
    %388 = vector.shape_cast %387 : vector<8xf32> to vector<8x1xf32>
    %389 = tpu.reciprocal %388 {approx = true} : vector<8x1xf32> -> vector<8x1xf32>
    %390 = vector.broadcast %389 : vector<8x1xf32> to vector<8x8xf32>
    %391 = arith.mulf %386, %390 : vector<8x8xf32>
    %cst_137 = arith.constant dense<0.000000e+00> : vector<8x8xf32>
    %392 = tpu.matmul %391, %377, %cst_137 {dimension_numbers = #tpu.dot_dimension_numbers<[1], [0], [0], [1], [0, 0, 1, 1], [], []>} : vector<8x8xf32>, vector<8x8xf32>, vector<8x8xf32> -> vector<8x8xf32>
    %393 = vector.extract_strided_slice %336 {offsets = [0, 24], sizes = [8, 8], strides = [1, 1]} : vector<8x32xf32> to vector<8x8xf32>
    %394 = vector.extract_strided_slice %337 {offsets = [0, 24], sizes = [8, 8], strides = [1, 1]} : vector<8x32xf32> to vector<8x8xf32>
    %395 = vector.extract_strided_slice %338 {offsets = [0, 24], sizes = [8, 8], strides = [1, 1]} : vector<8x32xf32> to vector<8x8xf32>
    %cst_138 = arith.constant dense<0.000000e+00> : vector<8x8xf32>
    %396 = tpu.matmul %393, %394, %cst_138 {dimension_numbers = #tpu.dot_dimension_numbers<[1], [1], [0], [0], [0, 0, 1, 0], [], []>} : vector<8x8xf32>, vector<8x8xf32>, vector<8x8xf32> -> vector<8x8xf32>
    %cst_139 = arith.constant 0.353553385 : f32
    %397 = vector.broadcast %cst_139 : f32 to vector<8x8xf32>
    %398 = arith.mulf %396, %397 : vector<8x8xf32>
    %399 = arith.addf %398, %12 : vector<8x8xf32>
    %cst_140 = arith.constant dense<0xFF800000> : vector<8xf32>
    %400 = vector.multi_reduction <maximumf>, %399, %cst_140 [1] : vector<8x8xf32> to vector<8xf32>
    %401 = vector.shape_cast %400 : vector<8xf32> to vector<8x1xf32>
    %402 = vector.broadcast %401 : vector<8x1xf32> to vector<8x8xf32>
    %403 = arith.subf %399, %402 : vector<8x8xf32>
    %404 = math.exp %403 : vector<8x8xf32>
    %cst_141 = arith.constant dense<0.000000e+00> : vector<8xf32>
    %405 = vector.multi_reduction <add>, %404, %cst_141 [1] : vector<8x8xf32> to vector<8xf32>
    %406 = vector.shape_cast %405 : vector<8xf32> to vector<8x1xf32>
    %407 = tpu.reciprocal %406 {approx = true} : vector<8x1xf32> -> vector<8x1xf32>
    %408 = vector.broadcast %407 : vector<8x1xf32> to vector<8x8xf32>
    %409 = arith.mulf %404, %408 : vector<8x8xf32>
    %cst_142 = arith.constant dense<0.000000e+00> : vector<8x8xf32>
    %410 = tpu.matmul %409, %395, %cst_142 {dimension_numbers = #tpu.dot_dimension_numbers<[1], [0], [0], [1], [0, 0, 1, 1], [], []>} : vector<8x8xf32>, vector<8x8xf32>, vector<8x8xf32> -> vector<8x8xf32>
    %411 = tpu.concatenate %356, %374, %392, %410 in 1 : vector<8x8xf32>, vector<8x8xf32>, vector<8x8xf32>, vector<8x8xf32> -> vector<8x32xf32>
    %412 = tpu.concatenate %335, %411 in 0 : vector<8x32xf32>, vector<8x32xf32> -> vector<16x32xf32>
    %c1_143 = arith.constant 1 : index
    %c0_144 = arith.constant 0 : index
    %c0_145 = arith.constant 0 : index
    %413 = vector.load %arg5[%c1_143, %c0_144, %c0_145] : memref<2x32x32xf32, #tpu.memory_space<vmem>>, vector<1x32x32xf32>
    %414 = vector.shape_cast %413 : vector<1x32x32xf32> to vector<32x32xf32>
    %cst_146 = arith.constant dense<0.000000e+00> : vector<16x32xf32>
    %415 = tpu.matmul %412, %414, %cst_146 {dimension_numbers = #tpu.dot_dimension_numbers<[1], [0], [0], [1], [0, 0, 1, 1], [], []>} : vector<16x32xf32>, vector<32x32xf32>, vector<16x32xf32> -> vector<16x32xf32>
    %c1_147 = arith.constant 1 : index
    %c0_148 = arith.constant 0 : index
    %c0_149 = arith.constant 0 : index
    %416 = vector.load %arg6[%c1_147, %c0_148, %c0_149] : memref<2x1x32xf32, #tpu.memory_space<vmem>>, vector<1x1x32xf32>
    %417 = vector.shape_cast %416 : vector<1x1x32xf32> to vector<1x32xf32>
    %418 = vector.broadcast %417 : vector<1x32xf32> to vector<16x32xf32>
    %419 = arith.addf %415, %418 : vector<16x32xf32>
    %420 = arith.addf %249, %419 : vector<16x32xf32>
    %c1_150 = arith.constant 1 : index
    %c0_151 = arith.constant 0 : index
    %c0_152 = arith.constant 0 : index
    %421 = vector.load %arg11[%c1_150, %c0_151, %c0_152] : memref<2x1x32xf32, #tpu.memory_space<vmem>>, vector<1x1x32xf32>
    %422 = vector.shape_cast %421 : vector<1x1x32xf32> to vector<1x32xf32>
    %c1_153 = arith.constant 1 : index
    %c0_154 = arith.constant 0 : index
    %c0_155 = arith.constant 0 : index
    %423 = vector.load %arg12[%c1_153, %c0_154, %c0_155] : memref<2x1x32xf32, #tpu.memory_space<vmem>>, vector<1x1x32xf32>
    %424 = vector.shape_cast %423 : vector<1x1x32xf32> to vector<1x32xf32>
    %cst_156 = arith.constant dense<0.000000e+00> : vector<16xf32>
    %425 = vector.multi_reduction <add>, %420, %cst_156 [1] : vector<16x32xf32> to vector<16xf32>
    %426 = vector.shape_cast %425 : vector<16xf32> to vector<16x1xf32>
    %cst_157 = arith.constant 3.200000e+01 : f32
    %427 = vector.broadcast %cst_157 : f32 to vector<16x1xf32>
    %428 = arith.divf %426, %427 : vector<16x1xf32>
    %429 = vector.broadcast %428 : vector<16x1xf32> to vector<16x32xf32>
    %430 = arith.subf %420, %429 : vector<16x32xf32>
    %431 = arith.mulf %430, %430 : vector<16x32xf32>
    %cst_158 = arith.constant dense<0.000000e+00> : vector<16xf32>
    %432 = vector.multi_reduction <add>, %431, %cst_158 [1] : vector<16x32xf32> to vector<16xf32>
    %433 = vector.shape_cast %432 : vector<16xf32> to vector<16x1xf32>
    %cst_159 = arith.constant 3.200000e+01 : f32
    %434 = vector.broadcast %cst_159 : f32 to vector<16x1xf32>
    %435 = arith.divf %433, %434 : vector<16x1xf32>
    %cst_160 = arith.constant 9.99999974E-6 : f32
    %436 = vector.broadcast %cst_160 : f32 to vector<16x1xf32>
    %437 = arith.addf %435, %436 : vector<16x1xf32>
    %438 = math.rsqrt %437 : vector<16x1xf32>
    %439 = vector.broadcast %438 : vector<16x1xf32> to vector<16x32xf32>
    %440 = arith.mulf %430, %439 : vector<16x32xf32>
    %441 = vector.broadcast %422 : vector<1x32xf32> to vector<16x32xf32>
    %442 = arith.mulf %440, %441 : vector<16x32xf32>
    %443 = vector.broadcast %424 : vector<1x32xf32> to vector<16x32xf32>
    %444 = arith.addf %442, %443 : vector<16x32xf32>
    %c1_161 = arith.constant 1 : index
    %c0_162 = arith.constant 0 : index
    %c0_163 = arith.constant 0 : index
    %445 = vector.load %arg7[%c1_161, %c0_162, %c0_163] : memref<2x32x64xf32, #tpu.memory_space<vmem>>, vector<1x32x64xf32>
    %446 = vector.shape_cast %445 : vector<1x32x64xf32> to vector<32x64xf32>
    %cst_164 = arith.constant dense<0.000000e+00> : vector<16x64xf32>
    %447 = tpu.matmul %444, %446, %cst_164 {dimension_numbers = #tpu.dot_dimension_numbers<[1], [0], [0], [1], [0, 0, 1, 1], [], []>} : vector<16x32xf32>, vector<32x64xf32>, vector<16x64xf32> -> vector<16x64xf32>
    %c1_165 = arith.constant 1 : index
    %c0_166 = arith.constant 0 : index
    %c0_167 = arith.constant 0 : index
    %448 = vector.load %arg8[%c1_165, %c0_166, %c0_167] : memref<2x1x64xf32, #tpu.memory_space<vmem>>, vector<1x1x64xf32>
    %449 = vector.shape_cast %448 : vector<1x1x64xf32> to vector<1x64xf32>
    %450 = vector.broadcast %449 : vector<1x64xf32> to vector<16x64xf32>
    %451 = arith.addf %447, %450 : vector<16x64xf32>
    %cst_168 = arith.constant 0.000000e+00 : f32
    %452 = vector.broadcast %cst_168 : f32 to vector<16x64xf32>
    %453 = arith.maximumf %451, %452 : vector<16x64xf32>
    %c1_169 = arith.constant 1 : index
    %c0_170 = arith.constant 0 : index
    %c0_171 = arith.constant 0 : index
    %454 = vector.load %arg9[%c1_169, %c0_170, %c0_171] : memref<2x64x32xf32, #tpu.memory_space<vmem>>, vector<1x64x32xf32>
    %455 = vector.shape_cast %454 : vector<1x64x32xf32> to vector<64x32xf32>
    %cst_172 = arith.constant dense<0.000000e+00> : vector<16x32xf32>
    %456 = tpu.matmul %453, %455, %cst_172 {dimension_numbers = #tpu.dot_dimension_numbers<[1], [0], [0], [1], [0, 0, 1, 1], [], []>} : vector<16x64xf32>, vector<64x32xf32>, vector<16x32xf32> -> vector<16x32xf32>
    %c1_173 = arith.constant 1 : index
    %c0_174 = arith.constant 0 : index
    %c0_175 = arith.constant 0 : index
    %457 = vector.load %arg10[%c1_173, %c0_174, %c0_175] : memref<2x1x32xf32, #tpu.memory_space<vmem>>, vector<1x1x32xf32>
    %458 = vector.shape_cast %457 : vector<1x1x32xf32> to vector<1x32xf32>
    %459 = vector.broadcast %458 : vector<1x32xf32> to vector<16x32xf32>
    %460 = arith.addf %456, %459 : vector<16x32xf32>
    %461 = arith.addf %444, %460 : vector<16x32xf32>
    %c1_176 = arith.constant 1 : index
    %c0_177 = arith.constant 0 : index
    %c0_178 = arith.constant 0 : index
    %462 = vector.load %arg13[%c1_176, %c0_177, %c0_178] : memref<2x1x32xf32, #tpu.memory_space<vmem>>, vector<1x1x32xf32>
    %463 = vector.shape_cast %462 : vector<1x1x32xf32> to vector<1x32xf32>
    %c1_179 = arith.constant 1 : index
    %c0_180 = arith.constant 0 : index
    %c0_181 = arith.constant 0 : index
    %464 = vector.load %arg14[%c1_179, %c0_180, %c0_181] : memref<2x1x32xf32, #tpu.memory_space<vmem>>, vector<1x1x32xf32>
    %465 = vector.shape_cast %464 : vector<1x1x32xf32> to vector<1x32xf32>
    %cst_182 = arith.constant dense<0.000000e+00> : vector<16xf32>
    %466 = vector.multi_reduction <add>, %461, %cst_182 [1] : vector<16x32xf32> to vector<16xf32>
    %467 = vector.shape_cast %466 : vector<16xf32> to vector<16x1xf32>
    %cst_183 = arith.constant 3.200000e+01 : f32
    %468 = vector.broadcast %cst_183 : f32 to vector<16x1xf32>
    %469 = arith.divf %467, %468 : vector<16x1xf32>
    %470 = vector.broadcast %469 : vector<16x1xf32> to vector<16x32xf32>
    %471 = arith.subf %461, %470 : vector<16x32xf32>
    %472 = arith.mulf %471, %471 : vector<16x32xf32>
    %cst_184 = arith.constant dense<0.000000e+00> : vector<16xf32>
    %473 = vector.multi_reduction <add>, %472, %cst_184 [1] : vector<16x32xf32> to vector<16xf32>
    %474 = vector.shape_cast %473 : vector<16xf32> to vector<16x1xf32>
    %cst_185 = arith.constant 3.200000e+01 : f32
    %475 = vector.broadcast %cst_185 : f32 to vector<16x1xf32>
    %476 = arith.divf %474, %475 : vector<16x1xf32>
    %cst_186 = arith.constant 9.99999974E-6 : f32
    %477 = vector.broadcast %cst_186 : f32 to vector<16x1xf32>
    %478 = arith.addf %476, %477 : vector<16x1xf32>
    %479 = math.rsqrt %478 : vector<16x1xf32>
    %480 = vector.broadcast %479 : vector<16x1xf32> to vector<16x32xf32>
    %481 = arith.mulf %471, %480 : vector<16x32xf32>
    %482 = vector.broadcast %463 : vector<1x32xf32> to vector<16x32xf32>
    %483 = arith.mulf %481, %482 : vector<16x32xf32>
    %484 = vector.broadcast %465 : vector<1x32xf32> to vector<16x32xf32>
    %485 = arith.addf %483, %484 : vector<16x32xf32>
    %c0_187 = arith.constant 0 : index
    %c0_188 = arith.constant 0 : index
    %486 = vector.load %arg15[%c0_187, %c0_188] : memref<1x32xf32, #tpu.memory_space<vmem>>, vector<1x32xf32>
    %c0_189 = arith.constant 0 : index
    %c0_190 = arith.constant 0 : index
    %487 = vector.load %arg16[%c0_189, %c0_190] : memref<1x32xf32, #tpu.memory_space<vmem>>, vector<1x32xf32>
    %cst_191 = arith.constant dense<0.000000e+00> : vector<16xf32>
    %488 = vector.multi_reduction <add>, %485, %cst_191 [1] : vector<16x32xf32> to vector<16xf32>
    %489 = vector.shape_cast %488 : vector<16xf32> to vector<16x1xf32>
    %cst_192 = arith.constant 3.200000e+01 : f32
    %490 = vector.broadcast %cst_192 : f32 to vector<16x1xf32>
    %491 = arith.divf %489, %490 : vector<16x1xf32>
    %492 = vector.broadcast %491 : vector<16x1xf32> to vector<16x32xf32>
    %493 = arith.subf %485, %492 : vector<16x32xf32>
    %494 = arith.mulf %493, %493 : vector<16x32xf32>
    %cst_193 = arith.constant dense<0.000000e+00> : vector<16xf32>
    %495 = vector.multi_reduction <add>, %494, %cst_193 [1] : vector<16x32xf32> to vector<16xf32>
    %496 = vector.shape_cast %495 : vector<16xf32> to vector<16x1xf32>
    %cst_194 = arith.constant 3.200000e+01 : f32
    %497 = vector.broadcast %cst_194 : f32 to vector<16x1xf32>
    %498 = arith.divf %496, %497 : vector<16x1xf32>
    %cst_195 = arith.constant 9.99999974E-6 : f32
    %499 = vector.broadcast %cst_195 : f32 to vector<16x1xf32>
    %500 = arith.addf %498, %499 : vector<16x1xf32>
    %501 = math.rsqrt %500 : vector<16x1xf32>
    %502 = vector.broadcast %501 : vector<16x1xf32> to vector<16x32xf32>
    %503 = arith.mulf %493, %502 : vector<16x32xf32>
    %504 = vector.broadcast %486 : vector<1x32xf32> to vector<16x32xf32>
    %505 = arith.mulf %503, %504 : vector<16x32xf32>
    %506 = vector.broadcast %487 : vector<1x32xf32> to vector<16x32xf32>
    %507 = arith.addf %505, %506 : vector<16x32xf32>
    %c0_196 = arith.constant 0 : index
    %c0_197 = arith.constant 0 : index
    %508 = vector.load %arg17[%c0_196, %c0_197] : memref<16x32xf32, #tpu.memory_space<vmem>>, vector<16x32xf32>
    tpu.vector_store %arg17[%c0_196, %c0_197], %507 {strides = array<i32>} : memref<16x32xf32, #tpu.memory_space<vmem>>, vector<16x32xf32>,
    return
  }
  func.func @transform_0(%arg0: i32, %arg1: memref<2xi32, #tpu.memory_space<smem>>) -> (i32, i32) {
    %c0_i32 = arith.constant 0 : i32
    %c0_i32_0 = arith.constant 0 : i32
    %c0_i32_1 = arith.constant 0 : i32
    return %c0_i32, %c0_i32_0 : i32, i32
  }
  func.func @transform_1(%arg0: i32, %arg1: memref<2xi32, #tpu.memory_space<smem>>) -> (i32, i32, i32) {
    %c0_i32 = arith.constant 0 : i32
    %c0_i32_0 = arith.constant 0 : i32
    %c0_i32_1 = arith.constant 0 : i32
    %c0_i32_2 = arith.constant 0 : i32
    return %c0_i32, %c0_i32_0, %c0_i32_1 : i32, i32, i32
  }
  func.func @transform_2(%arg0: i32, %arg1: memref<2xi32, #tpu.memory_space<smem>>) -> (i32, i32, i32) {
    %c0_i32 = arith.constant 0 : i32
    %c0_i32_0 = arith.constant 0 : i32
    %c0_i32_1 = arith.constant 0 : i32
    %c0_i32_2 = arith.constant 0 : i32
    return %c0_i32, %c0_i32_0, %c0_i32_1 : i32, i32, i32
  }
  func.func @transform_3(%arg0: i32, %arg1: memref<2xi32, #tpu.memory_space<smem>>) -> (i32, i32, i32) {
    %c0_i32 = arith.constant 0 : i32
    %c0_i32_0 = arith.constant 0 : i32
    %c0_i32_1 = arith.constant 0 : i32
    %c0_i32_2 = arith.constant 0 : i32
    return %c0_i32, %c0_i32_0, %c0_i32_1 : i32, i32, i32
  }
  func.func @transform_4(%arg0: i32, %arg1: memref<2xi32, #tpu.memory_space<smem>>) -> (i32, i32, i32) {
    %c0_i32 = arith.constant 0 : i32
    %c0_i32_0 = arith.constant 0 : i32
    %c0_i32_1 = arith.constant 0 : i32
    %c0_i32_2 = arith.constant 0 : i32
    return %c0_i32, %c0_i32_0, %c0_i32_1 : i32, i32, i32
  }
  func.func @transform_5(%arg0: i32, %arg1: memref<2xi32, #tpu.memory_space<smem>>) -> (i32, i32, i32) {
    %c0_i32 = arith.constant 0 : i32
    %c0_i32_0 = arith.constant 0 : i32
    %c0_i32_1 = arith.constant 0 : i32
    %c0_i32_2 = arith.constant 0 : i32
    return %c0_i32, %c0_i32_0, %c0_i32_1 : i32, i32, i32
  }
  func.func @transform_6(%arg0: i32, %arg1: memref<2xi32, #tpu.memory_space<smem>>) -> (i32, i32, i32) {
    %c0_i32 = arith.constant 0 : i32
    %c0_i32_0 = arith.constant 0 : i32
    %c0_i32_1 = arith.constant 0 : i32
    %c0_i32_2 = arith.constant 0 : i32
    return %c0_i32, %c0_i32_0, %c0_i32_1 : i32, i32, i32
  }
  func.func @transform_7(%arg0: i32, %arg1: memref<2xi32, #tpu.memory_space<smem>>) -> (i32, i32, i32) {
    %c0_i32 = arith.constant 0 : i32
    %c0_i32_0 = arith.constant 0 : i32
    %c0_i32_1 = arith.constant 0 : i32
    %c0_i32_2 = arith.constant 0 : i32
    return %c0_i32, %c0_i32_0, %c0_i32_1 : i32, i32, i32
  }
  func.func @transform_8(%arg0: i32, %arg1: memref<2xi32, #tpu.memory_space<smem>>) -> (i32, i32, i32) {
    %c0_i32 = arith.constant 0 : i32
    %c0_i32_0 = arith.constant 0 : i32
    %c0_i32_1 = arith.constant 0 : i32
    %c0_i32_2 = arith.constant 0 : i32
    return %c0_i32, %c0_i32_0, %c0_i32_1 : i32, i32, i32
  }
  func.func @transform_9(%arg0: i32, %arg1: memref<2xi32, #tpu.memory_space<smem>>) -> (i32, i32, i32) {
    %c0_i32 = arith.constant 0 : i32
    %c0_i32_0 = arith.constant 0 : i32
    %c0_i32_1 = arith.constant 0 : i32
    %c0_i32_2 = arith.constant 0 : i32
    return %c0_i32, %c0_i32_0, %c0_i32_1 : i32, i32, i32
  }
  func.func @transform_10(%arg0: i32, %arg1: memref<2xi32, #tpu.memory_space<smem>>) -> (i32, i32, i32) {
    %c0_i32 = arith.constant 0 : i32
    %c0_i32_0 = arith.constant 0 : i32
    %c0_i32_1 = arith.constant 0 : i32
    %c0_i32_2 = arith.constant 0 : i32
    return %c0_i32, %c0_i32_0, %c0_i32_1 : i32, i32, i32
  }
  func.func @transform_11(%arg0: i32, %arg1: memref<2xi32, #tpu.memory_space<smem>>) -> (i32, i32, i32) {
    %c0_i32 = arith.constant 0 : i32
    %c0_i32_0 = arith.constant 0 : i32
    %c0_i32_1 = arith.constant 0 : i32
    %c0_i32_2 = arith.constant 0 : i32
    return %c0_i32, %c0_i32_0, %c0_i32_1 : i32, i32, i32
  }
  func.func @transform_12(%arg0: i32, %arg1: memref<2xi32, #tpu.memory_space<smem>>) -> (i32, i32, i32) {
    %c0_i32 = arith.constant 0 : i32
    %c0_i32_0 = arith.constant 0 : i32
    %c0_i32_1 = arith.constant 0 : i32
    %c0_i32_2 = arith.constant 0 : i32
    return %c0_i32, %c0_i32_0, %c0_i32_1 : i32, i32, i32
  }
  func.func @transform_13(%arg0: i32, %arg1: memref<2xi32, #tpu.memory_space<smem>>) -> (i32, i32) {
    %c0_i32 = arith.constant 0 : i32
    %c0_i32_0 = arith.constant 0 : i32
    %c0_i32_1 = arith.constant 0 : i32
    return %c0_i32, %c0_i32_0 : i32, i32
  }
  func.func @transform_14(%arg0: i32, %arg1: memref<2xi32, #tpu.memory_space<smem>>) -> (i32, i32) {
    %c0_i32 = arith.constant 0 : i32
    %c0_i32_0 = arith.constant 0 : i32
    %c0_i32_1 = arith.constant 0 : i32
    return %c0_i32, %c0_i32_0 : i32, i32
  }
  func.func @transform_15(%arg0: i32, %arg1: memref<2xi32, #tpu.memory_space<smem>>) -> (i32, i32) {
    %c0_i32 = arith.constant 0 : i32
    %c0_i32_0 = arith.constant 0 : i32
    %c0_i32_1 = arith.constant 0 : i32
    return %c0_i32, %c0_i32_0 : i32, i32
  }
}

module attributes {stable_mosaic.version = 11 : i64} {
  func.func @_decoder_stack_kernel(%arg0: i32, %arg1: memref<2xi32, #tpu.memory_space<smem>>, %arg2: memref<2xi32, #tpu.memory_space<smem>>, %arg3: memref<32x4xf32, #tpu.memory_space<vmem>>, %arg4: memref<32x32xf32, #tpu.memory_space<vmem>>, %arg5: memref<4x32xf32, #tpu.memory_space<vmem>>, %arg6: memref<1x32xf32, #tpu.memory_space<vmem>>, %arg7: memref<16x32xf32, #tpu.memory_space<vmem>>, %arg8: memref<2x32x96xf32, #tpu.memory_space<vmem>>, %arg9: memref<2x1x96xf32, #tpu.memory_space<vmem>>, %arg10: memref<2x32x32xf32, #tpu.memory_space<vmem>>, %arg11: memref<2x1x32xf32, #tpu.memory_space<vmem>>, %arg12: memref<2x32x32xf32, #tpu.memory_space<vmem>>, %arg13: memref<2x1x32xf32, #tpu.memory_space<vmem>>, %arg14: memref<2x32x64xf32, #tpu.memory_space<vmem>>, %arg15: memref<2x1x64xf32, #tpu.memory_space<vmem>>, %arg16: memref<2x32x32xf32, #tpu.memory_space<vmem>>, %arg17: memref<2x1x32xf32, #tpu.memory_space<vmem>>, %arg18: memref<2x32x64xf32, #tpu.memory_space<vmem>>, %arg19: memref<2x1x64xf32, #tpu.memory_space<vmem>>, %arg20: memref<2x64x32xf32, #tpu.memory_space<vmem>>, %arg21: memref<2x1x32xf32, #tpu.memory_space<vmem>>, %arg22: memref<2x1x32xf32, #tpu.memory_space<vmem>>, %arg23: memref<2x1x32xf32, #tpu.memory_space<vmem>>, %arg24: memref<2x1x32xf32, #tpu.memory_space<vmem>>, %arg25: memref<2x1x32xf32, #tpu.memory_space<vmem>>, %arg26: memref<2x1x32xf32, #tpu.memory_space<vmem>>, %arg27: memref<2x1x32xf32, #tpu.memory_space<vmem>>, %arg28: memref<1x32xf32, #tpu.memory_space<vmem>>, %arg29: memref<1x32xf32, #tpu.memory_space<vmem>>, %arg30: memref<32x4xf32, #tpu.memory_space<vmem>>, %arg31: memref<1x4xf32, #tpu.memory_space<vmem>>, %arg32: memref<32x4xf32, #tpu.memory_space<vmem>>) attributes {dimension_semantics = [#tpu.dimension_semantics<arbitrary>], iteration_bounds = array<i64: 1>, scalar_prefetch = 2 : i64, scratch_operands = 0 : i64, tpu.core_type = #tpu.core_type<tc>, window_params = [{pipeline_mode = #tpu.pipeline_mode<synchronous>, transform_indices = @transform_0, window_bounds = array<i64: 32, 4>}, {pipeline_mode = #tpu.pipeline_mode<synchronous>, transform_indices = @transform_1, window_bounds = array<i64: 32, 32>}, {pipeline_mode = #tpu.pipeline_mode<synchronous>, transform_indices = @transform_2, window_bounds = array<i64: 4, 32>}, {pipeline_mode = #tpu.pipeline_mode<synchronous>, transform_indices = @transform_3, window_bounds = array<i64: 1, 32>}, {pipeline_mode = #tpu.pipeline_mode<synchronous>, transform_indices = @transform_4, window_bounds = array<i64: 16, 32>}, {pipeline_mode = #tpu.pipeline_mode<synchronous>, transform_indices = @transform_5, window_bounds = array<i64: 2, 32, 96>}, {pipeline_mode = #tpu.pipeline_mode<synchronous>, transform_indices = @transform_6, window_bounds = array<i64: 2, 1, 96>}, {pipeline_mode = #tpu.pipeline_mode<synchronous>, transform_indices = @transform_7, window_bounds = array<i64: 2, 32, 32>}, {pipeline_mode = #tpu.pipeline_mode<synchronous>, transform_indices = @transform_8, window_bounds = array<i64: 2, 1, 32>}, {pipeline_mode = #tpu.pipeline_mode<synchronous>, transform_indices = @transform_9, window_bounds = array<i64: 2, 32, 32>}, {pipeline_mode = #tpu.pipeline_mode<synchronous>, transform_indices = @transform_10, window_bounds = array<i64: 2, 1, 32>}, {pipeline_mode = #tpu.pipeline_mode<synchronous>, transform_indices = @transform_11, window_bounds = array<i64: 2, 32, 64>}, {pipeline_mode = #tpu.pipeline_mode<synchronous>, transform_indices = @transform_12, window_bounds = array<i64: 2, 1, 64>}, {pipeline_mode = #tpu.pipeline_mode<synchronous>, transform_indices = @transform_13, window_bounds = array<i64: 2, 32, 32>}, {pipeline_mode = #tpu.pipeline_mode<synchronous>, transform_indices = @transform_14, window_bounds = array<i64: 2, 1, 32>}, {pipeline_mode = #tpu.pipeline_mode<synchronous>, transform_indices = @transform_15, window_bounds = array<i64: 2, 32, 64>}, {pipeline_mode = #tpu.pipeline_mode<synchronous>, transform_indices = @transform_16, window_bounds = array<i64: 2, 1, 64>}, {pipeline_mode = #tpu.pipeline_mode<synchronous>, transform_indices = @transform_17, window_bounds = array<i64: 2, 64, 32>}, {pipeline_mode = #tpu.pipeline_mode<synchronous>, transform_indices = @transform_18, window_bounds = array<i64: 2, 1, 32>}, {pipeline_mode = #tpu.pipeline_mode<synchronous>, transform_indices = @transform_19, window_bounds = array<i64: 2, 1, 32>}, {pipeline_mode = #tpu.pipeline_mode<synchronous>, transform_indices = @transform_20, window_bounds = array<i64: 2, 1, 32>}, {pipeline_mode = #tpu.pipeline_mode<synchronous>, transform_indices = @transform_21, window_bounds = array<i64: 2, 1, 32>}, {pipeline_mode = #tpu.pipeline_mode<synchronous>, transform_indices = @transform_22, window_bounds = array<i64: 2, 1, 32>}, {pipeline_mode = #tpu.pipeline_mode<synchronous>, transform_indices = @transform_23, window_bounds = array<i64: 2, 1, 32>}, {pipeline_mode = #tpu.pipeline_mode<synchronous>, transform_indices = @transform_24, window_bounds = array<i64: 2, 1, 32>}, {pipeline_mode = #tpu.pipeline_mode<synchronous>, transform_indices = @transform_25, window_bounds = array<i64: 1, 32>}, {pipeline_mode = #tpu.pipeline_mode<synchronous>, transform_indices = @transform_26, window_bounds = array<i64: 1, 32>}, {pipeline_mode = #tpu.pipeline_mode<synchronous>, transform_indices = @transform_27, window_bounds = array<i64: 32, 4>}, {pipeline_mode = #tpu.pipeline_mode<synchronous>, transform_indices = @transform_28, window_bounds = array<i64: 1, 4>}, {pipeline_mode = #tpu.pipeline_mode<synchronous>, transform_indices = @transform_29, window_bounds = array<i64: 32, 4>}]} {
    %c0 = arith.constant 0 : index
    %c0_0 = arith.constant 0 : index
    %0 = vector.load %arg3[%c0, %c0_0] : memref<32x4xf32, #tpu.memory_space<vmem>>, vector<32x4xf32>
    %c0_1 = arith.constant 0 : index
    %c0_2 = arith.constant 0 : index
    %1 = vector.load %arg5[%c0_1, %c0_2] : memref<4x32xf32, #tpu.memory_space<vmem>>, vector<4x32xf32>
    %cst = arith.constant dense<0.000000e+00> : vector<32x32xf32>
    %2 = tpu.matmul %0, %1, %cst {dimension_numbers = #tpu.dot_dimension_numbers<[1], [0], [0], [1], [0, 0, 1, 1], [], []>} : vector<32x4xf32>, vector<4x32xf32>, vector<32x32xf32> -> vector<32x32xf32>
    %c0_3 = arith.constant 0 : index
    %c0_4 = arith.constant 0 : index
    %3 = vector.load %arg6[%c0_3, %c0_4] : memref<1x32xf32, #tpu.memory_space<vmem>>, vector<1x32xf32>
    %4 = vector.broadcast %3 : vector<1x32xf32> to vector<32x32xf32>
    %5 = arith.addf %2, %4 : vector<32x32xf32>
    %c0_5 = arith.constant 0 : index
    %c0_6 = arith.constant 0 : index
    %6 = vector.load %arg4[%c0_5, %c0_6] : memref<32x32xf32, #tpu.memory_space<vmem>>, vector<32x32xf32>
    %7 = arith.addf %5, %6 : vector<32x32xf32>
    %c0_7 = arith.constant 0 : index
    %c0_8 = arith.constant 0 : index
    %8 = vector.load %arg7[%c0_7, %c0_8] : memref<16x32xf32, #tpu.memory_space<vmem>>, vector<16x32xf32>
    %9 = tpu.iota {dimensions = array<i32: 0>} : vector<16x16xi32>
    %10 = tpu.iota {dimensions = array<i32: 1>} : vector<16x16xi32>
    %11 = tpu.iota {dimensions = array<i32: 1>} : vector<16x8xi32>
    %12 = arith.cmpi sgt, %10, %9 : vector<16x16xi32>
    %c0_9 = arith.constant 0 : index
    %13 = memref.load %arg2[%c0_9] : memref<2xi32, #tpu.memory_space<smem>>
    %14 = vector.broadcast %13 : i32 to vector<16x16xi32>
    %15 = arith.cmpi sge, %10, %14 : vector<16x16xi32>
    %16 = arith.ori %12, %15 : vector<16x16xi1>
    %cst_10 = arith.constant -1.000000e+30 : f32
    %cst_11 = arith.constant 0.000000e+00 : f32
    %17 = vector.broadcast %cst_10 : f32 to vector<16x16xf32>
    %18 = vector.broadcast %cst_11 : f32 to vector<16x16xf32>
    %19 = arith.select %16, %17, %18 : vector<16x16xi1>, vector<16x16xf32>
    %c1 = arith.constant 1 : index
    %20 = memref.load %arg2[%c1] : memref<2xi32, #tpu.memory_space<smem>>
    %21 = vector.broadcast %20 : i32 to vector<16x16xi32>
    %22 = arith.cmpi sge, %10, %21 : vector<16x16xi32>
    %23 = arith.ori %12, %22 : vector<16x16xi1>
    %cst_12 = arith.constant -1.000000e+30 : f32
    %cst_13 = arith.constant 0.000000e+00 : f32
    %24 = vector.broadcast %cst_12 : f32 to vector<16x16xf32>
    %25 = vector.broadcast %cst_13 : f32 to vector<16x16xf32>
    %26 = arith.select %23, %24, %25 : vector<16x16xi1>, vector<16x16xf32>
    %c0_14 = arith.constant 0 : index
    %27 = memref.load %arg1[%c0_14] : memref<2xi32, #tpu.memory_space<smem>>
    %28 = vector.broadcast %27 : i32 to vector<16x8xi32>
    %29 = arith.cmpi sge, %11, %28 : vector<16x8xi32>
    %cst_15 = arith.constant -1.000000e+30 : f32
    %cst_16 = arith.constant 0.000000e+00 : f32
    %30 = vector.broadcast %cst_15 : f32 to vector<16x8xf32>
    %31 = vector.broadcast %cst_16 : f32 to vector<16x8xf32>
    %32 = arith.select %29, %30, %31 : vector<16x8xi1>, vector<16x8xf32>
    %c1_17 = arith.constant 1 : index
    %33 = memref.load %arg1[%c1_17] : memref<2xi32, #tpu.memory_space<smem>>
    %34 = vector.broadcast %33 : i32 to vector<16x8xi32>
    %35 = arith.cmpi sge, %11, %34 : vector<16x8xi32>
    %cst_18 = arith.constant -1.000000e+30 : f32
    %cst_19 = arith.constant 0.000000e+00 : f32
    %36 = vector.broadcast %cst_18 : f32 to vector<16x8xf32>
    %37 = vector.broadcast %cst_19 : f32 to vector<16x8xf32>
    %38 = arith.select %35, %36, %37 : vector<16x8xi1>, vector<16x8xf32>
    %c0_20 = arith.constant 0 : index
    %c0_21 = arith.constant 0 : index
    %c0_22 = arith.constant 0 : index
    %39 = vector.load %arg8[%c0_20, %c0_21, %c0_22] : memref<2x32x96xf32, #tpu.memory_space<vmem>>, vector<1x32x96xf32>
    %40 = vector.shape_cast %39 : vector<1x32x96xf32> to vector<32x96xf32>
    %cst_23 = arith.constant dense<0.000000e+00> : vector<32x96xf32>
    %41 = tpu.matmul %7, %40, %cst_23 {dimension_numbers = #tpu.dot_dimension_numbers<[1], [0], [0], [1], [0, 0, 1, 1], [], []>} : vector<32x32xf32>, vector<32x96xf32>, vector<32x96xf32> -> vector<32x96xf32>
    %c0_24 = arith.constant 0 : index
    %c0_25 = arith.constant 0 : index
    %c0_26 = arith.constant 0 : index
    %42 = vector.load %arg9[%c0_24, %c0_25, %c0_26] : memref<2x1x96xf32, #tpu.memory_space<vmem>>, vector<1x1x96xf32>
    %43 = vector.shape_cast %42 : vector<1x1x96xf32> to vector<1x96xf32>
    %44 = vector.broadcast %43 : vector<1x96xf32> to vector<32x96xf32>
    %45 = arith.addf %41, %44 : vector<32x96xf32>
    %46 = vector.extract_strided_slice %45 {offsets = [0, 0], sizes = [32, 32], strides = [1, 1]} : vector<32x96xf32> to vector<32x32xf32>
    %47 = vector.extract_strided_slice %45 {offsets = [0, 32], sizes = [32, 32], strides = [1, 1]} : vector<32x96xf32> to vector<32x32xf32>
    %48 = vector.extract_strided_slice %45 {offsets = [0, 64], sizes = [32, 32], strides = [1, 1]} : vector<32x96xf32> to vector<32x32xf32>
    %49 = vector.extract_strided_slice %46 {offsets = [0, 0], sizes = [16, 32], strides = [1, 1]} : vector<32x32xf32> to vector<16x32xf32>
    %50 = vector.extract_strided_slice %47 {offsets = [0, 0], sizes = [16, 32], strides = [1, 1]} : vector<32x32xf32> to vector<16x32xf32>
    %51 = vector.extract_strided_slice %48 {offsets = [0, 0], sizes = [16, 32], strides = [1, 1]} : vector<32x32xf32> to vector<16x32xf32>
    %52 = vector.extract_strided_slice %49 {offsets = [0, 0], sizes = [16, 8], strides = [1, 1]} : vector<16x32xf32> to vector<16x8xf32>
    %53 = vector.extract_strided_slice %50 {offsets = [0, 0], sizes = [16, 8], strides = [1, 1]} : vector<16x32xf32> to vector<16x8xf32>
    %54 = vector.extract_strided_slice %51 {offsets = [0, 0], sizes = [16, 8], strides = [1, 1]} : vector<16x32xf32> to vector<16x8xf32>
    %cst_27 = arith.constant dense<0.000000e+00> : vector<16x16xf32>
    %55 = tpu.matmul %52, %53, %cst_27 {dimension_numbers = #tpu.dot_dimension_numbers<[1], [1], [0], [0], [0, 0, 1, 0], [], []>} : vector<16x8xf32>, vector<16x8xf32>, vector<16x16xf32> -> vector<16x16xf32>
    %cst_28 = arith.constant 0.353553385 : f32
    %56 = vector.broadcast %cst_28 : f32 to vector<16x16xf32>
    %57 = arith.mulf %55, %56 : vector<16x16xf32>
    %58 = arith.addf %57, %19 : vector<16x16xf32>
    %cst_29 = arith.constant dense<0xFF800000> : vector<16xf32>
    %59 = vector.multi_reduction <maximumf>, %58, %cst_29 [1] : vector<16x16xf32> to vector<16xf32>
    %60 = vector.shape_cast %59 : vector<16xf32> to vector<16x1xf32>
    %61 = vector.broadcast %60 : vector<16x1xf32> to vector<16x16xf32>
    %62 = arith.subf %58, %61 : vector<16x16xf32>
    %63 = math.exp %62 : vector<16x16xf32>
    %cst_30 = arith.constant dense<0.000000e+00> : vector<16xf32>
    %64 = vector.multi_reduction <add>, %63, %cst_30 [1] : vector<16x16xf32> to vector<16xf32>
    %65 = vector.shape_cast %64 : vector<16xf32> to vector<16x1xf32>
    %66 = tpu.reciprocal %65 {approx = true} : vector<16x1xf32> -> vector<16x1xf32>
    %67 = vector.broadcast %66 : vector<16x1xf32> to vector<16x16xf32>
    %68 = arith.mulf %63, %67 : vector<16x16xf32>
    %cst_31 = arith.constant dense<0.000000e+00> : vector<16x8xf32>
    %69 = tpu.matmul %68, %54, %cst_31 {dimension_numbers = #tpu.dot_dimension_numbers<[1], [0], [0], [1], [0, 0, 1, 1], [], []>} : vector<16x16xf32>, vector<16x8xf32>, vector<16x8xf32> -> vector<16x8xf32>
    %70 = vector.extract_strided_slice %49 {offsets = [0, 8], sizes = [16, 8], strides = [1, 1]} : vector<16x32xf32> to vector<16x8xf32>
    %71 = vector.extract_strided_slice %50 {offsets = [0, 8], sizes = [16, 8], strides = [1, 1]} : vector<16x32xf32> to vector<16x8xf32>
    %72 = vector.extract_strided_slice %51 {offsets = [0, 8], sizes = [16, 8], strides = [1, 1]} : vector<16x32xf32> to vector<16x8xf32>
    %cst_32 = arith.constant dense<0.000000e+00> : vector<16x16xf32>
    %73 = tpu.matmul %70, %71, %cst_32 {dimension_numbers = #tpu.dot_dimension_numbers<[1], [1], [0], [0], [0, 0, 1, 0], [], []>} : vector<16x8xf32>, vector<16x8xf32>, vector<16x16xf32> -> vector<16x16xf32>
    %cst_33 = arith.constant 0.353553385 : f32
    %74 = vector.broadcast %cst_33 : f32 to vector<16x16xf32>
    %75 = arith.mulf %73, %74 : vector<16x16xf32>
    %76 = arith.addf %75, %19 : vector<16x16xf32>
    %cst_34 = arith.constant dense<0xFF800000> : vector<16xf32>
    %77 = vector.multi_reduction <maximumf>, %76, %cst_34 [1] : vector<16x16xf32> to vector<16xf32>
    %78 = vector.shape_cast %77 : vector<16xf32> to vector<16x1xf32>
    %79 = vector.broadcast %78 : vector<16x1xf32> to vector<16x16xf32>
    %80 = arith.subf %76, %79 : vector<16x16xf32>
    %81 = math.exp %80 : vector<16x16xf32>
    %cst_35 = arith.constant dense<0.000000e+00> : vector<16xf32>
    %82 = vector.multi_reduction <add>, %81, %cst_35 [1] : vector<16x16xf32> to vector<16xf32>
    %83 = vector.shape_cast %82 : vector<16xf32> to vector<16x1xf32>
    %84 = tpu.reciprocal %83 {approx = true} : vector<16x1xf32> -> vector<16x1xf32>
    %85 = vector.broadcast %84 : vector<16x1xf32> to vector<16x16xf32>
    %86 = arith.mulf %81, %85 : vector<16x16xf32>
    %cst_36 = arith.constant dense<0.000000e+00> : vector<16x8xf32>
    %87 = tpu.matmul %86, %72, %cst_36 {dimension_numbers = #tpu.dot_dimension_numbers<[1], [0], [0], [1], [0, 0, 1, 1], [], []>} : vector<16x16xf32>, vector<16x8xf32>, vector<16x8xf32> -> vector<16x8xf32>
    %88 = vector.extract_strided_slice %49 {offsets = [0, 16], sizes = [16, 8], strides = [1, 1]} : vector<16x32xf32> to vector<16x8xf32>
    %89 = vector.extract_strided_slice %50 {offsets = [0, 16], sizes = [16, 8], strides = [1, 1]} : vector<16x32xf32> to vector<16x8xf32>
    %90 = vector.extract_strided_slice %51 {offsets = [0, 16], sizes = [16, 8], strides = [1, 1]} : vector<16x32xf32> to vector<16x8xf32>
    %cst_37 = arith.constant dense<0.000000e+00> : vector<16x16xf32>
    %91 = tpu.matmul %88, %89, %cst_37 {dimension_numbers = #tpu.dot_dimension_numbers<[1], [1], [0], [0], [0, 0, 1, 0], [], []>} : vector<16x8xf32>, vector<16x8xf32>, vector<16x16xf32> -> vector<16x16xf32>
    %cst_38 = arith.constant 0.353553385 : f32
    %92 = vector.broadcast %cst_38 : f32 to vector<16x16xf32>
    %93 = arith.mulf %91, %92 : vector<16x16xf32>
    %94 = arith.addf %93, %19 : vector<16x16xf32>
    %cst_39 = arith.constant dense<0xFF800000> : vector<16xf32>
    %95 = vector.multi_reduction <maximumf>, %94, %cst_39 [1] : vector<16x16xf32> to vector<16xf32>
    %96 = vector.shape_cast %95 : vector<16xf32> to vector<16x1xf32>
    %97 = vector.broadcast %96 : vector<16x1xf32> to vector<16x16xf32>
    %98 = arith.subf %94, %97 : vector<16x16xf32>
    %99 = math.exp %98 : vector<16x16xf32>
    %cst_40 = arith.constant dense<0.000000e+00> : vector<16xf32>
    %100 = vector.multi_reduction <add>, %99, %cst_40 [1] : vector<16x16xf32> to vector<16xf32>
    %101 = vector.shape_cast %100 : vector<16xf32> to vector<16x1xf32>
    %102 = tpu.reciprocal %101 {approx = true} : vector<16x1xf32> -> vector<16x1xf32>
    %103 = vector.broadcast %102 : vector<16x1xf32> to vector<16x16xf32>
    %104 = arith.mulf %99, %103 : vector<16x16xf32>
    %cst_41 = arith.constant dense<0.000000e+00> : vector<16x8xf32>
    %105 = tpu.matmul %104, %90, %cst_41 {dimension_numbers = #tpu.dot_dimension_numbers<[1], [0], [0], [1], [0, 0, 1, 1], [], []>} : vector<16x16xf32>, vector<16x8xf32>, vector<16x8xf32> -> vector<16x8xf32>
    %106 = vector.extract_strided_slice %49 {offsets = [0, 24], sizes = [16, 8], strides = [1, 1]} : vector<16x32xf32> to vector<16x8xf32>
    %107 = vector.extract_strided_slice %50 {offsets = [0, 24], sizes = [16, 8], strides = [1, 1]} : vector<16x32xf32> to vector<16x8xf32>
    %108 = vector.extract_strided_slice %51 {offsets = [0, 24], sizes = [16, 8], strides = [1, 1]} : vector<16x32xf32> to vector<16x8xf32>
    %cst_42 = arith.constant dense<0.000000e+00> : vector<16x16xf32>
    %109 = tpu.matmul %106, %107, %cst_42 {dimension_numbers = #tpu.dot_dimension_numbers<[1], [1], [0], [0], [0, 0, 1, 0], [], []>} : vector<16x8xf32>, vector<16x8xf32>, vector<16x16xf32> -> vector<16x16xf32>
    %cst_43 = arith.constant 0.353553385 : f32
    %110 = vector.broadcast %cst_43 : f32 to vector<16x16xf32>
    %111 = arith.mulf %109, %110 : vector<16x16xf32>
    %112 = arith.addf %111, %19 : vector<16x16xf32>
    %cst_44 = arith.constant dense<0xFF800000> : vector<16xf32>
    %113 = vector.multi_reduction <maximumf>, %112, %cst_44 [1] : vector<16x16xf32> to vector<16xf32>
    %114 = vector.shape_cast %113 : vector<16xf32> to vector<16x1xf32>
    %115 = vector.broadcast %114 : vector<16x1xf32> to vector<16x16xf32>
    %116 = arith.subf %112, %115 : vector<16x16xf32>
    %117 = math.exp %116 : vector<16x16xf32>
    %cst_45 = arith.constant dense<0.000000e+00> : vector<16xf32>
    %118 = vector.multi_reduction <add>, %117, %cst_45 [1] : vector<16x16xf32> to vector<16xf32>
    %119 = vector.shape_cast %118 : vector<16xf32> to vector<16x1xf32>
    %120 = tpu.reciprocal %119 {approx = true} : vector<16x1xf32> -> vector<16x1xf32>
    %121 = vector.broadcast %120 : vector<16x1xf32> to vector<16x16xf32>
    %122 = arith.mulf %117, %121 : vector<16x16xf32>
    %cst_46 = arith.constant dense<0.000000e+00> : vector<16x8xf32>
    %123 = tpu.matmul %122, %108, %cst_46 {dimension_numbers = #tpu.dot_dimension_numbers<[1], [0], [0], [1], [0, 0, 1, 1], [], []>} : vector<16x16xf32>, vector<16x8xf32>, vector<16x8xf32> -> vector<16x8xf32>
    %124 = tpu.concatenate %69, %87, %105, %123 in 1 : vector<16x8xf32>, vector<16x8xf32>, vector<16x8xf32>, vector<16x8xf32> -> vector<16x32xf32>
    %125 = vector.extract_strided_slice %46 {offsets = [16, 0], sizes = [16, 32], strides = [1, 1]} : vector<32x32xf32> to vector<16x32xf32>
    %126 = vector.extract_strided_slice %47 {offsets = [16, 0], sizes = [16, 32], strides = [1, 1]} : vector<32x32xf32> to vector<16x32xf32>
    %127 = vector.extract_strided_slice %48 {offsets = [16, 0], sizes = [16, 32], strides = [1, 1]} : vector<32x32xf32> to vector<16x32xf32>
    %128 = vector.extract_strided_slice %125 {offsets = [0, 0], sizes = [16, 8], strides = [1, 1]} : vector<16x32xf32> to vector<16x8xf32>
    %129 = vector.extract_strided_slice %126 {offsets = [0, 0], sizes = [16, 8], strides = [1, 1]} : vector<16x32xf32> to vector<16x8xf32>
    %130 = vector.extract_strided_slice %127 {offsets = [0, 0], sizes = [16, 8], strides = [1, 1]} : vector<16x32xf32> to vector<16x8xf32>
    %cst_47 = arith.constant dense<0.000000e+00> : vector<16x16xf32>
    %131 = tpu.matmul %128, %129, %cst_47 {dimension_numbers = #tpu.dot_dimension_numbers<[1], [1], [0], [0], [0, 0, 1, 0], [], []>} : vector<16x8xf32>, vector<16x8xf32>, vector<16x16xf32> -> vector<16x16xf32>
    %cst_48 = arith.constant 0.353553385 : f32
    %132 = vector.broadcast %cst_48 : f32 to vector<16x16xf32>
    %133 = arith.mulf %131, %132 : vector<16x16xf32>
    %134 = arith.addf %133, %26 : vector<16x16xf32>
    %cst_49 = arith.constant dense<0xFF800000> : vector<16xf32>
    %135 = vector.multi_reduction <maximumf>, %134, %cst_49 [1] : vector<16x16xf32> to vector<16xf32>
    %136 = vector.shape_cast %135 : vector<16xf32> to vector<16x1xf32>
    %137 = vector.broadcast %136 : vector<16x1xf32> to vector<16x16xf32>
    %138 = arith.subf %134, %137 : vector<16x16xf32>
    %139 = math.exp %138 : vector<16x16xf32>
    %cst_50 = arith.constant dense<0.000000e+00> : vector<16xf32>
    %140 = vector.multi_reduction <add>, %139, %cst_50 [1] : vector<16x16xf32> to vector<16xf32>
    %141 = vector.shape_cast %140 : vector<16xf32> to vector<16x1xf32>
    %142 = tpu.reciprocal %141 {approx = true} : vector<16x1xf32> -> vector<16x1xf32>
    %143 = vector.broadcast %142 : vector<16x1xf32> to vector<16x16xf32>
    %144 = arith.mulf %139, %143 : vector<16x16xf32>
    %cst_51 = arith.constant dense<0.000000e+00> : vector<16x8xf32>
    %145 = tpu.matmul %144, %130, %cst_51 {dimension_numbers = #tpu.dot_dimension_numbers<[1], [0], [0], [1], [0, 0, 1, 1], [], []>} : vector<16x16xf32>, vector<16x8xf32>, vector<16x8xf32> -> vector<16x8xf32>
    %146 = vector.extract_strided_slice %125 {offsets = [0, 8], sizes = [16, 8], strides = [1, 1]} : vector<16x32xf32> to vector<16x8xf32>
    %147 = vector.extract_strided_slice %126 {offsets = [0, 8], sizes = [16, 8], strides = [1, 1]} : vector<16x32xf32> to vector<16x8xf32>
    %148 = vector.extract_strided_slice %127 {offsets = [0, 8], sizes = [16, 8], strides = [1, 1]} : vector<16x32xf32> to vector<16x8xf32>
    %cst_52 = arith.constant dense<0.000000e+00> : vector<16x16xf32>
    %149 = tpu.matmul %146, %147, %cst_52 {dimension_numbers = #tpu.dot_dimension_numbers<[1], [1], [0], [0], [0, 0, 1, 0], [], []>} : vector<16x8xf32>, vector<16x8xf32>, vector<16x16xf32> -> vector<16x16xf32>
    %cst_53 = arith.constant 0.353553385 : f32
    %150 = vector.broadcast %cst_53 : f32 to vector<16x16xf32>
    %151 = arith.mulf %149, %150 : vector<16x16xf32>
    %152 = arith.addf %151, %26 : vector<16x16xf32>
    %cst_54 = arith.constant dense<0xFF800000> : vector<16xf32>
    %153 = vector.multi_reduction <maximumf>, %152, %cst_54 [1] : vector<16x16xf32> to vector<16xf32>
    %154 = vector.shape_cast %153 : vector<16xf32> to vector<16x1xf32>
    %155 = vector.broadcast %154 : vector<16x1xf32> to vector<16x16xf32>
    %156 = arith.subf %152, %155 : vector<16x16xf32>
    %157 = math.exp %156 : vector<16x16xf32>
    %cst_55 = arith.constant dense<0.000000e+00> : vector<16xf32>
    %158 = vector.multi_reduction <add>, %157, %cst_55 [1] : vector<16x16xf32> to vector<16xf32>
    %159 = vector.shape_cast %158 : vector<16xf32> to vector<16x1xf32>
    %160 = tpu.reciprocal %159 {approx = true} : vector<16x1xf32> -> vector<16x1xf32>
    %161 = vector.broadcast %160 : vector<16x1xf32> to vector<16x16xf32>
    %162 = arith.mulf %157, %161 : vector<16x16xf32>
    %cst_56 = arith.constant dense<0.000000e+00> : vector<16x8xf32>
    %163 = tpu.matmul %162, %148, %cst_56 {dimension_numbers = #tpu.dot_dimension_numbers<[1], [0], [0], [1], [0, 0, 1, 1], [], []>} : vector<16x16xf32>, vector<16x8xf32>, vector<16x8xf32> -> vector<16x8xf32>
    %164 = vector.extract_strided_slice %125 {offsets = [0, 16], sizes = [16, 8], strides = [1, 1]} : vector<16x32xf32> to vector<16x8xf32>
    %165 = vector.extract_strided_slice %126 {offsets = [0, 16], sizes = [16, 8], strides = [1, 1]} : vector<16x32xf32> to vector<16x8xf32>
    %166 = vector.extract_strided_slice %127 {offsets = [0, 16], sizes = [16, 8], strides = [1, 1]} : vector<16x32xf32> to vector<16x8xf32>
    %cst_57 = arith.constant dense<0.000000e+00> : vector<16x16xf32>
    %167 = tpu.matmul %164, %165, %cst_57 {dimension_numbers = #tpu.dot_dimension_numbers<[1], [1], [0], [0], [0, 0, 1, 0], [], []>} : vector<16x8xf32>, vector<16x8xf32>, vector<16x16xf32> -> vector<16x16xf32>
    %cst_58 = arith.constant 0.353553385 : f32
    %168 = vector.broadcast %cst_58 : f32 to vector<16x16xf32>
    %169 = arith.mulf %167, %168 : vector<16x16xf32>
    %170 = arith.addf %169, %26 : vector<16x16xf32>
    %cst_59 = arith.constant dense<0xFF800000> : vector<16xf32>
    %171 = vector.multi_reduction <maximumf>, %170, %cst_59 [1] : vector<16x16xf32> to vector<16xf32>
    %172 = vector.shape_cast %171 : vector<16xf32> to vector<16x1xf32>
    %173 = vector.broadcast %172 : vector<16x1xf32> to vector<16x16xf32>
    %174 = arith.subf %170, %173 : vector<16x16xf32>
    %175 = math.exp %174 : vector<16x16xf32>
    %cst_60 = arith.constant dense<0.000000e+00> : vector<16xf32>
    %176 = vector.multi_reduction <add>, %175, %cst_60 [1] : vector<16x16xf32> to vector<16xf32>
    %177 = vector.shape_cast %176 : vector<16xf32> to vector<16x1xf32>
    %178 = tpu.reciprocal %177 {approx = true} : vector<16x1xf32> -> vector<16x1xf32>
    %179 = vector.broadcast %178 : vector<16x1xf32> to vector<16x16xf32>
    %180 = arith.mulf %175, %179 : vector<16x16xf32>
    %cst_61 = arith.constant dense<0.000000e+00> : vector<16x8xf32>
    %181 = tpu.matmul %180, %166, %cst_61 {dimension_numbers = #tpu.dot_dimension_numbers<[1], [0], [0], [1], [0, 0, 1, 1], [], []>} : vector<16x16xf32>, vector<16x8xf32>, vector<16x8xf32> -> vector<16x8xf32>
    %182 = vector.extract_strided_slice %125 {offsets = [0, 24], sizes = [16, 8], strides = [1, 1]} : vector<16x32xf32> to vector<16x8xf32>
    %183 = vector.extract_strided_slice %126 {offsets = [0, 24], sizes = [16, 8], strides = [1, 1]} : vector<16x32xf32> to vector<16x8xf32>
    %184 = vector.extract_strided_slice %127 {offsets = [0, 24], sizes = [16, 8], strides = [1, 1]} : vector<16x32xf32> to vector<16x8xf32>
    %cst_62 = arith.constant dense<0.000000e+00> : vector<16x16xf32>
    %185 = tpu.matmul %182, %183, %cst_62 {dimension_numbers = #tpu.dot_dimension_numbers<[1], [1], [0], [0], [0, 0, 1, 0], [], []>} : vector<16x8xf32>, vector<16x8xf32>, vector<16x16xf32> -> vector<16x16xf32>
    %cst_63 = arith.constant 0.353553385 : f32
    %186 = vector.broadcast %cst_63 : f32 to vector<16x16xf32>
    %187 = arith.mulf %185, %186 : vector<16x16xf32>
    %188 = arith.addf %187, %26 : vector<16x16xf32>
    %cst_64 = arith.constant dense<0xFF800000> : vector<16xf32>
    %189 = vector.multi_reduction <maximumf>, %188, %cst_64 [1] : vector<16x16xf32> to vector<16xf32>
    %190 = vector.shape_cast %189 : vector<16xf32> to vector<16x1xf32>
    %191 = vector.broadcast %190 : vector<16x1xf32> to vector<16x16xf32>
    %192 = arith.subf %188, %191 : vector<16x16xf32>
    %193 = math.exp %192 : vector<16x16xf32>
    %cst_65 = arith.constant dense<0.000000e+00> : vector<16xf32>
    %194 = vector.multi_reduction <add>, %193, %cst_65 [1] : vector<16x16xf32> to vector<16xf32>
    %195 = vector.shape_cast %194 : vector<16xf32> to vector<16x1xf32>
    %196 = tpu.reciprocal %195 {approx = true} : vector<16x1xf32> -> vector<16x1xf32>
    %197 = vector.broadcast %196 : vector<16x1xf32> to vector<16x16xf32>
    %198 = arith.mulf %193, %197 : vector<16x16xf32>
    %cst_66 = arith.constant dense<0.000000e+00> : vector<16x8xf32>
    %199 = tpu.matmul %198, %184, %cst_66 {dimension_numbers = #tpu.dot_dimension_numbers<[1], [0], [0], [1], [0, 0, 1, 1], [], []>} : vector<16x16xf32>, vector<16x8xf32>, vector<16x8xf32> -> vector<16x8xf32>
    %200 = tpu.concatenate %145, %163, %181, %199 in 1 : vector<16x8xf32>, vector<16x8xf32>, vector<16x8xf32>, vector<16x8xf32> -> vector<16x32xf32>
    %201 = tpu.concatenate %124, %200 in 0 : vector<16x32xf32>, vector<16x32xf32> -> vector<32x32xf32>
    %c0_67 = arith.constant 0 : index
    %c0_68 = arith.constant 0 : index
    %c0_69 = arith.constant 0 : index
    %202 = vector.load %arg10[%c0_67, %c0_68, %c0_69] : memref<2x32x32xf32, #tpu.memory_space<vmem>>, vector<1x32x32xf32>
    %203 = vector.shape_cast %202 : vector<1x32x32xf32> to vector<32x32xf32>
    %cst_70 = arith.constant dense<0.000000e+00> : vector<32x32xf32>
    %204 = tpu.matmul %201, %203, %cst_70 {dimension_numbers = #tpu.dot_dimension_numbers<[1], [0], [0], [1], [0, 0, 1, 1], [], []>} : vector<32x32xf32>, vector<32x32xf32>, vector<32x32xf32> -> vector<32x32xf32>
    %c0_71 = arith.constant 0 : index
    %c0_72 = arith.constant 0 : index
    %c0_73 = arith.constant 0 : index
    %205 = vector.load %arg11[%c0_71, %c0_72, %c0_73] : memref<2x1x32xf32, #tpu.memory_space<vmem>>, vector<1x1x32xf32>
    %206 = vector.shape_cast %205 : vector<1x1x32xf32> to vector<1x32xf32>
    %207 = vector.broadcast %206 : vector<1x32xf32> to vector<32x32xf32>
    %208 = arith.addf %204, %207 : vector<32x32xf32>
    %209 = arith.addf %7, %208 : vector<32x32xf32>
    %c0_74 = arith.constant 0 : index
    %c0_75 = arith.constant 0 : index
    %c0_76 = arith.constant 0 : index
    %210 = vector.load %arg22[%c0_74, %c0_75, %c0_76] : memref<2x1x32xf32, #tpu.memory_space<vmem>>, vector<1x1x32xf32>
    %211 = vector.shape_cast %210 : vector<1x1x32xf32> to vector<1x32xf32>
    %c0_77 = arith.constant 0 : index
    %c0_78 = arith.constant 0 : index
    %c0_79 = arith.constant 0 : index
    %212 = vector.load %arg23[%c0_77, %c0_78, %c0_79] : memref<2x1x32xf32, #tpu.memory_space<vmem>>, vector<1x1x32xf32>
    %213 = vector.shape_cast %212 : vector<1x1x32xf32> to vector<1x32xf32>
    %cst_80 = arith.constant dense<0.000000e+00> : vector<32xf32>
    %214 = vector.multi_reduction <add>, %209, %cst_80 [1] : vector<32x32xf32> to vector<32xf32>
    %215 = vector.shape_cast %214 : vector<32xf32> to vector<32x1xf32>
    %cst_81 = arith.constant 3.200000e+01 : f32
    %216 = vector.broadcast %cst_81 : f32 to vector<32x1xf32>
    %217 = arith.divf %215, %216 : vector<32x1xf32>
    %218 = vector.broadcast %217 : vector<32x1xf32> to vector<32x32xf32>
    %219 = arith.subf %209, %218 : vector<32x32xf32>
    %220 = arith.mulf %219, %219 : vector<32x32xf32>
    %cst_82 = arith.constant dense<0.000000e+00> : vector<32xf32>
    %221 = vector.multi_reduction <add>, %220, %cst_82 [1] : vector<32x32xf32> to vector<32xf32>
    %222 = vector.shape_cast %221 : vector<32xf32> to vector<32x1xf32>
    %cst_83 = arith.constant 3.200000e+01 : f32
    %223 = vector.broadcast %cst_83 : f32 to vector<32x1xf32>
    %224 = arith.divf %222, %223 : vector<32x1xf32>
    %cst_84 = arith.constant 9.99999974E-6 : f32
    %225 = vector.broadcast %cst_84 : f32 to vector<32x1xf32>
    %226 = arith.addf %224, %225 : vector<32x1xf32>
    %227 = math.rsqrt %226 : vector<32x1xf32>
    %228 = vector.broadcast %227 : vector<32x1xf32> to vector<32x32xf32>
    %229 = arith.mulf %219, %228 : vector<32x32xf32>
    %230 = vector.broadcast %211 : vector<1x32xf32> to vector<32x32xf32>
    %231 = arith.mulf %229, %230 : vector<32x32xf32>
    %232 = vector.broadcast %213 : vector<1x32xf32> to vector<32x32xf32>
    %233 = arith.addf %231, %232 : vector<32x32xf32>
    %c0_85 = arith.constant 0 : index
    %c0_86 = arith.constant 0 : index
    %c0_87 = arith.constant 0 : index
    %234 = vector.load %arg12[%c0_85, %c0_86, %c0_87] : memref<2x32x32xf32, #tpu.memory_space<vmem>>, vector<1x32x32xf32>
    %235 = vector.shape_cast %234 : vector<1x32x32xf32> to vector<32x32xf32>
    %cst_88 = arith.constant dense<0.000000e+00> : vector<32x32xf32>
    %236 = tpu.matmul %233, %235, %cst_88 {dimension_numbers = #tpu.dot_dimension_numbers<[1], [0], [0], [1], [0, 0, 1, 1], [], []>} : vector<32x32xf32>, vector<32x32xf32>, vector<32x32xf32> -> vector<32x32xf32>
    %c0_89 = arith.constant 0 : index
    %c0_90 = arith.constant 0 : index
    %c0_91 = arith.constant 0 : index
    %237 = vector.load %arg13[%c0_89, %c0_90, %c0_91] : memref<2x1x32xf32, #tpu.memory_space<vmem>>, vector<1x1x32xf32>
    %238 = vector.shape_cast %237 : vector<1x1x32xf32> to vector<1x32xf32>
    %239 = vector.broadcast %238 : vector<1x32xf32> to vector<32x32xf32>
    %240 = arith.addf %236, %239 : vector<32x32xf32>
    %c0_92 = arith.constant 0 : index
    %c0_93 = arith.constant 0 : index
    %c0_94 = arith.constant 0 : index
    %241 = vector.load %arg14[%c0_92, %c0_93, %c0_94] : memref<2x32x64xf32, #tpu.memory_space<vmem>>, vector<1x32x64xf32>
    %242 = vector.shape_cast %241 : vector<1x32x64xf32> to vector<32x64xf32>
    %cst_95 = arith.constant dense<0.000000e+00> : vector<16x64xf32>
    %243 = tpu.matmul %8, %242, %cst_95 {dimension_numbers = #tpu.dot_dimension_numbers<[1], [0], [0], [1], [0, 0, 1, 1], [], []>} : vector<16x32xf32>, vector<32x64xf32>, vector<16x64xf32> -> vector<16x64xf32>
    %c0_96 = arith.constant 0 : index
    %c0_97 = arith.constant 0 : index
    %c0_98 = arith.constant 0 : index
    %244 = vector.load %arg15[%c0_96, %c0_97, %c0_98] : memref<2x1x64xf32, #tpu.memory_space<vmem>>, vector<1x1x64xf32>
    %245 = vector.shape_cast %244 : vector<1x1x64xf32> to vector<1x64xf32>
    %246 = vector.broadcast %245 : vector<1x64xf32> to vector<16x64xf32>
    %247 = arith.addf %243, %246 : vector<16x64xf32>
    %248 = vector.extract_strided_slice %247 {offsets = [0, 0], sizes = [16, 32], strides = [1, 1]} : vector<16x64xf32> to vector<16x32xf32>
    %249 = vector.extract_strided_slice %247 {offsets = [0, 32], sizes = [16, 32], strides = [1, 1]} : vector<16x64xf32> to vector<16x32xf32>
    %250 = vector.extract_strided_slice %240 {offsets = [0, 0], sizes = [16, 32], strides = [1, 1]} : vector<32x32xf32> to vector<16x32xf32>
    %251 = vector.extract_strided_slice %248 {offsets = [0, 0], sizes = [8, 32], strides = [1, 1]} : vector<16x32xf32> to vector<8x32xf32>
    %252 = vector.extract_strided_slice %249 {offsets = [0, 0], sizes = [8, 32], strides = [1, 1]} : vector<16x32xf32> to vector<8x32xf32>
    %253 = vector.extract_strided_slice %250 {offsets = [0, 0], sizes = [16, 8], strides = [1, 1]} : vector<16x32xf32> to vector<16x8xf32>
    %254 = vector.extract_strided_slice %251 {offsets = [0, 0], sizes = [8, 8], strides = [1, 1]} : vector<8x32xf32> to vector<8x8xf32>
    %255 = vector.extract_strided_slice %252 {offsets = [0, 0], sizes = [8, 8], strides = [1, 1]} : vector<8x32xf32> to vector<8x8xf32>
    %cst_99 = arith.constant dense<0.000000e+00> : vector<16x8xf32>
    %256 = tpu.matmul %253, %254, %cst_99 {dimension_numbers = #tpu.dot_dimension_numbers<[1], [1], [0], [0], [0, 0, 1, 0], [], []>} : vector<16x8xf32>, vector<8x8xf32>, vector<16x8xf32> -> vector<16x8xf32>
    %cst_100 = arith.constant 0.353553385 : f32
    %257 = vector.broadcast %cst_100 : f32 to vector<16x8xf32>
    %258 = arith.mulf %256, %257 : vector<16x8xf32>
    %259 = arith.addf %258, %32 : vector<16x8xf32>
    %cst_101 = arith.constant dense<0xFF800000> : vector<16xf32>
    %260 = vector.multi_reduction <maximumf>, %259, %cst_101 [1] : vector<16x8xf32> to vector<16xf32>
    %261 = vector.shape_cast %260 : vector<16xf32> to vector<16x1xf32>
    %262 = vector.broadcast %261 : vector<16x1xf32> to vector<16x8xf32>
    %263 = arith.subf %259, %262 : vector<16x8xf32>
    %264 = math.exp %263 : vector<16x8xf32>
    %cst_102 = arith.constant dense<0.000000e+00> : vector<16xf32>
    %265 = vector.multi_reduction <add>, %264, %cst_102 [1] : vector<16x8xf32> to vector<16xf32>
    %266 = vector.shape_cast %265 : vector<16xf32> to vector<16x1xf32>
    %267 = tpu.reciprocal %266 {approx = true} : vector<16x1xf32> -> vector<16x1xf32>
    %268 = vector.broadcast %267 : vector<16x1xf32> to vector<16x8xf32>
    %269 = arith.mulf %264, %268 : vector<16x8xf32>
    %cst_103 = arith.constant dense<0.000000e+00> : vector<16x8xf32>
    %270 = tpu.matmul %269, %255, %cst_103 {dimension_numbers = #tpu.dot_dimension_numbers<[1], [0], [0], [1], [0, 0, 1, 1], [], []>} : vector<16x8xf32>, vector<8x8xf32>, vector<16x8xf32> -> vector<16x8xf32>
    %271 = vector.extract_strided_slice %250 {offsets = [0, 8], sizes = [16, 8], strides = [1, 1]} : vector<16x32xf32> to vector<16x8xf32>
    %272 = vector.extract_strided_slice %251 {offsets = [0, 8], sizes = [8, 8], strides = [1, 1]} : vector<8x32xf32> to vector<8x8xf32>
    %273 = vector.extract_strided_slice %252 {offsets = [0, 8], sizes = [8, 8], strides = [1, 1]} : vector<8x32xf32> to vector<8x8xf32>
    %cst_104 = arith.constant dense<0.000000e+00> : vector<16x8xf32>
    %274 = tpu.matmul %271, %272, %cst_104 {dimension_numbers = #tpu.dot_dimension_numbers<[1], [1], [0], [0], [0, 0, 1, 0], [], []>} : vector<16x8xf32>, vector<8x8xf32>, vector<16x8xf32> -> vector<16x8xf32>
    %cst_105 = arith.constant 0.353553385 : f32
    %275 = vector.broadcast %cst_105 : f32 to vector<16x8xf32>
    %276 = arith.mulf %274, %275 : vector<16x8xf32>
    %277 = arith.addf %276, %32 : vector<16x8xf32>
    %cst_106 = arith.constant dense<0xFF800000> : vector<16xf32>
    %278 = vector.multi_reduction <maximumf>, %277, %cst_106 [1] : vector<16x8xf32> to vector<16xf32>
    %279 = vector.shape_cast %278 : vector<16xf32> to vector<16x1xf32>
    %280 = vector.broadcast %279 : vector<16x1xf32> to vector<16x8xf32>
    %281 = arith.subf %277, %280 : vector<16x8xf32>
    %282 = math.exp %281 : vector<16x8xf32>
    %cst_107 = arith.constant dense<0.000000e+00> : vector<16xf32>
    %283 = vector.multi_reduction <add>, %282, %cst_107 [1] : vector<16x8xf32> to vector<16xf32>
    %284 = vector.shape_cast %283 : vector<16xf32> to vector<16x1xf32>
    %285 = tpu.reciprocal %284 {approx = true} : vector<16x1xf32> -> vector<16x1xf32>
    %286 = vector.broadcast %285 : vector<16x1xf32> to vector<16x8xf32>
    %287 = arith.mulf %282, %286 : vector<16x8xf32>
    %cst_108 = arith.constant dense<0.000000e+00> : vector<16x8xf32>
    %288 = tpu.matmul %287, %273, %cst_108 {dimension_numbers = #tpu.dot_dimension_numbers<[1], [0], [0], [1], [0, 0, 1, 1], [], []>} : vector<16x8xf32>, vector<8x8xf32>, vector<16x8xf32> -> vector<16x8xf32>
    %289 = vector.extract_strided_slice %250 {offsets = [0, 16], sizes = [16, 8], strides = [1, 1]} : vector<16x32xf32> to vector<16x8xf32>
    %290 = vector.extract_strided_slice %251 {offsets = [0, 16], sizes = [8, 8], strides = [1, 1]} : vector<8x32xf32> to vector<8x8xf32>
    %291 = vector.extract_strided_slice %252 {offsets = [0, 16], sizes = [8, 8], strides = [1, 1]} : vector<8x32xf32> to vector<8x8xf32>
    %cst_109 = arith.constant dense<0.000000e+00> : vector<16x8xf32>
    %292 = tpu.matmul %289, %290, %cst_109 {dimension_numbers = #tpu.dot_dimension_numbers<[1], [1], [0], [0], [0, 0, 1, 0], [], []>} : vector<16x8xf32>, vector<8x8xf32>, vector<16x8xf32> -> vector<16x8xf32>
    %cst_110 = arith.constant 0.353553385 : f32
    %293 = vector.broadcast %cst_110 : f32 to vector<16x8xf32>
    %294 = arith.mulf %292, %293 : vector<16x8xf32>
    %295 = arith.addf %294, %32 : vector<16x8xf32>
    %cst_111 = arith.constant dense<0xFF800000> : vector<16xf32>
    %296 = vector.multi_reduction <maximumf>, %295, %cst_111 [1] : vector<16x8xf32> to vector<16xf32>
    %297 = vector.shape_cast %296 : vector<16xf32> to vector<16x1xf32>
    %298 = vector.broadcast %297 : vector<16x1xf32> to vector<16x8xf32>
    %299 = arith.subf %295, %298 : vector<16x8xf32>
    %300 = math.exp %299 : vector<16x8xf32>
    %cst_112 = arith.constant dense<0.000000e+00> : vector<16xf32>
    %301 = vector.multi_reduction <add>, %300, %cst_112 [1] : vector<16x8xf32> to vector<16xf32>
    %302 = vector.shape_cast %301 : vector<16xf32> to vector<16x1xf32>
    %303 = tpu.reciprocal %302 {approx = true} : vector<16x1xf32> -> vector<16x1xf32>
    %304 = vector.broadcast %303 : vector<16x1xf32> to vector<16x8xf32>
    %305 = arith.mulf %300, %304 : vector<16x8xf32>
    %cst_113 = arith.constant dense<0.000000e+00> : vector<16x8xf32>
    %306 = tpu.matmul %305, %291, %cst_113 {dimension_numbers = #tpu.dot_dimension_numbers<[1], [0], [0], [1], [0, 0, 1, 1], [], []>} : vector<16x8xf32>, vector<8x8xf32>, vector<16x8xf32> -> vector<16x8xf32>
    %307 = vector.extract_strided_slice %250 {offsets = [0, 24], sizes = [16, 8], strides = [1, 1]} : vector<16x32xf32> to vector<16x8xf32>
    %308 = vector.extract_strided_slice %251 {offsets = [0, 24], sizes = [8, 8], strides = [1, 1]} : vector<8x32xf32> to vector<8x8xf32>
    %309 = vector.extract_strided_slice %252 {offsets = [0, 24], sizes = [8, 8], strides = [1, 1]} : vector<8x32xf32> to vector<8x8xf32>
    %cst_114 = arith.constant dense<0.000000e+00> : vector<16x8xf32>
    %310 = tpu.matmul %307, %308, %cst_114 {dimension_numbers = #tpu.dot_dimension_numbers<[1], [1], [0], [0], [0, 0, 1, 0], [], []>} : vector<16x8xf32>, vector<8x8xf32>, vector<16x8xf32> -> vector<16x8xf32>
    %cst_115 = arith.constant 0.353553385 : f32
    %311 = vector.broadcast %cst_115 : f32 to vector<16x8xf32>
    %312 = arith.mulf %310, %311 : vector<16x8xf32>
    %313 = arith.addf %312, %32 : vector<16x8xf32>
    %cst_116 = arith.constant dense<0xFF800000> : vector<16xf32>
    %314 = vector.multi_reduction <maximumf>, %313, %cst_116 [1] : vector<16x8xf32> to vector<16xf32>
    %315 = vector.shape_cast %314 : vector<16xf32> to vector<16x1xf32>
    %316 = vector.broadcast %315 : vector<16x1xf32> to vector<16x8xf32>
    %317 = arith.subf %313, %316 : vector<16x8xf32>
    %318 = math.exp %317 : vector<16x8xf32>
    %cst_117 = arith.constant dense<0.000000e+00> : vector<16xf32>
    %319 = vector.multi_reduction <add>, %318, %cst_117 [1] : vector<16x8xf32> to vector<16xf32>
    %320 = vector.shape_cast %319 : vector<16xf32> to vector<16x1xf32>
    %321 = tpu.reciprocal %320 {approx = true} : vector<16x1xf32> -> vector<16x1xf32>
    %322 = vector.broadcast %321 : vector<16x1xf32> to vector<16x8xf32>
    %323 = arith.mulf %318, %322 : vector<16x8xf32>
    %cst_118 = arith.constant dense<0.000000e+00> : vector<16x8xf32>
    %324 = tpu.matmul %323, %309, %cst_118 {dimension_numbers = #tpu.dot_dimension_numbers<[1], [0], [0], [1], [0, 0, 1, 1], [], []>} : vector<16x8xf32>, vector<8x8xf32>, vector<16x8xf32> -> vector<16x8xf32>
    %325 = tpu.concatenate %270, %288, %306, %324 in 1 : vector<16x8xf32>, vector<16x8xf32>, vector<16x8xf32>, vector<16x8xf32> -> vector<16x32xf32>
    %326 = vector.extract_strided_slice %240 {offsets = [16, 0], sizes = [16, 32], strides = [1, 1]} : vector<32x32xf32> to vector<16x32xf32>
    %327 = vector.extract_strided_slice %248 {offsets = [8, 0], sizes = [8, 32], strides = [1, 1]} : vector<16x32xf32> to vector<8x32xf32>
    %328 = vector.extract_strided_slice %249 {offsets = [8, 0], sizes = [8, 32], strides = [1, 1]} : vector<16x32xf32> to vector<8x32xf32>
    %329 = vector.extract_strided_slice %326 {offsets = [0, 0], sizes = [16, 8], strides = [1, 1]} : vector<16x32xf32> to vector<16x8xf32>
    %330 = vector.extract_strided_slice %327 {offsets = [0, 0], sizes = [8, 8], strides = [1, 1]} : vector<8x32xf32> to vector<8x8xf32>
    %331 = vector.extract_strided_slice %328 {offsets = [0, 0], sizes = [8, 8], strides = [1, 1]} : vector<8x32xf32> to vector<8x8xf32>
    %cst_119 = arith.constant dense<0.000000e+00> : vector<16x8xf32>
    %332 = tpu.matmul %329, %330, %cst_119 {dimension_numbers = #tpu.dot_dimension_numbers<[1], [1], [0], [0], [0, 0, 1, 0], [], []>} : vector<16x8xf32>, vector<8x8xf32>, vector<16x8xf32> -> vector<16x8xf32>
    %cst_120 = arith.constant 0.353553385 : f32
    %333 = vector.broadcast %cst_120 : f32 to vector<16x8xf32>
    %334 = arith.mulf %332, %333 : vector<16x8xf32>
    %335 = arith.addf %334, %38 : vector<16x8xf32>
    %cst_121 = arith.constant dense<0xFF800000> : vector<16xf32>
    %336 = vector.multi_reduction <maximumf>, %335, %cst_121 [1] : vector<16x8xf32> to vector<16xf32>
    %337 = vector.shape_cast %336 : vector<16xf32> to vector<16x1xf32>
    %338 = vector.broadcast %337 : vector<16x1xf32> to vector<16x8xf32>
    %339 = arith.subf %335, %338 : vector<16x8xf32>
    %340 = math.exp %339 : vector<16x8xf32>
    %cst_122 = arith.constant dense<0.000000e+00> : vector<16xf32>
    %341 = vector.multi_reduction <add>, %340, %cst_122 [1] : vector<16x8xf32> to vector<16xf32>
    %342 = vector.shape_cast %341 : vector<16xf32> to vector<16x1xf32>
    %343 = tpu.reciprocal %342 {approx = true} : vector<16x1xf32> -> vector<16x1xf32>
    %344 = vector.broadcast %343 : vector<16x1xf32> to vector<16x8xf32>
    %345 = arith.mulf %340, %344 : vector<16x8xf32>
    %cst_123 = arith.constant dense<0.000000e+00> : vector<16x8xf32>
    %346 = tpu.matmul %345, %331, %cst_123 {dimension_numbers = #tpu.dot_dimension_numbers<[1], [0], [0], [1], [0, 0, 1, 1], [], []>} : vector<16x8xf32>, vector<8x8xf32>, vector<16x8xf32> -> vector<16x8xf32>
    %347 = vector.extract_strided_slice %326 {offsets = [0, 8], sizes = [16, 8], strides = [1, 1]} : vector<16x32xf32> to vector<16x8xf32>
    %348 = vector.extract_strided_slice %327 {offsets = [0, 8], sizes = [8, 8], strides = [1, 1]} : vector<8x32xf32> to vector<8x8xf32>
    %349 = vector.extract_strided_slice %328 {offsets = [0, 8], sizes = [8, 8], strides = [1, 1]} : vector<8x32xf32> to vector<8x8xf32>
    %cst_124 = arith.constant dense<0.000000e+00> : vector<16x8xf32>
    %350 = tpu.matmul %347, %348, %cst_124 {dimension_numbers = #tpu.dot_dimension_numbers<[1], [1], [0], [0], [0, 0, 1, 0], [], []>} : vector<16x8xf32>, vector<8x8xf32>, vector<16x8xf32> -> vector<16x8xf32>
    %cst_125 = arith.constant 0.353553385 : f32
    %351 = vector.broadcast %cst_125 : f32 to vector<16x8xf32>
    %352 = arith.mulf %350, %351 : vector<16x8xf32>
    %353 = arith.addf %352, %38 : vector<16x8xf32>
    %cst_126 = arith.constant dense<0xFF800000> : vector<16xf32>
    %354 = vector.multi_reduction <maximumf>, %353, %cst_126 [1] : vector<16x8xf32> to vector<16xf32>
    %355 = vector.shape_cast %354 : vector<16xf32> to vector<16x1xf32>
    %356 = vector.broadcast %355 : vector<16x1xf32> to vector<16x8xf32>
    %357 = arith.subf %353, %356 : vector<16x8xf32>
    %358 = math.exp %357 : vector<16x8xf32>
    %cst_127 = arith.constant dense<0.000000e+00> : vector<16xf32>
    %359 = vector.multi_reduction <add>, %358, %cst_127 [1] : vector<16x8xf32> to vector<16xf32>
    %360 = vector.shape_cast %359 : vector<16xf32> to vector<16x1xf32>
    %361 = tpu.reciprocal %360 {approx = true} : vector<16x1xf32> -> vector<16x1xf32>
    %362 = vector.broadcast %361 : vector<16x1xf32> to vector<16x8xf32>
    %363 = arith.mulf %358, %362 : vector<16x8xf32>
    %cst_128 = arith.constant dense<0.000000e+00> : vector<16x8xf32>
    %364 = tpu.matmul %363, %349, %cst_128 {dimension_numbers = #tpu.dot_dimension_numbers<[1], [0], [0], [1], [0, 0, 1, 1], [], []>} : vector<16x8xf32>, vector<8x8xf32>, vector<16x8xf32> -> vector<16x8xf32>
    %365 = vector.extract_strided_slice %326 {offsets = [0, 16], sizes = [16, 8], strides = [1, 1]} : vector<16x32xf32> to vector<16x8xf32>
    %366 = vector.extract_strided_slice %327 {offsets = [0, 16], sizes = [8, 8], strides = [1, 1]} : vector<8x32xf32> to vector<8x8xf32>
    %367 = vector.extract_strided_slice %328 {offsets = [0, 16], sizes = [8, 8], strides = [1, 1]} : vector<8x32xf32> to vector<8x8xf32>
    %cst_129 = arith.constant dense<0.000000e+00> : vector<16x8xf32>
    %368 = tpu.matmul %365, %366, %cst_129 {dimension_numbers = #tpu.dot_dimension_numbers<[1], [1], [0], [0], [0, 0, 1, 0], [], []>} : vector<16x8xf32>, vector<8x8xf32>, vector<16x8xf32> -> vector<16x8xf32>
    %cst_130 = arith.constant 0.353553385 : f32
    %369 = vector.broadcast %cst_130 : f32 to vector<16x8xf32>
    %370 = arith.mulf %368, %369 : vector<16x8xf32>
    %371 = arith.addf %370, %38 : vector<16x8xf32>
    %cst_131 = arith.constant dense<0xFF800000> : vector<16xf32>
    %372 = vector.multi_reduction <maximumf>, %371, %cst_131 [1] : vector<16x8xf32> to vector<16xf32>
    %373 = vector.shape_cast %372 : vector<16xf32> to vector<16x1xf32>
    %374 = vector.broadcast %373 : vector<16x1xf32> to vector<16x8xf32>
    %375 = arith.subf %371, %374 : vector<16x8xf32>
    %376 = math.exp %375 : vector<16x8xf32>
    %cst_132 = arith.constant dense<0.000000e+00> : vector<16xf32>
    %377 = vector.multi_reduction <add>, %376, %cst_132 [1] : vector<16x8xf32> to vector<16xf32>
    %378 = vector.shape_cast %377 : vector<16xf32> to vector<16x1xf32>
    %379 = tpu.reciprocal %378 {approx = true} : vector<16x1xf32> -> vector<16x1xf32>
    %380 = vector.broadcast %379 : vector<16x1xf32> to vector<16x8xf32>
    %381 = arith.mulf %376, %380 : vector<16x8xf32>
    %cst_133 = arith.constant dense<0.000000e+00> : vector<16x8xf32>
    %382 = tpu.matmul %381, %367, %cst_133 {dimension_numbers = #tpu.dot_dimension_numbers<[1], [0], [0], [1], [0, 0, 1, 1], [], []>} : vector<16x8xf32>, vector<8x8xf32>, vector<16x8xf32> -> vector<16x8xf32>
    %383 = vector.extract_strided_slice %326 {offsets = [0, 24], sizes = [16, 8], strides = [1, 1]} : vector<16x32xf32> to vector<16x8xf32>
    %384 = vector.extract_strided_slice %327 {offsets = [0, 24], sizes = [8, 8], strides = [1, 1]} : vector<8x32xf32> to vector<8x8xf32>
    %385 = vector.extract_strided_slice %328 {offsets = [0, 24], sizes = [8, 8], strides = [1, 1]} : vector<8x32xf32> to vector<8x8xf32>
    %cst_134 = arith.constant dense<0.000000e+00> : vector<16x8xf32>
    %386 = tpu.matmul %383, %384, %cst_134 {dimension_numbers = #tpu.dot_dimension_numbers<[1], [1], [0], [0], [0, 0, 1, 0], [], []>} : vector<16x8xf32>, vector<8x8xf32>, vector<16x8xf32> -> vector<16x8xf32>
    %cst_135 = arith.constant 0.353553385 : f32
    %387 = vector.broadcast %cst_135 : f32 to vector<16x8xf32>
    %388 = arith.mulf %386, %387 : vector<16x8xf32>
    %389 = arith.addf %388, %38 : vector<16x8xf32>
    %cst_136 = arith.constant dense<0xFF800000> : vector<16xf32>
    %390 = vector.multi_reduction <maximumf>, %389, %cst_136 [1] : vector<16x8xf32> to vector<16xf32>
    %391 = vector.shape_cast %390 : vector<16xf32> to vector<16x1xf32>
    %392 = vector.broadcast %391 : vector<16x1xf32> to vector<16x8xf32>
    %393 = arith.subf %389, %392 : vector<16x8xf32>
    %394 = math.exp %393 : vector<16x8xf32>
    %cst_137 = arith.constant dense<0.000000e+00> : vector<16xf32>
    %395 = vector.multi_reduction <add>, %394, %cst_137 [1] : vector<16x8xf32> to vector<16xf32>
    %396 = vector.shape_cast %395 : vector<16xf32> to vector<16x1xf32>
    %397 = tpu.reciprocal %396 {approx = true} : vector<16x1xf32> -> vector<16x1xf32>
    %398 = vector.broadcast %397 : vector<16x1xf32> to vector<16x8xf32>
    %399 = arith.mulf %394, %398 : vector<16x8xf32>
    %cst_138 = arith.constant dense<0.000000e+00> : vector<16x8xf32>
    %400 = tpu.matmul %399, %385, %cst_138 {dimension_numbers = #tpu.dot_dimension_numbers<[1], [0], [0], [1], [0, 0, 1, 1], [], []>} : vector<16x8xf32>, vector<8x8xf32>, vector<16x8xf32> -> vector<16x8xf32>
    %401 = tpu.concatenate %346, %364, %382, %400 in 1 : vector<16x8xf32>, vector<16x8xf32>, vector<16x8xf32>, vector<16x8xf32> -> vector<16x32xf32>
    %402 = tpu.concatenate %325, %401 in 0 : vector<16x32xf32>, vector<16x32xf32> -> vector<32x32xf32>
    %c0_139 = arith.constant 0 : index
    %c0_140 = arith.constant 0 : index
    %c0_141 = arith.constant 0 : index
    %403 = vector.load %arg16[%c0_139, %c0_140, %c0_141] : memref<2x32x32xf32, #tpu.memory_space<vmem>>, vector<1x32x32xf32>
    %404 = vector.shape_cast %403 : vector<1x32x32xf32> to vector<32x32xf32>
    %cst_142 = arith.constant dense<0.000000e+00> : vector<32x32xf32>
    %405 = tpu.matmul %402, %404, %cst_142 {dimension_numbers = #tpu.dot_dimension_numbers<[1], [0], [0], [1], [0, 0, 1, 1], [], []>} : vector<32x32xf32>, vector<32x32xf32>, vector<32x32xf32> -> vector<32x32xf32>
    %c0_143 = arith.constant 0 : index
    %c0_144 = arith.constant 0 : index
    %c0_145 = arith.constant 0 : index
    %406 = vector.load %arg17[%c0_143, %c0_144, %c0_145] : memref<2x1x32xf32, #tpu.memory_space<vmem>>, vector<1x1x32xf32>
    %407 = vector.shape_cast %406 : vector<1x1x32xf32> to vector<1x32xf32>
    %408 = vector.broadcast %407 : vector<1x32xf32> to vector<32x32xf32>
    %409 = arith.addf %405, %408 : vector<32x32xf32>
    %410 = arith.addf %233, %409 : vector<32x32xf32>
    %c0_146 = arith.constant 0 : index
    %c0_147 = arith.constant 0 : index
    %c0_148 = arith.constant 0 : index
    %411 = vector.load %arg24[%c0_146, %c0_147, %c0_148] : memref<2x1x32xf32, #tpu.memory_space<vmem>>, vector<1x1x32xf32>
    %412 = vector.shape_cast %411 : vector<1x1x32xf32> to vector<1x32xf32>
    %c0_149 = arith.constant 0 : index
    %c0_150 = arith.constant 0 : index
    %c0_151 = arith.constant 0 : index
    %413 = vector.load %arg25[%c0_149, %c0_150, %c0_151] : memref<2x1x32xf32, #tpu.memory_space<vmem>>, vector<1x1x32xf32>
    %414 = vector.shape_cast %413 : vector<1x1x32xf32> to vector<1x32xf32>
    %cst_152 = arith.constant dense<0.000000e+00> : vector<32xf32>
    %415 = vector.multi_reduction <add>, %410, %cst_152 [1] : vector<32x32xf32> to vector<32xf32>
    %416 = vector.shape_cast %415 : vector<32xf32> to vector<32x1xf32>
    %cst_153 = arith.constant 3.200000e+01 : f32
    %417 = vector.broadcast %cst_153 : f32 to vector<32x1xf32>
    %418 = arith.divf %416, %417 : vector<32x1xf32>
    %419 = vector.broadcast %418 : vector<32x1xf32> to vector<32x32xf32>
    %420 = arith.subf %410, %419 : vector<32x32xf32>
    %421 = arith.mulf %420, %420 : vector<32x32xf32>
    %cst_154 = arith.constant dense<0.000000e+00> : vector<32xf32>
    %422 = vector.multi_reduction <add>, %421, %cst_154 [1] : vector<32x32xf32> to vector<32xf32>
    %423 = vector.shape_cast %422 : vector<32xf32> to vector<32x1xf32>
    %cst_155 = arith.constant 3.200000e+01 : f32
    %424 = vector.broadcast %cst_155 : f32 to vector<32x1xf32>
    %425 = arith.divf %423, %424 : vector<32x1xf32>
    %cst_156 = arith.constant 9.99999974E-6 : f32
    %426 = vector.broadcast %cst_156 : f32 to vector<32x1xf32>
    %427 = arith.addf %425, %426 : vector<32x1xf32>
    %428 = math.rsqrt %427 : vector<32x1xf32>
    %429 = vector.broadcast %428 : vector<32x1xf32> to vector<32x32xf32>
    %430 = arith.mulf %420, %429 : vector<32x32xf32>
    %431 = vector.broadcast %412 : vector<1x32xf32> to vector<32x32xf32>
    %432 = arith.mulf %430, %431 : vector<32x32xf32>
    %433 = vector.broadcast %414 : vector<1x32xf32> to vector<32x32xf32>
    %434 = arith.addf %432, %433 : vector<32x32xf32>
    %c0_157 = arith.constant 0 : index
    %c0_158 = arith.constant 0 : index
    %c0_159 = arith.constant 0 : index
    %435 = vector.load %arg18[%c0_157, %c0_158, %c0_159] : memref<2x32x64xf32, #tpu.memory_space<vmem>>, vector<1x32x64xf32>
    %436 = vector.shape_cast %435 : vector<1x32x64xf32> to vector<32x64xf32>
    %cst_160 = arith.constant dense<0.000000e+00> : vector<32x64xf32>
    %437 = tpu.matmul %434, %436, %cst_160 {dimension_numbers = #tpu.dot_dimension_numbers<[1], [0], [0], [1], [0, 0, 1, 1], [], []>} : vector<32x32xf32>, vector<32x64xf32>, vector<32x64xf32> -> vector<32x64xf32>
    %c0_161 = arith.constant 0 : index
    %c0_162 = arith.constant 0 : index
    %c0_163 = arith.constant 0 : index
    %438 = vector.load %arg19[%c0_161, %c0_162, %c0_163] : memref<2x1x64xf32, #tpu.memory_space<vmem>>, vector<1x1x64xf32>
    %439 = vector.shape_cast %438 : vector<1x1x64xf32> to vector<1x64xf32>
    %440 = vector.broadcast %439 : vector<1x64xf32> to vector<32x64xf32>
    %441 = arith.addf %437, %440 : vector<32x64xf32>
    %cst_164 = arith.constant 0.000000e+00 : f32
    %442 = vector.broadcast %cst_164 : f32 to vector<32x64xf32>
    %443 = arith.maximumf %441, %442 : vector<32x64xf32>
    %c0_165 = arith.constant 0 : index
    %c0_166 = arith.constant 0 : index
    %c0_167 = arith.constant 0 : index
    %444 = vector.load %arg20[%c0_165, %c0_166, %c0_167] : memref<2x64x32xf32, #tpu.memory_space<vmem>>, vector<1x64x32xf32>
    %445 = vector.shape_cast %444 : vector<1x64x32xf32> to vector<64x32xf32>
    %cst_168 = arith.constant dense<0.000000e+00> : vector<32x32xf32>
    %446 = tpu.matmul %443, %445, %cst_168 {dimension_numbers = #tpu.dot_dimension_numbers<[1], [0], [0], [1], [0, 0, 1, 1], [], []>} : vector<32x64xf32>, vector<64x32xf32>, vector<32x32xf32> -> vector<32x32xf32>
    %c0_169 = arith.constant 0 : index
    %c0_170 = arith.constant 0 : index
    %c0_171 = arith.constant 0 : index
    %447 = vector.load %arg21[%c0_169, %c0_170, %c0_171] : memref<2x1x32xf32, #tpu.memory_space<vmem>>, vector<1x1x32xf32>
    %448 = vector.shape_cast %447 : vector<1x1x32xf32> to vector<1x32xf32>
    %449 = vector.broadcast %448 : vector<1x32xf32> to vector<32x32xf32>
    %450 = arith.addf %446, %449 : vector<32x32xf32>
    %451 = arith.addf %434, %450 : vector<32x32xf32>
    %c0_172 = arith.constant 0 : index
    %c0_173 = arith.constant 0 : index
    %c0_174 = arith.constant 0 : index
    %452 = vector.load %arg26[%c0_172, %c0_173, %c0_174] : memref<2x1x32xf32, #tpu.memory_space<vmem>>, vector<1x1x32xf32>
    %453 = vector.shape_cast %452 : vector<1x1x32xf32> to vector<1x32xf32>
    %c0_175 = arith.constant 0 : index
    %c0_176 = arith.constant 0 : index
    %c0_177 = arith.constant 0 : index
    %454 = vector.load %arg27[%c0_175, %c0_176, %c0_177] : memref<2x1x32xf32, #tpu.memory_space<vmem>>, vector<1x1x32xf32>
    %455 = vector.shape_cast %454 : vector<1x1x32xf32> to vector<1x32xf32>
    %cst_178 = arith.constant dense<0.000000e+00> : vector<32xf32>
    %456 = vector.multi_reduction <add>, %451, %cst_178 [1] : vector<32x32xf32> to vector<32xf32>
    %457 = vector.shape_cast %456 : vector<32xf32> to vector<32x1xf32>
    %cst_179 = arith.constant 3.200000e+01 : f32
    %458 = vector.broadcast %cst_179 : f32 to vector<32x1xf32>
    %459 = arith.divf %457, %458 : vector<32x1xf32>
    %460 = vector.broadcast %459 : vector<32x1xf32> to vector<32x32xf32>
    %461 = arith.subf %451, %460 : vector<32x32xf32>
    %462 = arith.mulf %461, %461 : vector<32x32xf32>
    %cst_180 = arith.constant dense<0.000000e+00> : vector<32xf32>
    %463 = vector.multi_reduction <add>, %462, %cst_180 [1] : vector<32x32xf32> to vector<32xf32>
    %464 = vector.shape_cast %463 : vector<32xf32> to vector<32x1xf32>
    %cst_181 = arith.constant 3.200000e+01 : f32
    %465 = vector.broadcast %cst_181 : f32 to vector<32x1xf32>
    %466 = arith.divf %464, %465 : vector<32x1xf32>
    %cst_182 = arith.constant 9.99999974E-6 : f32
    %467 = vector.broadcast %cst_182 : f32 to vector<32x1xf32>
    %468 = arith.addf %466, %467 : vector<32x1xf32>
    %469 = math.rsqrt %468 : vector<32x1xf32>
    %470 = vector.broadcast %469 : vector<32x1xf32> to vector<32x32xf32>
    %471 = arith.mulf %461, %470 : vector<32x32xf32>
    %472 = vector.broadcast %453 : vector<1x32xf32> to vector<32x32xf32>
    %473 = arith.mulf %471, %472 : vector<32x32xf32>
    %474 = vector.broadcast %455 : vector<1x32xf32> to vector<32x32xf32>
    %475 = arith.addf %473, %474 : vector<32x32xf32>
    %c1_183 = arith.constant 1 : index
    %c0_184 = arith.constant 0 : index
    %c0_185 = arith.constant 0 : index
    %476 = vector.load %arg8[%c1_183, %c0_184, %c0_185] : memref<2x32x96xf32, #tpu.memory_space<vmem>>, vector<1x32x96xf32>
    %477 = vector.shape_cast %476 : vector<1x32x96xf32> to vector<32x96xf32>
    %cst_186 = arith.constant dense<0.000000e+00> : vector<32x96xf32>
    %478 = tpu.matmul %475, %477, %cst_186 {dimension_numbers = #tpu.dot_dimension_numbers<[1], [0], [0], [1], [0, 0, 1, 1], [], []>} : vector<32x32xf32>, vector<32x96xf32>, vector<32x96xf32> -> vector<32x96xf32>
    %c1_187 = arith.constant 1 : index
    %c0_188 = arith.constant 0 : index
    %c0_189 = arith.constant 0 : index
    %479 = vector.load %arg9[%c1_187, %c0_188, %c0_189] : memref<2x1x96xf32, #tpu.memory_space<vmem>>, vector<1x1x96xf32>
    %480 = vector.shape_cast %479 : vector<1x1x96xf32> to vector<1x96xf32>
    %481 = vector.broadcast %480 : vector<1x96xf32> to vector<32x96xf32>
    %482 = arith.addf %478, %481 : vector<32x96xf32>
    %483 = vector.extract_strided_slice %482 {offsets = [0, 0], sizes = [32, 32], strides = [1, 1]} : vector<32x96xf32> to vector<32x32xf32>
    %484 = vector.extract_strided_slice %482 {offsets = [0, 32], sizes = [32, 32], strides = [1, 1]} : vector<32x96xf32> to vector<32x32xf32>
    %485 = vector.extract_strided_slice %482 {offsets = [0, 64], sizes = [32, 32], strides = [1, 1]} : vector<32x96xf32> to vector<32x32xf32>
    %486 = vector.extract_strided_slice %483 {offsets = [0, 0], sizes = [16, 32], strides = [1, 1]} : vector<32x32xf32> to vector<16x32xf32>
    %487 = vector.extract_strided_slice %484 {offsets = [0, 0], sizes = [16, 32], strides = [1, 1]} : vector<32x32xf32> to vector<16x32xf32>
    %488 = vector.extract_strided_slice %485 {offsets = [0, 0], sizes = [16, 32], strides = [1, 1]} : vector<32x32xf32> to vector<16x32xf32>
    %489 = vector.extract_strided_slice %486 {offsets = [0, 0], sizes = [16, 8], strides = [1, 1]} : vector<16x32xf32> to vector<16x8xf32>
    %490 = vector.extract_strided_slice %487 {offsets = [0, 0], sizes = [16, 8], strides = [1, 1]} : vector<16x32xf32> to vector<16x8xf32>
    %491 = vector.extract_strided_slice %488 {offsets = [0, 0], sizes = [16, 8], strides = [1, 1]} : vector<16x32xf32> to vector<16x8xf32>
    %cst_190 = arith.constant dense<0.000000e+00> : vector<16x16xf32>
    %492 = tpu.matmul %489, %490, %cst_190 {dimension_numbers = #tpu.dot_dimension_numbers<[1], [1], [0], [0], [0, 0, 1, 0], [], []>} : vector<16x8xf32>, vector<16x8xf32>, vector<16x16xf32> -> vector<16x16xf32>
    %cst_191 = arith.constant 0.353553385 : f32
    %493 = vector.broadcast %cst_191 : f32 to vector<16x16xf32>
    %494 = arith.mulf %492, %493 : vector<16x16xf32>
    %495 = arith.addf %494, %19 : vector<16x16xf32>
    %cst_192 = arith.constant dense<0xFF800000> : vector<16xf32>
    %496 = vector.multi_reduction <maximumf>, %495, %cst_192 [1] : vector<16x16xf32> to vector<16xf32>
    %497 = vector.shape_cast %496 : vector<16xf32> to vector<16x1xf32>
    %498 = vector.broadcast %497 : vector<16x1xf32> to vector<16x16xf32>
    %499 = arith.subf %495, %498 : vector<16x16xf32>
    %500 = math.exp %499 : vector<16x16xf32>
    %cst_193 = arith.constant dense<0.000000e+00> : vector<16xf32>
    %501 = vector.multi_reduction <add>, %500, %cst_193 [1] : vector<16x16xf32> to vector<16xf32>
    %502 = vector.shape_cast %501 : vector<16xf32> to vector<16x1xf32>
    %503 = tpu.reciprocal %502 {approx = true} : vector<16x1xf32> -> vector<16x1xf32>
    %504 = vector.broadcast %503 : vector<16x1xf32> to vector<16x16xf32>
    %505 = arith.mulf %500, %504 : vector<16x16xf32>
    %cst_194 = arith.constant dense<0.000000e+00> : vector<16x8xf32>
    %506 = tpu.matmul %505, %491, %cst_194 {dimension_numbers = #tpu.dot_dimension_numbers<[1], [0], [0], [1], [0, 0, 1, 1], [], []>} : vector<16x16xf32>, vector<16x8xf32>, vector<16x8xf32> -> vector<16x8xf32>
    %507 = vector.extract_strided_slice %486 {offsets = [0, 8], sizes = [16, 8], strides = [1, 1]} : vector<16x32xf32> to vector<16x8xf32>
    %508 = vector.extract_strided_slice %487 {offsets = [0, 8], sizes = [16, 8], strides = [1, 1]} : vector<16x32xf32> to vector<16x8xf32>
    %509 = vector.extract_strided_slice %488 {offsets = [0, 8], sizes = [16, 8], strides = [1, 1]} : vector<16x32xf32> to vector<16x8xf32>
    %cst_195 = arith.constant dense<0.000000e+00> : vector<16x16xf32>
    %510 = tpu.matmul %507, %508, %cst_195 {dimension_numbers = #tpu.dot_dimension_numbers<[1], [1], [0], [0], [0, 0, 1, 0], [], []>} : vector<16x8xf32>, vector<16x8xf32>, vector<16x16xf32> -> vector<16x16xf32>
    %cst_196 = arith.constant 0.353553385 : f32
    %511 = vector.broadcast %cst_196 : f32 to vector<16x16xf32>
    %512 = arith.mulf %510, %511 : vector<16x16xf32>
    %513 = arith.addf %512, %19 : vector<16x16xf32>
    %cst_197 = arith.constant dense<0xFF800000> : vector<16xf32>
    %514 = vector.multi_reduction <maximumf>, %513, %cst_197 [1] : vector<16x16xf32> to vector<16xf32>
    %515 = vector.shape_cast %514 : vector<16xf32> to vector<16x1xf32>
    %516 = vector.broadcast %515 : vector<16x1xf32> to vector<16x16xf32>
    %517 = arith.subf %513, %516 : vector<16x16xf32>
    %518 = math.exp %517 : vector<16x16xf32>
    %cst_198 = arith.constant dense<0.000000e+00> : vector<16xf32>
    %519 = vector.multi_reduction <add>, %518, %cst_198 [1] : vector<16x16xf32> to vector<16xf32>
    %520 = vector.shape_cast %519 : vector<16xf32> to vector<16x1xf32>
    %521 = tpu.reciprocal %520 {approx = true} : vector<16x1xf32> -> vector<16x1xf32>
    %522 = vector.broadcast %521 : vector<16x1xf32> to vector<16x16xf32>
    %523 = arith.mulf %518, %522 : vector<16x16xf32>
    %cst_199 = arith.constant dense<0.000000e+00> : vector<16x8xf32>
    %524 = tpu.matmul %523, %509, %cst_199 {dimension_numbers = #tpu.dot_dimension_numbers<[1], [0], [0], [1], [0, 0, 1, 1], [], []>} : vector<16x16xf32>, vector<16x8xf32>, vector<16x8xf32> -> vector<16x8xf32>
    %525 = vector.extract_strided_slice %486 {offsets = [0, 16], sizes = [16, 8], strides = [1, 1]} : vector<16x32xf32> to vector<16x8xf32>
    %526 = vector.extract_strided_slice %487 {offsets = [0, 16], sizes = [16, 8], strides = [1, 1]} : vector<16x32xf32> to vector<16x8xf32>
    %527 = vector.extract_strided_slice %488 {offsets = [0, 16], sizes = [16, 8], strides = [1, 1]} : vector<16x32xf32> to vector<16x8xf32>
    %cst_200 = arith.constant dense<0.000000e+00> : vector<16x16xf32>
    %528 = tpu.matmul %525, %526, %cst_200 {dimension_numbers = #tpu.dot_dimension_numbers<[1], [1], [0], [0], [0, 0, 1, 0], [], []>} : vector<16x8xf32>, vector<16x8xf32>, vector<16x16xf32> -> vector<16x16xf32>
    %cst_201 = arith.constant 0.353553385 : f32
    %529 = vector.broadcast %cst_201 : f32 to vector<16x16xf32>
    %530 = arith.mulf %528, %529 : vector<16x16xf32>
    %531 = arith.addf %530, %19 : vector<16x16xf32>
    %cst_202 = arith.constant dense<0xFF800000> : vector<16xf32>
    %532 = vector.multi_reduction <maximumf>, %531, %cst_202 [1] : vector<16x16xf32> to vector<16xf32>
    %533 = vector.shape_cast %532 : vector<16xf32> to vector<16x1xf32>
    %534 = vector.broadcast %533 : vector<16x1xf32> to vector<16x16xf32>
    %535 = arith.subf %531, %534 : vector<16x16xf32>
    %536 = math.exp %535 : vector<16x16xf32>
    %cst_203 = arith.constant dense<0.000000e+00> : vector<16xf32>
    %537 = vector.multi_reduction <add>, %536, %cst_203 [1] : vector<16x16xf32> to vector<16xf32>
    %538 = vector.shape_cast %537 : vector<16xf32> to vector<16x1xf32>
    %539 = tpu.reciprocal %538 {approx = true} : vector<16x1xf32> -> vector<16x1xf32>
    %540 = vector.broadcast %539 : vector<16x1xf32> to vector<16x16xf32>
    %541 = arith.mulf %536, %540 : vector<16x16xf32>
    %cst_204 = arith.constant dense<0.000000e+00> : vector<16x8xf32>
    %542 = tpu.matmul %541, %527, %cst_204 {dimension_numbers = #tpu.dot_dimension_numbers<[1], [0], [0], [1], [0, 0, 1, 1], [], []>} : vector<16x16xf32>, vector<16x8xf32>, vector<16x8xf32> -> vector<16x8xf32>
    %543 = vector.extract_strided_slice %486 {offsets = [0, 24], sizes = [16, 8], strides = [1, 1]} : vector<16x32xf32> to vector<16x8xf32>
    %544 = vector.extract_strided_slice %487 {offsets = [0, 24], sizes = [16, 8], strides = [1, 1]} : vector<16x32xf32> to vector<16x8xf32>
    %545 = vector.extract_strided_slice %488 {offsets = [0, 24], sizes = [16, 8], strides = [1, 1]} : vector<16x32xf32> to vector<16x8xf32>
    %cst_205 = arith.constant dense<0.000000e+00> : vector<16x16xf32>
    %546 = tpu.matmul %543, %544, %cst_205 {dimension_numbers = #tpu.dot_dimension_numbers<[1], [1], [0], [0], [0, 0, 1, 0], [], []>} : vector<16x8xf32>, vector<16x8xf32>, vector<16x16xf32> -> vector<16x16xf32>
    %cst_206 = arith.constant 0.353553385 : f32
    %547 = vector.broadcast %cst_206 : f32 to vector<16x16xf32>
    %548 = arith.mulf %546, %547 : vector<16x16xf32>
    %549 = arith.addf %548, %19 : vector<16x16xf32>
    %cst_207 = arith.constant dense<0xFF800000> : vector<16xf32>
    %550 = vector.multi_reduction <maximumf>, %549, %cst_207 [1] : vector<16x16xf32> to vector<16xf32>
    %551 = vector.shape_cast %550 : vector<16xf32> to vector<16x1xf32>
    %552 = vector.broadcast %551 : vector<16x1xf32> to vector<16x16xf32>
    %553 = arith.subf %549, %552 : vector<16x16xf32>
    %554 = math.exp %553 : vector<16x16xf32>
    %cst_208 = arith.constant dense<0.000000e+00> : vector<16xf32>
    %555 = vector.multi_reduction <add>, %554, %cst_208 [1] : vector<16x16xf32> to vector<16xf32>
    %556 = vector.shape_cast %555 : vector<16xf32> to vector<16x1xf32>
    %557 = tpu.reciprocal %556 {approx = true} : vector<16x1xf32> -> vector<16x1xf32>
    %558 = vector.broadcast %557 : vector<16x1xf32> to vector<16x16xf32>
    %559 = arith.mulf %554, %558 : vector<16x16xf32>
    %cst_209 = arith.constant dense<0.000000e+00> : vector<16x8xf32>
    %560 = tpu.matmul %559, %545, %cst_209 {dimension_numbers = #tpu.dot_dimension_numbers<[1], [0], [0], [1], [0, 0, 1, 1], [], []>} : vector<16x16xf32>, vector<16x8xf32>, vector<16x8xf32> -> vector<16x8xf32>
    %561 = tpu.concatenate %506, %524, %542, %560 in 1 : vector<16x8xf32>, vector<16x8xf32>, vector<16x8xf32>, vector<16x8xf32> -> vector<16x32xf32>
    %562 = vector.extract_strided_slice %483 {offsets = [16, 0], sizes = [16, 32], strides = [1, 1]} : vector<32x32xf32> to vector<16x32xf32>
    %563 = vector.extract_strided_slice %484 {offsets = [16, 0], sizes = [16, 32], strides = [1, 1]} : vector<32x32xf32> to vector<16x32xf32>
    %564 = vector.extract_strided_slice %485 {offsets = [16, 0], sizes = [16, 32], strides = [1, 1]} : vector<32x32xf32> to vector<16x32xf32>
    %565 = vector.extract_strided_slice %562 {offsets = [0, 0], sizes = [16, 8], strides = [1, 1]} : vector<16x32xf32> to vector<16x8xf32>
    %566 = vector.extract_strided_slice %563 {offsets = [0, 0], sizes = [16, 8], strides = [1, 1]} : vector<16x32xf32> to vector<16x8xf32>
    %567 = vector.extract_strided_slice %564 {offsets = [0, 0], sizes = [16, 8], strides = [1, 1]} : vector<16x32xf32> to vector<16x8xf32>
    %cst_210 = arith.constant dense<0.000000e+00> : vector<16x16xf32>
    %568 = tpu.matmul %565, %566, %cst_210 {dimension_numbers = #tpu.dot_dimension_numbers<[1], [1], [0], [0], [0, 0, 1, 0], [], []>} : vector<16x8xf32>, vector<16x8xf32>, vector<16x16xf32> -> vector<16x16xf32>
    %cst_211 = arith.constant 0.353553385 : f32
    %569 = vector.broadcast %cst_211 : f32 to vector<16x16xf32>
    %570 = arith.mulf %568, %569 : vector<16x16xf32>
    %571 = arith.addf %570, %26 : vector<16x16xf32>
    %cst_212 = arith.constant dense<0xFF800000> : vector<16xf32>
    %572 = vector.multi_reduction <maximumf>, %571, %cst_212 [1] : vector<16x16xf32> to vector<16xf32>
    %573 = vector.shape_cast %572 : vector<16xf32> to vector<16x1xf32>
    %574 = vector.broadcast %573 : vector<16x1xf32> to vector<16x16xf32>
    %575 = arith.subf %571, %574 : vector<16x16xf32>
    %576 = math.exp %575 : vector<16x16xf32>
    %cst_213 = arith.constant dense<0.000000e+00> : vector<16xf32>
    %577 = vector.multi_reduction <add>, %576, %cst_213 [1] : vector<16x16xf32> to vector<16xf32>
    %578 = vector.shape_cast %577 : vector<16xf32> to vector<16x1xf32>
    %579 = tpu.reciprocal %578 {approx = true} : vector<16x1xf32> -> vector<16x1xf32>
    %580 = vector.broadcast %579 : vector<16x1xf32> to vector<16x16xf32>
    %581 = arith.mulf %576, %580 : vector<16x16xf32>
    %cst_214 = arith.constant dense<0.000000e+00> : vector<16x8xf32>
    %582 = tpu.matmul %581, %567, %cst_214 {dimension_numbers = #tpu.dot_dimension_numbers<[1], [0], [0], [1], [0, 0, 1, 1], [], []>} : vector<16x16xf32>, vector<16x8xf32>, vector<16x8xf32> -> vector<16x8xf32>
    %583 = vector.extract_strided_slice %562 {offsets = [0, 8], sizes = [16, 8], strides = [1, 1]} : vector<16x32xf32> to vector<16x8xf32>
    %584 = vector.extract_strided_slice %563 {offsets = [0, 8], sizes = [16, 8], strides = [1, 1]} : vector<16x32xf32> to vector<16x8xf32>
    %585 = vector.extract_strided_slice %564 {offsets = [0, 8], sizes = [16, 8], strides = [1, 1]} : vector<16x32xf32> to vector<16x8xf32>
    %cst_215 = arith.constant dense<0.000000e+00> : vector<16x16xf32>
    %586 = tpu.matmul %583, %584, %cst_215 {dimension_numbers = #tpu.dot_dimension_numbers<[1], [1], [0], [0], [0, 0, 1, 0], [], []>} : vector<16x8xf32>, vector<16x8xf32>, vector<16x16xf32> -> vector<16x16xf32>
    %cst_216 = arith.constant 0.353553385 : f32
    %587 = vector.broadcast %cst_216 : f32 to vector<16x16xf32>
    %588 = arith.mulf %586, %587 : vector<16x16xf32>
    %589 = arith.addf %588, %26 : vector<16x16xf32>
    %cst_217 = arith.constant dense<0xFF800000> : vector<16xf32>
    %590 = vector.multi_reduction <maximumf>, %589, %cst_217 [1] : vector<16x16xf32> to vector<16xf32>
    %591 = vector.shape_cast %590 : vector<16xf32> to vector<16x1xf32>
    %592 = vector.broadcast %591 : vector<16x1xf32> to vector<16x16xf32>
    %593 = arith.subf %589, %592 : vector<16x16xf32>
    %594 = math.exp %593 : vector<16x16xf32>
    %cst_218 = arith.constant dense<0.000000e+00> : vector<16xf32>
    %595 = vector.multi_reduction <add>, %594, %cst_218 [1] : vector<16x16xf32> to vector<16xf32>
    %596 = vector.shape_cast %595 : vector<16xf32> to vector<16x1xf32>
    %597 = tpu.reciprocal %596 {approx = true} : vector<16x1xf32> -> vector<16x1xf32>
    %598 = vector.broadcast %597 : vector<16x1xf32> to vector<16x16xf32>
    %599 = arith.mulf %594, %598 : vector<16x16xf32>
    %cst_219 = arith.constant dense<0.000000e+00> : vector<16x8xf32>
    %600 = tpu.matmul %599, %585, %cst_219 {dimension_numbers = #tpu.dot_dimension_numbers<[1], [0], [0], [1], [0, 0, 1, 1], [], []>} : vector<16x16xf32>, vector<16x8xf32>, vector<16x8xf32> -> vector<16x8xf32>
    %601 = vector.extract_strided_slice %562 {offsets = [0, 16], sizes = [16, 8], strides = [1, 1]} : vector<16x32xf32> to vector<16x8xf32>
    %602 = vector.extract_strided_slice %563 {offsets = [0, 16], sizes = [16, 8], strides = [1, 1]} : vector<16x32xf32> to vector<16x8xf32>
    %603 = vector.extract_strided_slice %564 {offsets = [0, 16], sizes = [16, 8], strides = [1, 1]} : vector<16x32xf32> to vector<16x8xf32>
    %cst_220 = arith.constant dense<0.000000e+00> : vector<16x16xf32>
    %604 = tpu.matmul %601, %602, %cst_220 {dimension_numbers = #tpu.dot_dimension_numbers<[1], [1], [0], [0], [0, 0, 1, 0], [], []>} : vector<16x8xf32>, vector<16x8xf32>, vector<16x16xf32> -> vector<16x16xf32>
    %cst_221 = arith.constant 0.353553385 : f32
    %605 = vector.broadcast %cst_221 : f32 to vector<16x16xf32>
    %606 = arith.mulf %604, %605 : vector<16x16xf32>
    %607 = arith.addf %606, %26 : vector<16x16xf32>
    %cst_222 = arith.constant dense<0xFF800000> : vector<16xf32>
    %608 = vector.multi_reduction <maximumf>, %607, %cst_222 [1] : vector<16x16xf32> to vector<16xf32>
    %609 = vector.shape_cast %608 : vector<16xf32> to vector<16x1xf32>
    %610 = vector.broadcast %609 : vector<16x1xf32> to vector<16x16xf32>
    %611 = arith.subf %607, %610 : vector<16x16xf32>
    %612 = math.exp %611 : vector<16x16xf32>
    %cst_223 = arith.constant dense<0.000000e+00> : vector<16xf32>
    %613 = vector.multi_reduction <add>, %612, %cst_223 [1] : vector<16x16xf32> to vector<16xf32>
    %614 = vector.shape_cast %613 : vector<16xf32> to vector<16x1xf32>
    %615 = tpu.reciprocal %614 {approx = true} : vector<16x1xf32> -> vector<16x1xf32>
    %616 = vector.broadcast %615 : vector<16x1xf32> to vector<16x16xf32>
    %617 = arith.mulf %612, %616 : vector<16x16xf32>
    %cst_224 = arith.constant dense<0.000000e+00> : vector<16x8xf32>
    %618 = tpu.matmul %617, %603, %cst_224 {dimension_numbers = #tpu.dot_dimension_numbers<[1], [0], [0], [1], [0, 0, 1, 1], [], []>} : vector<16x16xf32>, vector<16x8xf32>, vector<16x8xf32> -> vector<16x8xf32>
    %619 = vector.extract_strided_slice %562 {offsets = [0, 24], sizes = [16, 8], strides = [1, 1]} : vector<16x32xf32> to vector<16x8xf32>
    %620 = vector.extract_strided_slice %563 {offsets = [0, 24], sizes = [16, 8], strides = [1, 1]} : vector<16x32xf32> to vector<16x8xf32>
    %621 = vector.extract_strided_slice %564 {offsets = [0, 24], sizes = [16, 8], strides = [1, 1]} : vector<16x32xf32> to vector<16x8xf32>
    %cst_225 = arith.constant dense<0.000000e+00> : vector<16x16xf32>
    %622 = tpu.matmul %619, %620, %cst_225 {dimension_numbers = #tpu.dot_dimension_numbers<[1], [1], [0], [0], [0, 0, 1, 0], [], []>} : vector<16x8xf32>, vector<16x8xf32>, vector<16x16xf32> -> vector<16x16xf32>
    %cst_226 = arith.constant 0.353553385 : f32
    %623 = vector.broadcast %cst_226 : f32 to vector<16x16xf32>
    %624 = arith.mulf %622, %623 : vector<16x16xf32>
    %625 = arith.addf %624, %26 : vector<16x16xf32>
    %cst_227 = arith.constant dense<0xFF800000> : vector<16xf32>
    %626 = vector.multi_reduction <maximumf>, %625, %cst_227 [1] : vector<16x16xf32> to vector<16xf32>
    %627 = vector.shape_cast %626 : vector<16xf32> to vector<16x1xf32>
    %628 = vector.broadcast %627 : vector<16x1xf32> to vector<16x16xf32>
    %629 = arith.subf %625, %628 : vector<16x16xf32>
    %630 = math.exp %629 : vector<16x16xf32>
    %cst_228 = arith.constant dense<0.000000e+00> : vector<16xf32>
    %631 = vector.multi_reduction <add>, %630, %cst_228 [1] : vector<16x16xf32> to vector<16xf32>
    %632 = vector.shape_cast %631 : vector<16xf32> to vector<16x1xf32>
    %633 = tpu.reciprocal %632 {approx = true} : vector<16x1xf32> -> vector<16x1xf32>
    %634 = vector.broadcast %633 : vector<16x1xf32> to vector<16x16xf32>
    %635 = arith.mulf %630, %634 : vector<16x16xf32>
    %cst_229 = arith.constant dense<0.000000e+00> : vector<16x8xf32>
    %636 = tpu.matmul %635, %621, %cst_229 {dimension_numbers = #tpu.dot_dimension_numbers<[1], [0], [0], [1], [0, 0, 1, 1], [], []>} : vector<16x16xf32>, vector<16x8xf32>, vector<16x8xf32> -> vector<16x8xf32>
    %637 = tpu.concatenate %582, %600, %618, %636 in 1 : vector<16x8xf32>, vector<16x8xf32>, vector<16x8xf32>, vector<16x8xf32> -> vector<16x32xf32>
    %638 = tpu.concatenate %561, %637 in 0 : vector<16x32xf32>, vector<16x32xf32> -> vector<32x32xf32>
    %c1_230 = arith.constant 1 : index
    %c0_231 = arith.constant 0 : index
    %c0_232 = arith.constant 0 : index
    %639 = vector.load %arg10[%c1_230, %c0_231, %c0_232] : memref<2x32x32xf32, #tpu.memory_space<vmem>>, vector<1x32x32xf32>
    %640 = vector.shape_cast %639 : vector<1x32x32xf32> to vector<32x32xf32>
    %cst_233 = arith.constant dense<0.000000e+00> : vector<32x32xf32>
    %641 = tpu.matmul %638, %640, %cst_233 {dimension_numbers = #tpu.dot_dimension_numbers<[1], [0], [0], [1], [0, 0, 1, 1], [], []>} : vector<32x32xf32>, vector<32x32xf32>, vector<32x32xf32> -> vector<32x32xf32>
    %c1_234 = arith.constant 1 : index
    %c0_235 = arith.constant 0 : index
    %c0_236 = arith.constant 0 : index
    %642 = vector.load %arg11[%c1_234, %c0_235, %c0_236] : memref<2x1x32xf32, #tpu.memory_space<vmem>>, vector<1x1x32xf32>
    %643 = vector.shape_cast %642 : vector<1x1x32xf32> to vector<1x32xf32>
    %644 = vector.broadcast %643 : vector<1x32xf32> to vector<32x32xf32>
    %645 = arith.addf %641, %644 : vector<32x32xf32>
    %646 = arith.addf %475, %645 : vector<32x32xf32>
    %c1_237 = arith.constant 1 : index
    %c0_238 = arith.constant 0 : index
    %c0_239 = arith.constant 0 : index
    %647 = vector.load %arg22[%c1_237, %c0_238, %c0_239] : memref<2x1x32xf32, #tpu.memory_space<vmem>>, vector<1x1x32xf32>
    %648 = vector.shape_cast %647 : vector<1x1x32xf32> to vector<1x32xf32>
    %c1_240 = arith.constant 1 : index
    %c0_241 = arith.constant 0 : index
    %c0_242 = arith.constant 0 : index
    %649 = vector.load %arg23[%c1_240, %c0_241, %c0_242] : memref<2x1x32xf32, #tpu.memory_space<vmem>>, vector<1x1x32xf32>
    %650 = vector.shape_cast %649 : vector<1x1x32xf32> to vector<1x32xf32>
    %cst_243 = arith.constant dense<0.000000e+00> : vector<32xf32>
    %651 = vector.multi_reduction <add>, %646, %cst_243 [1] : vector<32x32xf32> to vector<32xf32>
    %652 = vector.shape_cast %651 : vector<32xf32> to vector<32x1xf32>
    %cst_244 = arith.constant 3.200000e+01 : f32
    %653 = vector.broadcast %cst_244 : f32 to vector<32x1xf32>
    %654 = arith.divf %652, %653 : vector<32x1xf32>
    %655 = vector.broadcast %654 : vector<32x1xf32> to vector<32x32xf32>
    %656 = arith.subf %646, %655 : vector<32x32xf32>
    %657 = arith.mulf %656, %656 : vector<32x32xf32>
    %cst_245 = arith.constant dense<0.000000e+00> : vector<32xf32>
    %658 = vector.multi_reduction <add>, %657, %cst_245 [1] : vector<32x32xf32> to vector<32xf32>
    %659 = vector.shape_cast %658 : vector<32xf32> to vector<32x1xf32>
    %cst_246 = arith.constant 3.200000e+01 : f32
    %660 = vector.broadcast %cst_246 : f32 to vector<32x1xf32>
    %661 = arith.divf %659, %660 : vector<32x1xf32>
    %cst_247 = arith.constant 9.99999974E-6 : f32
    %662 = vector.broadcast %cst_247 : f32 to vector<32x1xf32>
    %663 = arith.addf %661, %662 : vector<32x1xf32>
    %664 = math.rsqrt %663 : vector<32x1xf32>
    %665 = vector.broadcast %664 : vector<32x1xf32> to vector<32x32xf32>
    %666 = arith.mulf %656, %665 : vector<32x32xf32>
    %667 = vector.broadcast %648 : vector<1x32xf32> to vector<32x32xf32>
    %668 = arith.mulf %666, %667 : vector<32x32xf32>
    %669 = vector.broadcast %650 : vector<1x32xf32> to vector<32x32xf32>
    %670 = arith.addf %668, %669 : vector<32x32xf32>
    %c1_248 = arith.constant 1 : index
    %c0_249 = arith.constant 0 : index
    %c0_250 = arith.constant 0 : index
    %671 = vector.load %arg12[%c1_248, %c0_249, %c0_250] : memref<2x32x32xf32, #tpu.memory_space<vmem>>, vector<1x32x32xf32>
    %672 = vector.shape_cast %671 : vector<1x32x32xf32> to vector<32x32xf32>
    %cst_251 = arith.constant dense<0.000000e+00> : vector<32x32xf32>
    %673 = tpu.matmul %670, %672, %cst_251 {dimension_numbers = #tpu.dot_dimension_numbers<[1], [0], [0], [1], [0, 0, 1, 1], [], []>} : vector<32x32xf32>, vector<32x32xf32>, vector<32x32xf32> -> vector<32x32xf32>
    %c1_252 = arith.constant 1 : index
    %c0_253 = arith.constant 0 : index
    %c0_254 = arith.constant 0 : index
    %674 = vector.load %arg13[%c1_252, %c0_253, %c0_254] : memref<2x1x32xf32, #tpu.memory_space<vmem>>, vector<1x1x32xf32>
    %675 = vector.shape_cast %674 : vector<1x1x32xf32> to vector<1x32xf32>
    %676 = vector.broadcast %675 : vector<1x32xf32> to vector<32x32xf32>
    %677 = arith.addf %673, %676 : vector<32x32xf32>
    %c1_255 = arith.constant 1 : index
    %c0_256 = arith.constant 0 : index
    %c0_257 = arith.constant 0 : index
    %678 = vector.load %arg14[%c1_255, %c0_256, %c0_257] : memref<2x32x64xf32, #tpu.memory_space<vmem>>, vector<1x32x64xf32>
    %679 = vector.shape_cast %678 : vector<1x32x64xf32> to vector<32x64xf32>
    %cst_258 = arith.constant dense<0.000000e+00> : vector<16x64xf32>
    %680 = tpu.matmul %8, %679, %cst_258 {dimension_numbers = #tpu.dot_dimension_numbers<[1], [0], [0], [1], [0, 0, 1, 1], [], []>} : vector<16x32xf32>, vector<32x64xf32>, vector<16x64xf32> -> vector<16x64xf32>
    %c1_259 = arith.constant 1 : index
    %c0_260 = arith.constant 0 : index
    %c0_261 = arith.constant 0 : index
    %681 = vector.load %arg15[%c1_259, %c0_260, %c0_261] : memref<2x1x64xf32, #tpu.memory_space<vmem>>, vector<1x1x64xf32>
    %682 = vector.shape_cast %681 : vector<1x1x64xf32> to vector<1x64xf32>
    %683 = vector.broadcast %682 : vector<1x64xf32> to vector<16x64xf32>
    %684 = arith.addf %680, %683 : vector<16x64xf32>
    %685 = vector.extract_strided_slice %684 {offsets = [0, 0], sizes = [16, 32], strides = [1, 1]} : vector<16x64xf32> to vector<16x32xf32>
    %686 = vector.extract_strided_slice %684 {offsets = [0, 32], sizes = [16, 32], strides = [1, 1]} : vector<16x64xf32> to vector<16x32xf32>
    %687 = vector.extract_strided_slice %677 {offsets = [0, 0], sizes = [16, 32], strides = [1, 1]} : vector<32x32xf32> to vector<16x32xf32>
    %688 = vector.extract_strided_slice %685 {offsets = [0, 0], sizes = [8, 32], strides = [1, 1]} : vector<16x32xf32> to vector<8x32xf32>
    %689 = vector.extract_strided_slice %686 {offsets = [0, 0], sizes = [8, 32], strides = [1, 1]} : vector<16x32xf32> to vector<8x32xf32>
    %690 = vector.extract_strided_slice %687 {offsets = [0, 0], sizes = [16, 8], strides = [1, 1]} : vector<16x32xf32> to vector<16x8xf32>
    %691 = vector.extract_strided_slice %688 {offsets = [0, 0], sizes = [8, 8], strides = [1, 1]} : vector<8x32xf32> to vector<8x8xf32>
    %692 = vector.extract_strided_slice %689 {offsets = [0, 0], sizes = [8, 8], strides = [1, 1]} : vector<8x32xf32> to vector<8x8xf32>
    %cst_262 = arith.constant dense<0.000000e+00> : vector<16x8xf32>
    %693 = tpu.matmul %690, %691, %cst_262 {dimension_numbers = #tpu.dot_dimension_numbers<[1], [1], [0], [0], [0, 0, 1, 0], [], []>} : vector<16x8xf32>, vector<8x8xf32>, vector<16x8xf32> -> vector<16x8xf32>
    %cst_263 = arith.constant 0.353553385 : f32
    %694 = vector.broadcast %cst_263 : f32 to vector<16x8xf32>
    %695 = arith.mulf %693, %694 : vector<16x8xf32>
    %696 = arith.addf %695, %32 : vector<16x8xf32>
    %cst_264 = arith.constant dense<0xFF800000> : vector<16xf32>
    %697 = vector.multi_reduction <maximumf>, %696, %cst_264 [1] : vector<16x8xf32> to vector<16xf32>
    %698 = vector.shape_cast %697 : vector<16xf32> to vector<16x1xf32>
    %699 = vector.broadcast %698 : vector<16x1xf32> to vector<16x8xf32>
    %700 = arith.subf %696, %699 : vector<16x8xf32>
    %701 = math.exp %700 : vector<16x8xf32>
    %cst_265 = arith.constant dense<0.000000e+00> : vector<16xf32>
    %702 = vector.multi_reduction <add>, %701, %cst_265 [1] : vector<16x8xf32> to vector<16xf32>
    %703 = vector.shape_cast %702 : vector<16xf32> to vector<16x1xf32>
    %704 = tpu.reciprocal %703 {approx = true} : vector<16x1xf32> -> vector<16x1xf32>
    %705 = vector.broadcast %704 : vector<16x1xf32> to vector<16x8xf32>
    %706 = arith.mulf %701, %705 : vector<16x8xf32>
    %cst_266 = arith.constant dense<0.000000e+00> : vector<16x8xf32>
    %707 = tpu.matmul %706, %692, %cst_266 {dimension_numbers = #tpu.dot_dimension_numbers<[1], [0], [0], [1], [0, 0, 1, 1], [], []>} : vector<16x8xf32>, vector<8x8xf32>, vector<16x8xf32> -> vector<16x8xf32>
    %708 = vector.extract_strided_slice %687 {offsets = [0, 8], sizes = [16, 8], strides = [1, 1]} : vector<16x32xf32> to vector<16x8xf32>
    %709 = vector.extract_strided_slice %688 {offsets = [0, 8], sizes = [8, 8], strides = [1, 1]} : vector<8x32xf32> to vector<8x8xf32>
    %710 = vector.extract_strided_slice %689 {offsets = [0, 8], sizes = [8, 8], strides = [1, 1]} : vector<8x32xf32> to vector<8x8xf32>
    %cst_267 = arith.constant dense<0.000000e+00> : vector<16x8xf32>
    %711 = tpu.matmul %708, %709, %cst_267 {dimension_numbers = #tpu.dot_dimension_numbers<[1], [1], [0], [0], [0, 0, 1, 0], [], []>} : vector<16x8xf32>, vector<8x8xf32>, vector<16x8xf32> -> vector<16x8xf32>
    %cst_268 = arith.constant 0.353553385 : f32
    %712 = vector.broadcast %cst_268 : f32 to vector<16x8xf32>
    %713 = arith.mulf %711, %712 : vector<16x8xf32>
    %714 = arith.addf %713, %32 : vector<16x8xf32>
    %cst_269 = arith.constant dense<0xFF800000> : vector<16xf32>
    %715 = vector.multi_reduction <maximumf>, %714, %cst_269 [1] : vector<16x8xf32> to vector<16xf32>
    %716 = vector.shape_cast %715 : vector<16xf32> to vector<16x1xf32>
    %717 = vector.broadcast %716 : vector<16x1xf32> to vector<16x8xf32>
    %718 = arith.subf %714, %717 : vector<16x8xf32>
    %719 = math.exp %718 : vector<16x8xf32>
    %cst_270 = arith.constant dense<0.000000e+00> : vector<16xf32>
    %720 = vector.multi_reduction <add>, %719, %cst_270 [1] : vector<16x8xf32> to vector<16xf32>
    %721 = vector.shape_cast %720 : vector<16xf32> to vector<16x1xf32>
    %722 = tpu.reciprocal %721 {approx = true} : vector<16x1xf32> -> vector<16x1xf32>
    %723 = vector.broadcast %722 : vector<16x1xf32> to vector<16x8xf32>
    %724 = arith.mulf %719, %723 : vector<16x8xf32>
    %cst_271 = arith.constant dense<0.000000e+00> : vector<16x8xf32>
    %725 = tpu.matmul %724, %710, %cst_271 {dimension_numbers = #tpu.dot_dimension_numbers<[1], [0], [0], [1], [0, 0, 1, 1], [], []>} : vector<16x8xf32>, vector<8x8xf32>, vector<16x8xf32> -> vector<16x8xf32>
    %726 = vector.extract_strided_slice %687 {offsets = [0, 16], sizes = [16, 8], strides = [1, 1]} : vector<16x32xf32> to vector<16x8xf32>
    %727 = vector.extract_strided_slice %688 {offsets = [0, 16], sizes = [8, 8], strides = [1, 1]} : vector<8x32xf32> to vector<8x8xf32>
    %728 = vector.extract_strided_slice %689 {offsets = [0, 16], sizes = [8, 8], strides = [1, 1]} : vector<8x32xf32> to vector<8x8xf32>
    %cst_272 = arith.constant dense<0.000000e+00> : vector<16x8xf32>
    %729 = tpu.matmul %726, %727, %cst_272 {dimension_numbers = #tpu.dot_dimension_numbers<[1], [1], [0], [0], [0, 0, 1, 0], [], []>} : vector<16x8xf32>, vector<8x8xf32>, vector<16x8xf32> -> vector<16x8xf32>
    %cst_273 = arith.constant 0.353553385 : f32
    %730 = vector.broadcast %cst_273 : f32 to vector<16x8xf32>
    %731 = arith.mulf %729, %730 : vector<16x8xf32>
    %732 = arith.addf %731, %32 : vector<16x8xf32>
    %cst_274 = arith.constant dense<0xFF800000> : vector<16xf32>
    %733 = vector.multi_reduction <maximumf>, %732, %cst_274 [1] : vector<16x8xf32> to vector<16xf32>
    %734 = vector.shape_cast %733 : vector<16xf32> to vector<16x1xf32>
    %735 = vector.broadcast %734 : vector<16x1xf32> to vector<16x8xf32>
    %736 = arith.subf %732, %735 : vector<16x8xf32>
    %737 = math.exp %736 : vector<16x8xf32>
    %cst_275 = arith.constant dense<0.000000e+00> : vector<16xf32>
    %738 = vector.multi_reduction <add>, %737, %cst_275 [1] : vector<16x8xf32> to vector<16xf32>
    %739 = vector.shape_cast %738 : vector<16xf32> to vector<16x1xf32>
    %740 = tpu.reciprocal %739 {approx = true} : vector<16x1xf32> -> vector<16x1xf32>
    %741 = vector.broadcast %740 : vector<16x1xf32> to vector<16x8xf32>
    %742 = arith.mulf %737, %741 : vector<16x8xf32>
    %cst_276 = arith.constant dense<0.000000e+00> : vector<16x8xf32>
    %743 = tpu.matmul %742, %728, %cst_276 {dimension_numbers = #tpu.dot_dimension_numbers<[1], [0], [0], [1], [0, 0, 1, 1], [], []>} : vector<16x8xf32>, vector<8x8xf32>, vector<16x8xf32> -> vector<16x8xf32>
    %744 = vector.extract_strided_slice %687 {offsets = [0, 24], sizes = [16, 8], strides = [1, 1]} : vector<16x32xf32> to vector<16x8xf32>
    %745 = vector.extract_strided_slice %688 {offsets = [0, 24], sizes = [8, 8], strides = [1, 1]} : vector<8x32xf32> to vector<8x8xf32>
    %746 = vector.extract_strided_slice %689 {offsets = [0, 24], sizes = [8, 8], strides = [1, 1]} : vector<8x32xf32> to vector<8x8xf32>
    %cst_277 = arith.constant dense<0.000000e+00> : vector<16x8xf32>
    %747 = tpu.matmul %744, %745, %cst_277 {dimension_numbers = #tpu.dot_dimension_numbers<[1], [1], [0], [0], [0, 0, 1, 0], [], []>} : vector<16x8xf32>, vector<8x8xf32>, vector<16x8xf32> -> vector<16x8xf32>
    %cst_278 = arith.constant 0.353553385 : f32
    %748 = vector.broadcast %cst_278 : f32 to vector<16x8xf32>
    %749 = arith.mulf %747, %748 : vector<16x8xf32>
    %750 = arith.addf %749, %32 : vector<16x8xf32>
    %cst_279 = arith.constant dense<0xFF800000> : vector<16xf32>
    %751 = vector.multi_reduction <maximumf>, %750, %cst_279 [1] : vector<16x8xf32> to vector<16xf32>
    %752 = vector.shape_cast %751 : vector<16xf32> to vector<16x1xf32>
    %753 = vector.broadcast %752 : vector<16x1xf32> to vector<16x8xf32>
    %754 = arith.subf %750, %753 : vector<16x8xf32>
    %755 = math.exp %754 : vector<16x8xf32>
    %cst_280 = arith.constant dense<0.000000e+00> : vector<16xf32>
    %756 = vector.multi_reduction <add>, %755, %cst_280 [1] : vector<16x8xf32> to vector<16xf32>
    %757 = vector.shape_cast %756 : vector<16xf32> to vector<16x1xf32>
    %758 = tpu.reciprocal %757 {approx = true} : vector<16x1xf32> -> vector<16x1xf32>
    %759 = vector.broadcast %758 : vector<16x1xf32> to vector<16x8xf32>
    %760 = arith.mulf %755, %759 : vector<16x8xf32>
    %cst_281 = arith.constant dense<0.000000e+00> : vector<16x8xf32>
    %761 = tpu.matmul %760, %746, %cst_281 {dimension_numbers = #tpu.dot_dimension_numbers<[1], [0], [0], [1], [0, 0, 1, 1], [], []>} : vector<16x8xf32>, vector<8x8xf32>, vector<16x8xf32> -> vector<16x8xf32>
    %762 = tpu.concatenate %707, %725, %743, %761 in 1 : vector<16x8xf32>, vector<16x8xf32>, vector<16x8xf32>, vector<16x8xf32> -> vector<16x32xf32>
    %763 = vector.extract_strided_slice %677 {offsets = [16, 0], sizes = [16, 32], strides = [1, 1]} : vector<32x32xf32> to vector<16x32xf32>
    %764 = vector.extract_strided_slice %685 {offsets = [8, 0], sizes = [8, 32], strides = [1, 1]} : vector<16x32xf32> to vector<8x32xf32>
    %765 = vector.extract_strided_slice %686 {offsets = [8, 0], sizes = [8, 32], strides = [1, 1]} : vector<16x32xf32> to vector<8x32xf32>
    %766 = vector.extract_strided_slice %763 {offsets = [0, 0], sizes = [16, 8], strides = [1, 1]} : vector<16x32xf32> to vector<16x8xf32>
    %767 = vector.extract_strided_slice %764 {offsets = [0, 0], sizes = [8, 8], strides = [1, 1]} : vector<8x32xf32> to vector<8x8xf32>
    %768 = vector.extract_strided_slice %765 {offsets = [0, 0], sizes = [8, 8], strides = [1, 1]} : vector<8x32xf32> to vector<8x8xf32>
    %cst_282 = arith.constant dense<0.000000e+00> : vector<16x8xf32>
    %769 = tpu.matmul %766, %767, %cst_282 {dimension_numbers = #tpu.dot_dimension_numbers<[1], [1], [0], [0], [0, 0, 1, 0], [], []>} : vector<16x8xf32>, vector<8x8xf32>, vector<16x8xf32> -> vector<16x8xf32>
    %cst_283 = arith.constant 0.353553385 : f32
    %770 = vector.broadcast %cst_283 : f32 to vector<16x8xf32>
    %771 = arith.mulf %769, %770 : vector<16x8xf32>
    %772 = arith.addf %771, %38 : vector<16x8xf32>
    %cst_284 = arith.constant dense<0xFF800000> : vector<16xf32>
    %773 = vector.multi_reduction <maximumf>, %772, %cst_284 [1] : vector<16x8xf32> to vector<16xf32>
    %774 = vector.shape_cast %773 : vector<16xf32> to vector<16x1xf32>
    %775 = vector.broadcast %774 : vector<16x1xf32> to vector<16x8xf32>
    %776 = arith.subf %772, %775 : vector<16x8xf32>
    %777 = math.exp %776 : vector<16x8xf32>
    %cst_285 = arith.constant dense<0.000000e+00> : vector<16xf32>
    %778 = vector.multi_reduction <add>, %777, %cst_285 [1] : vector<16x8xf32> to vector<16xf32>
    %779 = vector.shape_cast %778 : vector<16xf32> to vector<16x1xf32>
    %780 = tpu.reciprocal %779 {approx = true} : vector<16x1xf32> -> vector<16x1xf32>
    %781 = vector.broadcast %780 : vector<16x1xf32> to vector<16x8xf32>
    %782 = arith.mulf %777, %781 : vector<16x8xf32>
    %cst_286 = arith.constant dense<0.000000e+00> : vector<16x8xf32>
    %783 = tpu.matmul %782, %768, %cst_286 {dimension_numbers = #tpu.dot_dimension_numbers<[1], [0], [0], [1], [0, 0, 1, 1], [], []>} : vector<16x8xf32>, vector<8x8xf32>, vector<16x8xf32> -> vector<16x8xf32>
    %784 = vector.extract_strided_slice %763 {offsets = [0, 8], sizes = [16, 8], strides = [1, 1]} : vector<16x32xf32> to vector<16x8xf32>
    %785 = vector.extract_strided_slice %764 {offsets = [0, 8], sizes = [8, 8], strides = [1, 1]} : vector<8x32xf32> to vector<8x8xf32>
    %786 = vector.extract_strided_slice %765 {offsets = [0, 8], sizes = [8, 8], strides = [1, 1]} : vector<8x32xf32> to vector<8x8xf32>
    %cst_287 = arith.constant dense<0.000000e+00> : vector<16x8xf32>
    %787 = tpu.matmul %784, %785, %cst_287 {dimension_numbers = #tpu.dot_dimension_numbers<[1], [1], [0], [0], [0, 0, 1, 0], [], []>} : vector<16x8xf32>, vector<8x8xf32>, vector<16x8xf32> -> vector<16x8xf32>
    %cst_288 = arith.constant 0.353553385 : f32
    %788 = vector.broadcast %cst_288 : f32 to vector<16x8xf32>
    %789 = arith.mulf %787, %788 : vector<16x8xf32>
    %790 = arith.addf %789, %38 : vector<16x8xf32>
    %cst_289 = arith.constant dense<0xFF800000> : vector<16xf32>
    %791 = vector.multi_reduction <maximumf>, %790, %cst_289 [1] : vector<16x8xf32> to vector<16xf32>
    %792 = vector.shape_cast %791 : vector<16xf32> to vector<16x1xf32>
    %793 = vector.broadcast %792 : vector<16x1xf32> to vector<16x8xf32>
    %794 = arith.subf %790, %793 : vector<16x8xf32>
    %795 = math.exp %794 : vector<16x8xf32>
    %cst_290 = arith.constant dense<0.000000e+00> : vector<16xf32>
    %796 = vector.multi_reduction <add>, %795, %cst_290 [1] : vector<16x8xf32> to vector<16xf32>
    %797 = vector.shape_cast %796 : vector<16xf32> to vector<16x1xf32>
    %798 = tpu.reciprocal %797 {approx = true} : vector<16x1xf32> -> vector<16x1xf32>
    %799 = vector.broadcast %798 : vector<16x1xf32> to vector<16x8xf32>
    %800 = arith.mulf %795, %799 : vector<16x8xf32>
    %cst_291 = arith.constant dense<0.000000e+00> : vector<16x8xf32>
    %801 = tpu.matmul %800, %786, %cst_291 {dimension_numbers = #tpu.dot_dimension_numbers<[1], [0], [0], [1], [0, 0, 1, 1], [], []>} : vector<16x8xf32>, vector<8x8xf32>, vector<16x8xf32> -> vector<16x8xf32>
    %802 = vector.extract_strided_slice %763 {offsets = [0, 16], sizes = [16, 8], strides = [1, 1]} : vector<16x32xf32> to vector<16x8xf32>
    %803 = vector.extract_strided_slice %764 {offsets = [0, 16], sizes = [8, 8], strides = [1, 1]} : vector<8x32xf32> to vector<8x8xf32>
    %804 = vector.extract_strided_slice %765 {offsets = [0, 16], sizes = [8, 8], strides = [1, 1]} : vector<8x32xf32> to vector<8x8xf32>
    %cst_292 = arith.constant dense<0.000000e+00> : vector<16x8xf32>
    %805 = tpu.matmul %802, %803, %cst_292 {dimension_numbers = #tpu.dot_dimension_numbers<[1], [1], [0], [0], [0, 0, 1, 0], [], []>} : vector<16x8xf32>, vector<8x8xf32>, vector<16x8xf32> -> vector<16x8xf32>
    %cst_293 = arith.constant 0.353553385 : f32
    %806 = vector.broadcast %cst_293 : f32 to vector<16x8xf32>
    %807 = arith.mulf %805, %806 : vector<16x8xf32>
    %808 = arith.addf %807, %38 : vector<16x8xf32>
    %cst_294 = arith.constant dense<0xFF800000> : vector<16xf32>
    %809 = vector.multi_reduction <maximumf>, %808, %cst_294 [1] : vector<16x8xf32> to vector<16xf32>
    %810 = vector.shape_cast %809 : vector<16xf32> to vector<16x1xf32>
    %811 = vector.broadcast %810 : vector<16x1xf32> to vector<16x8xf32>
    %812 = arith.subf %808, %811 : vector<16x8xf32>
    %813 = math.exp %812 : vector<16x8xf32>
    %cst_295 = arith.constant dense<0.000000e+00> : vector<16xf32>
    %814 = vector.multi_reduction <add>, %813, %cst_295 [1] : vector<16x8xf32> to vector<16xf32>
    %815 = vector.shape_cast %814 : vector<16xf32> to vector<16x1xf32>
    %816 = tpu.reciprocal %815 {approx = true} : vector<16x1xf32> -> vector<16x1xf32>
    %817 = vector.broadcast %816 : vector<16x1xf32> to vector<16x8xf32>
    %818 = arith.mulf %813, %817 : vector<16x8xf32>
    %cst_296 = arith.constant dense<0.000000e+00> : vector<16x8xf32>
    %819 = tpu.matmul %818, %804, %cst_296 {dimension_numbers = #tpu.dot_dimension_numbers<[1], [0], [0], [1], [0, 0, 1, 1], [], []>} : vector<16x8xf32>, vector<8x8xf32>, vector<16x8xf32> -> vector<16x8xf32>
    %820 = vector.extract_strided_slice %763 {offsets = [0, 24], sizes = [16, 8], strides = [1, 1]} : vector<16x32xf32> to vector<16x8xf32>
    %821 = vector.extract_strided_slice %764 {offsets = [0, 24], sizes = [8, 8], strides = [1, 1]} : vector<8x32xf32> to vector<8x8xf32>
    %822 = vector.extract_strided_slice %765 {offsets = [0, 24], sizes = [8, 8], strides = [1, 1]} : vector<8x32xf32> to vector<8x8xf32>
    %cst_297 = arith.constant dense<0.000000e+00> : vector<16x8xf32>
    %823 = tpu.matmul %820, %821, %cst_297 {dimension_numbers = #tpu.dot_dimension_numbers<[1], [1], [0], [0], [0, 0, 1, 0], [], []>} : vector<16x8xf32>, vector<8x8xf32>, vector<16x8xf32> -> vector<16x8xf32>
    %cst_298 = arith.constant 0.353553385 : f32
    %824 = vector.broadcast %cst_298 : f32 to vector<16x8xf32>
    %825 = arith.mulf %823, %824 : vector<16x8xf32>
    %826 = arith.addf %825, %38 : vector<16x8xf32>
    %cst_299 = arith.constant dense<0xFF800000> : vector<16xf32>
    %827 = vector.multi_reduction <maximumf>, %826, %cst_299 [1] : vector<16x8xf32> to vector<16xf32>
    %828 = vector.shape_cast %827 : vector<16xf32> to vector<16x1xf32>
    %829 = vector.broadcast %828 : vector<16x1xf32> to vector<16x8xf32>
    %830 = arith.subf %826, %829 : vector<16x8xf32>
    %831 = math.exp %830 : vector<16x8xf32>
    %cst_300 = arith.constant dense<0.000000e+00> : vector<16xf32>
    %832 = vector.multi_reduction <add>, %831, %cst_300 [1] : vector<16x8xf32> to vector<16xf32>
    %833 = vector.shape_cast %832 : vector<16xf32> to vector<16x1xf32>
    %834 = tpu.reciprocal %833 {approx = true} : vector<16x1xf32> -> vector<16x1xf32>
    %835 = vector.broadcast %834 : vector<16x1xf32> to vector<16x8xf32>
    %836 = arith.mulf %831, %835 : vector<16x8xf32>
    %cst_301 = arith.constant dense<0.000000e+00> : vector<16x8xf32>
    %837 = tpu.matmul %836, %822, %cst_301 {dimension_numbers = #tpu.dot_dimension_numbers<[1], [0], [0], [1], [0, 0, 1, 1], [], []>} : vector<16x8xf32>, vector<8x8xf32>, vector<16x8xf32> -> vector<16x8xf32>
    %838 = tpu.concatenate %783, %801, %819, %837 in 1 : vector<16x8xf32>, vector<16x8xf32>, vector<16x8xf32>, vector<16x8xf32> -> vector<16x32xf32>
    %839 = tpu.concatenate %762, %838 in 0 : vector<16x32xf32>, vector<16x32xf32> -> vector<32x32xf32>
    %c1_302 = arith.constant 1 : index
    %c0_303 = arith.constant 0 : index
    %c0_304 = arith.constant 0 : index
    %840 = vector.load %arg16[%c1_302, %c0_303, %c0_304] : memref<2x32x32xf32, #tpu.memory_space<vmem>>, vector<1x32x32xf32>
    %841 = vector.shape_cast %840 : vector<1x32x32xf32> to vector<32x32xf32>
    %cst_305 = arith.constant dense<0.000000e+00> : vector<32x32xf32>
    %842 = tpu.matmul %839, %841, %cst_305 {dimension_numbers = #tpu.dot_dimension_numbers<[1], [0], [0], [1], [0, 0, 1, 1], [], []>} : vector<32x32xf32>, vector<32x32xf32>, vector<32x32xf32> -> vector<32x32xf32>
    %c1_306 = arith.constant 1 : index
    %c0_307 = arith.constant 0 : index
    %c0_308 = arith.constant 0 : index
    %843 = vector.load %arg17[%c1_306, %c0_307, %c0_308] : memref<2x1x32xf32, #tpu.memory_space<vmem>>, vector<1x1x32xf32>
    %844 = vector.shape_cast %843 : vector<1x1x32xf32> to vector<1x32xf32>
    %845 = vector.broadcast %844 : vector<1x32xf32> to vector<32x32xf32>
    %846 = arith.addf %842, %845 : vector<32x32xf32>
    %847 = arith.addf %670, %846 : vector<32x32xf32>
    %c1_309 = arith.constant 1 : index
    %c0_310 = arith.constant 0 : index
    %c0_311 = arith.constant 0 : index
    %848 = vector.load %arg24[%c1_309, %c0_310, %c0_311] : memref<2x1x32xf32, #tpu.memory_space<vmem>>, vector<1x1x32xf32>
    %849 = vector.shape_cast %848 : vector<1x1x32xf32> to vector<1x32xf32>
    %c1_312 = arith.constant 1 : index
    %c0_313 = arith.constant 0 : index
    %c0_314 = arith.constant 0 : index
    %850 = vector.load %arg25[%c1_312, %c0_313, %c0_314] : memref<2x1x32xf32, #tpu.memory_space<vmem>>, vector<1x1x32xf32>
    %851 = vector.shape_cast %850 : vector<1x1x32xf32> to vector<1x32xf32>
    %cst_315 = arith.constant dense<0.000000e+00> : vector<32xf32>
    %852 = vector.multi_reduction <add>, %847, %cst_315 [1] : vector<32x32xf32> to vector<32xf32>
    %853 = vector.shape_cast %852 : vector<32xf32> to vector<32x1xf32>
    %cst_316 = arith.constant 3.200000e+01 : f32
    %854 = vector.broadcast %cst_316 : f32 to vector<32x1xf32>
    %855 = arith.divf %853, %854 : vector<32x1xf32>
    %856 = vector.broadcast %855 : vector<32x1xf32> to vector<32x32xf32>
    %857 = arith.subf %847, %856 : vector<32x32xf32>
    %858 = arith.mulf %857, %857 : vector<32x32xf32>
    %cst_317 = arith.constant dense<0.000000e+00> : vector<32xf32>
    %859 = vector.multi_reduction <add>, %858, %cst_317 [1] : vector<32x32xf32> to vector<32xf32>
    %860 = vector.shape_cast %859 : vector<32xf32> to vector<32x1xf32>
    %cst_318 = arith.constant 3.200000e+01 : f32
    %861 = vector.broadcast %cst_318 : f32 to vector<32x1xf32>
    %862 = arith.divf %860, %861 : vector<32x1xf32>
    %cst_319 = arith.constant 9.99999974E-6 : f32
    %863 = vector.broadcast %cst_319 : f32 to vector<32x1xf32>
    %864 = arith.addf %862, %863 : vector<32x1xf32>
    %865 = math.rsqrt %864 : vector<32x1xf32>
    %866 = vector.broadcast %865 : vector<32x1xf32> to vector<32x32xf32>
    %867 = arith.mulf %857, %866 : vector<32x32xf32>
    %868 = vector.broadcast %849 : vector<1x32xf32> to vector<32x32xf32>
    %869 = arith.mulf %867, %868 : vector<32x32xf32>
    %870 = vector.broadcast %851 : vector<1x32xf32> to vector<32x32xf32>
    %871 = arith.addf %869, %870 : vector<32x32xf32>
    %c1_320 = arith.constant 1 : index
    %c0_321 = arith.constant 0 : index
    %c0_322 = arith.constant 0 : index
    %872 = vector.load %arg18[%c1_320, %c0_321, %c0_322] : memref<2x32x64xf32, #tpu.memory_space<vmem>>, vector<1x32x64xf32>
    %873 = vector.shape_cast %872 : vector<1x32x64xf32> to vector<32x64xf32>
    %cst_323 = arith.constant dense<0.000000e+00> : vector<32x64xf32>
    %874 = tpu.matmul %871, %873, %cst_323 {dimension_numbers = #tpu.dot_dimension_numbers<[1], [0], [0], [1], [0, 0, 1, 1], [], []>} : vector<32x32xf32>, vector<32x64xf32>, vector<32x64xf32> -> vector<32x64xf32>
    %c1_324 = arith.constant 1 : index
    %c0_325 = arith.constant 0 : index
    %c0_326 = arith.constant 0 : index
    %875 = vector.load %arg19[%c1_324, %c0_325, %c0_326] : memref<2x1x64xf32, #tpu.memory_space<vmem>>, vector<1x1x64xf32>
    %876 = vector.shape_cast %875 : vector<1x1x64xf32> to vector<1x64xf32>
    %877 = vector.broadcast %876 : vector<1x64xf32> to vector<32x64xf32>
    %878 = arith.addf %874, %877 : vector<32x64xf32>
    %cst_327 = arith.constant 0.000000e+00 : f32
    %879 = vector.broadcast %cst_327 : f32 to vector<32x64xf32>
    %880 = arith.maximumf %878, %879 : vector<32x64xf32>
    %c1_328 = arith.constant 1 : index
    %c0_329 = arith.constant 0 : index
    %c0_330 = arith.constant 0 : index
    %881 = vector.load %arg20[%c1_328, %c0_329, %c0_330] : memref<2x64x32xf32, #tpu.memory_space<vmem>>, vector<1x64x32xf32>
    %882 = vector.shape_cast %881 : vector<1x64x32xf32> to vector<64x32xf32>
    %cst_331 = arith.constant dense<0.000000e+00> : vector<32x32xf32>
    %883 = tpu.matmul %880, %882, %cst_331 {dimension_numbers = #tpu.dot_dimension_numbers<[1], [0], [0], [1], [0, 0, 1, 1], [], []>} : vector<32x64xf32>, vector<64x32xf32>, vector<32x32xf32> -> vector<32x32xf32>
    %c1_332 = arith.constant 1 : index
    %c0_333 = arith.constant 0 : index
    %c0_334 = arith.constant 0 : index
    %884 = vector.load %arg21[%c1_332, %c0_333, %c0_334] : memref<2x1x32xf32, #tpu.memory_space<vmem>>, vector<1x1x32xf32>
    %885 = vector.shape_cast %884 : vector<1x1x32xf32> to vector<1x32xf32>
    %886 = vector.broadcast %885 : vector<1x32xf32> to vector<32x32xf32>
    %887 = arith.addf %883, %886 : vector<32x32xf32>
    %888 = arith.addf %871, %887 : vector<32x32xf32>
    %c1_335 = arith.constant 1 : index
    %c0_336 = arith.constant 0 : index
    %c0_337 = arith.constant 0 : index
    %889 = vector.load %arg26[%c1_335, %c0_336, %c0_337] : memref<2x1x32xf32, #tpu.memory_space<vmem>>, vector<1x1x32xf32>
    %890 = vector.shape_cast %889 : vector<1x1x32xf32> to vector<1x32xf32>
    %c1_338 = arith.constant 1 : index
    %c0_339 = arith.constant 0 : index
    %c0_340 = arith.constant 0 : index
    %891 = vector.load %arg27[%c1_338, %c0_339, %c0_340] : memref<2x1x32xf32, #tpu.memory_space<vmem>>, vector<1x1x32xf32>
    %892 = vector.shape_cast %891 : vector<1x1x32xf32> to vector<1x32xf32>
    %cst_341 = arith.constant dense<0.000000e+00> : vector<32xf32>
    %893 = vector.multi_reduction <add>, %888, %cst_341 [1] : vector<32x32xf32> to vector<32xf32>
    %894 = vector.shape_cast %893 : vector<32xf32> to vector<32x1xf32>
    %cst_342 = arith.constant 3.200000e+01 : f32
    %895 = vector.broadcast %cst_342 : f32 to vector<32x1xf32>
    %896 = arith.divf %894, %895 : vector<32x1xf32>
    %897 = vector.broadcast %896 : vector<32x1xf32> to vector<32x32xf32>
    %898 = arith.subf %888, %897 : vector<32x32xf32>
    %899 = arith.mulf %898, %898 : vector<32x32xf32>
    %cst_343 = arith.constant dense<0.000000e+00> : vector<32xf32>
    %900 = vector.multi_reduction <add>, %899, %cst_343 [1] : vector<32x32xf32> to vector<32xf32>
    %901 = vector.shape_cast %900 : vector<32xf32> to vector<32x1xf32>
    %cst_344 = arith.constant 3.200000e+01 : f32
    %902 = vector.broadcast %cst_344 : f32 to vector<32x1xf32>
    %903 = arith.divf %901, %902 : vector<32x1xf32>
    %cst_345 = arith.constant 9.99999974E-6 : f32
    %904 = vector.broadcast %cst_345 : f32 to vector<32x1xf32>
    %905 = arith.addf %903, %904 : vector<32x1xf32>
    %906 = math.rsqrt %905 : vector<32x1xf32>
    %907 = vector.broadcast %906 : vector<32x1xf32> to vector<32x32xf32>
    %908 = arith.mulf %898, %907 : vector<32x32xf32>
    %909 = vector.broadcast %890 : vector<1x32xf32> to vector<32x32xf32>
    %910 = arith.mulf %908, %909 : vector<32x32xf32>
    %911 = vector.broadcast %892 : vector<1x32xf32> to vector<32x32xf32>
    %912 = arith.addf %910, %911 : vector<32x32xf32>
    %c0_346 = arith.constant 0 : index
    %c0_347 = arith.constant 0 : index
    %913 = vector.load %arg28[%c0_346, %c0_347] : memref<1x32xf32, #tpu.memory_space<vmem>>, vector<1x32xf32>
    %c0_348 = arith.constant 0 : index
    %c0_349 = arith.constant 0 : index
    %914 = vector.load %arg29[%c0_348, %c0_349] : memref<1x32xf32, #tpu.memory_space<vmem>>, vector<1x32xf32>
    %cst_350 = arith.constant dense<0.000000e+00> : vector<32xf32>
    %915 = vector.multi_reduction <add>, %912, %cst_350 [1] : vector<32x32xf32> to vector<32xf32>
    %916 = vector.shape_cast %915 : vector<32xf32> to vector<32x1xf32>
    %cst_351 = arith.constant 3.200000e+01 : f32
    %917 = vector.broadcast %cst_351 : f32 to vector<32x1xf32>
    %918 = arith.divf %916, %917 : vector<32x1xf32>
    %919 = vector.broadcast %918 : vector<32x1xf32> to vector<32x32xf32>
    %920 = arith.subf %912, %919 : vector<32x32xf32>
    %921 = arith.mulf %920, %920 : vector<32x32xf32>
    %cst_352 = arith.constant dense<0.000000e+00> : vector<32xf32>
    %922 = vector.multi_reduction <add>, %921, %cst_352 [1] : vector<32x32xf32> to vector<32xf32>
    %923 = vector.shape_cast %922 : vector<32xf32> to vector<32x1xf32>
    %cst_353 = arith.constant 3.200000e+01 : f32
    %924 = vector.broadcast %cst_353 : f32 to vector<32x1xf32>
    %925 = arith.divf %923, %924 : vector<32x1xf32>
    %cst_354 = arith.constant 9.99999974E-6 : f32
    %926 = vector.broadcast %cst_354 : f32 to vector<32x1xf32>
    %927 = arith.addf %925, %926 : vector<32x1xf32>
    %928 = math.rsqrt %927 : vector<32x1xf32>
    %929 = vector.broadcast %928 : vector<32x1xf32> to vector<32x32xf32>
    %930 = arith.mulf %920, %929 : vector<32x32xf32>
    %931 = vector.broadcast %913 : vector<1x32xf32> to vector<32x32xf32>
    %932 = arith.mulf %930, %931 : vector<32x32xf32>
    %933 = vector.broadcast %914 : vector<1x32xf32> to vector<32x32xf32>
    %934 = arith.addf %932, %933 : vector<32x32xf32>
    %c0_355 = arith.constant 0 : index
    %c0_356 = arith.constant 0 : index
    %935 = vector.load %arg30[%c0_355, %c0_356] : memref<32x4xf32, #tpu.memory_space<vmem>>, vector<32x4xf32>
    %cst_357 = arith.constant dense<0.000000e+00> : vector<32x4xf32>
    %936 = tpu.matmul %934, %935, %cst_357 {dimension_numbers = #tpu.dot_dimension_numbers<[1], [0], [0], [1], [0, 0, 1, 1], [], []>} : vector<32x32xf32>, vector<32x4xf32>, vector<32x4xf32> -> vector<32x4xf32>
    %c0_358 = arith.constant 0 : index
    %c0_359 = arith.constant 0 : index
    %937 = vector.load %arg31[%c0_358, %c0_359] : memref<1x4xf32, #tpu.memory_space<vmem>>, vector<1x4xf32>
    %938 = vector.broadcast %937 : vector<1x4xf32> to vector<32x4xf32>
    %939 = arith.addf %936, %938 : vector<32x4xf32>
    %c0_360 = arith.constant 0 : index
    %c0_361 = arith.constant 0 : index
    %940 = vector.load %arg32[%c0_360, %c0_361] : memref<32x4xf32, #tpu.memory_space<vmem>>, vector<32x4xf32>
    tpu.vector_store %arg32[%c0_360, %c0_361], %939 {strides = array<i32>} : memref<32x4xf32, #tpu.memory_space<vmem>>, vector<32x4xf32>,
    return
  }
  func.func @transform_0(%arg0: i32, %arg1: memref<2xi32, #tpu.memory_space<smem>>, %arg2: memref<2xi32, #tpu.memory_space<smem>>) -> (i32, i32) {
    %c0_i32 = arith.constant 0 : i32
    %c0_i32_0 = arith.constant 0 : i32
    %c0_i32_1 = arith.constant 0 : i32
    return %c0_i32, %c0_i32_0 : i32, i32
  }
  func.func @transform_1(%arg0: i32, %arg1: memref<2xi32, #tpu.memory_space<smem>>, %arg2: memref<2xi32, #tpu.memory_space<smem>>) -> (i32, i32) {
    %c0_i32 = arith.constant 0 : i32
    %c0_i32_0 = arith.constant 0 : i32
    %c0_i32_1 = arith.constant 0 : i32
    return %c0_i32, %c0_i32_0 : i32, i32
  }
  func.func @transform_2(%arg0: i32, %arg1: memref<2xi32, #tpu.memory_space<smem>>, %arg2: memref<2xi32, #tpu.memory_space<smem>>) -> (i32, i32) {
    %c0_i32 = arith.constant 0 : i32
    %c0_i32_0 = arith.constant 0 : i32
    %c0_i32_1 = arith.constant 0 : i32
    return %c0_i32, %c0_i32_0 : i32, i32
  }
  func.func @transform_3(%arg0: i32, %arg1: memref<2xi32, #tpu.memory_space<smem>>, %arg2: memref<2xi32, #tpu.memory_space<smem>>) -> (i32, i32) {
    %c0_i32 = arith.constant 0 : i32
    %c0_i32_0 = arith.constant 0 : i32
    %c0_i32_1 = arith.constant 0 : i32
    return %c0_i32, %c0_i32_0 : i32, i32
  }
  func.func @transform_4(%arg0: i32, %arg1: memref<2xi32, #tpu.memory_space<smem>>, %arg2: memref<2xi32, #tpu.memory_space<smem>>) -> (i32, i32) {
    %c0_i32 = arith.constant 0 : i32
    %c0_i32_0 = arith.constant 0 : i32
    %c0_i32_1 = arith.constant 0 : i32
    return %c0_i32, %c0_i32_0 : i32, i32
  }
  func.func @transform_5(%arg0: i32, %arg1: memref<2xi32, #tpu.memory_space<smem>>, %arg2: memref<2xi32, #tpu.memory_space<smem>>) -> (i32, i32, i32) {
    %c0_i32 = arith.constant 0 : i32
    %c0_i32_0 = arith.constant 0 : i32
    %c0_i32_1 = arith.constant 0 : i32
    %c0_i32_2 = arith.constant 0 : i32
    return %c0_i32, %c0_i32_0, %c0_i32_1 : i32, i32, i32
  }
  func.func @transform_6(%arg0: i32, %arg1: memref<2xi32, #tpu.memory_space<smem>>, %arg2: memref<2xi32, #tpu.memory_space<smem>>) -> (i32, i32, i32) {
    %c0_i32 = arith.constant 0 : i32
    %c0_i32_0 = arith.constant 0 : i32
    %c0_i32_1 = arith.constant 0 : i32
    %c0_i32_2 = arith.constant 0 : i32
    return %c0_i32, %c0_i32_0, %c0_i32_1 : i32, i32, i32
  }
  func.func @transform_7(%arg0: i32, %arg1: memref<2xi32, #tpu.memory_space<smem>>, %arg2: memref<2xi32, #tpu.memory_space<smem>>) -> (i32, i32, i32) {
    %c0_i32 = arith.constant 0 : i32
    %c0_i32_0 = arith.constant 0 : i32
    %c0_i32_1 = arith.constant 0 : i32
    %c0_i32_2 = arith.constant 0 : i32
    return %c0_i32, %c0_i32_0, %c0_i32_1 : i32, i32, i32
  }
  func.func @transform_8(%arg0: i32, %arg1: memref<2xi32, #tpu.memory_space<smem>>, %arg2: memref<2xi32, #tpu.memory_space<smem>>) -> (i32, i32, i32) {
    %c0_i32 = arith.constant 0 : i32
    %c0_i32_0 = arith.constant 0 : i32
    %c0_i32_1 = arith.constant 0 : i32
    %c0_i32_2 = arith.constant 0 : i32
    return %c0_i32, %c0_i32_0, %c0_i32_1 : i32, i32, i32
  }
  func.func @transform_9(%arg0: i32, %arg1: memref<2xi32, #tpu.memory_space<smem>>, %arg2: memref<2xi32, #tpu.memory_space<smem>>) -> (i32, i32, i32) {
    %c0_i32 = arith.constant 0 : i32
    %c0_i32_0 = arith.constant 0 : i32
    %c0_i32_1 = arith.constant 0 : i32
    %c0_i32_2 = arith.constant 0 : i32
    return %c0_i32, %c0_i32_0, %c0_i32_1 : i32, i32, i32
  }
  func.func @transform_10(%arg0: i32, %arg1: memref<2xi32, #tpu.memory_space<smem>>, %arg2: memref<2xi32, #tpu.memory_space<smem>>) -> (i32, i32, i32) {
    %c0_i32 = arith.constant 0 : i32
    %c0_i32_0 = arith.constant 0 : i32
    %c0_i32_1 = arith.constant 0 : i32
    %c0_i32_2 = arith.constant 0 : i32
    return %c0_i32, %c0_i32_0, %c0_i32_1 : i32, i32, i32
  }
  func.func @transform_11(%arg0: i32, %arg1: memref<2xi32, #tpu.memory_space<smem>>, %arg2: memref<2xi32, #tpu.memory_space<smem>>) -> (i32, i32, i32) {
    %c0_i32 = arith.constant 0 : i32
    %c0_i32_0 = arith.constant 0 : i32
    %c0_i32_1 = arith.constant 0 : i32
    %c0_i32_2 = arith.constant 0 : i32
    return %c0_i32, %c0_i32_0, %c0_i32_1 : i32, i32, i32
  }
  func.func @transform_12(%arg0: i32, %arg1: memref<2xi32, #tpu.memory_space<smem>>, %arg2: memref<2xi32, #tpu.memory_space<smem>>) -> (i32, i32, i32) {
    %c0_i32 = arith.constant 0 : i32
    %c0_i32_0 = arith.constant 0 : i32
    %c0_i32_1 = arith.constant 0 : i32
    %c0_i32_2 = arith.constant 0 : i32
    return %c0_i32, %c0_i32_0, %c0_i32_1 : i32, i32, i32
  }
  func.func @transform_13(%arg0: i32, %arg1: memref<2xi32, #tpu.memory_space<smem>>, %arg2: memref<2xi32, #tpu.memory_space<smem>>) -> (i32, i32, i32) {
    %c0_i32 = arith.constant 0 : i32
    %c0_i32_0 = arith.constant 0 : i32
    %c0_i32_1 = arith.constant 0 : i32
    %c0_i32_2 = arith.constant 0 : i32
    return %c0_i32, %c0_i32_0, %c0_i32_1 : i32, i32, i32
  }
  func.func @transform_14(%arg0: i32, %arg1: memref<2xi32, #tpu.memory_space<smem>>, %arg2: memref<2xi32, #tpu.memory_space<smem>>) -> (i32, i32, i32) {
    %c0_i32 = arith.constant 0 : i32
    %c0_i32_0 = arith.constant 0 : i32
    %c0_i32_1 = arith.constant 0 : i32
    %c0_i32_2 = arith.constant 0 : i32
    return %c0_i32, %c0_i32_0, %c0_i32_1 : i32, i32, i32
  }
  func.func @transform_15(%arg0: i32, %arg1: memref<2xi32, #tpu.memory_space<smem>>, %arg2: memref<2xi32, #tpu.memory_space<smem>>) -> (i32, i32, i32) {
    %c0_i32 = arith.constant 0 : i32
    %c0_i32_0 = arith.constant 0 : i32
    %c0_i32_1 = arith.constant 0 : i32
    %c0_i32_2 = arith.constant 0 : i32
    return %c0_i32, %c0_i32_0, %c0_i32_1 : i32, i32, i32
  }
  func.func @transform_16(%arg0: i32, %arg1: memref<2xi32, #tpu.memory_space<smem>>, %arg2: memref<2xi32, #tpu.memory_space<smem>>) -> (i32, i32, i32) {
    %c0_i32 = arith.constant 0 : i32
    %c0_i32_0 = arith.constant 0 : i32
    %c0_i32_1 = arith.constant 0 : i32
    %c0_i32_2 = arith.constant 0 : i32
    return %c0_i32, %c0_i32_0, %c0_i32_1 : i32, i32, i32
  }
  func.func @transform_17(%arg0: i32, %arg1: memref<2xi32, #tpu.memory_space<smem>>, %arg2: memref<2xi32, #tpu.memory_space<smem>>) -> (i32, i32, i32) {
    %c0_i32 = arith.constant 0 : i32
    %c0_i32_0 = arith.constant 0 : i32
    %c0_i32_1 = arith.constant 0 : i32
    %c0_i32_2 = arith.constant 0 : i32
    return %c0_i32, %c0_i32_0, %c0_i32_1 : i32, i32, i32
  }
  func.func @transform_18(%arg0: i32, %arg1: memref<2xi32, #tpu.memory_space<smem>>, %arg2: memref<2xi32, #tpu.memory_space<smem>>) -> (i32, i32, i32) {
    %c0_i32 = arith.constant 0 : i32
    %c0_i32_0 = arith.constant 0 : i32
    %c0_i32_1 = arith.constant 0 : i32
    %c0_i32_2 = arith.constant 0 : i32
    return %c0_i32, %c0_i32_0, %c0_i32_1 : i32, i32, i32
  }
  func.func @transform_19(%arg0: i32, %arg1: memref<2xi32, #tpu.memory_space<smem>>, %arg2: memref<2xi32, #tpu.memory_space<smem>>) -> (i32, i32, i32) {
    %c0_i32 = arith.constant 0 : i32
    %c0_i32_0 = arith.constant 0 : i32
    %c0_i32_1 = arith.constant 0 : i32
    %c0_i32_2 = arith.constant 0 : i32
    return %c0_i32, %c0_i32_0, %c0_i32_1 : i32, i32, i32
  }
  func.func @transform_20(%arg0: i32, %arg1: memref<2xi32, #tpu.memory_space<smem>>, %arg2: memref<2xi32, #tpu.memory_space<smem>>) -> (i32, i32, i32) {
    %c0_i32 = arith.constant 0 : i32
    %c0_i32_0 = arith.constant 0 : i32
    %c0_i32_1 = arith.constant 0 : i32
    %c0_i32_2 = arith.constant 0 : i32
    return %c0_i32, %c0_i32_0, %c0_i32_1 : i32, i32, i32
  }
  func.func @transform_21(%arg0: i32, %arg1: memref<2xi32, #tpu.memory_space<smem>>, %arg2: memref<2xi32, #tpu.memory_space<smem>>) -> (i32, i32, i32) {
    %c0_i32 = arith.constant 0 : i32
    %c0_i32_0 = arith.constant 0 : i32
    %c0_i32_1 = arith.constant 0 : i32
    %c0_i32_2 = arith.constant 0 : i32
    return %c0_i32, %c0_i32_0, %c0_i32_1 : i32, i32, i32
  }
  func.func @transform_22(%arg0: i32, %arg1: memref<2xi32, #tpu.memory_space<smem>>, %arg2: memref<2xi32, #tpu.memory_space<smem>>) -> (i32, i32, i32) {
    %c0_i32 = arith.constant 0 : i32
    %c0_i32_0 = arith.constant 0 : i32
    %c0_i32_1 = arith.constant 0 : i32
    %c0_i32_2 = arith.constant 0 : i32
    return %c0_i32, %c0_i32_0, %c0_i32_1 : i32, i32, i32
  }
  func.func @transform_23(%arg0: i32, %arg1: memref<2xi32, #tpu.memory_space<smem>>, %arg2: memref<2xi32, #tpu.memory_space<smem>>) -> (i32, i32, i32) {
    %c0_i32 = arith.constant 0 : i32
    %c0_i32_0 = arith.constant 0 : i32
    %c0_i32_1 = arith.constant 0 : i32
    %c0_i32_2 = arith.constant 0 : i32
    return %c0_i32, %c0_i32_0, %c0_i32_1 : i32, i32, i32
  }
  func.func @transform_24(%arg0: i32, %arg1: memref<2xi32, #tpu.memory_space<smem>>, %arg2: memref<2xi32, #tpu.memory_space<smem>>) -> (i32, i32, i32) {
    %c0_i32 = arith.constant 0 : i32
    %c0_i32_0 = arith.constant 0 : i32
    %c0_i32_1 = arith.constant 0 : i32
    %c0_i32_2 = arith.constant 0 : i32
    return %c0_i32, %c0_i32_0, %c0_i32_1 : i32, i32, i32
  }
  func.func @transform_25(%arg0: i32, %arg1: memref<2xi32, #tpu.memory_space<smem>>, %arg2: memref<2xi32, #tpu.memory_space<smem>>) -> (i32, i32) {
    %c0_i32 = arith.constant 0 : i32
    %c0_i32_0 = arith.constant 0 : i32
    %c0_i32_1 = arith.constant 0 : i32
    return %c0_i32, %c0_i32_0 : i32, i32
  }
  func.func @transform_26(%arg0: i32, %arg1: memref<2xi32, #tpu.memory_space<smem>>, %arg2: memref<2xi32, #tpu.memory_space<smem>>) -> (i32, i32) {
    %c0_i32 = arith.constant 0 : i32
    %c0_i32_0 = arith.constant 0 : i32
    %c0_i32_1 = arith.constant 0 : i32
    return %c0_i32, %c0_i32_0 : i32, i32
  }
  func.func @transform_27(%arg0: i32, %arg1: memref<2xi32, #tpu.memory_space<smem>>, %arg2: memref<2xi32, #tpu.memory_space<smem>>) -> (i32, i32) {
    %c0_i32 = arith.constant 0 : i32
    %c0_i32_0 = arith.constant 0 : i32
    %c0_i32_1 = arith.constant 0 : i32
    return %c0_i32, %c0_i32_0 : i32, i32
  }
  func.func @transform_28(%arg0: i32, %arg1: memref<2xi32, #tpu.memory_space<smem>>, %arg2: memref<2xi32, #tpu.memory_space<smem>>) -> (i32, i32) {
    %c0_i32 = arith.constant 0 : i32
    %c0_i32_0 = arith.constant 0 : i32
    %c0_i32_1 = arith.constant 0 : i32
    return %c0_i32, %c0_i32_0 : i32, i32
  }
  func.func @transform_29(%arg0: i32, %arg1: memref<2xi32, #tpu.memory_space<smem>>, %arg2: memref<2xi32, #tpu.memory_space<smem>>) -> (i32, i32) {
    %c0_i32 = arith.constant 0 : i32
    %c0_i32_0 = arith.constant 0 : i32
    %c0_i32_1 = arith.constant 0 : i32
    return %c0_i32, %c0_i32_0 : i32, i32
  }
}

</mosaic_0001>

<bundles_post_ra>
// kernel: tfhw_forward.2
= control target key start
LH: loop header
LB: loop body
LE: loop exit
PB: predicated region body
PF: predicated region fallthrough
CT: control target
= control target key end

     0   :  { %s5112_s0 = inlined_call_operand.vmem [shape: s32[2], index: 0, kind: input, shape index: {}]   ;;  %s5113_s1 = inlined_call_operand.vmem [shape: f32[16,32], index: 1, kind: input, shape index: {}]   ;;  %s5114_s2 = inlined_call_operand.vmem [shape: f32[2,32,96], index: 2, kind: input, shape index: {}]   ;;  %s5115_s3 = inlined_call_operand.vmem [shape: f32[2,1,96], index: 3, kind: input, shape index: {}]   ;;  %s5116_s4 = inlined_call_operand.vmem [shape: f32[2,32,32], index: 4, kind: input, shape index: {}]   ;;  %s5117_s5 = inlined_call_operand.vmem [shape: f32[2,1,32], index: 5, kind: input, shape index: {}]   ;;  %s5118_s6 = inlined_call_operand.vmem [shape: f32[2,32,64], index: 6, kind: input, shape index: {}]   ;;  %s5119_s7 = inlined_call_operand.vmem [shape: f32[2,1,64], index: 7, kind: input, shape index: {}]   ;;  %s5120_s8 = inlined_call_operand.vmem [shape: f32[2,64,32], index: 8, kind: input, shape index: {}]   ;;  %s5121_s9 = inlined_call_operand.vmem [shape: f32[2,1,32], index: 9, kind: input, shape index: {}]   ;;  %s5122_s10 = inlined_call_operand.vmem [shape: f32[2,1,32], index: 10, kind: input, shape index: {}]   ;;  %s5123_s11 = inlined_call_operand.vmem [shape: f32[2,1,32], index: 11, kind: input, shape index: {}]   ;;  %s5124_s12 = inlined_call_operand.vmem [shape: f32[2,1,32], index: 12, kind: input, shape index: {}]   ;;  %s5125_s13 = inlined_call_operand.vmem [shape: f32[2,1,32], index: 13, kind: input, shape index: {}]   ;;  %s5126_s14 = inlined_call_operand.vmem [shape: f32[1,32], index: 14, kind: input, shape index: {}]   ;;  %s5127_s15 = inlined_call_operand.vmem [shape: f32[1,32], index: 15, kind: input, shape index: {}]   ;;  %s5128_s16 = inlined_call_operand.vmem [shape: f32[16,32], index: 16, kind: output, shape index: {}]  }
   0x1   :  { %5142 = sst [smem:[#allocation5_spill]] %s5112_s0 }
   0x2   :  { %5143 = sst [smem:[#allocation6_spill]] %s5121_s9 }
   0x3   :  { %s5144_s23 = sld [smem:[#allocation5_spill]] }
   0x9   :  { %s21_s9 = sshll.u32 %s5144_s23, 4  ;;  %s22_s9 = int_to_ptr.vmem [resolvable:$true] %s21_s9 }
   0xa   :  { %s4393_s24 = scalar_lea.vmem %s22_s9, 16  ;;  %p4398_p1 = scmp.lt.s32.totalorder %s22_s9, %s22_s9 }
   0xb   :  { %p4394_p0 = scmp.ne.s32.totalorder %s22_s9, %s4393_s24  ;;  %p4399_p2 = scmp.lt.s32.totalorder %s4393_s24, %s4393_s24 }
   0xd   :  { %p4400_p3 = por %p4399_p2, %p4398_p1 }
   0xf   :  { %p4401_p4 = pnand %p4400_p3, %p4394_p0 }
  0x11   :  { %4404 = shalt.err (!%p4401_p4)  }
  0x12   :  { %s4407_s25 = smov [#allocation3]  }
  0x13   :  { %24 = dma.vmem_to_smem %s22_s9, 16, %s4407_s25, [#allocation2] }
  0x14   :  { %4405 = dma.done.wait [#allocation2], 16 }
  0x15   :  { %4406 = vsyncadd [#allocation2], 4294967280 }
  0x16   :  { %26 = sfence }
  0x17   :  { %v72_v0 = vld [vmem:[%s5114_s2 + $0x18] sm:$0xff]  ;;  %v71_v1 = vld [vmem:[%s5114_s2 + $0x10] sm:$0xff]  ;;  %vm80_vm0 = vcmask 261120   ;;  %v4521_v2 = vld [vmem:[%s5113_s1] sm:$0xff]  ;;  %v4408_v6 = vmov 0.0   ;;  %vm4409_vm1 = vmmov 0   ;;  %v57_v27 = vlaneseq }
  0x18   :  { %4028 = vmatprep.subr.mxu1 %v72_v0  ;;  %v70_v3 = vld [vmem:[%s5114_s2 + $0x8] sm:$0xff]  ;;  %4036 = vmatprep.mubr.msk.f32.mxu1 %vm80_vm0, %v4521_v2  ;;  %v69_v4 = vld [vmem:[%s5114_s2] sm:$0xff]  ;;  %s4410_s23 = smov 120   ;;  %s4411_s24 = smov 96   ;;  %vm165_vm2 = vcmask 64512   ;;  %vm843_vm5 = vcmask 130048  }
  0x19   :  { %4029 = vmatpush3.msra.mxu1 %v72_v0  ;;  %v4534_v5 = vld [vmem:[%s5113_s1 + $0x8] sm:$0xff]  ;;  %4049 = vmatprep.subr.mxu0 %v4408_v6  ;;  %v3798_v8 = vld [vmem:[%s5115_s3] ss:$0 sm:$0xff]  ;;  %s4412_s25 = smov 80   ;;  %s4413_s26 = smov 88   ;;  %v58_v28 = vand.u32 127, %v57_v27 }
  0x1a   :  { %4030 = vmatprep.subr.mxu1 %v71_v1  ;;  %4051 = vmatprep.mubr.msk.f32.mxu0 %vm4409_vm1, %v4408_v6  ;;  %s5138_s27 = smov 72   ;;  %s4415_s28 = smov 112   ;;  %vm845_vm6 = vcmask 195584   ;;  %vm1777_vm7 = vcmask 523264  }
  0x1b   :  { %4031 = vmatpush3.msra.mxu1 %v71_v1  ;;  %s4416_s29 = smov 104   ;;  %s5134_s30 = smov 56  }
  0x1c   :  { %4032 = vmatprep.subr.mxu1 %v70_v3  ;;  %s5136_s0 = smov 64   ;;  %s59_s9 = sld [smem:[#allocation3]] }
  0x1d   :  { %4033 = vmatpush3.msra.mxu1 %v70_v3  ;;  %s3797_s17 = sld [smem:[#allocation3 + $0x1]]  ;;  %s5132_s18 = smov 40  }
  0x1e   :  { %4034 = vmatprep.subr.mxu1 %v69_v4  ;;  %s5130_s19 = smov 48   ;;  %s4421_s20 = smov 8  }
  0x1f   :  { %4035 = vmatpush3.msra.mxu1 %v69_v4  ;;  %s4422_s21 = smov 16   ;;  %s5140_s1 = smov 24  }
  0x20   :  { %4037 = vmatmul.mubr.msk.f32.vlgmr.msra.gmra.mxu1 %vm80_vm0, %v4534_v5  ;;  %4039 = vmatprep.subr.mxu1 %v4408_v6 }
  0x21   :  { %4041 = vmatprep.mubr.msk.f32.mxu1 %vm4409_vm1, %v4408_v6 }
  0x22   :  { %v60_v29 = vstv %s59_s9 }
  0x23   :  { %vm61_vm3 = vcmp.ge.s32.totalorder %v58_v28, %v60_v29  ;;  %v64_v44 = vstv %s3797_s17  ;;  %s5147_s17 = smov 64  }
  0x24   :  { %v4624_v31 = vsel %vm61_vm3, -1e+30, %v4408_v6  ;;  %vm65_vm4 = vcmp.ge.s32.totalorder %v58_v28, %v64_v44 }
  0x25   :  { %v4634_v52 = vsel %vm65_vm4, -1e+30, %v4408_v6 }
  0xe0   :  { %v4038_v7 = vpop.f32.mrf.mxu1 }
  0xe1   :  { %v4561_v11 = vadd.f32 %v4038_v7, %v3798_v8 }
  0xe2   :  { %v153_v9 = vpop.f32.mrf.mxu1 }
  0xe3   :  { %v4547_v10 = vadd.f32 %v3798_v8, %v153_v9 }
  0xe5   :  { %329 = vrot.lane.b32.xlu1 %v4547_v10, %s4410_s23  ;;  %163 = vrot.lane.b32.xlu0 %v4547_v10, %s4411_s24 }
  0xe9   :  { %498 = vrot.lane.b32.xlu1 %v4547_v10, %s4412_s25  ;;  %331 = vrot.lane.b32.xlu0 %v4547_v10, %s4413_s26 }
  0xed   :  { %665 = vrot.lane.b32.xlu1 %v4547_v10, %s5138_s27  ;;  %496 = vrot.lane.b32.xlu0 %v4547_v10, %s4415_s28 }
  0xf1   :  { %848 = vrot.lane.b32.xlu1 %v4561_v11, %s4411_s24  ;;  %663 = vrot.lane.b32.xlu0 %v4547_v10, %s4416_s29 }
  0xf5   :  { %1013 = vrot.lane.b32.xlu1 %v4561_v11, %s4410_s23  ;;  %1015 = vrot.lane.b32.xlu0 %v4561_v11, %s4413_s26 }
  0xf9   :  { %1180 = vrot.lane.b32.xlu1 %v4561_v11, %s4415_s28  ;;  %1182 = vrot.lane.b32.xlu0 %v4561_v11, %s4412_s25 }
  0xfd   :  { %1347 = vrot.lane.b32.xlu1 %v4561_v11, %s4416_s29  ;;  %1349 = vrot.lane.b32.xlu0 %v4561_v11, %s5138_s27 }
 0x101   :  { %420 = vrot.lane.b32.xlu1 %v4547_v10, %s5134_s30  ;;  %253 = vrot.lane.b32.xlu0 %v4547_v10, %s5136_s0 }
 0x157   :  { %v330_v12 = vpop.permute.xlu1 %329  ;;  %v164_v13 = vpop.permute.xlu0 %163 }
 0x158   :  { %4040 = vmatpush3.xpose.msk.msra.mxu1 %vm165_vm2, %v164_v13 }
 0x159   :  { %4044 = vmatprep.subr.mxu1 %v4408_v6 }
 0x15b   :  { %v499_v14 = vpop.permute.xlu1 %498  ;;  %v332_v15 = vpop.permute.xlu0 %331  ;;  %4042 = vmatmul.mubr.msk.f32.vlgmr.msra.gmra.mxu1 %vm165_vm2, %v4547_v10 }
 0x15c   :  { %4050 = vmatpush3.xpose.msk.msra.mxu0 %vm165_vm2, %v332_v15  ;;  %4046 = vmatprep.mubr.msk.f32.mxu1 %vm4409_vm1, %v4408_v6 }
 0x15d   :  { %4059 = vmatprep.subr.mxu0 %v4408_v6 }
 0x15f   :  { %v666_v16 = vpop.permute.xlu1 %665  ;;  %v497_v17 = vpop.permute.xlu0 %496  ;;  %4052 = vmatmul.mubr.msk.f32.vlgmr.msra.gmra.mxu0 %vm165_vm2, %v330_v12 }
 0x160   :  { %4060 = vmatpush3.xpose.msk.msra.mxu0 %vm165_vm2, %v499_v14  ;;  %4061 = vmatprep.mubr.msk.f32.mxu0 %vm4409_vm1, %v4408_v6 }
 0x161   :  { %4069 = vmatprep.subr.mxu0 %v4408_v6 }
 0x163   :  { %v664_v18 = vpop.permute.xlu0 %663  ;;  %4062 = vmatmul.mubr.msk.f32.vlgmr.msra.gmra.mxu0 %vm165_vm2, %v497_v17  ;;  %v849_v19 = vpop.permute.xlu1 %848 }
 0x164   :  { %4070 = vmatpush3.xpose.msk.msra.mxu0 %vm165_vm2, %v666_v16  ;;  %4071 = vmatprep.mubr.msk.f32.mxu0 %vm4409_vm1, %v4408_v6 }
 0x165   :  { %4079 = vmatprep.subr.mxu0 %v4408_v6 }
 0x167   :  { %v1016_v20 = vpop.permute.xlu0 %1015  ;;  %4072 = vmatmul.mubr.msk.f32.vlgmr.msra.gmra.mxu0 %vm165_vm2, %v664_v18  ;;  %v1014_v21 = vpop.permute.xlu1 %1013 }
 0x168   :  { %4080 = vmatpush3.xpose.msk.msra.mxu0 %vm165_vm2, %v849_v19  ;;  %4081 = vmatprep.mubr.msk.f32.mxu0 %vm4409_vm1, %v4408_v6 }
 0x169   :  { %4089 = vmatprep.subr.mxu0 %v4408_v6 }
 0x16b   :  { %v1183_v22 = vpop.permute.xlu0 %1182  ;;  %4082 = vmatmul.mubr.msk.f32.vlgmr.msra.gmra.mxu0 %vm165_vm2, %v4561_v11  ;;  %v1181_v24 = vpop.permute.xlu1 %1180 }
 0x16c   :  { %4090 = vmatpush3.xpose.msk.msra.mxu0 %vm165_vm2, %v1016_v20  ;;  %4091 = vmatprep.mubr.msk.f32.mxu0 %vm4409_vm1, %v4408_v6 }
 0x16d   :  { %4099 = vmatprep.subr.mxu0 %v4408_v6 }
 0x16f   :  { %v1350_v23 = vpop.permute.xlu0 %1349  ;;  %4092 = vmatmul.mubr.msk.f32.vlgmr.msra.gmra.mxu0 %vm165_vm2, %v1014_v21  ;;  %v1348_v26 = vpop.permute.xlu1 %1347 }
 0x170   :  { %4100 = vmatpush3.xpose.msk.msra.mxu0 %vm165_vm2, %v1183_v22  ;;  %4101 = vmatprep.mubr.msk.f32.mxu0 %vm4409_vm1, %v4408_v6 }
 0x171   :  { %4109 = vmatprep.subr.mxu0 %v4408_v6 }
 0x173   :  { %v254_v25 = vpop.permute.xlu0 %253  ;;  %4102 = vmatmul.mubr.msk.f32.vlgmr.msra.gmra.mxu0 %vm165_vm2, %v1181_v24  ;;  %v4649_v14 = vpop.permute.xlu1 %420 }
 0x174   :  { %4045 = vmatpush3.msra.mxu1 %v254_v25  ;;  %4110 = vmatpush3.xpose.msk.msra.mxu0 %vm165_vm2, %v1350_v23 }
 0x175   :  { %4111 = vmatprep.mubr.msk.f32.mxu0 %vm4409_vm1, %v4408_v6  ;;  %4054 = vmatprep.subr.mxu1 %v4408_v6 }
 0x177   :  { %4112 = vmatmul.mubr.msk.f32.vlgmr.msra.gmra.mxu0 %vm165_vm2, %v1348_v26 }
 0x21b   :  { %v236_v30 = vpop.f32.mrf.mxu1 }
 0x21c   :  { %v240_v32 = vmul.f32 0.35355338, %v236_v30 }
 0x21d   :  { %v4043_v33 = vpop.f32.mrf.mxu1 }
 0x21e   :  { %v241_v34 = vadd.f32 %v240_v32, %v4624_v31 }
 0x21f   :  { %v403_v35 = vpop.f32.mrf.mxu0 }
 0x220   :  { %v407_v36 = vmul.f32 0.35355338, %v403_v35  ;;  %v242_v37 = vsel %vm165_vm2, %v241_v34, -inf }
 0x221   :  { %v4053_v38 = vpop.f32.mrf.mxu0  ;;  %243 = vmax.xlane.f32.xlu0 %v242_v37 }
 0x222   :  { %v408_v39 = vadd.f32 %v407_v36, %v4624_v31 }
 0x223   :  { %v570_v40 = vpop.f32.mrf.mxu0 }
 0x224   :  { %v574_v41 = vmul.f32 0.35355338, %v570_v40  ;;  %v409_v42 = vsel %vm165_vm2, %v408_v39, -inf }
 0x225   :  { %v4063_v43 = vpop.f32.mrf.mxu0  ;;  %410 = vmax.xlane.f32.xlu1 %v409_v42 }
 0x226   :  { %v575_v45 = vadd.f32 %v574_v41, %v4624_v31 }
 0x227   :  { %v737_v46 = vpop.f32.mrf.mxu0 }
 0x228   :  { %v741_v47 = vmul.f32 0.35355338, %v737_v46  ;;  %v576_v48 = vsel %vm165_vm2, %v575_v45, -inf }
 0x229   :  { %v4073_v49 = vpop.f32.mrf.mxu0  ;;  %577 = vmax.xlane.f32.xlu0 %v576_v48 }
 0x22a   :  { %v742_v50 = vadd.f32 %v741_v47, %v4624_v31 }
 0x22b   :  { %v920_v51 = vpop.f32.mrf.mxu0 }
 0x22c   :  { %v924_v53 = vmul.f32 0.35355338, %v920_v51  ;;  %v743_v54 = vsel %vm165_vm2, %v742_v50, -inf }
 0x22d   :  { %v4083_v55 = vpop.f32.mrf.mxu0  ;;  %744 = vmax.xlane.f32.xlu0 %v743_v54 }
 0x22e   :  { %v925_v56 = vadd.f32 %v924_v53, %v4634_v52 }
 0x22f   :  { %v1087_v57 = vpop.f32.mrf.mxu0 }
 0x230   :  { %v1091_v58 = vmul.f32 0.35355338, %v1087_v57  ;;  %v926_v59 = vsel %vm165_vm2, %v925_v56, -inf }
 0x231   :  { %v4093_v60 = vpop.f32.mrf.mxu0  ;;  %927 = vmax.xlane.f32.xlu1 %v926_v59 }
 0x232   :  { %v1092_v61 = vadd.f32 %v1091_v58, %v4634_v52 }
 0x233   :  { %v1254_v62 = vpop.f32.mrf.mxu0 }
 0x234   :  { %v1258_v63 = vmul.f32 0.35355338, %v1254_v62  ;;  %v1093_v0 = vsel %vm165_vm2, %v1092_v61, -inf }
 0x235   :  { %v4103_v1 = vpop.f32.mrf.mxu0  ;;  %1094 = vmax.xlane.f32.xlu0 %v1093_v0 }
 0x236   :  { %v1259_v3 = vadd.f32 %v1258_v63, %v4634_v52 }
 0x237   :  { %v1421_v4 = vpop.f32.mrf.mxu0 }
 0x238   :  { %v1425_v7 = vmul.f32 0.35355338, %v1421_v4  ;;  %v1260_v8 = vsel %vm165_vm2, %v1259_v3, -inf }
 0x239   :  { %v4113_v9 = vpop.f32.mrf.mxu0  ;;  %1261 = vmax.xlane.f32.xlu1 %v1260_v8 }
 0x23a   :  { %v1426_v12 = vadd.f32 %v1425_v7, %v4634_v52 }
 0x23c   :  { %v1427_v13 = vsel %vm165_vm2, %v1426_v12, -inf }
 0x23d   :  { %1428 = vmax.xlane.f32.xlu0 %v1427_v13 }
 0x24a   :  { %754 = vrot.lane.b32.xlu1 %v4547_v10, %s5132_s18 }
 0x253   :  { %587 = vrot.lane.b32.xlu0 %v4547_v10, %s5130_s19 }
 0x2aa   :  { %v244_v15 = vpop.xlane.xlu0 %243 }
 0x2ab   :  { %v245_v16 = vsub.f32 %v241_v34, %v244_v15 }
 0x2ad   :  { %v246_v17 = vmul.f32 1.442695, %v245_v16 }
 0x2ae   :  { %v411_v18 = vpop.xlane.xlu1 %410 }
 0x2af   :  { %4309 = vpow2.f32 %v246_v17  ;;  %v412_v19 = vsub.f32 %v408_v39, %v411_v18 }
 0x2b1   :  { %v413_v20 = vmul.f32 1.442695, %v412_v19 }
 0x2b2   :  { %v578_v21 = vpop.xlane.xlu0 %577 }
 0x2b3   :  { %4311 = vpow2.f32 %v413_v20  ;;  %v579_v22 = vsub.f32 %v575_v45, %v578_v21 }
 0x2b5   :  { %v580_v23 = vmul.f32 1.442695, %v579_v22 }
 0x2b6   :  { %v745_v24 = vpop.xlane.xlu0 %744 }
 0x2b7   :  { %4313 = vpow2.f32 %v580_v23  ;;  %v746_v25 = vsub.f32 %v742_v50, %v745_v24 }
 0x2b9   :  { %v747_v26 = vmul.f32 1.442695, %v746_v25 }
 0x2ba   :  { %v928_v35 = vpop.xlane.xlu1 %927 }
 0x2bb   :  { %4315 = vpow2.f32 %v747_v26  ;;  %v929_v36 = vsub.f32 %v925_v56, %v928_v35  ;;  %v1531_v35 = vld [vmem:[%s5116_s4 + $0x10] sm:$0xff] }
 0x2bc   :  { %v4310_v27 = vpop.eup %4309 }
 0x2bd   :  { %v248_v10 = vsel %vm165_vm2, %v4310_v27, 0.0  ;;  %v930_v40 = vmul.f32 1.442695, %v929_v36  ;;  %v1530_v36 = vld [vmem:[%s5116_s4 + $0x8] sm:$0xff] }
 0x2be   :  { %249 = vadd.xlane.f32.xlu1 %v248_v10  ;;  %v1095_v37 = vpop.xlane.xlu0 %1094 }
 0x2bf   :  { %v1096_v39 = vsub.f32 %v1092_v61, %v1095_v37  ;;  %4317 = vpow2.f32 %v930_v40  ;;  %v1529_v37 = vld [vmem:[%s5116_s4] sm:$0xff] }
 0x2c0   :  { %v4312_v28 = vpop.eup %4311 }
 0x2c1   :  { %v415_v29 = vsel %vm165_vm2, %v4312_v28, 0.0  ;;  %v1097_v43 = vmul.f32 1.442695, %v1096_v39 }
 0x2c2   :  { %416 = vadd.xlane.f32.xlu0 %v415_v29  ;;  %v1262_v38 = vpop.xlane.xlu1 %1261 }
 0x2c3   :  { %v1263_v41 = vsub.f32 %v1259_v3, %v1262_v38  ;;  %4319 = vpow2.f32 %v1097_v43 }
 0x2c4   :  { %v4314_v30 = vpop.eup %4313 }
 0x2c5   :  { %v582_v32 = vsel %vm165_vm2, %v4314_v30, 0.0  ;;  %v1264_v44 = vmul.f32 1.442695, %v1263_v41 }
 0x2c6   :  { %583 = vadd.xlane.f32.xlu1 %v582_v32  ;;  %v1429_v42 = vpop.xlane.xlu0 %1428  ;;  %v755_v56 = vpop.permute.xlu1 %754 }
 0x2c7   :  { %v1430_v45 = vsub.f32 %v1426_v12, %v1429_v42  ;;  %4321 = vpow2.f32 %v1264_v44 }
 0x2c8   :  { %v4654_v33 = vpop.eup %4315 }
 0x2c9   :  { %v749_v34 = vsel %vm165_vm2, %v4654_v33, 0.0  ;;  %v1431_v46 = vmul.f32 1.442695, %v1430_v45 }
 0x2ca   :  { %750 = vadd.xlane.f32.xlu0 %v749_v34  ;;  %v588_v57 = vpop.permute.xlu0 %587  ;;  %v1532_v34 = vld [vmem:[%s5116_s4 + $0x18] sm:$0xff] }
 0x2cb   :  { %4323 = vpow2.f32 %v1431_v46  ;;  %4119 = vmatprep.subr.mxu0 %v1532_v34 }
 0x2cc   :  { %v4318_v47 = vpop.eup %4317  ;;  %4120 = vmatpush3.msra.mxu0 %v1532_v34 }
 0x2cd   :  { %v932_v49 = vsel %vm165_vm2, %v4318_v47, 0.0  ;;  %4121 = vmatprep.subr.mxu0 %v1531_v35 }
 0x2ce   :  { %4122 = vmatpush3.msra.mxu0 %v1531_v35 }
 0x2cf   :  { %4123 = vmatprep.subr.mxu0 %v1530_v36 }
 0x2d0   :  { %v4662_v48 = vpop.eup %4319  ;;  %4124 = vmatpush3.msra.mxu0 %v1530_v36 }
 0x2d1   :  { %v1099_v53 = vsel %vm165_vm2, %v4662_v48, 0.0  ;;  %4125 = vmatprep.subr.mxu0 %v1529_v37 }
 0x2d2   :  { %4126 = vmatpush3.msra.mxu0 %v1529_v37 }
 0x2d4   :  { %v4665_v50 = vpop.eup %4321 }
 0x2d5   :  { %v1266_v51 = vsel %vm165_vm2, %v4665_v50, 0.0 }
 0x2d7   :  { %1104 = vrot.lane.b32.xlu1 %v4561_v11, %s5134_s30 }
 0x2d8   :  { %v4671_v54 = vpop.eup %4323 }
 0x2d9   :  { %v1433_v55 = vsel %vm165_vm2, %v4671_v54, 0.0 }
 0x2e0   :  { %937 = vrot.lane.b32.xlu0 %v4561_v11, %s5136_s0  ;;  %s5145_s0 = sld [smem:[#allocation6_spill]] }
 0x2fb   :  { %933 = vadd.xlane.f32.xlu1 %v932_v49 }
 0x2ff   :  { %1267 = vadd.xlane.f32.xlu1 %v1266_v51  ;;  %1100 = vadd.xlane.f32.xlu0 %v1099_v53 }
 0x303   :  { %1434 = vadd.xlane.f32.xlu1 %v1433_v55 }
 0x314   :  { %1438 = vrot.lane.b32.xlu1 %v4561_v11, %s5132_s18 }
 0x315   :  { %1271 = vrot.lane.b32.xlu0 %v4561_v11, %s5130_s19 }
 0x347   :  { %v250_v58 = vpop.xlane.xlu1 %249 }
 0x348   :  { %4325 = vrcp.f32 %v250_v58 }
 0x34b   :  { %v417_v59 = vpop.xlane.xlu0 %416 }
 0x34c   :  { %4327 = vrcp.f32 %v417_v59  ;;  %v3825_v59 = vld [vmem:[%s5117_s5] ss:$0 sm:$0xff] }
 0x34f   :  { %v584_v60 = vpop.xlane.xlu1 %583 }
 0x350   :  { %4329 = vrcp.f32 %v584_v60 }
 0x353   :  { %v751_v61 = vpop.xlane.xlu0 %750  ;;  %v1105_v9 = vpop.permute.xlu1 %1104 }
 0x354   :  { %4331 = vrcp.f32 %v751_v61 }
 0x355   :  { %v4326_v62 = vpop.eup %4325 }
 0x356   :  { %v252_v63 = vmul.f32 %v4326_v62, %v4310_v27 }
 0x357   :  { %v938_v8 = vpop.permute.xlu0 %937 }
 0x358   :  { %4047 = vmatmul.mubr.msk.f32.vlgmr.msra.gmra.mxu1 %vm165_vm2, %v252_v63 }
 0x359   :  { %v4328_v0 = vpop.eup %4327  ;;  %4055 = vmatpush3.msra.mxu1 %v4649_v14  ;;  %4056 = vmatprep.mubr.msk.f32.mxu1 %vm4409_vm1, %v4408_v6 }
 0x35a   :  { %4064 = vmatprep.subr.mxu1 %v4408_v6  ;;  %v419_v11 = vmul.f32 %v4328_v0, %v4312_v28 }
 0x35c   :  { %4057 = vmatmul.mubr.msk.f32.vlgmr.msra.gmra.mxu1 %vm165_vm2, %v419_v11 }
 0x35d   :  { %v4330_v1 = vpop.eup %4329  ;;  %4065 = vmatpush3.msra.mxu1 %v588_v57  ;;  %4066 = vmatprep.mubr.msk.f32.mxu1 %vm4409_vm1, %v4408_v6 }
 0x35e   :  { %4074 = vmatprep.subr.mxu1 %v4408_v6  ;;  %v586_v3 = vmul.f32 %v4330_v1, %v4314_v30 }
 0x360   :  { %4067 = vmatmul.mubr.msk.f32.vlgmr.msra.gmra.mxu1 %vm165_vm2, %v586_v3 }
 0x361   :  { %v4332_v4 = vpop.eup %4331  ;;  %4075 = vmatpush3.msra.mxu1 %v755_v56  ;;  %4076 = vmatprep.mubr.msk.f32.mxu1 %vm4409_vm1, %v4408_v6 }
 0x362   :  { %4084 = vmatprep.subr.mxu1 %v4408_v6  ;;  %v753_v7 = vmul.f32 %v4332_v4, %v4654_v33 }
 0x364   :  { %4077 = vmatmul.mubr.msk.f32.vlgmr.msra.gmra.mxu1 %vm165_vm2, %v753_v7 }
 0x365   :  { %4085 = vmatpush3.msra.mxu1 %v938_v8  ;;  %4086 = vmatprep.mubr.msk.f32.mxu1 %vm4409_vm1, %v4408_v6 }
 0x366   :  { %4094 = vmatprep.subr.mxu1 %v4408_v6 }
 0x384   :  { %v934_v12 = vpop.xlane.xlu1 %933 }
 0x385   :  { %4333 = vrcp.f32 %v934_v12 }
 0x388   :  { %v1268_v13 = vpop.xlane.xlu1 %1267  ;;  %v1101_v14 = vpop.xlane.xlu0 %1100 }
 0x389   :  { %4335 = vrcp.f32 %v1101_v14 }
 0x38a   :  { %4337 = vrcp.f32 %v1268_v13 }
 0x38c   :  { %v1435_v15 = vpop.xlane.xlu1 %1434  ;;  %v1272_v21 = vpop.permute.xlu0 %1271 }
 0x38d   :  { %4339 = vrcp.f32 %v1435_v15 }
 0x390   :  { %v1439_v24 = vpop.permute.xlu1 %1438 }
 0x392   :  { %v4334_v16 = vpop.eup %4333 }
 0x393   :  { %v936_v17 = vmul.f32 %v4334_v16, %v4318_v47 }
 0x395   :  { %4087 = vmatmul.mubr.msk.f32.vlgmr.msra.gmra.mxu1 %vm165_vm2, %v936_v17  ;;  %v1670_v17 = vld [vmem:[%s5118_s6 + $0x10] sm:$0xff] }
 0x396   :  { %4095 = vmatpush3.msra.mxu1 %v1105_v9  ;;  %4096 = vmatprep.mubr.msk.f32.mxu1 %vm4409_vm1, %v4408_v6  ;;  %v4336_v18 = vpop.eup %4335 }
 0x397   :  { %4104 = vmatprep.subr.mxu1 %v4408_v6  ;;  %v1103_v19 = vmul.f32 %v4336_v18, %v4662_v48  ;;  %v4338_v20 = vpop.eup %4337  ;;  %v1669_v18 = vld [vmem:[%s5118_s6 + $0x8] sm:$0xff] }
 0x398   :  { %v1270_v22 = vmul.f32 %v4338_v20, %v4665_v50  ;;  %v1769_v20 = vld [vmem:[%s5120_s8 + $0x38] sm:$0xff] }
 0x399   :  { %4097 = vmatmul.mubr.msk.f32.vlgmr.msra.gmra.mxu1 %vm165_vm2, %v1103_v19  ;;  %v1668_v19 = vld [vmem:[%s5118_s6] sm:$0xff]  ;;  %4141 = vmatprep.subr.mxu0 %v1769_v20 }
 0x39a   :  { %4105 = vmatpush3.msra.mxu1 %v1272_v21  ;;  %4106 = vmatprep.mubr.msk.f32.mxu1 %vm4409_vm1, %v4408_v6  ;;  %v4340_v23 = vpop.eup %4339  ;;  %v1768_v21 = vld [vmem:[%s5120_s8 + $0x30] sm:$0xff] }
 0x39b   :  { %4114 = vmatprep.subr.mxu1 %v4408_v6  ;;  %v1437_v25 = vmul.f32 %v4340_v23, %v4671_v54  ;;  %v1766_v23 = vld [vmem:[%s5120_s8 + $0x20] sm:$0xff] }
 0x39d   :  { %4107 = vmatmul.mubr.msk.f32.vlgmr.msra.gmra.mxu1 %vm165_vm2, %v1270_v22  ;;  %v1767_v22 = vld [vmem:[%s5120_s8 + $0x28] sm:$0xff] }
 0x39e   :  { %4115 = vmatpush3.msra.mxu1 %v1439_v24  ;;  %4116 = vmatprep.mubr.msk.f32.mxu1 %vm4409_vm1, %v4408_v6 }
 0x3a1   :  { %4117 = vmatmul.mubr.msk.f32.vlgmr.msra.gmra.mxu1 %vm165_vm2, %v1437_v25 }
 0x418   :  { %v325_v26 = vpop.f32.mrf.mxu1 }
 0x41a   :  { %v4048_v27 = vpop.f32.mrf.mxu1 }
 0x41c   :  { %v492_v10 = vpop.f32.mrf.mxu1 }
 0x41d   :  { %831 = vrot.lane.b32.xlu0 %v492_v10, %s4421_s20 }
 0x41e   :  { %v4058_v28 = vpop.f32.mrf.mxu1 }
 0x420   :  { %v659_v29 = vpop.f32.mrf.mxu1 }
 0x421   :  { %835 = vrot.lane.b32.xlu1 %v659_v29, %s4422_s21 }
 0x422   :  { %v4068_v30 = vpop.f32.mrf.mxu1 }
 0x423   :  { %v3828_v30 = vld [vmem:[%s5122_s10] ss:$0 sm:$0xff] }
 0x424   :  { %v826_v32 = vpop.f32.mrf.mxu1 }
 0x425   :  { %839 = vrot.lane.b32.xlu1 %v826_v32, %s5140_s1 }
 0x426   :  { %v4078_v33 = vpop.f32.mrf.mxu1 }
 0x427   :  { %v3829_v33 = vld [vmem:[%s5123_s11] ss:$0 sm:$0xff] }
 0x455   :  { %v1009_v38 = vpop.f32.mrf.mxu1 }
 0x457   :  { %v4088_v39 = vpop.f32.mrf.mxu1 }
 0x459   :  { %v1176_v40 = vpop.f32.mrf.mxu1 }
 0x45a   :  { %1515 = vrot.lane.b32.xlu0 %v1176_v40, %s4421_s20  ;;  %v1765_v40 = vld [vmem:[%s5120_s8 + $0x18] sm:$0xff] }
 0x45b   :  { %v4098_v41 = vpop.f32.mrf.mxu1 }
 0x45c   :  { %v1764_v41 = vld [vmem:[%s5120_s8 + $0x10] sm:$0xff] }
 0x45d   :  { %v1343_v42 = vpop.f32.mrf.mxu1 }
 0x45e   :  { %1519 = vrot.lane.b32.xlu0 %v1343_v42, %s4422_s21  ;;  %v1763_v42 = vld [vmem:[%s5120_s8 + $0x8] sm:$0xff] }
 0x45f   :  { %v4108_v43 = vpop.f32.mrf.mxu1 }
 0x460   :  { %v1762_v43 = vld [vmem:[%s5120_s8] sm:$0xff] }
 0x461   :  { %v1510_v44 = vpop.f32.mrf.mxu1 }
 0x462   :  { %1523 = vrot.lane.b32.xlu1 %v1510_v44, %s5140_s1  ;;  %v3830_v44 = vld [vmem:[%s5119_s7] ss:$0 sm:$0xff] }
 0x463   :  { %v4118_v45 = vpop.f32.mrf.mxu1 }
 0x48f   :  { %v832_v46 = vpop.permute.xlu0 %831 }
 0x490   :  { %v842_v48 = vsel %vm165_vm2, %v325_v26, %v832_v46 }
 0x493   :  { %v836_v47 = vpop.permute.xlu1 %835 }
 0x494   :  { %v844_v49 = vsel %vm843_vm5, %v842_v48, %v836_v47 }
 0x497   :  { %v840_v50 = vpop.permute.xlu1 %839 }
 0x498   :  { %v846_v51 = vsel %vm845_vm6, %v844_v49, %v840_v50 }
 0x499   :  { %4127 = vmatprep.mubr.msk.f32.mxu0 %vm80_vm0, %v846_v51  ;;  %v3833_v51 = vld [vmem:[%s5145_s0] ss:$0 sm:$0xff] }
 0x4cc   :  { %v1516_v53 = vpop.permute.xlu0 %1515 }
 0x4cd   :  { %v1526_v55 = vsel %vm165_vm2, %v1009_v38, %v1516_v53 }
 0x4d0   :  { %v1520_v54 = vpop.permute.xlu0 %1519 }
 0x4d1   :  { %v1527_v56 = vsel %vm843_vm5, %v1526_v55, %v1520_v54 }
 0x4d4   :  { %v1524_v57 = vpop.permute.xlu1 %1523 }
 0x4d5   :  { %v1528_v58 = vsel %vm845_vm6, %v1527_v56, %v1524_v57 }
 0x4d6   :  { %4128 = vmatmul.mubr.msk.f32.vlgmr.msra.gmra.mxu0 %vm80_vm0, %v1528_v58 }
 0x4d7   :  { %4142 = vmatpush3.msra.mxu0 %v1769_v20  ;;  %v3836_v20 = vld [vmem:[%s5124_s12] ss:$0 sm:$0xff] }
 0x4d8   :  { %4143 = vmatprep.subr.mxu0 %v1768_v21 }
 0x4d9   :  { %4144 = vmatpush3.msra.mxu0 %v1768_v21 }
 0x4da   :  { %4145 = vmatprep.subr.mxu0 %v1767_v22 }
 0x4db   :  { %4146 = vmatpush3.msra.mxu0 %v1767_v22 }
 0x4dc   :  { %4147 = vmatprep.subr.mxu0 %v1766_v23 }
 0x4dd   :  { %4148 = vmatpush3.msra.mxu0 %v1766_v23 }
 0x4de   :  { %4149 = vmatprep.subr.mxu0 %v1765_v40 }
 0x4df   :  { %4150 = vmatpush3.msra.mxu0 %v1765_v40 }
 0x4e0   :  { %4151 = vmatprep.subr.mxu0 %v1764_v41 }
 0x4e1   :  { %4152 = vmatpush3.msra.mxu0 %v1764_v41 }
 0x4e2   :  { %4153 = vmatprep.subr.mxu0 %v1763_v42 }
 0x4e3   :  { %4154 = vmatpush3.msra.mxu0 %v1763_v42 }
 0x4e4   :  { %4155 = vmatprep.subr.mxu0 %v1762_v43 }
 0x4e5   :  { %4156 = vmatpush3.msra.mxu0 %v1762_v43 }
 0x4e6   :  { %4181 = vmatprep.subr.mxu0 %v4408_v6 }
 0x596   :  { %v4129_v60 = vpop.f32.mrf.mxu0 }
 0x597   :  { %v1618_v61 = vadd.f32 %v4129_v60, %v3825_v59 }
 0x598   :  { %v1612_v62 = vpop.f32.mrf.mxu0 }
 0x599   :  { %v1613_v63 = vadd.f32 %v3825_v59, %v1612_v62  ;;  %v1622_v0 = vadd.f32 %v1618_v61, %v4534_v5 }
 0x59b   :  { %v1628_v11 = vsel %vm80_vm0, %v1622_v0, 0.0  ;;  %v1621_v1 = vadd.f32 %v1613_v63, %v4521_v2  ;;  %v1671_v2 = vld [vmem:[%s5118_s6 + $0x18] sm:$0xff] }
 0x59c   :  { %1629 = vadd.xlane.f32.xlu1 %v1628_v11  ;;  %4130 = vmatprep.subr.mxu1 %v1671_v2 }
 0x59d   :  { %v1625_v3 = vsel %vm80_vm0, %v1621_v1, 0.0  ;;  %4131 = vmatpush3.msra.mxu1 %v1671_v2 }
 0x59e   :  { %1626 = vadd.xlane.f32.xlu0 %v1625_v3  ;;  %4132 = vmatprep.subr.mxu1 %v1670_v17 }
 0x59f   :  { %4133 = vmatpush3.msra.mxu1 %v1670_v17 }
 0x5a0   :  { %4134 = vmatprep.subr.mxu1 %v1669_v18 }
 0x5a1   :  { %4135 = vmatpush3.msra.mxu1 %v1669_v18 }
 0x5a2   :  { %4136 = vmatprep.subr.mxu1 %v1668_v19 }
 0x5a3   :  { %4137 = vmatpush3.msra.mxu1 %v1668_v19 }
 0x625   :  { %v1630_v4 = vpop.xlane.xlu1 %1629 }
 0x626   :  { %v1633_v7 = vmul.f32 0.03125, %v1630_v4 }
 0x627   :  { %v1627_v8 = vpop.xlane.xlu0 %1626 }
 0x628   :  { %v1632_v9 = vmul.f32 0.03125, %v1627_v8  ;;  %v1635_v12 = vsub.f32 %v1622_v0, %v1633_v7 }
 0x62a   :  { %v1634_v13 = vsub.f32 %v1621_v1, %v1632_v9  ;;  %v1637_v16 = vmul.f32 %v1635_v12, %v1635_v12  ;;  %v3841_v9 = vld [vmem:[%s5114_s2 + $0x38] sm:$0xff] }
 0x62b   :  { %4160 = vmatprep.subr.mxu1 %v3841_v9 }
 0x62c   :  { %v1636_v14 = vmul.f32 %v1634_v13, %v1634_v13  ;;  %v1641_v5 = vsel %vm80_vm0, %v1637_v16, 0.0 }
 0x62e   :  { %v1638_v15 = vsel %vm80_vm0, %v1636_v14, 0.0  ;;  %v3838_v14 = vld [vmem:[%s5114_s2 + $0x20] sm:$0xff] }
 0x62f   :  { %1639 = vadd.xlane.f32.xlu0 %v1638_v15 }
 0x633   :  { %1642 = vadd.xlane.f32.xlu0 %v1641_v5 }
 0x6b8   :  { %v1640_v24 = vpop.xlane.xlu0 %1639 }
 0x6b9   :  { %v1644_v25 = vmul.f32 0.03125, %v1640_v24 }
 0x6bb   :  { %v1646_v26 = vadd.f32 1e-05, %v1644_v25  ;;  %v3837_v25 = vld [vmem:[%s5125_s13] ss:$0 sm:$0xff] }
 0x6bc   :  { %v1643_v27 = vpop.xlane.xlu0 %1642 }
 0x6bd   :  { %4341 = vrsqrt.f32 %v1646_v26  ;;  %v1645_v10 = vmul.f32 0.03125, %v1643_v27 }
 0x6bf   :  { %v1647_v28 = vadd.f32 1e-05, %v1645_v10 }
 0x6c1   :  { %4343 = vrsqrt.f32 %v1647_v28 }
 0x6ca   :  { %v4342_v29 = vpop.eup %4341 }
 0x6cb   :  { %v1650_v32 = vmul.f32 %v4342_v29, %v1634_v13  ;;  %v3839_v13 = vld [vmem:[%s5114_s2 + $0x28] sm:$0xff]  ;;  %v3843_v29 = vld [vmem:[%s5115_s3 + $0x1] ss:$0 sm:$0xff]  ;;  %s5146_s3 = smov 72  }
 0x6cd   :  { %v1658_v34 = vmul.f32 %v3828_v30, %v1650_v32 }
 0x6ce   :  { %v4344_v35 = vpop.eup %4343 }
 0x6cf   :  { %v1651_v36 = vmul.f32 %v4344_v35, %v1635_v12  ;;  %v1666_v37 = vadd.f32 %v3829_v33, %v1658_v34  ;;  %v3840_v12 = vld [vmem:[%s5114_s2 + $0x30] sm:$0xff] }
 0x6d1   :  { %v1659_v38 = vmul.f32 %v3828_v30, %v1651_v36  ;;  %4138 = vmatprep.mubr.msk.f32.mxu1 %vm80_vm0, %v1666_v37 }
 0x6d3   :  { %v1667_v39 = vadd.f32 %v3829_v33, %v1659_v38 }
 0x6d5   :  { %4139 = vmatmul.mubr.msk.f32.vlgmr.msra.gmra.mxu1 %vm80_vm0, %v1667_v39 }
 0x6d6   :  { %4161 = vmatpush3.msra.mxu1 %v3841_v9 }
 0x6d7   :  { %4162 = vmatprep.subr.mxu1 %v3840_v12 }
 0x6d8   :  { %4163 = vmatpush3.msra.mxu1 %v3840_v12 }
 0x6d9   :  { %4164 = vmatprep.subr.mxu1 %v3839_v13 }
 0x6da   :  { %4165 = vmatpush3.msra.mxu1 %v3839_v13 }
 0x6db   :  { %4166 = vmatprep.subr.mxu1 %v3838_v14 }
 0x6dc   :  { %4167 = vmatpush3.msra.mxu1 %v3838_v14 }
 0x6dd   :  { %4171 = vmatprep.subr.mxu1 %v4408_v6 }
 0x795   :  { %v4140_v45 = vpop.f32.mrf.mxu1 }
 0x796   :  { %v1757_v46 = vadd.f32 %v4140_v45, %v3830_v44 }
 0x797   :  { %v1751_v47 = vpop.f32.mrf.mxu1 }
 0x798   :  { %v1752_v48 = vadd.f32 %v3830_v44, %v1751_v47  ;;  %v1761_v50 = vmax.f32 %v1757_v46, 0.0 }
 0x79a   :  { %v1760_v49 = vmax.f32 %v1752_v48, 0.0 }
 0x79c   :  { %4157 = vmatprep.mubr.msk.f32.mxu0 %vm1777_vm7, %v1760_v49 }
 0x79d   :  { %4158 = vmatmul.mubr.msk.f32.vlgmr.msra.gmra.mxu0 %vm1777_vm7, %v1761_v50 }
 0x79e   :  { %4183 = vmatprep.mubr.msk.f32.mxu0 %vm4409_vm1, %v4408_v6 }
 0x85d   :  { %v4159_v53 = vpop.f32.mrf.mxu0 }
 0x85e   :  { %v1856_v54 = vadd.f32 %v4159_v53, %v3833_v51 }
 0x85f   :  { %v1850_v55 = vpop.f32.mrf.mxu0 }
 0x860   :  { %v1851_v56 = vadd.f32 %v3833_v51, %v1850_v55  ;;  %v1860_v57 = vadd.f32 %v1856_v54, %v1667_v39 }
 0x862   :  { %v1866_v58 = vsel %vm80_vm0, %v1860_v57, 0.0  ;;  %v1859_v59 = vadd.f32 %v1851_v56, %v1666_v37 }
 0x863   :  { %1867 = vadd.xlane.f32.xlu0 %v1866_v58 }
 0x864   :  { %v1863_v60 = vsel %vm80_vm0, %v1859_v59, 0.0 }
 0x865   :  { %1864 = vadd.xlane.f32.xlu1 %v1863_v60 }
 0x8ec   :  { %v1868_v61 = vpop.xlane.xlu0 %1867 }
 0x8ed   :  { %v1870_v62 = vmul.f32 0.03125, %v1868_v61 }
 0x8ee   :  { %v1865_v63 = vpop.xlane.xlu1 %1864 }
 0x8ef   :  { %v1872_v0 = vsub.f32 %v1860_v57, %v1870_v62  ;;  %v1869_v11 = vmul.f32 0.03125, %v1865_v63 }
 0x8f1   :  { %v1871_v1 = vsub.f32 %v1859_v59, %v1869_v11  ;;  %v1874_v3 = vmul.f32 %v1872_v0, %v1872_v0 }
 0x8f3   :  { %v1878_v4 = vsel %vm80_vm0, %v1874_v3, 0.0  ;;  %v1873_v7 = vmul.f32 %v1871_v1, %v1871_v1 }
 0x8f4   :  { %1879 = vadd.xlane.f32.xlu0 %v1878_v4 }
 0x8f5   :  { %v1875_v8 = vsel %vm80_vm0, %v1873_v7, 0.0 }
 0x8f6   :  { %1876 = vadd.xlane.f32.xlu1 %v1875_v8 }
 0x97d   :  { %v1880_v15 = vpop.xlane.xlu0 %1879 }
 0x97e   :  { %v1882_v16 = vmul.f32 0.03125, %v1880_v15 }
 0x97f   :  { %v1877_v5 = vpop.xlane.xlu1 %1876 }
 0x980   :  { %v1884_v2 = vadd.f32 1e-05, %v1882_v16  ;;  %v1881_v17 = vmul.f32 0.03125, %v1877_v5 }
 0x982   :  { %4345 = vrsqrt.f32 %v1884_v2  ;;  %v1883_v18 = vadd.f32 1e-05, %v1881_v17 }
 0x984   :  { %4347 = vrsqrt.f32 %v1883_v18 }
 0x98f   :  { %v4346_v19 = vpop.eup %4345 }
 0x990   :  { %v1888_v21 = vmul.f32 %v4346_v19, %v1872_v0 }
 0x991   :  { %v4348_v22 = vpop.eup %4347 }
 0x992   :  { %v1887_v23 = vmul.f32 %v4348_v22, %v1871_v1  ;;  %v1896_v24 = vmul.f32 %v3836_v20, %v1888_v21 }
 0x994   :  { %v1895_v26 = vmul.f32 %v3836_v20, %v1887_v23  ;;  %v4827_v10 = vadd.f32 %v3837_v25, %v1896_v24 }
 0x996   :  { %v4825_v27 = vadd.f32 %v3837_v25, %v1895_v26 }
 0x998   :  { %4168 = vmatprep.mubr.msk.f32.mxu1 %vm80_vm0, %v4825_v27 }
 0x999   :  { %4169 = vmatmul.mubr.msk.f32.vlgmr.msra.gmra.mxu1 %vm80_vm0, %v4827_v10 }
 0x99a   :  { %4173 = vmatprep.mubr.msk.f32.mxu1 %vm4409_vm1, %v4408_v6 }
 0xa59   :  { %v4170_v28 = vpop.f32.mrf.mxu1 }
 0xa5a   :  { %v4852_v33 = vadd.f32 %v4170_v28, %v3843_v29 }
 0xa5b   :  { %v1990_v30 = vpop.f32.mrf.mxu1 }
 0xa5c   :  { %v4838_v32 = vadd.f32 %v3843_v29, %v1990_v30 }
 0xa5e   :  { %2167 = vrot.lane.b32.xlu0 %v4838_v32, %s4413_s26  ;;  %2000 = vrot.lane.b32.xlu1 %v4838_v32, %s4411_s24 }
 0xa62   :  { %2332 = vrot.lane.b32.xlu0 %v4838_v32, %s4415_s28  ;;  %2165 = vrot.lane.b32.xlu1 %v4838_v32, %s4410_s23 }
 0xa66   :  { %2499 = vrot.lane.b32.xlu0 %v4838_v32, %s4416_s29  ;;  %2334 = vrot.lane.b32.xlu1 %v4838_v32, %s4412_s25 }
 0xa6a   :  { %2849 = vrot.lane.b32.xlu0 %v4852_v33, %s4413_s26  ;;  %2501 = vrot.lane.b32.xlu1 %v4838_v32, %s5146_s3  ;;  %s5148_s26 = smov 56  }
 0xa6e   :  { %3016 = vrot.lane.b32.xlu0 %v4852_v33, %s4412_s25  ;;  %2682 = vrot.lane.b32.xlu1 %v4852_v33, %s4411_s24  ;;  %s5150_s24 = smov 48   ;;  %s5151_s25 = smov 24  }
 0xa72   :  { %3183 = vrot.lane.b32.xlu0 %v4852_v33, %s5146_s3  ;;  %2847 = vrot.lane.b32.xlu1 %v4852_v33, %s4410_s23  ;;  %s5149_s23 = smov 40  }
 0xa76   :  { %2089 = vrot.lane.b32.xlu0 %v4838_v32, %s5147_s17  ;;  %3014 = vrot.lane.b32.xlu1 %v4852_v33, %s4415_s28 }
 0xa7a   :  { %3181 = vrot.lane.b32.xlu1 %v4852_v33, %s4416_s29 }
 0xa7e   :  { %2256 = vrot.lane.b32.xlu1 %v4838_v32, %s5148_s26 }
 0xad0   :  { %v2168_v34 = vpop.permute.xlu0 %2167  ;;  %v2001_v35 = vpop.permute.xlu1 %2000 }
 0xad1   :  { %4172 = vmatpush3.xpose.msk.msra.mxu1 %vm165_vm2, %v2001_v35  ;;  %4182 = vmatpush3.xpose.msk.msra.mxu0 %vm165_vm2, %v2168_v34 }
 0xad2   :  { %4191 = vmatprep.subr.mxu0 %v4408_v6  ;;  %4176 = vmatprep.subr.mxu1 %v4408_v6 }
 0xad4   :  { %v2333_v36 = vpop.permute.xlu0 %2332  ;;  %4174 = vmatmul.mubr.msk.f32.vlgmr.msra.gmra.mxu1 %vm165_vm2, %v4838_v32  ;;  %v2166_v37 = vpop.permute.xlu1 %2165 }
 0xad5   :  { %4184 = vmatmul.mubr.msk.f32.vlgmr.msra.gmra.mxu0 %vm165_vm2, %v2166_v37  ;;  %4178 = vmatprep.mubr.msk.f32.mxu1 %vm4409_vm1, %v4408_v6 }
 0xad6   :  { %4193 = vmatprep.mubr.msk.f32.mxu0 %vm4409_vm1, %v4408_v6 }
 0xad8   :  { %v2500_v38 = vpop.permute.xlu0 %2499  ;;  %v2335_v39 = vpop.permute.xlu1 %2334 }
 0xad9   :  { %4192 = vmatpush3.xpose.msk.msra.mxu0 %vm165_vm2, %v2335_v39 }
 0xada   :  { %4201 = vmatprep.subr.mxu0 %v4408_v6 }
 0xadc   :  { %v2850_v40 = vpop.permute.xlu0 %2849  ;;  %4194 = vmatmul.mubr.msk.f32.vlgmr.msra.gmra.mxu0 %vm165_vm2, %v2333_v36  ;;  %v2502_v41 = vpop.permute.xlu1 %2501 }
 0xadd   :  { %4202 = vmatpush3.xpose.msk.msra.mxu0 %vm165_vm2, %v2502_v41  ;;  %4203 = vmatprep.mubr.msk.f32.mxu0 %vm4409_vm1, %v4408_v6 }
 0xade   :  { %4211 = vmatprep.subr.mxu0 %v4408_v6 }
 0xae0   :  { %v3017_v42 = vpop.permute.xlu0 %3016  ;;  %4204 = vmatmul.mubr.msk.f32.vlgmr.msra.gmra.mxu0 %vm165_vm2, %v2500_v38  ;;  %v2683_v43 = vpop.permute.xlu1 %2682 }
 0xae1   :  { %4212 = vmatpush3.xpose.msk.msra.mxu0 %vm165_vm2, %v2683_v43  ;;  %4213 = vmatprep.mubr.msk.f32.mxu0 %vm4409_vm1, %v4408_v6 }
 0xae2   :  { %4221 = vmatprep.subr.mxu0 %v4408_v6 }
 0xae4   :  { %v3184_v44 = vpop.permute.xlu0 %3183  ;;  %4214 = vmatmul.mubr.msk.f32.vlgmr.msra.gmra.mxu0 %vm165_vm2, %v4852_v33  ;;  %v2848_v45 = vpop.permute.xlu1 %2847 }
 0xae5   :  { %4222 = vmatpush3.xpose.msk.msra.mxu0 %vm165_vm2, %v2850_v40  ;;  %4223 = vmatprep.mubr.msk.f32.mxu0 %vm4409_vm1, %v4408_v6 }
 0xae6   :  { %4231 = vmatprep.subr.mxu0 %v4408_v6 }
 0xae8   :  { %v2090_v46 = vpop.permute.xlu0 %2089  ;;  %4224 = vmatmul.mubr.msk.f32.vlgmr.msra.gmra.mxu0 %vm165_vm2, %v2848_v45  ;;  %v3015_v47 = vpop.permute.xlu1 %3014 }
 0xae9   :  { %4177 = vmatpush3.msra.mxu1 %v2090_v46  ;;  %4232 = vmatpush3.xpose.msk.msra.mxu0 %vm165_vm2, %v3017_v42 }
 0xaea   :  { %4233 = vmatprep.mubr.msk.f32.mxu0 %vm4409_vm1, %v4408_v6  ;;  %4241 = vmatprep.subr.mxu0 %v4408_v6 }
 0xaeb   :  { %4186 = vmatprep.subr.mxu1 %v4408_v6 }
 0xaec   :  { %4234 = vmatmul.mubr.msk.f32.vlgmr.msra.gmra.mxu0 %vm165_vm2, %v3015_v47  ;;  %v3182_v48 = vpop.permute.xlu1 %3181 }
 0xaed   :  { %4242 = vmatpush3.xpose.msk.msra.mxu0 %vm165_vm2, %v3184_v44  ;;  %4243 = vmatprep.mubr.msk.f32.mxu0 %vm4409_vm1, %v4408_v6 }
 0xaf0   :  { %4244 = vmatmul.mubr.msk.f32.vlgmr.msra.gmra.mxu0 %vm165_vm2, %v3182_v48  ;;  %v4934_v28 = vpop.permute.xlu1 %2256 }
 0xb94   :  { %v2072_v49 = vpop.f32.mrf.mxu1 }
 0xb95   :  { %v2076_v50 = vmul.f32 0.35355338, %v2072_v49  ;;  %v2239_v51 = vpop.f32.mrf.mxu0 }
 0xb96   :  { %v2243_v53 = vmul.f32 0.35355338, %v2239_v51  ;;  %v4175_v54 = vpop.f32.mrf.mxu1 }
 0xb97   :  { %v4185_v55 = vpop.f32.mrf.mxu0  ;;  %v2077_v56 = vadd.f32 %v2076_v50, %v4624_v31 }
 0xb98   :  { %v2244_v57 = vadd.f32 %v2243_v53, %v4624_v31 }
 0xb99   :  { %v2078_v58 = vsel %vm165_vm2, %v2077_v56, -inf }
 0xb9a   :  { %2079 = vmax.xlane.f32.xlu0 %v2078_v58  ;;  %v2245_v59 = vsel %vm165_vm2, %v2244_v57, -inf }
 0xb9b   :  { %2246 = vmax.xlane.f32.xlu1 %v2245_v59 }
 0xb9c   :  { %v2406_v60 = vpop.f32.mrf.mxu0 }
 0xb9d   :  { %v2410_v61 = vmul.f32 0.35355338, %v2406_v60 }
 0xb9e   :  { %v4195_v62 = vpop.f32.mrf.mxu0 }
 0xb9f   :  { %v2411_v63 = vadd.f32 %v2410_v61, %v4624_v31 }
 0xba0   :  { %v2573_v0 = vpop.f32.mrf.mxu0 }
 0xba1   :  { %v2577_v11 = vmul.f32 0.35355338, %v2573_v0  ;;  %v2412_v1 = vsel %vm165_vm2, %v2411_v63, -inf }
 0xba2   :  { %2413 = vmax.xlane.f32.xlu0 %v2412_v1  ;;  %v4205_v3 = vpop.f32.mrf.mxu0 }
 0xba3   :  { %v2578_v4 = vadd.f32 %v2577_v11, %v4624_v31 }
 0xba4   :  { %v2754_v7 = vpop.f32.mrf.mxu0 }
 0xba5   :  { %v2758_v8 = vmul.f32 0.35355338, %v2754_v7  ;;  %v2579_v9 = vsel %vm165_vm2, %v2578_v4, -inf }
 0xba6   :  { %2580 = vmax.xlane.f32.xlu0 %v2579_v9  ;;  %v4215_v12 = vpop.f32.mrf.mxu0 }
 0xba7   :  { %v2759_v13 = vadd.f32 %v2758_v8, %v4634_v52 }
 0xba8   :  { %v2921_v14 = vpop.f32.mrf.mxu0 }
 0xba9   :  { %v2925_v15 = vmul.f32 0.35355338, %v2921_v14  ;;  %v2760_v16 = vsel %vm165_vm2, %v2759_v13, -inf }
 0xbaa   :  { %2761 = vmax.xlane.f32.xlu1 %v2760_v16  ;;  %v4225_v5 = vpop.f32.mrf.mxu0 }
 0xbab   :  { %v2926_v2 = vadd.f32 %v2925_v15, %v4634_v52 }
 0xbac   :  { %v3088_v17 = vpop.f32.mrf.mxu0 }
 0xbad   :  { %v3092_v18 = vmul.f32 0.35355338, %v3088_v17  ;;  %v2927_v31 = vsel %vm165_vm2, %v2926_v2, -inf }
 0xbae   :  { %2928 = vmax.xlane.f32.xlu0 %v2927_v31  ;;  %v4235_v19 = vpop.f32.mrf.mxu0 }
 0xbaf   :  { %v3093_v20 = vadd.f32 %v3092_v18, %v4634_v52 }
 0xbb0   :  { %v3255_v21 = vpop.f32.mrf.mxu0 }
 0xbb1   :  { %v3259_v22 = vmul.f32 0.35355338, %v3255_v21  ;;  %v3094_v23 = vsel %vm165_vm2, %v3093_v20, -inf }
 0xbb2   :  { %3095 = vmax.xlane.f32.xlu1 %v3094_v23  ;;  %v4245_v24 = vpop.f32.mrf.mxu0 }
 0xbb3   :  { %v3260_v25 = vadd.f32 %v3259_v22, %v4634_v52 }
 0xbb5   :  { %v3261_v26 = vsel %vm165_vm2, %v3260_v25, -inf }
 0xbb6   :  { %3262 = vmax.xlane.f32.xlu0 %v3261_v26 }
 0xbc3   :  { %2590 = vrot.lane.b32.xlu1 %v4838_v32, %s5149_s23 }
 0xbcc   :  { %2423 = vrot.lane.b32.xlu0 %v4838_v32, %s5150_s24 }
 0xc23   :  { %v2080_v29 = vpop.xlane.xlu0 %2079 }
 0xc24   :  { %v2081_v30 = vsub.f32 %v2077_v56, %v2080_v29  ;;  %v2247_v34 = vpop.xlane.xlu1 %2246 }
 0xc25   :  { %v2248_v35 = vsub.f32 %v2244_v57, %v2247_v34 }
 0xc26   :  { %v2082_v36 = vmul.f32 1.442695, %v2081_v30 }
 0xc27   :  { %v2249_v37 = vmul.f32 1.442695, %v2248_v35 }
 0xc28   :  { %4349 = vpow2.f32 %v2082_v36 }
 0xc29   :  { %4351 = vpow2.f32 %v2249_v37 }
 0xc2b   :  { %v2414_v52 = vpop.xlane.xlu0 %2413 }
 0xc2c   :  { %v2415_v38 = vsub.f32 %v2411_v63, %v2414_v52 }
 0xc2e   :  { %v2416_v39 = vmul.f32 1.442695, %v2415_v38 }
 0xc2f   :  { %v2581_v40 = vpop.xlane.xlu0 %2580 }
 0xc30   :  { %4353 = vpow2.f32 %v2416_v39  ;;  %v2582_v41 = vsub.f32 %v2578_v4, %v2581_v40 }
 0xc32   :  { %v2583_v42 = vmul.f32 1.442695, %v2582_v41 }
 0xc33   :  { %v2762_v50 = vpop.xlane.xlu1 %2761 }
 0xc34   :  { %4355 = vpow2.f32 %v2583_v42  ;;  %v2763_v51 = vsub.f32 %v2759_v13, %v2762_v50 }
 0xc35   :  { %v4350_v43 = vpop.eup %4349 }
 0xc36   :  { %v4352_v32 = vpop.eup %4351  ;;  %v2084_v44 = vsel %vm165_vm2, %v4350_v43, 0.0  ;;  %v2764_v56 = vmul.f32 1.442695, %v2763_v51 }
 0xc37   :  { %2085 = vadd.xlane.f32.xlu1 %v2084_v44  ;;  %v2251_v45 = vsel %vm165_vm2, %v4352_v32, 0.0  ;;  %v2929_v53 = vpop.xlane.xlu0 %2928 }
 0xc38   :  { %2252 = vadd.xlane.f32.xlu0 %v2251_v45  ;;  %v2930_v55 = vsub.f32 %v2926_v2, %v2929_v53  ;;  %4357 = vpow2.f32 %v2764_v56 }
 0xc3a   :  { %v2931_v59 = vmul.f32 1.442695, %v2930_v55 }
 0xc3b   :  { %v3096_v54 = vpop.xlane.xlu1 %3095 }
 0xc3c   :  { %v3097_v57 = vsub.f32 %v3093_v20, %v3096_v54  ;;  %4359 = vpow2.f32 %v2931_v59 }
 0xc3d   :  { %v4354_v46 = vpop.eup %4353 }
 0xc3e   :  { %v2418_v47 = vsel %vm165_vm2, %v4354_v46, 0.0  ;;  %v3098_v60 = vmul.f32 1.442695, %v3097_v57 }
 0xc3f   :  { %2419 = vadd.xlane.f32.xlu1 %v2418_v47  ;;  %v3263_v58 = vpop.xlane.xlu0 %3262  ;;  %v2591_v9 = vpop.permute.xlu1 %2590  ;;  %v3872_v47 = vld [vmem:[%s5116_s4 + $0x30] sm:$0xff] }
 0xc40   :  { %v3264_v61 = vsub.f32 %v3260_v25, %v3263_v58  ;;  %4361 = vpow2.f32 %v3098_v60 }
 0xc41   :  { %v4939_v48 = vpop.eup %4355 }
 0xc42   :  { %v2585_v49 = vsel %vm165_vm2, %v4939_v48, 0.0  ;;  %v3265_v62 = vmul.f32 1.442695, %v3264_v61 }
 0xc43   :  { %2586 = vadd.xlane.f32.xlu0 %v2585_v49  ;;  %v2424_v12 = vpop.permute.xlu0 %2423  ;;  %v3870_v49 = vld [vmem:[%s5116_s4 + $0x20] sm:$0xff] }
 0xc44   :  { %4363 = vpow2.f32 %v3265_v62 }
 0xc45   :  { %v4358_v63 = vpop.eup %4357 }
 0xc46   :  { %v2766_v11 = vsel %vm165_vm2, %v4358_v63, 0.0 }
 0xc49   :  { %v4947_v0 = vpop.eup %4359 }
 0xc4a   :  { %v2933_v3 = vsel %vm165_vm2, %v4947_v0, 0.0 }
 0xc4d   :  { %v4950_v1 = vpop.eup %4361 }
 0xc4e   :  { %v3100_v4 = vsel %vm165_vm2, %v4950_v1, 0.0 }
 0xc50   :  { %2938 = vrot.lane.b32.xlu1 %v4852_v33, %s5148_s26 }
 0xc51   :  { %v4956_v7 = vpop.eup %4363 }
 0xc52   :  { %v3267_v8 = vsel %vm165_vm2, %v4956_v7, 0.0 }
 0xc59   :  { %2771 = vrot.lane.b32.xlu0 %v4852_v33, %s5147_s17 }
 0xc74   :  { %2767 = vadd.xlane.f32.xlu1 %v2766_v11 }
 0xc78   :  { %2934 = vadd.xlane.f32.xlu0 %v2933_v3  ;;  %3101 = vadd.xlane.f32.xlu1 %v3100_v4 }
 0xc7c   :  { %3268 = vadd.xlane.f32.xlu1 %v3267_v8 }
 0xc8d   :  { %3272 = vrot.lane.b32.xlu1 %v4852_v33, %s5149_s23 }
 0xc8e   :  { %3105 = vrot.lane.b32.xlu0 %v4852_v33, %s5150_s24 }
 0xcc0   :  { %v2086_v13 = vpop.xlane.xlu1 %2085 }
 0xcc1   :  { %4365 = vrcp.f32 %v2086_v13  ;;  %v2253_v14 = vpop.xlane.xlu0 %2252 }
 0xcc2   :  { %4367 = vrcp.f32 %v2253_v14 }
 0xcc8   :  { %v2420_v15 = vpop.xlane.xlu1 %2419 }
 0xcc9   :  { %4369 = vrcp.f32 %v2420_v15 }
 0xccc   :  { %v2587_v16 = vpop.xlane.xlu0 %2586  ;;  %v2939_v22 = vpop.permute.xlu1 %2938 }
 0xccd   :  { %4371 = vrcp.f32 %v2587_v16 }
 0xcce   :  { %v4366_v5 = vpop.eup %4365 }
 0xccf   :  { %v2088_v2 = vmul.f32 %v4366_v5, %v4350_v43  ;;  %v4368_v17 = vpop.eup %4367 }
 0xcd0   :  { %v2255_v33 = vmul.f32 %v4368_v17, %v4352_v32  ;;  %v2772_v21 = vpop.permute.xlu0 %2771 }
 0xcd1   :  { %4179 = vmatmul.mubr.msk.f32.vlgmr.msra.gmra.mxu1 %vm165_vm2, %v2088_v2 }
 0xcd2   :  { %4187 = vmatpush3.msra.mxu1 %v4934_v28  ;;  %4188 = vmatprep.mubr.msk.f32.mxu1 %vm4409_vm1, %v4408_v6 }
 0xcd3   :  { %4196 = vmatprep.subr.mxu1 %v4408_v6 }
 0xcd5   :  { %4189 = vmatmul.mubr.msk.f32.vlgmr.msra.gmra.mxu1 %vm165_vm2, %v2255_v33 }
 0xcd6   :  { %v4370_v18 = vpop.eup %4369  ;;  %4197 = vmatpush3.msra.mxu1 %v2424_v12  ;;  %4198 = vmatprep.mubr.msk.f32.mxu1 %vm4409_vm1, %v4408_v6 }
 0xcd7   :  { %4206 = vmatprep.subr.mxu1 %v4408_v6  ;;  %v2422_v31 = vmul.f32 %v4370_v18, %v4354_v46 }
 0xcd9   :  { %4199 = vmatmul.mubr.msk.f32.vlgmr.msra.gmra.mxu1 %vm165_vm2, %v2422_v31 }
 0xcda   :  { %v4372_v19 = vpop.eup %4371  ;;  %4207 = vmatpush3.msra.mxu1 %v2591_v9  ;;  %4208 = vmatprep.mubr.msk.f32.mxu1 %vm4409_vm1, %v4408_v6  ;;  %v3875_v9 = vld [vmem:[%s5117_s5 + $0x1] ss:$0 sm:$0xff] }
 0xcdb   :  { %4216 = vmatprep.subr.mxu1 %v4408_v6  ;;  %v2589_v20 = vmul.f32 %v4372_v19, %v4939_v48  ;;  %v3871_v48 = vld [vmem:[%s5116_s4 + $0x28] sm:$0xff] }
 0xcdd   :  { %4209 = vmatmul.mubr.msk.f32.vlgmr.msra.gmra.mxu1 %vm165_vm2, %v2589_v20 }
 0xcde   :  { %4217 = vmatpush3.msra.mxu1 %v2772_v21  ;;  %4218 = vmatprep.mubr.msk.f32.mxu1 %vm4409_vm1, %v4408_v6 }
 0xcdf   :  { %4226 = vmatprep.subr.mxu1 %v4408_v6 }
 0xcfd   :  { %v2768_v23 = vpop.xlane.xlu1 %2767 }
 0xcfe   :  { %4373 = vrcp.f32 %v2768_v23 }
 0xd01   :  { %v2935_v24 = vpop.xlane.xlu0 %2934  ;;  %v3102_v25 = vpop.xlane.xlu1 %3101 }
 0xd02   :  { %4375 = vrcp.f32 %v2935_v24 }
 0xd03   :  { %4377 = vrcp.f32 %v3102_v25  ;;  %v3884_v25 = vld [vmem:[%s5118_s6 + $0x30] sm:$0xff] }
 0xd05   :  { %v3269_v26 = vpop.xlane.xlu1 %3268  ;;  %v3106_v36 = vpop.permute.xlu0 %3105 }
 0xd06   :  { %4379 = vrcp.f32 %v3269_v26  ;;  %v3883_v26 = vld [vmem:[%s5118_s6 + $0x28] sm:$0xff] }
 0xd09   :  { %v3273_v38 = vpop.permute.xlu1 %3272 }
 0xd0b   :  { %v4374_v28 = vpop.eup %4373 }
 0xd0c   :  { %v2770_v29 = vmul.f32 %v4374_v28, %v4358_v63  ;;  %v3882_v28 = vld [vmem:[%s5118_s6 + $0x20] sm:$0xff] }
 0xd0e   :  { %4219 = vmatmul.mubr.msk.f32.vlgmr.msra.gmra.mxu1 %vm165_vm2, %v2770_v29  ;;  %v3897_v29 = vld [vmem:[%s5120_s8 + $0x78] sm:$0xff] }
 0xd0f   :  { %v4376_v30 = vpop.eup %4375  ;;  %4227 = vmatpush3.msra.mxu1 %v2939_v22  ;;  %4228 = vmatprep.mubr.msk.f32.mxu1 %vm4409_vm1, %v4408_v6 }
 0xd10   :  { %4236 = vmatprep.subr.mxu1 %v4408_v6  ;;  %v2937_v34 = vmul.f32 %v4376_v30, %v4947_v0  ;;  %v4378_v35 = vpop.eup %4377  ;;  %v3896_v30 = vld [vmem:[%s5120_s8 + $0x70] sm:$0xff] }
 0xd11   :  { %v3104_v37 = vmul.f32 %v4378_v35, %v4950_v1  ;;  %v3894_v35 = vld [vmem:[%s5120_s8 + $0x60] sm:$0xff] }
 0xd12   :  { %4229 = vmatmul.mubr.msk.f32.vlgmr.msra.gmra.mxu1 %vm165_vm2, %v2937_v34  ;;  %v3895_v34 = vld [vmem:[%s5120_s8 + $0x68] sm:$0xff] }
 0xd13   :  { %4237 = vmatpush3.msra.mxu1 %v3106_v36  ;;  %4238 = vmatprep.mubr.msk.f32.mxu1 %vm4409_vm1, %v4408_v6  ;;  %v4380_v52 = vpop.eup %4379 }
 0xd14   :  { %4246 = vmatprep.subr.mxu1 %v4408_v6  ;;  %v3271_v39 = vmul.f32 %v4380_v52, %v4956_v7 }
 0xd16   :  { %4239 = vmatmul.mubr.msk.f32.vlgmr.msra.gmra.mxu1 %vm165_vm2, %v3104_v37 }
 0xd17   :  { %4247 = vmatpush3.msra.mxu1 %v3273_v38  ;;  %4248 = vmatprep.mubr.msk.f32.mxu1 %vm4409_vm1, %v4408_v6  ;;  %v3873_v6 = vld [vmem:[%s5116_s4 + $0x38] sm:$0xff] }
 0xd18   :  { %4251 = vmatprep.subr.mxu0 %v3873_v6 }
 0xd19   :  { %4252 = vmatpush3.msra.mxu0 %v3873_v6 }
 0xd1a   :  { %4249 = vmatmul.mubr.msk.f32.vlgmr.msra.gmra.mxu1 %vm165_vm2, %v3271_v39  ;;  %4253 = vmatprep.subr.mxu0 %v3872_v47 }
 0xd1b   :  { %4254 = vmatpush3.msra.mxu0 %v3872_v47 }
 0xd1c   :  { %4255 = vmatprep.subr.mxu0 %v3871_v48 }
 0xd1d   :  { %4256 = vmatpush3.msra.mxu0 %v3871_v48 }
 0xd1e   :  { %4257 = vmatprep.subr.mxu0 %v3870_v49 }
 0xd1f   :  { %4258 = vmatpush3.msra.mxu0 %v3870_v49  ;;  %v3893_v49 = vld [vmem:[%s5120_s8 + $0x58] sm:$0xff] }
 0xd20   :  { %4273 = vmatprep.subr.mxu0 %v3897_v29 }
 0xd91   :  { %v2161_v40 = vpop.f32.mrf.mxu1 }
 0xd93   :  { %v4180_v41 = vpop.f32.mrf.mxu1 }
 0xd95   :  { %v2328_v42 = vpop.f32.mrf.mxu1 }
 0xd96   :  { %2667 = vrot.lane.b32.xlu0 %v2328_v42, %s4421_s20  ;;  %v3880_v42 = vld [vmem:[%s5122_s10 + $0x1] ss:$0 sm:$0xff] }
 0xd97   :  { %v4190_v43 = vpop.f32.mrf.mxu1 }
 0xd99   :  { %v2495_v32 = vpop.f32.mrf.mxu1 }
 0xd9a   :  { %2671 = vrot.lane.b32.xlu1 %v2495_v32, %s4422_s21  ;;  %v3881_v32 = vld [vmem:[%s5123_s11 + $0x1] ss:$0 sm:$0xff] }
 0xd9b   :  { %v4200_v44 = vpop.f32.mrf.mxu1 }
 0xd9d   :  { %v2662_v45 = vpop.f32.mrf.mxu1 }
 0xd9e   :  { %2675 = vrot.lane.b32.xlu1 %v2662_v45, %s5151_s25 }
 0xd9f   :  { %v4210_v46 = vpop.f32.mrf.mxu1 }
 0xdce   :  { %v2843_v50 = vpop.f32.mrf.mxu1 }
 0xdd0   :  { %v4220_v51 = vpop.f32.mrf.mxu1 }
 0xdd1   :  { %v3891_v51 = vld [vmem:[%s5120_s8 + $0x48] sm:$0xff] }
 0xdd2   :  { %v3010_v53 = vpop.f32.mrf.mxu1 }
 0xdd3   :  { %3349 = vrot.lane.b32.xlu0 %v3010_v53, %s4421_s20  ;;  %v3890_v53 = vld [vmem:[%s5120_s8 + $0x40] sm:$0xff] }
 0xdd4   :  { %v4230_v54 = vpop.f32.mrf.mxu1 }
 0xdd5   :  { %v3887_v54 = vld [vmem:[%s5119_s7 + $0x1] ss:$0 sm:$0xff] }
 0xdd6   :  { %v3177_v55 = vpop.f32.mrf.mxu1 }
 0xdd7   :  { %3353 = vrot.lane.b32.xlu0 %v3177_v55, %s4422_s21 }
 0xdd8   :  { %v4240_v56 = vpop.f32.mrf.mxu1 }
 0xdda   :  { %v3344_v57 = vpop.f32.mrf.mxu1 }
 0xddb   :  { %3357 = vrot.lane.b32.xlu1 %v3344_v57, %s5151_s25 }
 0xddc   :  { %v4250_v58 = vpop.f32.mrf.mxu1 }
 0xe08   :  { %v2668_v59 = vpop.permute.xlu0 %2667 }
 0xe09   :  { %v2678_v61 = vsel %vm165_vm2, %v2161_v40, %v2668_v59 }
 0xe0c   :  { %v2672_v60 = vpop.permute.xlu1 %2671 }
 0xe0d   :  { %v2679_v62 = vsel %vm843_vm5, %v2678_v61, %v2672_v60  ;;  %v3899_v61 = vld [vmem:[%s5145_s0 + $0x1] ss:$0 sm:$0xff] }
 0xe10   :  { %v2676_v63 = vpop.permute.xlu1 %2675 }
 0xe11   :  { %v2680_v0 = vsel %vm845_vm6, %v2679_v62, %v2676_v63 }
 0xe12   :  { %4259 = vmatprep.mubr.msk.f32.mxu0 %vm80_vm0, %v2680_v0 }
 0xe45   :  { %v3350_v11 = vpop.permute.xlu0 %3349 }
 0xe46   :  { %v3360_v3 = vsel %vm165_vm2, %v2843_v50, %v3350_v11  ;;  %v3892_v50 = vld [vmem:[%s5120_s8 + $0x50] sm:$0xff] }
 0xe49   :  { %v3354_v1 = vpop.permute.xlu0 %3353 }
 0xe4a   :  { %v3361_v4 = vsel %vm843_vm5, %v3360_v3, %v3354_v1 }
 0xe4d   :  { %v3358_v7 = vpop.permute.xlu1 %3357 }
 0xe4e   :  { %v3362_v8 = vsel %vm845_vm6, %v3361_v4, %v3358_v7 }
 0xe4f   :  { %4260 = vmatmul.mubr.msk.f32.vlgmr.msra.gmra.mxu0 %vm80_vm0, %v3362_v8 }
 0xe50   :  { %4274 = vmatpush3.msra.mxu0 %v3897_v29 }
 0xe51   :  { %4275 = vmatprep.subr.mxu0 %v3896_v30 }
 0xe52   :  { %4276 = vmatpush3.msra.mxu0 %v3896_v30 }
 0xe53   :  { %4277 = vmatprep.subr.mxu0 %v3895_v34 }
 0xe54   :  { %4278 = vmatpush3.msra.mxu0 %v3895_v34 }
 0xe55   :  { %4279 = vmatprep.subr.mxu0 %v3894_v35 }
 0xe56   :  { %4280 = vmatpush3.msra.mxu0 %v3894_v35 }
 0xe57   :  { %4281 = vmatprep.subr.mxu0 %v3893_v49 }
 0xe58   :  { %4282 = vmatpush3.msra.mxu0 %v3893_v49 }
 0xe59   :  { %4283 = vmatprep.subr.mxu0 %v3892_v50 }
 0xe5a   :  { %4284 = vmatpush3.msra.mxu0 %v3892_v50  ;;  %v3906_v50 = vld [vmem:[%s5126_s14] ss:$0 sm:$0xff] }
 0xe5b   :  { %4285 = vmatprep.subr.mxu0 %v3891_v51 }
 0xe5c   :  { %4286 = vmatpush3.msra.mxu0 %v3891_v51 }
 0xe5d   :  { %4287 = vmatprep.subr.mxu0 %v3890_v53 }
 0xe5e   :  { %4288 = vmatpush3.msra.mxu0 %v3890_v53 }
 0xf0f   :  { %v4261_v12 = vpop.f32.mrf.mxu0 }
 0xf10   :  { %v3454_v13 = vadd.f32 %v4261_v12, %v3875_v9 }
 0xf11   :  { %v3448_v14 = vpop.f32.mrf.mxu0 }
 0xf12   :  { %v3449_v15 = vadd.f32 %v3875_v9, %v3448_v14  ;;  %v3458_v16 = vadd.f32 %v3454_v13, %v4827_v10 }
 0xf14   :  { %v3466_v5 = vsel %vm80_vm0, %v3458_v16, 0.0  ;;  %v3457_v2 = vadd.f32 %v3449_v15, %v4825_v27  ;;  %v3885_v27 = vld [vmem:[%s5118_s6 + $0x38] sm:$0xff] }
 0xf15   :  { %3467 = vadd.xlane.f32.xlu1 %v3466_v5  ;;  %4262 = vmatprep.subr.mxu1 %v3885_v27 }
 0xf16   :  { %v3463_v17 = vsel %vm80_vm0, %v3457_v2, 0.0  ;;  %4263 = vmatpush3.msra.mxu1 %v3885_v27  ;;  %v3905_v27 = vld [vmem:[%s5125_s13 + $0x1] ss:$0 sm:$0xff] }
 0xf17   :  { %3464 = vadd.xlane.f32.xlu0 %v3463_v17  ;;  %4264 = vmatprep.subr.mxu1 %v3884_v25 }
 0xf18   :  { %4265 = vmatpush3.msra.mxu1 %v3884_v25 }
 0xf19   :  { %4266 = vmatprep.subr.mxu1 %v3883_v26 }
 0xf1a   :  { %4267 = vmatpush3.msra.mxu1 %v3883_v26 }
 0xf1b   :  { %4268 = vmatprep.subr.mxu1 %v3882_v28 }
 0xf1c   :  { %4269 = vmatpush3.msra.mxu1 %v3882_v28 }
 0xf9e   :  { %v3468_v33 = vpop.xlane.xlu1 %3467 }
 0xf9f   :  { %v3470_v18 = vmul.f32 0.03125, %v3468_v33 }
 0xfa0   :  { %v3465_v31 = vpop.xlane.xlu0 %3464 }
 0xfa1   :  { %v3469_v19 = vmul.f32 0.03125, %v3465_v31  ;;  %v3472_v20 = vsub.f32 %v3458_v16, %v3470_v18 }
 0xfa3   :  { %v3471_v21 = vsub.f32 %v3457_v2, %v3469_v19  ;;  %v3474_v24 = vmul.f32 %v3472_v20, %v3472_v20 }
 0xfa5   :  { %v3473_v22 = vmul.f32 %v3471_v21, %v3471_v21  ;;  %v3478_v10 = vsel %vm80_vm0, %v3474_v24, 0.0 }
 0xfa7   :  { %v3475_v23 = vsel %vm80_vm0, %v3473_v22, 0.0 }
 0xfa8   :  { %3476 = vadd.xlane.f32.xlu0 %v3475_v23  ;;  %v3904_v23 = vld [vmem:[%s5124_s12 + $0x1] ss:$0 sm:$0xff] }
 0xfac   :  { %3479 = vadd.xlane.f32.xlu0 %v3478_v10 }
0x1031   :  { %v3477_v36 = vpop.xlane.xlu0 %3476 }
0x1032   :  { %v3481_v37 = vmul.f32 0.03125, %v3477_v36 }
0x1034   :  { %v3483_v52 = vadd.f32 1e-05, %v3481_v37 }
0x1035   :  { %v3480_v38 = vpop.xlane.xlu0 %3479 }
0x1036   :  { %4381 = vrsqrt.f32 %v3483_v52  ;;  %v3482_v39 = vmul.f32 0.03125, %v3480_v38 }
0x1038   :  { %v3484_v40 = vadd.f32 1e-05, %v3482_v39 }
0x103a   :  { %4383 = vrsqrt.f32 %v3484_v40 }
0x1043   :  { %v4382_v41 = vpop.eup %4381 }
0x1044   :  { %v3487_v43 = vmul.f32 %v4382_v41, %v3471_v21 }
0x1046   :  { %v3495_v44 = vmul.f32 %v3880_v42, %v3487_v43 }
0x1047   :  { %v4384_v45 = vpop.eup %4383 }
0x1048   :  { %v3488_v46 = vmul.f32 %v4384_v45, %v3472_v20  ;;  %v3503_v6 = vadd.f32 %v3881_v32, %v3495_v44 }
0x104a   :  { %v3496_v47 = vmul.f32 %v3880_v42, %v3488_v46  ;;  %4270 = vmatprep.mubr.msk.f32.mxu1 %vm80_vm0, %v3503_v6 }
0x104c   :  { %v3504_v48 = vadd.f32 %v3881_v32, %v3496_v47 }
0x104e   :  { %4271 = vmatmul.mubr.msk.f32.vlgmr.msra.gmra.mxu1 %vm80_vm0, %v3504_v48 }
0x110e   :  { %v4272_v55 = vpop.f32.mrf.mxu1 }
0x110f   :  { %v3596_v56 = vadd.f32 %v4272_v55, %v3887_v54 }
0x1110   :  { %v3590_v57 = vpop.f32.mrf.mxu1 }
0x1111   :  { %v3591_v58 = vadd.f32 %v3887_v54, %v3590_v57  ;;  %v3600_v60 = vmax.f32 %v3596_v56, 0.0  ;;  %v3907_v54 = vld [vmem:[%s5127_s15] ss:$0 sm:$0xff] }
0x1113   :  { %v3599_v59 = vmax.f32 %v3591_v58, 0.0 }
0x1115   :  { %4289 = vmatprep.mubr.msk.f32.mxu0 %vm1777_vm7, %v3599_v59 }
0x1116   :  { %4290 = vmatmul.mubr.msk.f32.vlgmr.msra.gmra.mxu0 %vm1777_vm7, %v3600_v60 }
0x11d6   :  { %v4291_v62 = vpop.f32.mrf.mxu0 }
0x11d7   :  { %v3696_v63 = vadd.f32 %v4291_v62, %v3899_v61 }
0x11d8   :  { %v3690_v0 = vpop.f32.mrf.mxu0 }
0x11d9   :  { %v3700_v11 = vadd.f32 %v3696_v63, %v3504_v48  ;;  %v3691_v1 = vadd.f32 %v3899_v61, %v3690_v0 }
0x11db   :  { %v3699_v3 = vadd.f32 %v3691_v1, %v3503_v6  ;;  %v3708_v4 = vsel %vm80_vm0, %v3700_v11, 0.0 }
0x11dc   :  { %3709 = vadd.xlane.f32.xlu0 %v3708_v4 }
0x11dd   :  { %v3705_v7 = vsel %vm80_vm0, %v3699_v3, 0.0 }
0x11de   :  { %3706 = vadd.xlane.f32.xlu1 %v3705_v7 }
0x1265   :  { %v3710_v8 = vpop.xlane.xlu0 %3709 }
0x1266   :  { %v3712_v9 = vmul.f32 0.03125, %v3710_v8 }
0x1267   :  { %v3707_v12 = vpop.xlane.xlu1 %3706 }
0x1268   :  { %v3714_v13 = vsub.f32 %v3700_v11, %v3712_v9  ;;  %v3711_v14 = vmul.f32 0.03125, %v3707_v12 }
0x126a   :  { %v3713_v15 = vsub.f32 %v3699_v3, %v3711_v14  ;;  %v3716_v16 = vmul.f32 %v3714_v13, %v3714_v13 }
0x126c   :  { %v3720_v5 = vsel %vm80_vm0, %v3716_v16, 0.0  ;;  %v3715_v2 = vmul.f32 %v3713_v15, %v3713_v15 }
0x126d   :  { %3721 = vadd.xlane.f32.xlu0 %v3720_v5 }
0x126e   :  { %v3717_v17 = vsel %vm80_vm0, %v3715_v2, 0.0 }
0x126f   :  { %3718 = vadd.xlane.f32.xlu1 %v3717_v17 }
0x12f6   :  { %v3722_v33 = vpop.xlane.xlu0 %3721 }
0x12f7   :  { %v3724_v18 = vmul.f32 0.03125, %v3722_v33 }
0x12f8   :  { %v3719_v31 = vpop.xlane.xlu1 %3718 }
0x12f9   :  { %v3726_v19 = vadd.f32 1e-05, %v3724_v18  ;;  %v3723_v20 = vmul.f32 0.03125, %v3719_v31 }
0x12fb   :  { %4385 = vrsqrt.f32 %v3726_v19  ;;  %v3725_v21 = vadd.f32 1e-05, %v3723_v20 }
0x12fd   :  { %4387 = vrsqrt.f32 %v3725_v21 }
0x1308   :  { %v4386_v22 = vpop.eup %4385 }
0x1309   :  { %v3730_v24 = vmul.f32 %v4386_v22, %v3714_v13 }
0x130a   :  { %v4388_v10 = vpop.eup %4387 }
0x130b   :  { %v3738_v25 = vmul.f32 %v3904_v23, %v3730_v24  ;;  %v3729_v26 = vmul.f32 %v4388_v10, %v3713_v15 }
0x130d   :  { %v3746_v28 = vadd.f32 %v3905_v27, %v3738_v25  ;;  %v3737_v29 = vmul.f32 %v3904_v23, %v3729_v26 }
0x130f   :  { %v3752_v30 = vsel %vm80_vm0, %v3746_v28, 0.0  ;;  %v3745_v34 = vadd.f32 %v3905_v27, %v3737_v29 }
0x1310   :  { %3753 = vadd.xlane.f32.xlu0 %v3752_v30 }
0x1311   :  { %v3749_v35 = vsel %vm80_vm0, %v3745_v34, 0.0 }
0x1312   :  { %3750 = vadd.xlane.f32.xlu1 %v3749_v35 }
0x1399   :  { %v3754_v36 = vpop.xlane.xlu0 %3753 }
0x139a   :  { %v3756_v37 = vmul.f32 0.03125, %v3754_v36 }
0x139b   :  { %v3751_v52 = vpop.xlane.xlu1 %3750 }
0x139c   :  { %v3758_v38 = vsub.f32 %v3746_v28, %v3756_v37  ;;  %v3755_v39 = vmul.f32 0.03125, %v3751_v52 }
0x139e   :  { %v3757_v40 = vsub.f32 %v3745_v34, %v3755_v39  ;;  %v3760_v41 = vmul.f32 %v3758_v38, %v3758_v38 }
0x13a0   :  { %v3764_v42 = vsel %vm80_vm0, %v3760_v41, 0.0  ;;  %v3759_v43 = vmul.f32 %v3757_v40, %v3757_v40 }
0x13a1   :  { %3765 = vadd.xlane.f32.xlu0 %v3764_v42 }
0x13a2   :  { %v3761_v32 = vsel %vm80_vm0, %v3759_v43, 0.0 }
0x13a3   :  { %3762 = vadd.xlane.f32.xlu1 %v3761_v32 }
0x142a   :  { %v3766_v44 = vpop.xlane.xlu0 %3765 }
0x142b   :  { %v3768_v45 = vmul.f32 0.03125, %v3766_v44 }
0x142c   :  { %v3763_v46 = vpop.xlane.xlu1 %3762 }
0x142d   :  { %v3770_v6 = vadd.f32 1e-05, %v3768_v45  ;;  %v3767_v47 = vmul.f32 0.03125, %v3763_v46 }
0x142f   :  { %4389 = vrsqrt.f32 %v3770_v6  ;;  %v3769_v48 = vadd.f32 1e-05, %v3767_v47 }
0x1431   :  { %4391 = vrsqrt.f32 %v3769_v48 }
0x143c   :  { %v4390_v49 = vpop.eup %4389 }
0x143d   :  { %v3774_v51 = vmul.f32 %v4390_v49, %v3758_v38 }
0x143e   :  { %v4392_v53 = vpop.eup %4391 }
0x143f   :  { %v3782_v55 = vmul.f32 %v3906_v50, %v3774_v51  ;;  %v3773_v56 = vmul.f32 %v4392_v53, %v3757_v40 }
0x1441   :  { %v3790_v57 = vadd.f32 %v3907_v54, %v3782_v55  ;;  %v3781_v58 = vmul.f32 %v3906_v50, %v3773_v56 }
0x1443   :  { %3792 = vst.msk [vmem:[%s5128_s16 + $0x8] sm:$0xff] %vm80_vm0, %v3790_v57  ;;  %v3789_v59 = vadd.f32 %v3907_v54, %v3781_v58 }
0x1445   :  { %3791 = vst.msk [vmem:[%s5128_s16] sm:$0xff] %vm80_vm0, %v3789_v59 }

// kernel: tfhw_forward.3
= control target key start
LH: loop header
LB: loop body
LE: loop exit
PB: predicated region body
PF: predicated region fallthrough
CT: control target
= control target key end

     0   :  { %s10794_s6 = smov 2   ;;  %s10795_s10 = smov 3   ;;  %s12513_s0 = inlined_call_operand.smem [shape: u32[32], index: -1, kind: input, shape index: {}] }
   0x1   :  { %s10847_s5 = sld [smem:[%s12513_s0]]   ;;  %s10796_s14 = smov 4  }
   0x2   :  { %s10852_s9 = sld [smem:[%s12513_s0 + %s10794_s6]]   ;;  %s10797_s18 = smov 5  }
   0x3   :  { %s10857_s13 = sld [smem:[%s12513_s0 + %s10795_s10]]   ;;  %s10798_s22 = smov 6  }
   0x4   :  { %s10862_s17 = sld [smem:[%s12513_s0 + %s10796_s14]]   ;;  %s10799_s26 = smov 7  }
   0x5   :  { %s10867_s21 = sld [smem:[%s12513_s0 + %s10797_s18]]   ;;  %s12514_s30 = smov 8  }
   0x6   :  { %s10872_s25 = sld [smem:[%s12513_s0 + %s10798_s22]]   ;;  %s10801_s4 = smov 9  }
   0x7   :  { %s10877_s29 = sld [smem:[%s12513_s0 + %s10799_s26]]   ;;  %s10802_s10 = smov 10  }
   0x8   :  { %s10883_s3 = sld [smem:[%s12513_s0 + %s12514_s30]]   ;;  %s10803_s15 = smov 11  }
   0x9   :  { %s10888_s8 = sld [smem:[%s12513_s0 + %s10801_s4]]   ;;  %s10804_s20 = smov 12  }
   0xa   :  { %s10893_s14 = sld [smem:[%s12513_s0 + %s10802_s10]]   ;;  %s10805_s26 = smov 13  }
   0xb   :  { %s10898_s19 = sld [smem:[%s12513_s0 + %s10803_s15]]   ;;  %s10806_s2 = smov 14  }
   0xc   :  { %s10903_s24 = sld [smem:[%s12513_s0 + %s10804_s20]]   ;;  %s10807_s10 = smov 15  }
   0xd   :  { %s10908_s1 = sld [smem:[%s12513_s0 + %s10805_s26]]   ;;  %s12517_s16 = smov 16  }
   0xe   :  { %s10913_s7 = sld [smem:[%s12513_s0 + %s10806_s2]]   ;;  %s10809_s23 = smov 17  }
   0xf   :  { %s10918_s15 = sld [smem:[%s12513_s0 + %s10807_s10]]   ;;  %s10810_s2 = smov 18  }
  0x10   :  { %s10924_s22 = sld [smem:[%s12513_s0 + %s12517_s16]]   ;;  %s10811_s10 = smov 19  }
  0x11   :  { %s10929_s28 = sld [smem:[%s12513_s0 + %s10809_s23]]   ;;  %s10812_s18 = smov 20  }
  0x12   :  { %12556 = sst [smem:[#allocation6_spill]] %s10903_s24  ;;  %s10813_s23 = smov 21  }
  0x13   :  { %s10934_s11 = sld [smem:[%s12513_s0 + %s10810_s2]]   ;;  %s10814_s2 = smov 22  }
  0x14   :  { %12557 = sst [smem:[#allocation7_spill]] %s10913_s7  ;;  %s10817_s26 = smov 25  }
  0x15   :  { %12558 = sst [smem:[#allocation8_spill]] %s10918_s15  ;;  %s68_s24 = sshll.u32 %s10847_s5, 4  ;;  %s69_s24 = int_to_ptr.vmem [resolvable:$true] %s68_s24 }
  0x16   :  { %12559 = sst [smem:[#allocation9_spill]] %s10924_s22  ;;  %p10773_p1 = scmp.lt.s32.totalorder %s69_s24, %s69_s24 }
  0x17   :  { %12560 = sst [smem:[#allocation10_spill]] %s10929_s28 }
  0x18   :  { %s10939_s15 = sld [smem:[%s12513_s0 + %s10811_s10]]   ;;  %s10815_s10 = smov 23  }
  0x19   :  { %12561 = sst [smem:[#allocation11_spill]] %s10934_s11 }
  0x1a   :  { %s10944_s22 = sld [smem:[%s12513_s0 + %s10812_s18]]   ;;  %s12527_s18 = smov 24  }
  0x1b   :  { %s10949_s28 = sld [smem:[%s12513_s0 + %s10813_s23]]  }
  0x1c   :  { %s10954_s30 = sld [smem:[%s12513_s0 + %s10814_s2]]   ;;  %s10818_s2 = smov 26  }
  0x1d   :  { %s10959_s16 = sld [smem:[%s12513_s0 + %s10815_s10]]   ;;  %s10819_s10 = smov 27  }
  0x1e   :  { %12562 = sst [smem:[#allocation12_spill]] %s10939_s15  ;;  %s10821_s15 = smov 29  }
  0x1f   :  { %s10965_s23 = sld [smem:[%s12513_s0 + %s12527_s18]]  }
  0x20   :  { %12563 = sst [smem:[#allocation13_spill]] %s10944_s22  ;;  %s10820_s22 = smov 28  }
  0x21   :  { %s10970_s4 = sld [smem:[%s12513_s0 + %s10817_s26]]  }
  0x22   :  { %s10975_s11 = sld [smem:[%s12513_s0 + %s10818_s2]]   ;;  %s10822_s2 = smov 30  }
  0x23   :  { %12564 = sst [smem:[#allocation14_spill]] %s10959_s16 }
  0x24   :  { %s10980_s7 = sld [smem:[%s12513_s0 + %s10819_s10]]   ;;  %s10823_s10 = smov 31  }
  0x25   :  { %12565 = sst [smem:[#allocation15_spill]] %s10965_s23 }
  0x26   :  { %s10985_s23 = sld [smem:[%s12513_s0 + %s10820_s22]]   ;;  %s10768_s22 = scalar_lea.vmem %s69_s24, 16 }
  0x27   :  { %12566 = sst [smem:[#allocation16_spill]] %s10970_s4  ;;  %p10769_p0 = scmp.ne.s32.totalorder %s69_s24, %s10768_s22 }
  0x28   :  { %12567 = sst [smem:[#allocation17_spill]] %s10975_s11  ;;  %p10774_p2 = scmp.lt.s32.totalorder %s10768_s22, %s10768_s22 }
  0x29   :  { %s10990_s4 = sld [smem:[%s12513_s0 + %s10821_s15]]  }
  0x2a   :  { %12568 = sst [smem:[#allocation18_spill]] %s10980_s7  ;;  %p10775_p3 = por %p10774_p2, %p10773_p1 }
  0x2b   :  { %s10996_s16 = sld [smem:[%s12513_s0 + %s10822_s2]]  }
  0x2c   :  { %12569 = sst [smem:[#allocation19_spill]] %s10985_s23  ;;  %p10776_p4 = pnand %p10775_p3, %p10769_p0 }
  0x2d   :  { %s11001_s18 = sld [smem:[%s12513_s0 + %s10823_s10]]  }
  0x2f   :  { %12570 = sst [smem:[#allocation20_spill]] %s10990_s4 }
  0x31   :  { %12571 = sst [smem:[#allocation21_spill]] %s10996_s16 }
  0x33   :  { %12572 = sst [smem:[#allocation22_spill]] %s11001_s18 }
  0x34   :  { %10779 = shalt.err (!%p10776_p4)  }
  0x35   :  { %s10824_s5 = smov [#allocation3]   ;;  %s10825_s20 = smov 1  }
  0x36   :  { %71 = dma.vmem_to_smem %s69_s24, 16, %s10824_s5, [#allocation2] }
  0x37   :  { %s9099_s26 = sld [smem:[%s12513_s0 + %s10825_s20]]  }
  0x3d   :  { %s72_s27 = sshll.u32 %s9099_s26, 4  ;;  %s73_s27 = int_to_ptr.vmem [resolvable:$true] %s72_s27 }
  0x3e   :  { %s10780_s2 = scalar_lea.vmem %s73_s27, 16  ;;  %p10785_p6 = scmp.lt.s32.totalorder %s73_s27, %s73_s27 }
  0x3f   :  { %p10781_p5 = scmp.ne.s32.totalorder %s73_s27, %s10780_s2  ;;  %p10786_p7 = scmp.lt.s32.totalorder %s10780_s2, %s10780_s2 }
  0x41   :  { %p10787_p8 = por %p10786_p7, %p10785_p6 }
  0x43   :  { %p10788_p9 = pnand %p10787_p8, %p10781_p5 }
  0x45   :  { %10791 = shalt.err (!%p10788_p9)  }
  0x46   :  { %s10826_s7 = smov [#allocation4]  }
  0x47   :  { %75 = dma.vmem_to_smem %s73_s27, 16, %s10826_s7, [#allocation2] }
  0x48   :  { %10792 = dma.done.wait [#allocation2], 32 }
  0x49   :  { %10793 = vsyncadd [#allocation2], 4294967264 }
  0x4a   :  { %77 = sfence }
  0x4b   :  { %v140_v0 = vld [vmem:[%s10862_s17] sm:$0xf]  ;;  %vm161_vm0 = vcmask 1043456   ;;  %vm148_vm1 = vcmask 31744   ;;  %v137_v2 = vld [vmem:[%s10852_s9 + $0x8] sm:$0xff]  ;;  %v292_v3 = vld [vmem:[%s10877_s29 + $0x18] sm:$0xff]  ;;  %v260_v44 = vlaneseq }
  0x4c   :  { %v136_v1 = vld [vmem:[%s10852_s9] sm:$0xff]  ;;  %9797 = vmatprep.subr.msk.mxu0 %vm161_vm0, %v140_v0  ;;  %9805 = vmatprep.subr.mxu1 %v292_v3  ;;  %v291_v4 = vld [vmem:[%s10877_s29 + $0x10] sm:$0xff]  ;;  %v290_v5 = vld [vmem:[%s10877_s29 + $0x8] sm:$0xff]  ;;  %vm300_vm2 = vcmask 261120   ;;  %vm404_vm3 = vcmask 64512   ;;  %s12552_s0 = smov 96  }
  0x4d   :  { %9799 = vmatprep.mubr.msk.f32.mxu0 %vm148_vm1, %v136_v1  ;;  %9798 = vmatpush3.msk.msra.mxu0 %vm161_vm0, %v140_v0  ;;  %v289_v6 = vld [vmem:[%s10877_s29] sm:$0xff]  ;;  %v138_v7 = vld [vmem:[%s10852_s9 + $0x10] sm:$0xff]  ;;  %v139_v8 = vld [vmem:[%s10852_s9 + $0x18] sm:$0xff]  ;;  %s12550_s9 = smov 88   ;;  %s12546_s17 = smov 80   ;;  %v11096_v45 = vshrl.u32 %v260_v44, 7 }
  0x4e   :  { %9800 = vmatmul.mubr.msk.f32.vlgmr.msra.gmra.mxu0 %vm148_vm1, %v137_v2  ;;  %9806 = vmatpush3.msra.mxu1 %v292_v3  ;;  %v9130_v9 = vld [vmem:[%s10867_s21] ss:$0 sm:$0xff]  ;;  %v251_v14 = vld [vmem:[%s10857_s13 + $0x8] sm:$0xff]  ;;  %v253_v20 = vld [vmem:[%s10857_s13 + $0x18] sm:$0xff]  ;;  %s12544_s21 = smov 112   ;;  %s267_s24 = sld [smem:[#allocation4]] }
  0x4f   :  { %9807 = vmatprep.subr.mxu1 %v291_v4  ;;  %9802 = vmatprep.mubr.msk.f32.mxu0 %vm148_vm1, %v138_v7  ;;  %v250_v13 = vld [vmem:[%s10857_s13] sm:$0xff]  ;;  %v252_v22 = vld [vmem:[%s10857_s13 + $0x10] sm:$0xff]  ;;  %s12548_s13 = smov 120   ;;  %v11099_v46 = vadd.s32 8, %v11096_v45  ;;  %v11101_v47 = vand.u32 127, %v260_v44  ;;  %v10832_v50 = vmov 0.0  }
  0x50   :  { %9808 = vmatpush3.msra.mxu1 %v291_v4  ;;  %v11041_v26 = vld [vmem:[%s10883_s3] ss:$0 sm:$0xff]  ;;  %vm492_vm9 = vcmask 130048   ;;  %s12542_s6 = smov 64   ;;  %s12540_s10 = smov 56   ;;  %vm1242_vm13 = vcmask 195584  }
  0x51   :  { %9809 = vmatprep.subr.mxu1 %v290_v5  ;;  %vm266_vm4 = vcmp.gt.s32.totalorder %v11101_v47, %v11099_v46  ;;  %vm265_vm6 = vcmp.gt.s32.totalorder %v11101_v47, %v11096_v45  ;;  %s12538_s12 = smov 48   ;;  %s12536_s22 = smov 72   ;;  %vm4419_vm0 = vcmask 523264  }
  0x52   :  { %9810 = vmatpush3.msra.mxu1 %v290_v5  ;;  %9803 = vmatmul.mubr.msk.f32.gmra.mxu0 %vm148_vm1, %v139_v8  ;;  %s12534_s5 = smov 104   ;;  %s9136_s20 = sld [smem:[#allocation4 + $0x1]] }
  0x53   :  { %9811 = vmatprep.subr.mxu1 %v289_v6  ;;  %s12532_s11 = smov 40   ;;  %s12573_s15 = smov 8  }
  0x54   :  { %9812 = vmatpush3.msra.mxu1 %v289_v6  ;;  %v268_v48 = vstv %s267_s24  ;;  %s12574_s26 = smov 16   ;;  %s12575_s27 = smov 24  }
  0x55   :  { %vm269_vm5 = vcmp.ge.s32.totalorder %v11101_v47, %v268_v48  ;;  %s12576_s2 = sld [smem:[#allocation7_spill]]  ;;  %s12593_s18 = smov 72  }
  0x56   :  { %vm271_vm7 = vmor %vm266_vm4, %vm269_vm5  ;;  %s12577_s7 = sld [smem:[#allocation6_spill]]  ;;  %s12594_s16 = smov 104  }
  0x57   :  { %vm270_vm8 = vmor %vm265_vm6, %vm269_vm5  ;;  %v11115_v51 = vsel %vm271_vm7, -1e+30, %v10832_v50  ;;  %s281_s24 = sld [smem:[#allocation3]]  ;;  %s12595_s23 = smov 40  }
  0x58   :  { %v11118_v54 = vsel %vm270_vm8, -1e+30, %v10832_v50  ;;  %s12596_s4 = smov 96  }
 0x10e   :  { %v9801_v10 = vpop.f32.mrf.mxu0 }
 0x10f   :  { %v237_v11 = vadd.f32 %v9801_v10, %v9130_v9 }
 0x110   :  { %v231_v12 = vpop.f32.mrf.mxu0 }
 0x111   :  { %v232_v15 = vadd.f32 %v9130_v9, %v231_v12  ;;  %v11024_v17 = vadd.f32 %v251_v14, %v237_v11 }
 0x112   :  { %v9804_v18 = vpop.f32.mrf.mxu0 }
 0x113   :  { %v11022_v16 = vadd.f32 %v250_v13, %v232_v15  ;;  %v247_v19 = vadd.f32 %v9804_v18, %v9130_v9 }
 0x114   :  { %v241_v21 = vpop.f32.mrf.mxu0 }
 0x115   :  { %9813 = vmatprep.mubr.msk.f32.mxu1 %vm300_vm2, %v11022_v16  ;;  %v242_v23 = vadd.f32 %v9130_v9, %v241_v21  ;;  %v11032_v24 = vadd.f32 %v253_v20, %v247_v19 }
 0x116   :  { %9814 = vmatmul.mubr.msk.f32.vlgmr.msra.gmra.mxu1 %vm300_vm2, %v11024_v17 }
 0x117   :  { %v11034_v25 = vadd.f32 %v252_v22, %v242_v23 }
 0x119   :  { %9816 = vmatprep.mubr.msk.f32.mxu1 %vm300_vm2, %v11034_v25 }
 0x11a   :  { %9817 = vmatmul.mubr.msk.f32.gmra.mxu1 %vm300_vm2, %v11032_v24 }
 0x1d6   :  { %v9815_v27 = vpop.f32.mrf.mxu1 }
 0x1d7   :  { %v11044_v28 = vadd.f32 %v9815_v27, %v11041_v26 }
 0x1d8   :  { %v379_v29 = vpop.f32.mrf.mxu1 }
 0x1d9   :  { %v11047_v30 = vadd.f32 %v11041_v26, %v379_v29  ;;  %402 = vrot.lane.b32.xlu0 %v11044_v28, %s12552_s0 }
 0x1da   :  { %v11089_v41 = vpop.f32.mrf.mxu1 }
 0x1db   :  { %400 = vrot.lane.b32.xlu1 %v11047_v30, %s12552_s0  ;;  %9823 = vmatprep.mubr.msk.f32.mxu0 %vm404_vm3, %v11047_v30 }
 0x1dc   :  { %v389_v42 = vpop.f32.mrf.mxu1 }
 0x1dd   :  { %608 = vrot.lane.b32.xlu0 %v11044_v28, %s12550_s9  ;;  %v11092_v43 = vadd.f32 %v11041_v26, %v389_v42 }
 0x1df   :  { %606 = vrot.lane.b32.xlu1 %v11047_v30, %s12550_s9 }
 0x1e1   :  { %602 = vrot.lane.b32.xlu0 %v11047_v30, %s12548_s13 }
 0x1e3   :  { %812 = vrot.lane.b32.xlu1 %v11044_v28, %s12546_s17 }
 0x1e5   :  { %604 = vrot.lane.b32.xlu0 %v11044_v28, %s12548_s13 }
 0x1e7   :  { %810 = vrot.lane.b32.xlu1 %v11047_v30, %s12546_s17 }
 0x1e9   :  { %806 = vrot.lane.b32.xlu0 %v11047_v30, %s12544_s21 }
 0x1eb   :  { %808 = vrot.lane.b32.xlu1 %v11044_v28, %s12544_s21 }
 0x24b   :  { %v403_v31 = vpop.permute.xlu0 %402 }
 0x24c   :  { %9819 = vmatprep.subr.msk.mxu0 %vm404_vm3, %v403_v31 }
 0x24d   :  { %9820 = vmatpush3.xpose.msk.msra.mxu0 %vm404_vm3, %v403_v31  ;;  %v401_v32 = vpop.permute.xlu1 %400 }
 0x24e   :  { %9821 = vmatprep.subr.msk.mxu0 %vm404_vm3, %v401_v32 }
 0x24f   :  { %v609_v33 = vpop.permute.xlu0 %608 }
 0x250   :  { %9833 = vmatprep.subr.msk.mxu1 %vm404_vm3, %v609_v33 }
 0x251   :  { %9822 = vmatpush3.xpose.msk.msra.mxu0 %vm404_vm3, %v401_v32  ;;  %9834 = vmatpush3.xpose.msk.msra.mxu1 %vm404_vm3, %v609_v33  ;;  %v607_v34 = vpop.permute.xlu1 %606 }
 0x252   :  { %9835 = vmatprep.subr.msk.mxu1 %vm404_vm3, %v607_v34 }
 0x253   :  { %v603_v35 = vpop.permute.xlu0 %602 }
 0x254   :  { %9824 = vmatmul.mubr.msk.f32.vlgmr.msra.gmra.mxu0 %vm404_vm3, %v11044_v28  ;;  %9837 = vmatprep.mubr.msk.f32.mxu1 %vm404_vm3, %v603_v35 }
 0x255   :  { %9836 = vmatpush3.xpose.msk.msra.mxu1 %vm404_vm3, %v607_v34  ;;  %v813_v36 = vpop.permute.xlu1 %812 }
 0x256   :  { %9847 = vmatprep.subr.msk.mxu1 %vm404_vm3, %v813_v36 }
 0x257   :  { %v605_v37 = vpop.permute.xlu0 %604 }
 0x258   :  { %9838 = vmatmul.mubr.msk.f32.vlgmr.msra.gmra.mxu1 %vm404_vm3, %v605_v37 }
 0x259   :  { %9848 = vmatpush3.xpose.msk.msra.mxu1 %vm404_vm3, %v813_v36  ;;  %v811_v38 = vpop.permute.xlu1 %810 }
 0x25a   :  { %9849 = vmatprep.subr.msk.mxu1 %vm404_vm3, %v811_v38 }
 0x25b   :  { %v807_v39 = vpop.permute.xlu0 %806 }
 0x25c   :  { %9851 = vmatprep.mubr.msk.f32.mxu1 %vm404_vm3, %v807_v39 }
 0x25d   :  { %9850 = vmatpush3.xpose.msk.msra.mxu1 %vm404_vm3, %v811_v38  ;;  %v809_v40 = vpop.permute.xlu1 %808 }
 0x260   :  { %9852 = vmatmul.mubr.msk.f32.vlgmr.msra.gmra.mxu1 %vm404_vm3, %v809_v40 }
 0x261   :  { %9879 = vmatprep.mubr.msk.f32.mxu1 %vm404_vm3, %v11092_v43 }
 0x314   :  { %v9825_v49 = vpop.f32.mrf.mxu0 }
 0x315   :  { %v489_v52 = vmul.f32 0.35355338, %v9825_v49 }
 0x316   :  { %v479_v53 = vpop.f32.mrf.mxu0 }
 0x317   :  { %v488_v55 = vmul.f32 0.35355338, %v479_v53  ;;  %v491_v56 = vadd.f32 %v489_v52, %v11115_v51 }
 0x318   :  { %v9839_v57 = vpop.f32.mrf.mxu1 }
 0x319   :  { %v496_v58 = vsel %vm492_vm9, %v491_v56, -inf  ;;  %v490_v59 = vadd.f32 %v488_v55, %v11118_v54  ;;  %v694_v61 = vmul.f32 0.35355338, %v9839_v57  ;;  %v11160_v55 = vadd.f32 %v11089_v41, %v11041_v26 }
 0x31a   :  { %v684_v60 = vpop.f32.mrf.mxu1  ;;  %497 = vmax.xlane.f32.xlu1 %v496_v58 }
 0x31b   :  { %v693_v62 = vmul.f32 0.35355338, %v684_v60  ;;  %v493_v63 = vsel %vm492_vm9, %v490_v59, -inf  ;;  %v696_v2 = vadd.f32 %v694_v61, %v11115_v51 }
 0x31c   :  { %494 = vmax.xlane.f32.xlu0 %v493_v63 }
 0x31d   :  { %v695_v0 = vadd.f32 %v693_v62, %v11118_v54  ;;  %v700_v5 = vsel %vm492_vm9, %v696_v2, -inf }
 0x31f   :  { %v697_v1 = vsel %vm492_vm9, %v695_v0, -inf }
 0x320   :  { %v9853_v3 = vpop.f32.mrf.mxu1  ;;  %698 = vmax.xlane.f32.xlu0 %v697_v1 }
 0x321   :  { %v898_v4 = vmul.f32 0.35355338, %v9853_v3 }
 0x322   :  { %v888_v8 = vpop.f32.mrf.mxu1 }
 0x323   :  { %v900_v6 = vadd.f32 %v898_v4, %v11115_v51  ;;  %v897_v9 = vmul.f32 0.35355338, %v888_v8 }
 0x324   :  { %701 = vmax.xlane.f32.xlu0 %v700_v5 }
 0x325   :  { %v904_v7 = vsel %vm492_vm9, %v900_v6, -inf  ;;  %v899_v10 = vadd.f32 %v897_v9, %v11118_v54 }
 0x327   :  { %v901_v11 = vsel %vm492_vm9, %v899_v10, -inf }
 0x328   :  { %905 = vmax.xlane.f32.xlu0 %v904_v7 }
 0x32b   :  { %517 = vrot.lane.b32.xlu1 %v11044_v28, %s12542_s6 }
 0x32f   :  { %721 = vrot.lane.b32.xlu1 %v11044_v28, %s12540_s10 }
 0x333   :  { %719 = vrot.lane.b32.xlu1 %v11047_v30, %s12540_s10 }
 0x337   :  { %923 = vrot.lane.b32.xlu1 %v11047_v30, %s12538_s12 }
 0x33e   :  { %515 = vrot.lane.b32.xlu0 %v11047_v30, %s12542_s6 }
 0x342   :  { %925 = vrot.lane.b32.xlu0 %v11044_v28, %s12538_s12 }
 0x346   :  { %1016 = vrot.lane.b32.xlu0 %v11044_v28, %s12536_s22 }
 0x35b   :  { %902 = vmax.xlane.f32.xlu1 %v901_v11 }
 0x36c   :  { %1014 = vrot.lane.b32.xlu1 %v11047_v30, %s12536_s22 }
 0x3a3   :  { %v498_v12 = vpop.xlane.xlu1 %497 }
 0x3a4   :  { %v500_v13 = vsub.f32 %v491_v56, %v498_v12 }
 0x3a5   :  { %v495_v14 = vpop.xlane.xlu0 %494 }
 0x3a6   :  { %v503_v15 = vmul.f32 1.442695, %v500_v13  ;;  %v499_v18 = vsub.f32 %v490_v59, %v495_v14 }
 0x3a7   :  { %v518_v19 = vpop.permute.xlu1 %517 }
 0x3a8   :  { %10454 = vpow2.f32 %v503_v15  ;;  %v501_v20 = vmul.f32 1.442695, %v499_v18  ;;  %9826 = vmatprep.subr.mxu0 %v518_v19 }
 0x3a9   :  { %9827 = vmatpush3.msra.mxu0 %v518_v19  ;;  %v699_v21 = vpop.xlane.xlu0 %698 }
 0x3aa   :  { %10456 = vpow2.f32 %v501_v20  ;;  %v703_v22 = vsub.f32 %v695_v0, %v699_v21 }
 0x3ab   :  { %v722_v39 = vpop.permute.xlu1 %721 }
 0x3ac   :  { %v705_v23 = vmul.f32 1.442695, %v703_v22 }
 0x3ad   :  { %v702_v27 = vpop.xlane.xlu0 %701 }
 0x3ae   :  { %10458 = vpow2.f32 %v705_v23  ;;  %v704_v29 = vsub.f32 %v696_v2, %v702_v27 }
 0x3af   :  { %v720_v56 = vpop.permute.xlu1 %719 }
 0x3b0   :  { %v707_v31 = vmul.f32 1.442695, %v704_v29 }
 0x3b1   :  { %v906_v32 = vpop.xlane.xlu0 %905 }
 0x3b2   :  { %10460 = vpow2.f32 %v707_v31  ;;  %v908_v33 = vsub.f32 %v900_v6, %v906_v32 }
 0x3b3   :  { %v924_v57 = vpop.permute.xlu1 %923 }
 0x3b4   :  { %v911_v34 = vmul.f32 1.442695, %v908_v33 }
 0x3b5   :  { %v10455_v35 = vpop.eup %10454  ;;  %v516_v36 = vpop.permute.xlu0 %515 }
 0x3b6   :  { %10462 = vpow2.f32 %v911_v34  ;;  %9828 = vmatprep.subr.mxu0 %v516_v36  ;;  %v508_v37 = vsel %vm492_vm9, %v10455_v35, 0.0 }
 0x3b7   :  { %v10457_v38 = vpop.eup %10456  ;;  %509 = vadd.xlane.f32.xlu0 %v508_v37  ;;  %9829 = vmatpush3.msra.mxu0 %v516_v36 }
 0x3b8   :  { %9840 = vmatprep.subr.mxu0 %v722_v39  ;;  %v505_v40 = vsel %vm492_vm9, %v10457_v38, 0.0 }
 0x3b9   :  { %506 = vadd.xlane.f32.xlu1 %v505_v40  ;;  %v926_v26 = vpop.permute.xlu0 %925 }
 0x3bb   :  { %v10459_v42 = vpop.eup %10458 }
 0x3bc   :  { %v709_v44 = vsel %vm492_vm9, %v10459_v42, 0.0 }
 0x3bd   :  { %710 = vadd.xlane.f32.xlu1 %v709_v44  ;;  %v1017_v41 = vpop.permute.xlu0 %1016 }
 0x3bf   :  { %v10461_v48 = vpop.eup %10460 }
 0x3c0   :  { %v712_v49 = vsel %vm492_vm9, %v10461_v48, 0.0 }
 0x3c1   :  { %713 = vadd.xlane.f32.xlu0 %v712_v49 }
 0x3c3   :  { %v11152_v52 = vpop.eup %10462 }
 0x3c4   :  { %v916_v53 = vsel %vm492_vm9, %v11152_v52, 0.0 }
 0x3c5   :  { %917 = vadd.xlane.f32.xlu0 %v916_v53 }
 0x3ce   :  { %1010 = vrot.lane.b32.xlu1 %v11047_v30, %s12534_s5 }
 0x3db   :  { %1249 = vrot.lane.b32.xlu0 %v11160_v55, %s12552_s0 }
 0x3df   :  { %1012 = vrot.lane.b32.xlu0 %v11044_v28, %s12534_s5 }
 0x3e4   :  { %v903_v58 = vpop.xlane.xlu1 %902 }
 0x3e5   :  { %v907_v59 = vsub.f32 %v899_v10, %v903_v58 }
 0x3e7   :  { %v909_v60 = vmul.f32 1.442695, %v907_v59 }
 0x3e8   :  { %v1015_v63 = vpop.permute.xlu1 %1014 }
 0x3e9   :  { %10464 = vpow2.f32 %v909_v60 }
 0x3f6   :  { %v10465_v61 = vpop.eup %10464 }
 0x3f7   :  { %v913_v62 = vsel %vm492_vm9, %v10465_v61, 0.0 }
 0x3f8   :  { %914 = vadd.xlane.f32.xlu1 %v913_v62 }
 0x409   :  { %1247 = vrot.lane.b32.xlu1 %v11092_v43, %s12552_s0 }
 0x440   :  { %v510_v0 = vpop.xlane.xlu0 %509 }
 0x441   :  { %10466 = vrcp.f32 %v510_v0 }
 0x442   :  { %v507_v1 = vpop.xlane.xlu1 %506 }
 0x443   :  { %10468 = vrcp.f32 %v507_v1 }
 0x446   :  { %v711_v2 = vpop.xlane.xlu1 %710 }
 0x447   :  { %10470 = vrcp.f32 %v711_v2 }
 0x44a   :  { %v714_v3 = vpop.xlane.xlu0 %713  ;;  %v1011_v14 = vpop.permute.xlu1 %1010 }
 0x44b   :  { %10472 = vrcp.f32 %v714_v3 }
 0x44e   :  { %v918_v4 = vpop.xlane.xlu0 %917  ;;  %v10467_v5 = vpop.eup %10466 }
 0x44f   :  { %v514_v9 = vmul.f32 %v10467_v5, %v10455_v35  ;;  %10474 = vrcp.f32 %v918_v4  ;;  %v275_v35 = vstv %s9136_s20  ;;  %s9137_s20 = sld [smem:[#allocation3 + $0x1]] }
 0x450   :  { %v10469_v6 = vpop.eup %10468  ;;  %vm276_vm10 = vcmp.ge.s32.totalorder %v11101_v47, %v275_v35 }
 0x451   :  { %v513_v7 = vmul.f32 %v10469_v6, %v10457_v38  ;;  %vm277_vm11 = vmor %vm265_vm6, %vm276_vm10 }
 0x452   :  { %v1250_v8 = vpop.permute.xlu0 %1249  ;;  %v11206_v49 = vsel %vm277_vm11, -1e+30, %v10832_v50  ;;  %vm278_vm12 = vmor %vm266_vm4, %vm276_vm10 }
 0x453   :  { %9830 = vmatprep.mubr.msk.f32.mxu0 %vm492_vm9, %v513_v7  ;;  %9875 = vmatprep.subr.msk.mxu1 %vm404_vm3, %v1250_v8  ;;  %v11216_v58 = vsel %vm278_vm12, -1e+30, %v10832_v50 }
 0x454   :  { %v10471_v10 = vpop.eup %10470  ;;  %9831 = vmatmul.mubr.msk.f32.vlgmr.msra.gmra.mxu0 %vm492_vm9, %v514_v9  ;;  %9876 = vmatpush3.xpose.msk.msra.mxu1 %vm404_vm3, %v1250_v8 }
 0x455   :  { %9841 = vmatpush3.msra.mxu0 %v722_v39  ;;  %v717_v11 = vmul.f32 %v10471_v10, %v10459_v42 }
 0x456   :  { %9842 = vmatprep.subr.mxu0 %v720_v56  ;;  %v1013_v23 = vpop.permute.xlu0 %1012 }
 0x457   :  { %9843 = vmatpush3.msra.mxu0 %v720_v56  ;;  %9844 = vmatprep.mubr.msk.f32.mxu0 %vm492_vm9, %v717_v11 }
 0x458   :  { %v10473_v12 = vpop.eup %10472  ;;  %9854 = vmatprep.subr.mxu0 %v926_v26 }
 0x459   :  { %v718_v13 = vmul.f32 %v10473_v12, %v10461_v48 }
 0x45b   :  { %9845 = vmatmul.mubr.msk.f32.vlgmr.msra.gmra.mxu0 %vm492_vm9, %v718_v13 }
 0x45c   :  { %9855 = vmatpush3.msra.mxu0 %v926_v26  ;;  %v10475_v19 = vpop.eup %10474 }
 0x45d   :  { %9856 = vmatprep.subr.mxu0 %v924_v57  ;;  %v922_v22 = vmul.f32 %v10475_v19, %v11152_v52 }
 0x45e   :  { %9857 = vmatpush3.msra.mxu0 %v924_v57 }
 0x45f   :  { %9861 = vmatprep.subr.msk.mxu0 %vm404_vm3, %v1017_v41 }
 0x481   :  { %v915_v15 = vpop.xlane.xlu1 %914 }
 0x482   :  { %10476 = vrcp.f32 %v915_v15 }
 0x485   :  { %v1248_v18 = vpop.permute.xlu1 %1247 }
 0x486   :  { %9877 = vmatprep.subr.msk.mxu1 %vm404_vm3, %v1248_v18 }
 0x487   :  { %9878 = vmatpush3.xpose.msk.msra.mxu1 %vm404_vm3, %v1248_v18 }
 0x48a   :  { %9880 = vmatmul.mubr.msk.f32.vlgmr.msra.gmra.mxu1 %vm404_vm3, %v11160_v55 }
 0x48f   :  { %v10477_v20 = vpop.eup %10476 }
 0x490   :  { %v921_v21 = vmul.f32 %v10477_v20, %v10465_v61 }
 0x492   :  { %9858 = vmatprep.mubr.msk.f32.mxu0 %vm492_vm9, %v921_v21 }
 0x493   :  { %9859 = vmatmul.mubr.msk.f32.vlgmr.msra.gmra.mxu0 %vm492_vm9, %v922_v22 }
 0x494   :  { %9862 = vmatpush3.xpose.msk.msra.mxu0 %vm404_vm3, %v1017_v41  ;;  %9865 = vmatprep.mubr.msk.f32.mxu0 %vm404_vm3, %v1011_v14 }
 0x495   :  { %9863 = vmatprep.subr.msk.mxu0 %vm404_vm3, %v1015_v63 }
 0x498   :  { %9864 = vmatpush3.xpose.msk.msra.mxu0 %vm404_vm3, %v1015_v63 }
 0x49b   :  { %9866 = vmatmul.mubr.msk.f32.vlgmr.msra.gmra.mxu0 %vm404_vm3, %v1013_v23 }
 0x514   :  { %v11188_v27 = vpop.f32.mrf.mxu0 }
 0x516   :  { %v11190_v29 = vpop.f32.mrf.mxu0 }
 0x51b   :  { %v11192_v31 = vpop.f32.mrf.mxu0 }
 0x51d   :  { %v11194_v32 = vpop.f32.mrf.mxu0 }
 0x54a   :  { %v9881_v34 = vpop.f32.mrf.mxu1 }
 0x54b   :  { %v1335_v56 = vmul.f32 0.35355338, %v9881_v34 }
 0x54c   :  { %v1325_v37 = vpop.f32.mrf.mxu1 }
 0x54d   :  { %v1334_v42 = vmul.f32 0.35355338, %v1325_v37  ;;  %v1337_v60 = vadd.f32 %v1335_v56, %v11216_v58 }
 0x54f   :  { %v1336_v57 = vadd.f32 %v1334_v42, %v11206_v49  ;;  %v1341_v61 = vsel %vm492_vm9, %v1337_v60, -inf }
 0x551   :  { %v1338_v59 = vsel %vm492_vm9, %v1336_v57, -inf }
 0x553   :  { %v11196_v33 = vpop.f32.mrf.mxu0 }
 0x555   :  { %v11198_v36 = vpop.f32.mrf.mxu0 }
 0x55b   :  { %v9867_v38 = vpop.f32.mrf.mxu0 }
 0x55c   :  { %v1102_v39 = vmul.f32 0.35355338, %v9867_v38 }
 0x55d   :  { %v1092_v40 = vpop.f32.mrf.mxu0 }
 0x55e   :  { %v1101_v44 = vmul.f32 0.35355338, %v1092_v40  ;;  %v1104_v48 = vadd.f32 %v1102_v39, %v11115_v51 }
 0x560   :  { %v1108_v52 = vsel %vm492_vm9, %v1104_v48, -inf  ;;  %v1103_v53 = vadd.f32 %v1101_v44, %v11118_v54 }
 0x561   :  { %1109 = vmax.xlane.f32.xlu1 %v1108_v52 }
 0x562   :  { %v1105_v45 = vsel %vm492_vm9, %v1103_v53, -inf }
 0x563   :  { %1106 = vmax.xlane.f32.xlu0 %v1105_v45 }
 0x567   :  { %1339 = vmax.xlane.f32.xlu0 %v1338_v59 }
 0x56b   :  { %1342 = vmax.xlane.f32.xlu0 %v1341_v61 }
 0x5ea   :  { %v1110_v6 = vpop.xlane.xlu1 %1109 }
 0x5eb   :  { %v1112_v7 = vsub.f32 %v1104_v48, %v1110_v6 }
 0x5ec   :  { %v1107_v46 = vpop.xlane.xlu0 %1106 }
 0x5ed   :  { %v1115_v8 = vmul.f32 1.442695, %v1112_v7  ;;  %v1111_v9 = vsub.f32 %v1103_v53, %v1107_v46 }
 0x5ef   :  { %v1113_v10 = vmul.f32 1.442695, %v1111_v9 }
 0x5f0   :  { %v1340_v62 = vpop.xlane.xlu0 %1339 }
 0x5f1   :  { %v1344_v26 = vsub.f32 %v1336_v57, %v1340_v62 }
 0x5f3   :  { %v1346_v41 = vmul.f32 1.442695, %v1344_v26 }
 0x5f4   :  { %v1343_v63 = vpop.xlane.xlu0 %1342 }
 0x5f5   :  { %10478 = vpow2.f32 %v1346_v41  ;;  %v1345_v0 = vsub.f32 %v1337_v60, %v1343_v63 }
 0x5f7   :  { %v1348_v1 = vmul.f32 1.442695, %v1345_v0 }
 0x5f9   :  { %10480 = vpow2.f32 %v1348_v1 }
 0x5fa   :  { %10482 = vpow2.f32 %v1115_v8 }
 0x5fb   :  { %10484 = vpow2.f32 %v1113_v10 }
 0x602   :  { %v10479_v2 = vpop.eup %10478 }
 0x603   :  { %v1350_v3 = vsel %vm492_vm9, %v10479_v2, 0.0 }
 0x604   :  { %1351 = vadd.xlane.f32.xlu1 %v1350_v3 }
 0x606   :  { %v10481_v4 = vpop.eup %10480 }
 0x607   :  { %v1353_v5 = vsel %vm492_vm9, %v10481_v4, 0.0  ;;  %v10483_v11 = vpop.eup %10482 }
 0x608   :  { %1354 = vadd.xlane.f32.xlu0 %v1353_v5  ;;  %v1120_v12 = vsel %vm492_vm9, %v10483_v11, 0.0 }
 0x615   :  { %1129 = vrot.lane.b32.xlu1 %v11044_v28, %s12532_s11  ;;  %v10485_v28 = vpop.eup %10484 }
 0x616   :  { %v1117_v13 = vsel %vm492_vm9, %v10485_v28, 0.0 }
 0x619   :  { %1362 = vrot.lane.b32.xlu1 %v11160_v55, %s12542_s6 }
 0x61d   :  { %1360 = vrot.lane.b32.xlu1 %v11092_v43, %s12542_s6  ;;  %s12585_s6 = sld [smem:[#allocation13_spill]] }
 0x61e   :  { %1127 = vrot.lane.b32.xlu0 %v11047_v30, %s12532_s11 }
 0x63d   :  { %1121 = vadd.xlane.f32.xlu0 %v1120_v12 }
 0x641   :  { %1118 = vadd.xlane.f32.xlu1 %v1117_v13 }
 0x652   :  { %1451 = vrot.lane.b32.xlu1 %v11092_v43, %s12550_s9 }
 0x653   :  { %1453 = vrot.lane.b32.xlu0 %v11160_v55, %s12550_s9 }
 0x656   :  { %1449 = vrot.lane.b32.xlu1 %v11160_v55, %s12548_s13 }
 0x657   :  { %1447 = vrot.lane.b32.xlu0 %v11092_v43, %s12548_s13 }
 0x68d   :  { %v1352_v30 = vpop.xlane.xlu1 %1351 }
 0x68e   :  { %10486 = vrcp.f32 %v1352_v30 }
 0x691   :  { %v1130_v14 = vpop.permute.xlu1 %1129  ;;  %v1355_v15 = vpop.xlane.xlu0 %1354 }
 0x692   :  { %9868 = vmatprep.subr.mxu0 %v1130_v14 }
 0x693   :  { %9869 = vmatpush3.msra.mxu0 %v1130_v14 }
 0x695   :  { %v1128_v18 = vpop.permute.xlu0 %1127  ;;  %v1363_v19 = vpop.permute.xlu1 %1362 }
 0x696   :  { %9870 = vmatprep.subr.mxu0 %v1128_v18 }
 0x697   :  { %9871 = vmatpush3.msra.mxu0 %v1128_v18 }
 0x698   :  { %9882 = vmatprep.subr.mxu0 %v1363_v19 }
 0x699   :  { %v1361_v20 = vpop.permute.xlu1 %1360 }
 0x69b   :  { %v10487_v23 = vpop.eup %10486 }
 0x69c   :  { %v1358_v42 = vmul.f32 %v10487_v23, %v10479_v2 }
 0x6c6   :  { %v1122_v21 = vpop.xlane.xlu0 %1121 }
 0x6c7   :  { %10488 = vrcp.f32 %v1122_v21 }
 0x6ca   :  { %v1119_v22 = vpop.xlane.xlu1 %1118  ;;  %v1454_v38 = vpop.permute.xlu0 %1453 }
 0x6cb   :  { %10490 = vrcp.f32 %v1119_v22 }
 0x6cc   :  { %10492 = vrcp.f32 %v1355_v15 }
 0x6ce   :  { %v1448_v48 = vpop.permute.xlu0 %1447  ;;  %v1452_v52 = vpop.permute.xlu1 %1451 }
 0x6d2   :  { %v1450_v53 = vpop.permute.xlu1 %1449 }
 0x6d4   :  { %v10489_v34 = vpop.eup %10488 }
 0x6d5   :  { %v1126_v39 = vmul.f32 %v10489_v34, %v10483_v11 }
 0x6d8   :  { %v10491_v35 = vpop.eup %10490 }
 0x6d9   :  { %v1125_v37 = vmul.f32 %v10491_v35, %v10485_v28  ;;  %v10493_v40 = vpop.eup %10492 }
 0x6da   :  { %v1359_v44 = vmul.f32 %v10493_v40, %v10481_v4 }
 0x6db   :  { %9872 = vmatprep.mubr.msk.f32.mxu0 %vm492_vm9, %v1125_v37 }
 0x6dc   :  { %9873 = vmatmul.mubr.msk.f32.vlgmr.msra.gmra.mxu0 %vm492_vm9, %v1126_v39 }
 0x6dd   :  { %9883 = vmatpush3.msra.mxu0 %v1363_v19  ;;  %9886 = vmatprep.mubr.msk.f32.mxu0 %vm492_vm9, %v1358_v42 }
 0x6de   :  { %9884 = vmatprep.subr.mxu0 %v1361_v20 }
 0x6df   :  { %9885 = vmatpush3.msra.mxu0 %v1361_v20 }
 0x6e0   :  { %9889 = vmatprep.subr.msk.mxu0 %vm404_vm3, %v1454_v38  ;;  %9887 = vmatmul.mubr.msk.f32.vlgmr.msra.gmra.mxu0 %vm492_vm9, %v1359_v44 }
 0x6e1   :  { %9890 = vmatpush3.xpose.msk.msra.mxu0 %vm404_vm3, %v1454_v38  ;;  %9893 = vmatprep.mubr.msk.f32.mxu0 %vm404_vm3, %v1448_v48 }
 0x6e2   :  { %9891 = vmatprep.subr.msk.mxu0 %vm404_vm3, %v1452_v52 }
 0x6e5   :  { %9892 = vmatpush3.xpose.msk.msra.mxu0 %vm404_vm3, %v1452_v52 }
 0x6e8   :  { %9894 = vmatmul.mubr.msk.f32.vlgmr.msra.gmra.mxu0 %vm404_vm3, %v1450_v53 }
 0x79c   :  { %v11251_v56 = vpop.f32.mrf.mxu0 }
 0x79e   :  { %v11253_v45 = vpop.f32.mrf.mxu0 }
 0x7a0   :  { %v11255_v57 = vpop.f32.mrf.mxu0 }
 0x7a2   :  { %v11257_v59 = vpop.f32.mrf.mxu0 }
 0x7a8   :  { %v9895_v60 = vpop.f32.mrf.mxu0 }
 0x7a9   :  { %v1539_v61 = vmul.f32 0.35355338, %v9895_v60 }
 0x7aa   :  { %v1529_v46 = vpop.f32.mrf.mxu0 }
 0x7ab   :  { %v1538_v62 = vmul.f32 0.35355338, %v1529_v46  ;;  %v1541_v26 = vadd.f32 %v1539_v61, %v11216_v58 }
 0x7ad   :  { %v1545_v41 = vsel %vm492_vm9, %v1541_v26, -inf  ;;  %v1540_v63 = vadd.f32 %v1538_v62, %v11206_v49 }
 0x7ae   :  { %1546 = vmax.xlane.f32.xlu1 %v1545_v41 }
 0x7af   :  { %v1542_v0 = vsel %vm492_vm9, %v1540_v63, -inf }
 0x7b0   :  { %1543 = vmax.xlane.f32.xlu0 %v1542_v0 }
 0x7bf   :  { %1566 = vrot.lane.b32.xlu1 %v11160_v55, %s12540_s10 }
 0x7c3   :  { %1657 = vrot.lane.b32.xlu1 %v11160_v55, %s12546_s17 }
 0x7c7   :  { %1655 = vrot.lane.b32.xlu1 %v11092_v43, %s12546_s17 }
 0x7cb   :  { %1653 = vrot.lane.b32.xlu1 %v11160_v55, %s12544_s21 }
 0x837   :  { %v1547_v1 = vpop.xlane.xlu1 %1546 }
 0x838   :  { %v1549_v2 = vsub.f32 %v1541_v26, %v1547_v1 }
 0x839   :  { %v1544_v3 = vpop.xlane.xlu0 %1543 }
 0x83a   :  { %v1552_v4 = vmul.f32 1.442695, %v1549_v2  ;;  %v1548_v5 = vsub.f32 %v1540_v63, %v1544_v3 }
 0x83b   :  { %v1567_v6 = vpop.permute.xlu1 %1566 }
 0x83c   :  { %10494 = vpow2.f32 %v1552_v4  ;;  %v1550_v7 = vmul.f32 1.442695, %v1548_v5  ;;  %9896 = vmatprep.subr.mxu1 %v1567_v6 }
 0x83d   :  { %9897 = vmatpush3.msra.mxu1 %v1567_v6 }
 0x83e   :  { %10496 = vpow2.f32 %v1550_v7 }
 0x83f   :  { %v1658_v30 = vpop.permute.xlu1 %1657 }
 0x843   :  { %v1656_v21 = vpop.permute.xlu1 %1655 }
 0x847   :  { %v1654_v22 = vpop.permute.xlu1 %1653 }
 0x849   :  { %v10495_v8 = vpop.eup %10494 }
 0x84a   :  { %v1557_v9 = vsel %vm492_vm9, %v10495_v8, 0.0 }
 0x84b   :  { %v10497_v10 = vpop.eup %10496  ;;  %1558 = vadd.xlane.f32.xlu0 %v1557_v9 }
 0x84c   :  { %v1554_v11 = vsel %vm492_vm9, %v10497_v10, 0.0 }
 0x84f   :  { %1555 = vadd.xlane.f32.xlu0 %v1554_v11 }
 0x865   :  { %1564 = vrot.lane.b32.xlu0 %v11092_v43, %s12540_s10  ;;  %s12584_s10 = sld [smem:[#allocation11_spill]] }
 0x869   :  { %1651 = vrot.lane.b32.xlu0 %v11092_v43, %s12544_s21 }
 0x8d4   :  { %v1559_v12 = vpop.xlane.xlu0 %1558 }
 0x8d5   :  { %10498 = vrcp.f32 %v1559_v12 }
 0x8d8   :  { %v1556_v28 = vpop.xlane.xlu0 %1555 }
 0x8d9   :  { %10500 = vrcp.f32 %v1556_v28 }
 0x8dc   :  { %v1565_v13 = vpop.permute.xlu0 %1564 }
 0x8dd   :  { %9898 = vmatprep.subr.mxu1 %v1565_v13 }
 0x8de   :  { %9899 = vmatpush3.msra.mxu1 %v1565_v13 }
 0x8df   :  { %9903 = vmatprep.subr.msk.mxu1 %vm404_vm3, %v1658_v30 }
 0x8e0   :  { %v1652_v20 = vpop.permute.xlu0 %1651 }
 0x8e2   :  { %v10499_v14 = vpop.eup %10498 }
 0x8e3   :  { %v1563_v19 = vmul.f32 %v10499_v14, %v10495_v8 }
 0x8e6   :  { %v10501_v15 = vpop.eup %10500 }
 0x8e7   :  { %v1562_v18 = vmul.f32 %v10501_v15, %v10497_v10 }
 0x8e9   :  { %9900 = vmatprep.mubr.msk.f32.mxu1 %vm492_vm9, %v1562_v18 }
 0x8ea   :  { %9901 = vmatmul.mubr.msk.f32.vlgmr.msra.gmra.mxu1 %vm492_vm9, %v1563_v19 }
 0x8eb   :  { %9904 = vmatpush3.xpose.msk.msra.mxu1 %vm404_vm3, %v1658_v30  ;;  %9907 = vmatprep.mubr.msk.f32.mxu1 %vm404_vm3, %v1652_v20 }
 0x8ec   :  { %9905 = vmatprep.subr.msk.mxu1 %vm404_vm3, %v1656_v21 }
 0x8ef   :  { %9906 = vmatpush3.xpose.msk.msra.mxu1 %vm404_vm3, %v1656_v21 }
 0x8f2   :  { %9908 = vmatmul.mubr.msk.f32.vlgmr.msra.gmra.mxu1 %vm404_vm3, %v1654_v22 }
 0x9aa   :  { %v11285_v23 = vpop.f32.mrf.mxu1 }
 0x9ac   :  { %v11287_v34 = vpop.f32.mrf.mxu1 }
 0x9b2   :  { %v9909_v35 = vpop.f32.mrf.mxu1 }
 0x9b3   :  { %v1743_v37 = vmul.f32 0.35355338, %v9909_v35 }
 0x9b4   :  { %v1733_v38 = vpop.f32.mrf.mxu1 }
 0x9b5   :  { %v1742_v39 = vmul.f32 0.35355338, %v1733_v38  ;;  %v1745_v40 = vadd.f32 %v1743_v37, %v11216_v58 }
 0x9b7   :  { %v1749_v42 = vsel %vm492_vm9, %v1745_v40, -inf  ;;  %v1744_v44 = vadd.f32 %v1742_v39, %v11206_v49 }
 0x9b8   :  { %1750 = vmax.xlane.f32.xlu1 %v1749_v42  ;;  %v2092_v42 = vld [vmem:[%s10888_s8 + $0x18] sm:$0xff] }
 0x9b9   :  { %v1746_v48 = vsel %vm492_vm9, %v1744_v44, -inf }
 0x9ba   :  { %1747 = vmax.xlane.f32.xlu0 %v1746_v48 }
 0x9c9   :  { %1770 = vrot.lane.b32.xlu1 %v11160_v55, %s12538_s12 }
 0x9cd   :  { %1861 = vrot.lane.b32.xlu1 %v11160_v55, %s12536_s22 }
 0x9d1   :  { %1859 = vrot.lane.b32.xlu1 %v11092_v43, %s12536_s22 }
 0x9d5   :  { %1857 = vrot.lane.b32.xlu1 %v11160_v55, %s12534_s5 }
 0xa41   :  { %v1751_v52 = vpop.xlane.xlu1 %1750 }
 0xa42   :  { %v1753_v53 = vsub.f32 %v1745_v40, %v1751_v52 }
 0xa43   :  { %v1748_v60 = vpop.xlane.xlu0 %1747 }
 0xa44   :  { %v1756_v61 = vmul.f32 1.442695, %v1753_v53  ;;  %v1752_v46 = vsub.f32 %v1744_v44, %v1748_v60 }
 0xa45   :  { %v1771_v62 = vpop.permute.xlu1 %1770 }
 0xa46   :  { %10502 = vpow2.f32 %v1756_v61  ;;  %v1754_v26 = vmul.f32 1.442695, %v1752_v46  ;;  %9910 = vmatprep.subr.mxu0 %v1771_v62 }
 0xa47   :  { %9911 = vmatpush3.msra.mxu0 %v1771_v62 }
 0xa48   :  { %10504 = vpow2.f32 %v1754_v26 }
 0xa49   :  { %v1862_v5 = vpop.permute.xlu1 %1861 }
 0xa4d   :  { %v1860_v11 = vpop.permute.xlu1 %1859 }
 0xa51   :  { %v1858_v12 = vpop.permute.xlu1 %1857 }
 0xa53   :  { %v10503_v41 = vpop.eup %10502 }
 0xa54   :  { %v1761_v63 = vsel %vm492_vm9, %v10503_v41, 0.0 }
 0xa55   :  { %v10505_v0 = vpop.eup %10504  ;;  %1762 = vadd.xlane.f32.xlu0 %v1761_v63  ;;  %v2091_v63 = vld [vmem:[%s10888_s8 + $0x10] sm:$0xff] }
 0xa56   :  { %v1758_v1 = vsel %vm492_vm9, %v10505_v0, 0.0 }
 0xa59   :  { %1759 = vadd.xlane.f32.xlu0 %v1758_v1  ;;  %v2090_v1 = vld [vmem:[%s10888_s8 + $0x8] sm:$0xff] }
 0xa6f   :  { %1768 = vrot.lane.b32.xlu0 %v11092_v43, %s12538_s12  ;;  %s12583_s12 = sld [smem:[#allocation12_spill]] }
 0xa73   :  { %1855 = vrot.lane.b32.xlu0 %v11092_v43, %s12534_s5 }
 0xade   :  { %v1763_v2 = vpop.xlane.xlu0 %1762 }
 0xadf   :  { %10506 = vrcp.f32 %v1763_v2  ;;  %v2089_v2 = vld [vmem:[%s10888_s8] sm:$0xff] }
 0xae2   :  { %v1760_v3 = vpop.xlane.xlu0 %1759 }
 0xae3   :  { %10508 = vrcp.f32 %v1760_v3 }
 0xae6   :  { %v1769_v4 = vpop.permute.xlu0 %1768 }
 0xae7   :  { %9912 = vmatprep.subr.mxu0 %v1769_v4 }
 0xae8   :  { %9913 = vmatpush3.msra.mxu0 %v1769_v4 }
 0xae9   :  { %9917 = vmatprep.subr.msk.mxu0 %vm404_vm3, %v1862_v5 }
 0xaea   :  { %v1856_v10 = vpop.permute.xlu0 %1855 }
 0xaec   :  { %v10507_v6 = vpop.eup %10506 }
 0xaed   :  { %v1767_v9 = vmul.f32 %v10507_v6, %v10503_v41 }
 0xaf0   :  { %v10509_v7 = vpop.eup %10508 }
 0xaf1   :  { %v1766_v8 = vmul.f32 %v10509_v7, %v10505_v0 }
 0xaf3   :  { %9914 = vmatprep.mubr.msk.f32.mxu0 %vm492_vm9, %v1766_v8 }
 0xaf4   :  { %9915 = vmatmul.mubr.msk.f32.vlgmr.msra.gmra.mxu0 %vm492_vm9, %v1767_v9 }
 0xaf5   :  { %9918 = vmatpush3.xpose.msk.msra.mxu0 %vm404_vm3, %v1862_v5  ;;  %9921 = vmatprep.mubr.msk.f32.mxu0 %vm404_vm3, %v1856_v10  ;;  %v11362_v10 = vld [vmem:[%s10893_s14] ss:$0 sm:$0xff] }
 0xaf6   :  { %9919 = vmatprep.subr.msk.mxu0 %vm404_vm3, %v1860_v11 }
 0xaf9   :  { %9920 = vmatpush3.xpose.msk.msra.mxu0 %vm404_vm3, %v1860_v11 }
 0xafc   :  { %9922 = vmatmul.mubr.msk.f32.vlgmr.msra.gmra.mxu0 %vm404_vm3, %v1858_v12 }
 0xbb4   :  { %v9916_v28 = vpop.f32.mrf.mxu0 }
 0xbb6   :  { %v1846_v13 = vpop.f32.mrf.mxu0 }
 0xbbc   :  { %v9923_v30 = vpop.f32.mrf.mxu0 }
 0xbbd   :  { %v1947_v14 = vmul.f32 0.35355338, %v9923_v30 }
 0xbbe   :  { %v1937_v15 = vpop.f32.mrf.mxu0 }
 0xbbf   :  { %v1946_v18 = vmul.f32 0.35355338, %v1937_v15  ;;  %v1949_v19 = vadd.f32 %v1947_v14, %v11216_v58 }
 0xbc1   :  { %v1953_v20 = vsel %vm492_vm9, %v1949_v19, -inf  ;;  %v1948_v21 = vadd.f32 %v1946_v18, %v11206_v49 }
 0xbc2   :  { %1954 = vmax.xlane.f32.xlu1 %v1953_v20 }
 0xbc3   :  { %v1950_v22 = vsel %vm492_vm9, %v1948_v21, -inf }
 0xbc4   :  { %1951 = vmax.xlane.f32.xlu0 %v1950_v22 }
 0xbd3   :  { %1974 = vrot.lane.b32.xlu1 %v11160_v55, %s12532_s11 }
 0xbd7   :  { %1216 = vrot.lane.b32.xlu1 %v11194_v32, %s12573_s15 }
 0xbda   :  { %1972 = vrot.lane.b32.xlu0 %v11092_v43, %s12532_s11  ;;  %s12580_s11 = sld [smem:[#allocation10_spill]] }
 0xbdb   :  { %1218 = vrot.lane.b32.xlu1 %v11192_v31, %s12573_s15 }
 0xbdf   :  { %1226 = vrot.lane.b32.xlu1 %v11196_v33, %s12574_s26 }
 0xbe3   :  { %1234 = vrot.lane.b32.xlu1 %v11251_v56, %s12575_s27 }
 0xbe7   :  { %2063 = vrot.lane.b32.xlu1 %v11285_v23, %s12573_s15 }
 0xbeb   :  { %2071 = vrot.lane.b32.xlu1 %v9916_v28, %s12574_s26 }
 0xc4b   :  { %v1955_v55 = vpop.xlane.xlu1 %1954 }
 0xc4c   :  { %v1957_v35 = vsub.f32 %v1949_v19, %v1955_v55 }
 0xc4d   :  { %v1952_v32 = vpop.xlane.xlu0 %1951 }
 0xc4e   :  { %v1960_v37 = vmul.f32 1.442695, %v1957_v35  ;;  %v1956_v38 = vsub.f32 %v1948_v21, %v1952_v32 }
 0xc4f   :  { %v1975_v43 = vpop.permute.xlu1 %1974 }
 0xc50   :  { %10510 = vpow2.f32 %v1960_v37  ;;  %v1958_v31 = vmul.f32 1.442695, %v1956_v38  ;;  %9924 = vmatprep.subr.mxu1 %v1975_v43 }
 0xc51   :  { %9925 = vmatpush3.msra.mxu1 %v1975_v43  ;;  %v1973_v33 = vpop.permute.xlu0 %1972 }
 0xc52   :  { %10512 = vpow2.f32 %v1958_v31  ;;  %9926 = vmatprep.subr.mxu1 %v1973_v33 }
 0xc53   :  { %9927 = vmatpush3.msra.mxu1 %v1973_v33  ;;  %v1217_v52 = vpop.permute.xlu1 %1216 }
 0xc54   :  { %9931 = vmatprep.subr.mxu1 %v2092_v42  ;;  %v1238_v62 = vsel %vm404_vm3, %v11190_v29, %v1217_v52  ;;  %v2279_v52 = vld [vmem:[%s10898_s19 + $0x18] sm:$0xff] }
 0xc55   :  { %9945 = vmatprep.subr.mxu0 %v2279_v52 }
 0xc56   :  { %9946 = vmatpush3.msra.mxu0 %v2279_v52 }
 0xc57   :  { %v1219_v60 = vpop.permute.xlu1 %1218 }
 0xc58   :  { %v1239_v3 = vsel %vm404_vm3, %v11188_v27, %v1219_v60  ;;  %v2384_v60 = vld [vmem:[%s10908_s1] sm:$0xff] }
 0xc5d   :  { %v10511_v56 = vpop.eup %10510 }
 0xc5e   :  { %v1965_v23 = vsel %vm492_vm9, %v10511_v56, 0.0 }
 0xc5f   :  { %v10513_v39 = vpop.eup %10512  ;;  %1966 = vadd.xlane.f32.xlu0 %v1965_v23 }
 0xc60   :  { %v1962_v40 = vsel %vm492_vm9, %v10513_v39, 0.0 }
 0xc63   :  { %1963 = vadd.xlane.f32.xlu0 %v1962_v40  ;;  %v2387_v40 = vld [vmem:[%s10908_s1 + $0x18] sm:$0xff] }
 0xc79   :  { %1224 = vrot.lane.b32.xlu0 %v11198_v36, %s12574_s26 }
 0xc7d   :  { %1232 = vrot.lane.b32.xlu0 %v11253_v45, %s12575_s27 }
 0xc81   :  { %2061 = vrot.lane.b32.xlu0 %v11287_v34, %s12573_s15  ;;  %v1227_v34 = vpop.permute.xlu1 %1226 }
 0xc82   :  { %v1241_v4 = vsel %vm492_vm9, %v1239_v3, %v1227_v34 }
 0xc85   :  { %2069 = vrot.lane.b32.xlu0 %v1846_v13, %s12574_s26  ;;  %v1235_v29 = vpop.permute.xlu1 %1234 }
 0xc86   :  { %v1244_v5 = vsel %vm1242_vm13, %v1241_v4, %v1235_v29 }
 0xc89   :  { %v2064_v14 = vpop.permute.xlu1 %2063 }
 0xc8a   :  { %v2084_v22 = vsel %vm404_vm3, %v11255_v57, %v2064_v14 }
 0xc8d   :  { %v2072_v18 = vpop.permute.xlu1 %2071 }
 0xc8e   :  { %v2086_v55 = vsel %vm492_vm9, %v2084_v22, %v2072_v18 }
 0xce8   :  { %v1967_v44 = vpop.xlane.xlu0 %1966 }
 0xce9   :  { %10514 = vrcp.f32 %v1967_v44  ;;  %v258_v44 = vld [vmem:[%s10872_s25] sm:$0xff] }
 0xcec   :  { %v1964_v48 = vpop.xlane.xlu0 %1963 }
 0xced   :  { %10516 = vrcp.f32 %v1964_v48  ;;  %v2385_v48 = vld [vmem:[%s10908_s1 + $0x8] sm:$0xff] }
 0xcf0   :  { %v1225_v53 = vpop.permute.xlu0 %1224 }
 0xcf1   :  { %v1240_v41 = vsel %vm492_vm9, %v1238_v62, %v1225_v53  ;;  %v2278_v53 = vld [vmem:[%s10898_s19 + $0x10] sm:$0xff] }
 0xcf2   :  { %9947 = vmatprep.subr.mxu0 %v2278_v53 }
 0xcf3   :  { %9948 = vmatpush3.msra.mxu0 %v2278_v53 }
 0xcf4   :  { %v1233_v46 = vpop.permute.xlu0 %1232 }
 0xcf5   :  { %v1243_v0 = vsel %vm1242_vm13, %v1240_v41, %v1233_v46  ;;  %v2276_v46 = vld [vmem:[%s10898_s19] sm:$0xff] }
 0xcf6   :  { %v10515_v36 = vpop.eup %10514 }
 0xcf7   :  { %v1971_v26 = vmul.f32 %v10515_v36, %v10511_v56  ;;  %v2277_v36 = vld [vmem:[%s10898_s19 + $0x8] sm:$0xff] }
 0xcf8   :  { %v2062_v15 = vpop.permute.xlu0 %2061  ;;  %9949 = vmatprep.subr.mxu0 %v2277_v36 }
 0xcf9   :  { %v2083_v20 = vsel %vm404_vm3, %v11257_v59, %v2062_v15  ;;  %9950 = vmatpush3.msra.mxu0 %v2277_v36 }
 0xcfa   :  { %v10517_v61 = vpop.eup %10516  ;;  %9951 = vmatprep.subr.mxu0 %v2276_v46 }
 0xcfb   :  { %v1970_v45 = vmul.f32 %v10517_v61, %v10513_v39  ;;  %v259_v61 = vld [vmem:[%s10872_s25 + $0x8] sm:$0xff]  ;;  %9952 = vmatpush3.msra.mxu0 %v2276_v46 }
 0xcfc   :  { %v2070_v19 = vpop.permute.xlu0 %2069 }
 0xcfd   :  { %9928 = vmatprep.mubr.msk.f32.mxu1 %vm492_vm9, %v1970_v45 }
 0xcfe   :  { %9929 = vmatmul.mubr.msk.f32.vlgmr.msra.gmra.mxu1 %vm492_vm9, %v1971_v26 }
 0xcff   :  { %9932 = vmatpush3.msra.mxu1 %v2092_v42  ;;  %9939 = vmatprep.mubr.msk.f32.mxu1 %vm300_vm2, %v1243_v0  ;;  %v2386_v42 = vld [vmem:[%s10908_s1 + $0x10] sm:$0xff] }
 0xd00   :  { %9933 = vmatprep.subr.mxu1 %v2091_v63 }
 0xd01   :  { %9934 = vmatpush3.msra.mxu1 %v2091_v63 }
 0xd02   :  { %9935 = vmatprep.subr.mxu1 %v2090_v1 }
 0xd03   :  { %9936 = vmatpush3.msra.mxu1 %v2090_v1 }
 0xd04   :  { %9937 = vmatprep.subr.mxu1 %v2089_v2 }
 0xd05   :  { %9938 = vmatpush3.msra.mxu1 %v2089_v2 }
 0xd06   :  { %9940 = vmatmul.mubr.msk.f32.vlgmr.msra.gmra.mxu1 %vm300_vm2, %v1244_v5  ;;  %9959 = vmatprep.subr.mxu1 %v2387_v40 }
 0xd07   :  { %9960 = vmatpush3.msra.mxu1 %v2387_v40 }
 0xd08   :  { %9961 = vmatprep.subr.mxu1 %v2386_v42 }
 0xd09   :  { %9962 = vmatpush3.msra.mxu1 %v2386_v42 }
 0xd0a   :  { %9963 = vmatprep.subr.mxu1 %v2385_v48 }
 0xd0b   :  { %9964 = vmatpush3.msra.mxu1 %v2385_v48 }
 0xd0c   :  { %9965 = vmatprep.subr.mxu1 %v2384_v60 }
 0xd0d   :  { %9966 = vmatpush3.msra.mxu1 %v2384_v60 }
 0xdbe   :  { %v9930_v6 = vpop.f32.mrf.mxu1 }
 0xdbf   :  { %2079 = vrot.lane.b32.xlu1 %v9930_v6, %s12575_s27 }
 0xdc0   :  { %v2050_v7 = vpop.f32.mrf.mxu1 }
 0xdc1   :  { %2077 = vrot.lane.b32.xlu0 %v2050_v7, %s12575_s27 }
 0xdc6   :  { %v9941_v8 = vpop.f32.mrf.mxu1 }
 0xdc7   :  { %v2184_v11 = vadd.f32 %v9941_v8, %v11362_v10 }
 0xdc8   :  { %v2178_v9 = vpop.f32.mrf.mxu1 }
 0xdc9   :  { %v2179_v27 = vadd.f32 %v11362_v10, %v2178_v9  ;;  %v2198_v28 = vadd.f32 %v2184_v11, %v11024_v17  ;;  %v9197_v9 = vld [vmem:[%s10954_s30] ss:$0 sm:$0xff] }
 0xdcb   :  { %v2197_v12 = vadd.f32 %v2179_v27, %v11022_v16  ;;  %v2206_v30 = vsel %vm300_vm2, %v2198_v28, 0.0  ;;  %v2085_v16 = vsel %vm492_vm9, %v2083_v20, %v2070_v19 }
 0xdcd   :  { %v2203_v13 = vsel %vm300_vm2, %v2197_v12, 0.0 }
 0xde0   :  { %2204 = vadd.xlane.f32.xlu0 %v2203_v13 }
 0xde3   :  { %2207 = vadd.xlane.f32.xlu1 %v2206_v30  ;;  %v9203_v30 = vld [vmem:[%s12576_s2] ss:$0 sm:$0xff] }
 0xe31   :  { %v2080_v21 = vpop.permute.xlu1 %2079 }
 0xe32   :  { %v2088_v32 = vsel %vm1242_vm13, %v2086_v55, %v2080_v21 }
 0xe33   :  { %v2078_v17 = vpop.permute.xlu0 %2077 }
 0xe34   :  { %v2087_v35 = vsel %vm1242_vm13, %v2085_v16, %v2078_v17 }
 0xe35   :  { %9942 = vmatprep.mubr.msk.f32.mxu1 %vm300_vm2, %v2087_v35 }
 0xe36   :  { %9943 = vmatmul.mubr.msk.f32.gmra.mxu1 %vm300_vm2, %v2088_v32 }
 0xe37   :  { %9967 = vmatprep.mubr.msk.f32.mxu1 %vm300_vm2, %v258_v44 }
 0xe3a   :  { %9968 = vmatmul.mubr.msk.f32.vlgmr.msra.gmra.mxu1 %vm300_vm2, %v259_v61 }
 0xe69   :  { %v2205_v59 = vpop.xlane.xlu0 %2204 }
 0xe6a   :  { %v2216_v37 = vmul.f32 0.03125, %v2205_v59 }
 0xe6c   :  { %v2220_v57 = vsub.f32 %v2197_v12, %v2216_v37  ;;  %v2208_v38 = vpop.xlane.xlu1 %2207  ;;  %v11426_v37 = vld [vmem:[%s12577_s7] ss:$0 sm:$0xff] }
 0xe6d   :  { %v2217_v43 = vmul.f32 0.03125, %v2208_v38 }
 0xe6e   :  { %v2224_v31 = vmul.f32 %v2220_v57, %v2220_v57 }
 0xe6f   :  { %v2221_v33 = vsub.f32 %v2198_v28, %v2217_v43 }
 0xe70   :  { %v2228_v56 = vsel %vm300_vm2, %v2224_v31, 0.0 }
 0xe71   :  { %2229 = vadd.xlane.f32.xlu0 %v2228_v56  ;;  %v2225_v23 = vmul.f32 %v2221_v33, %v2221_v33 }
 0xe73   :  { %v2231_v39 = vsel %vm300_vm2, %v2225_v23, 0.0 }
 0xe75   :  { %2232 = vadd.xlane.f32.xlu0 %v2231_v39 }
 0xef6   :  { %v9944_v45 = vpop.f32.mrf.mxu1 }
 0xef7   :  { %v2194_v62 = vadd.f32 %v9944_v45, %v11362_v10 }
 0xef8   :  { %v2188_v34 = vpop.f32.mrf.mxu1 }
 0xef9   :  { %v2189_v26 = vadd.f32 %v11362_v10, %v2188_v34  ;;  %v2200_v41 = vadd.f32 %v2194_v62, %v11032_v24  ;;  %v9196_v24 = vld [vmem:[%s10949_s28] ss:$0 sm:$0xff] }
 0xefa   :  { %v2230_v63 = vpop.xlane.xlu0 %2229  ;;  %v9969_v13 = vpop.f32.mrf.mxu1 }
 0xefb   :  { %v2240_v0 = vmul.f32 0.03125, %v2230_v63  ;;  %v2212_v1 = vsel %vm300_vm2, %v2200_v41, 0.0  ;;  %v2199_v2 = vadd.f32 %v2189_v26, %v11034_v25  ;;  %v11411_v14 = vadd.f32 %v9969_v13, %v9203_v30 }
 0xefc   :  { %2213 = vadd.xlane.f32.xlu0 %v2212_v1  ;;  %v2467_v15 = vpop.f32.mrf.mxu1 }
 0xefd   :  { %v2244_v29 = vadd.f32 1e-05, %v2240_v0  ;;  %v2209_v3 = vsel %vm300_vm2, %v2199_v2, 0.0  ;;  %v11413_v18 = vadd.f32 %v9203_v30, %v2467_v15 }
 0xefe   :  { %2210 = vadd.xlane.f32.xlu1 %v2209_v3  ;;  %v2233_v4 = vpop.xlane.xlu0 %2232 }
 0xeff   :  { %10518 = vrsqrt.f32 %v2244_v29  ;;  %v2241_v5 = vmul.f32 0.03125, %v2233_v4  ;;  %9970 = vmatprep.subr.msk.mxu0 %vm404_vm3, %v11413_v18 }
 0xf01   :  { %v2245_v6 = vadd.f32 1e-05, %v2241_v5 }
 0xf03   :  { %10520 = vrsqrt.f32 %v2245_v6 }
 0xf0c   :  { %v10519_v7 = vpop.eup %10518 }
 0xf0d   :  { %v2252_v8 = vmul.f32 %v10519_v7, %v2220_v57 }
 0xf0f   :  { %v2262_v10 = vmul.f32 %v9196_v24, %v2252_v8 }
 0xf10   :  { %v10521_v27 = vpop.eup %10520 }
 0xf11   :  { %v11402_v11 = vadd.f32 %v9197_v9, %v2262_v10  ;;  %v2253_v25 = vmul.f32 %v10521_v27, %v2221_v33  ;;  %v282_v10 = vstv %s281_s24  ;;  %s12578_s24 = sld [smem:[#allocation8_spill]] }
 0xf12   :  { %vm283_vm14 = vcmp.ge.s32.totalorder %v11101_v47, %v282_v10 }
 0xf13   :  { %9953 = vmatprep.mubr.msk.f32.mxu0 %vm300_vm2, %v11402_v11  ;;  %v2263_v12 = vmul.f32 %v9196_v24, %v2253_v25  ;;  %v11485_v13 = vsel %vm283_vm14, -1e+30, %v10832_v50 }
 0xf15   :  { %v11406_v28 = vadd.f32 %v9197_v9, %v2263_v12 }
 0xf17   :  { %9954 = vmatmul.mubr.msk.f32.vlgmr.msra.gmra.mxu0 %vm300_vm2, %v11406_v28 }
 0xf18   :  { %9971 = vmatpush3.xpose.msk.msra.mxu0 %vm404_vm3, %v11413_v18 }
 0xf85   :  { %v2214_v19 = vpop.xlane.xlu0 %2213 }
 0xf86   :  { %v2219_v20 = vmul.f32 0.03125, %v2214_v19 }
 0xf87   :  { %v2211_v21 = vpop.xlane.xlu1 %2210 }
 0xf88   :  { %v2223_v22 = vsub.f32 %v2200_v41, %v2219_v20  ;;  %v2218_v16 = vmul.f32 0.03125, %v2211_v21 }
 0xf8a   :  { %v2222_v17 = vsub.f32 %v2199_v2, %v2218_v16  ;;  %v2227_v55 = vmul.f32 %v2223_v22, %v2223_v22 }
 0xf8c   :  { %v2237_v35 = vsel %vm300_vm2, %v2227_v55, 0.0  ;;  %v2226_v32 = vmul.f32 %v2222_v17, %v2222_v17 }
 0xf8d   :  { %2238 = vadd.xlane.f32.xlu0 %v2237_v35 }
 0xf8e   :  { %v2234_v59 = vsel %vm300_vm2, %v2226_v32, 0.0 }
 0xf8f   :  { %2235 = vadd.xlane.f32.xlu1 %v2234_v59 }
 0xfa0   :  { %2674 = vrot.lane.b32.xlu1 %v11413_v18, %s12548_s13 }
 0xfa4   :  { %2871 = vrot.lane.b32.xlu1 %v11413_v18, %s12544_s21 }
 0xfd7   :  { %v9955_v57 = vpop.f32.mrf.mxu0 }
 0xfd8   :  { %v2371_v38 = vadd.f32 %v9955_v57, %v11426_v37 }
 0xfd9   :  { %v2365_v43 = vpop.f32.mrf.mxu0 }
 0xfda   :  { %v2366_v31 = vadd.f32 %v11426_v37, %v2365_v43  ;;  %2672 = vrot.lane.b32.xlu1 %v2371_v38, %s12548_s13 }
 0xfdc   :  { %2670 = vrot.lane.b32.xlu0 %v2366_v31, %s12548_s13 }
 0xfde   :  { %2869 = vrot.lane.b32.xlu1 %v2371_v38, %s12544_s21 }
 0xfe0   :  { %2867 = vrot.lane.b32.xlu0 %v2366_v31, %s12544_s21 }
 0xfe2   :  { %3064 = vrot.lane.b32.xlu1 %v2366_v31, %s12534_s5 }
 0xfe4   :  { %3068 = vrot.lane.b32.xlu0 %v11413_v18, %s12534_s5 }
 0xfe6   :  { %3489 = vrot.lane.b32.xlu1 %v11411_v14, %s12548_s13 }
 0xfe8   :  { %3066 = vrot.lane.b32.xlu0 %v2371_v38, %s12534_s5 }
 0xfea   :  { %3883 = vrot.lane.b32.xlu1 %v11411_v14, %s12534_s5 }
 0xfec   :  { %3686 = vrot.lane.b32.xlu0 %v11411_v14, %s12544_s21 }
0x1016   :  { %v2239_v33 = vpop.xlane.xlu0 %2238 }
0x1017   :  { %v2243_v56 = vmul.f32 0.03125, %v2239_v33 }
0x1018   :  { %v2236_v23 = vpop.xlane.xlu1 %2235 }
0x1019   :  { %v2247_v39 = vadd.f32 1e-05, %v2243_v56  ;;  %v2242_v40 = vmul.f32 0.03125, %v2236_v23 }
0x101b   :  { %10522 = vrsqrt.f32 %v2247_v39  ;;  %v2246_v42 = vadd.f32 1e-05, %v2242_v40 }
0x101c   :  { %v2675_v44 = vpop.permute.xlu1 %2674 }
0x101d   :  { %10524 = vrsqrt.f32 %v2246_v42  ;;  %9980 = vmatprep.subr.msk.mxu0 %vm404_vm3, %v2675_v44 }
0x1020   :  { %v2872_v62 = vpop.permute.xlu1 %2871 }
0x1028   :  { %v10523_v48 = vpop.eup %10522 }
0x1029   :  { %v2255_v52 = vmul.f32 %v10523_v48, %v2223_v22 }
0x102a   :  { %v10525_v53 = vpop.eup %10524 }
0x102b   :  { %v2254_v60 = vmul.f32 %v10525_v53, %v2222_v17  ;;  %v2265_v36 = vmul.f32 %v9196_v24, %v2255_v52 }
0x102d   :  { %v2264_v61 = vmul.f32 %v9196_v24, %v2254_v60  ;;  %v11447_v45 = vadd.f32 %v9197_v9, %v2265_v36 }
0x102f   :  { %v11445_v46 = vadd.f32 %v9197_v9, %v2264_v61 }
0x1031   :  { %9956 = vmatprep.mubr.msk.f32.mxu0 %vm300_vm2, %v11445_v46 }
0x1032   :  { %9957 = vmatmul.mubr.msk.f32.gmra.mxu0 %vm300_vm2, %v11447_v45 }
0x1033   :  { %9972 = vmatprep.mubr.msk.f32.mxu0 %vm404_vm3, %v2366_v31 }
0x1036   :  { %9973 = vmatmul.mubr.msk.f32.vlgmr.msra.gmra.mxu0 %vm404_vm3, %v2371_v38 }
0x1037   :  { %9981 = vmatpush3.xpose.msk.msra.mxu0 %vm404_vm3, %v2675_v44 }
0x1038   :  { %9990 = vmatprep.subr.msk.mxu0 %vm404_vm3, %v2872_v62 }
0x104c   :  { %v2673_v34 = vpop.permute.xlu1 %2672 }
0x104e   :  { %v2671_v26 = vpop.permute.xlu0 %2670 }
0x104f   :  { %9982 = vmatprep.mubr.msk.f32.mxu0 %vm404_vm3, %v2671_v26 }
0x1050   :  { %v2870_v41 = vpop.permute.xlu1 %2869  ;;  %9983 = vmatmul.mubr.msk.f32.vlgmr.msra.gmra.mxu0 %vm404_vm3, %v2673_v34 }
0x1051   :  { %9991 = vmatpush3.xpose.msk.msra.mxu0 %vm404_vm3, %v2872_v62 }
0x1052   :  { %v2868_v63 = vpop.permute.xlu0 %2867 }
0x1053   :  { %9992 = vmatprep.mubr.msk.f32.mxu0 %vm404_vm3, %v2868_v63 }
0x1054   :  { %v3065_v0 = vpop.permute.xlu1 %3064  ;;  %9993 = vmatmul.mubr.msk.f32.vlgmr.msra.gmra.mxu0 %vm404_vm3, %v2870_v41 }
0x1055   :  { %10002 = vmatprep.mubr.msk.f32.mxu0 %vm404_vm3, %v3065_v0 }
0x1056   :  { %v3069_v1 = vpop.permute.xlu0 %3068 }
0x1057   :  { %10000 = vmatprep.subr.msk.mxu0 %vm404_vm3, %v3069_v1 }
0x1058   :  { %10001 = vmatpush3.xpose.msk.msra.mxu0 %vm404_vm3, %v3069_v1  ;;  %v3490_v29 = vpop.permute.xlu1 %3489 }
0x1059   :  { %10010 = vmatprep.subr.msk.mxu0 %vm404_vm3, %v11411_v14 }
0x105a   :  { %v3067_v2 = vpop.permute.xlu0 %3066 }
0x105b   :  { %10003 = vmatmul.mubr.msk.f32.vlgmr.msra.gmra.mxu0 %vm404_vm3, %v3067_v2 }
0x105c   :  { %10011 = vmatpush3.xpose.msk.msra.mxu0 %vm404_vm3, %v11411_v14  ;;  %v3884_v53 = vpop.permute.xlu1 %3883 }
0x105d   :  { %10020 = vmatprep.subr.msk.mxu0 %vm404_vm3, %v3490_v29 }
0x105e   :  { %v3687_v7 = vpop.permute.xlu0 %3686 }
0x10f2   :  { %v9958_v3 = vpop.f32.mrf.mxu0 }
0x10f3   :  { %v2381_v4 = vadd.f32 %v9958_v3, %v11426_v37 }
0x10f4   :  { %v2375_v5 = vpop.f32.mrf.mxu0 }
0x10f5   :  { %v2376_v6 = vadd.f32 %v11426_v37, %v2375_v5  ;;  %3487 = vrot.lane.b32.xlu1 %v2381_v4, %s12548_s13 }
0x10f6   :  { %v9974_v24 = vpop.f32.mrf.mxu0 }
0x10f7   :  { %3485 = vrot.lane.b32.xlu0 %v2376_v6, %s12548_s13  ;;  %10012 = vmatprep.mubr.msk.f32.mxu0 %vm404_vm3, %v2376_v6  ;;  %v2561_v30 = vmul.f32 0.35355338, %v9974_v24 }
0x10f8   :  { %10013 = vmatmul.mubr.msk.f32.vlgmr.msra.gmra.mxu0 %vm404_vm3, %v2381_v4  ;;  %v2551_v8 = vpop.f32.mrf.mxu0 }
0x10f9   :  { %10021 = vmatpush3.xpose.msk.msra.mxu0 %vm404_vm3, %v3490_v29  ;;  %3684 = vrot.lane.b32.xlu1 %v2381_v4, %s12544_s21  ;;  %v2560_v25 = vmul.f32 0.35355338, %v2551_v8  ;;  %v2563_v22 = vadd.f32 %v2561_v30, %v11485_v13 }
0x10fa   :  { %10030 = vmatprep.subr.msk.mxu0 %vm404_vm3, %v3687_v7 }
0x10fb   :  { %3682 = vrot.lane.b32.xlu0 %v2376_v6, %s12544_s21  ;;  %v2562_v15 = vadd.f32 %v2560_v25, %v11485_v13  ;;  %v2567_v57 = vsel %vm404_vm3, %v2563_v22, -inf  ;;  %s12586_s21 = sld [smem:[#allocation16_spill]] }
0x10fd   :  { %3881 = vrot.lane.b32.xlu1 %v2381_v4, %s12534_s5  ;;  %v2564_v35 = vsel %vm404_vm3, %v2562_v15, -inf }
0x10ff   :  { %3879 = vrot.lane.b32.xlu0 %v2376_v6, %s12534_s5  ;;  %s12581_s5 = sld [smem:[#allocation14_spill]] }
0x1110   :  { %v9984_v9 = vpop.f32.mrf.mxu0 }
0x1111   :  { %v2758_v19 = vmul.f32 0.35355338, %v9984_v9 }
0x1112   :  { %v2748_v27 = vpop.f32.mrf.mxu0 }
0x1113   :  { %v2757_v16 = vmul.f32 0.35355338, %v2748_v27  ;;  %v2760_v17 = vadd.f32 %v2758_v19, %v11485_v13 }
0x1114   :  { %v9994_v12 = vpop.f32.mrf.mxu0 }
0x1115   :  { %v2759_v59 = vadd.f32 %v2757_v16, %v11485_v13  ;;  %v2955_v37 = vmul.f32 0.35355338, %v9994_v12  ;;  %v2764_v31 = vsel %vm404_vm3, %v2760_v17, -inf }
0x1116   :  { %v2945_v20 = vpop.f32.mrf.mxu0 }
0x1117   :  { %v2954_v55 = vmul.f32 0.35355338, %v2945_v20  ;;  %v2957_v33 = vadd.f32 %v2955_v37, %v11485_v13  ;;  %v2761_v23 = vsel %vm404_vm3, %v2759_v59, -inf }
0x1119   :  { %v2956_v38 = vadd.f32 %v2954_v55, %v11485_v13  ;;  %v2961_v44 = vsel %vm404_vm3, %v2957_v33, -inf }
0x111b   :  { %v10004_v21 = vpop.f32.mrf.mxu0  ;;  %v2958_v40 = vsel %vm404_vm3, %v2956_v38, -inf }
0x111c   :  { %v3152_v56 = vmul.f32 0.35355338, %v10004_v21 }
0x111d   :  { %v3142_v32 = vpop.f32.mrf.mxu0 }
0x111e   :  { %2565 = vmax.xlane.f32.xlu0 %v2564_v35  ;;  %v3151_v43 = vmul.f32 0.35355338, %v3142_v32  ;;  %v3154_v42 = vadd.f32 %v3152_v56, %v11485_v13 }
0x1120   :  { %v11498_v39 = vadd.f32 %v3151_v43, %v11485_v13  ;;  %v3158_v52 = vsel %vm404_vm3, %v3154_v42, -inf }
0x1121   :  { %2568 = vmax.xlane.f32.xlu1 %v2567_v57 }
0x1122   :  { %2765 = vmax.xlane.f32.xlu0 %v2764_v31  ;;  %v3155_v48 = vsel %vm404_vm3, %v11498_v39, -inf }
0x1125   :  { %2762 = vmax.xlane.f32.xlu1 %v2761_v23 }
0x1126   :  { %2959 = vmax.xlane.f32.xlu0 %v2958_v40 }
0x1129   :  { %2962 = vmax.xlane.f32.xlu1 %v2961_v44 }
0x112a   :  { %3156 = vmax.xlane.f32.xlu0 %v3155_v48  ;;  %v286_v48 = vstv %s9137_s20  ;;  %s12579_s20 = sld [smem:[#allocation9_spill]] }
0x112b   :  { %vm287_vm15 = vcmp.ge.s32.totalorder %v11101_v47, %v286_v48 }
0x112d   :  { %3159 = vmax.xlane.f32.xlu1 %v3158_v52 }
0x113e   :  { %2586 = vrot.lane.b32.xlu1 %v11413_v18, %s12552_s0 }
0x1167   :  { %v3488_v60 = vpop.permute.xlu1 %3487 }
0x1169   :  { %v3486_v36 = vpop.permute.xlu0 %3485 }
0x116a   :  { %10022 = vmatprep.mubr.msk.f32.mxu0 %vm404_vm3, %v3486_v36 }
0x116b   :  { %10023 = vmatmul.mubr.msk.f32.vlgmr.msra.gmra.mxu0 %vm404_vm3, %v3488_v60  ;;  %v3685_v61 = vpop.permute.xlu1 %3684 }
0x116c   :  { %10031 = vmatpush3.xpose.msk.msra.mxu0 %vm404_vm3, %v3687_v7 }
0x116d   :  { %10040 = vmatprep.subr.msk.mxu0 %vm404_vm3, %v3884_v53  ;;  %v3683_v62 = vpop.permute.xlu0 %3682 }
0x116e   :  { %10032 = vmatprep.mubr.msk.f32.mxu0 %vm404_vm3, %v3683_v62 }
0x116f   :  { %10033 = vmatmul.mubr.msk.f32.vlgmr.msra.gmra.mxu0 %vm404_vm3, %v3685_v61  ;;  %v3882_v26 = vpop.permute.xlu1 %3881 }
0x1170   :  { %10041 = vmatpush3.xpose.msk.msra.mxu0 %vm404_vm3, %v3884_v53 }
0x1171   :  { %v3880_v34 = vpop.permute.xlu0 %3879 }
0x1172   :  { %10042 = vmatprep.mubr.msk.f32.mxu0 %vm404_vm3, %v3880_v34 }
0x1173   :  { %10043 = vmatmul.mubr.msk.f32.vlgmr.msra.gmra.mxu0 %vm404_vm3, %v3882_v26 }
0x11a7   :  { %v2566_v41 = vpop.xlane.xlu0 %2565 }
0x11a8   :  { %v2570_v63 = vsub.f32 %v2562_v15, %v2566_v41 }
0x11aa   :  { %v2569_v0 = vpop.xlane.xlu1 %2568  ;;  %v2572_v3 = vmul.f32 1.442695, %v2570_v63 }
0x11ab   :  { %v2571_v1 = vsub.f32 %v2563_v22, %v2569_v0  ;;  %v2766_v2 = vpop.xlane.xlu0 %2765 }
0x11ac   :  { %v2768_v29 = vsub.f32 %v2760_v17, %v2766_v2 }
0x11ad   :  { %v2574_v4 = vmul.f32 1.442695, %v2571_v1 }
0x11ae   :  { %v2763_v5 = vpop.xlane.xlu1 %2762  ;;  %v2771_v24 = vmul.f32 1.442695, %v2768_v29 }
0x11af   :  { %10526 = vpow2.f32 %v2574_v4  ;;  %v2767_v6 = vsub.f32 %v2759_v59, %v2763_v5  ;;  %v2960_v7 = vpop.xlane.xlu0 %2959 }
0x11b0   :  { %v2964_v8 = vsub.f32 %v2956_v38, %v2960_v7  ;;  %10528 = vpow2.f32 %v2572_v3 }
0x11b1   :  { %v2769_v9 = vmul.f32 1.442695, %v2767_v6 }
0x11b2   :  { %v2966_v10 = vmul.f32 1.442695, %v2964_v8  ;;  %v2963_v27 = vpop.xlane.xlu1 %2962 }
0x11b3   :  { %10530 = vpow2.f32 %v2769_v9  ;;  %v2965_v25 = vsub.f32 %v2957_v33, %v2963_v27  ;;  %v3157_v56 = vpop.xlane.xlu0 %3156 }
0x11b4   :  { %10532 = vpow2.f32 %v2771_v24  ;;  %v3161_v23 = vsub.f32 %v11498_v39, %v3157_v56  ;;  %v11556_v39 = vsel %vm287_vm15, -1e+30, %v10832_v50 }
0x11b5   :  { %10534 = vpow2.f32 %v2966_v10  ;;  %v2968_v12 = vmul.f32 1.442695, %v2965_v25 }
0x11b6   :  { %v3160_v30 = vpop.xlane.xlu1 %3159  ;;  %v3163_v40 = vmul.f32 1.442695, %v3161_v23 }
0x11b7   :  { %v3162_v15 = vsub.f32 %v3154_v42, %v3160_v30  ;;  %10536 = vpow2.f32 %v2968_v12 }
0x11b8   :  { %v10014_v42 = vpop.f32.mrf.mxu0 }
0x11b9   :  { %v3165_v19 = vmul.f32 1.442695, %v3162_v15  ;;  %v3376_v62 = vmul.f32 0.35355338, %v10014_v42 }
0x11ba   :  { %v2587_v20 = vpop.permute.xlu1 %2586  ;;  %v3366_v52 = vpop.f32.mrf.mxu0 }
0x11bb   :  { %9975 = vmatprep.subr.mxu1 %v2587_v20  ;;  %10538 = vpow2.f32 %v3165_v19  ;;  %v3375_v53 = vmul.f32 0.35355338, %v3366_v52  ;;  %v11566_v47 = vadd.f32 %v3376_v62, %v11556_v39 }
0x11bc   :  { %v11517_v21 = vpop.eup %10526  ;;  %9976 = vmatpush3.msra.mxu1 %v2587_v20  ;;  %10540 = vpow2.f32 %v3163_v40 }
0x11bd   :  { %v2579_v22 = vsel %vm404_vm3, %v11517_v21, 0.0  ;;  %v11521_v16 = vpop.eup %10528  ;;  %v11559_v36 = vadd.f32 %v3375_v53, %v11556_v39  ;;  %v3382_v0 = vsel %vm404_vm3, %v11566_v47, -inf }
0x11be   :  { %2580 = vadd.xlane.f32.xlu0 %v2579_v22  ;;  %v2576_v32 = vsel %vm404_vm3, %v11521_v16, 0.0 }
0x11bf   :  { %v3379_v61 = vsel %vm404_vm3, %v11559_v36, -inf }
0x11c0   :  { %v11523_v17 = vpop.eup %10530 }
0x11c1   :  { %v11525_v55 = vpop.eup %10532  ;;  %v2773_v35 = vsel %vm404_vm3, %v11523_v17, 0.0 }
0x11c2   :  { %v11531_v59 = vpop.eup %10534  ;;  %2774 = vadd.xlane.f32.xlu1 %v2773_v35  ;;  %2577 = vadd.xlane.f32.xlu0 %v2576_v32  ;;  %v2776_v37 = vsel %vm404_vm3, %v11525_v55, 0.0 }
0x11c3   :  { %v2970_v57 = vsel %vm404_vm3, %v11531_v59, 0.0 }
0x11c4   :  { %v11537_v38 = vpop.eup %10536 }
0x11c5   :  { %v2973_v43 = vsel %vm404_vm3, %v11537_v38, 0.0 }
0x11c6   :  { %2777 = vadd.xlane.f32.xlu0 %v2776_v37  ;;  %2971 = vadd.xlane.f32.xlu1 %v2970_v57 }
0x11c8   :  { %v11541_v31 = vpop.eup %10538 }
0x11c9   :  { %v3170_v33 = vsel %vm404_vm3, %v11541_v31, 0.0  ;;  %v11550_v44 = vpop.eup %10540 }
0x11ca   :  { %2974 = vadd.xlane.f32.xlu0 %v2973_v43  ;;  %v3167_v60 = vsel %vm404_vm3, %v11550_v44, 0.0 }
0x11ce   :  { %3171 = vadd.xlane.f32.xlu0 %v3170_v33 }
0x11d7   :  { %2980 = vrot.lane.b32.xlu1 %v11413_v18, %s12546_s17 }
0x11e4   :  { %2783 = vrot.lane.b32.xlu0 %v11413_v18, %s12550_s9 }
0x11fb   :  { %3168 = vadd.xlane.f32.xlu1 %v3167_v60 }
0x1203   :  { %3380 = vmax.xlane.f32.xlu0 %v3379_v61 }
0x120c   :  { %3177 = vrot.lane.b32.xlu1 %v11413_v18, %s12536_s22 }
0x122b   :  { %v10024_v34 = vpop.f32.mrf.mxu0 }
0x122c   :  { %v3573_v26 = vmul.f32 0.35355338, %v10024_v34 }
0x122d   :  { %v3563_v41 = vpop.f32.mrf.mxu0 }
0x122e   :  { %v3572_v63 = vmul.f32 0.35355338, %v3563_v41  ;;  %v11574_v2 = vadd.f32 %v3573_v26, %v11556_v39 }
0x122f   :  { %v10034_v50 = vpop.f32.mrf.mxu0 }
0x1230   :  { %v11571_v1 = vadd.f32 %v3572_v63, %v11556_v39  ;;  %3383 = vmax.xlane.f32.xlu1 %v3382_v0  ;;  %v3770_v29 = vmul.f32 0.35355338, %v10034_v50  ;;  %v3579_v24 = vsel %vm404_vm3, %v11574_v2, -inf }
0x1231   :  { %v3760_v18 = vpop.f32.mrf.mxu0 }
0x1232   :  { %v3769_v3 = vmul.f32 0.35355338, %v3760_v18  ;;  %v3576_v4 = vsel %vm404_vm3, %v11571_v1, -inf  ;;  %v11584_v8 = vadd.f32 %v3770_v29, %v11556_v39 }
0x1233   :  { %v10044_v5 = vpop.f32.mrf.mxu0  ;;  %3577 = vmax.xlane.f32.xlu0 %v3576_v4 }
0x1234   :  { %v11579_v6 = vadd.f32 %v3769_v3, %v11556_v39  ;;  %v3967_v9 = vmul.f32 0.35355338, %v10044_v5  ;;  %v3776_v30 = vsel %vm404_vm3, %v11584_v8, -inf }
0x1235   :  { %v3957_v7 = vpop.f32.mrf.mxu0 }
0x1236   :  { %v3966_v10 = vmul.f32 0.35355338, %v3957_v7  ;;  %v3773_v27 = vsel %vm404_vm3, %v11579_v6, -inf  ;;  %v11592_v12 = vadd.f32 %v3967_v9, %v11556_v39 }
0x1237   :  { %3580 = vmax.xlane.f32.xlu0 %v3579_v24  ;;  %3774 = vmax.xlane.f32.xlu1 %v3773_v27 }
0x1238   :  { %v11589_v25 = vadd.f32 %v3966_v10, %v11556_v39  ;;  %v3973_v19 = vsel %vm404_vm3, %v11592_v12, -inf }
0x123a   :  { %v3970_v15 = vsel %vm404_vm3, %v11589_v25, -inf }
0x123b   :  { %3777 = vmax.xlane.f32.xlu0 %v3776_v30  ;;  %3971 = vmax.xlane.f32.xlu1 %v3970_v15 }
0x123f   :  { %3974 = vmax.xlane.f32.xlu0 %v3973_v19 }
0x1247   :  { %v2581_v20 = vpop.xlane.xlu0 %2580 }
0x1248   :  { %10542 = vrcp.f32 %v2581_v20 }
0x124b   :  { %v2775_v22 = vpop.xlane.xlu1 %2774  ;;  %v2578_v35 = vpop.xlane.xlu0 %2577 }
0x124c   :  { %10544 = vrcp.f32 %v2775_v22  ;;  %3401 = vrot.lane.b32.xlu1 %v11411_v14, %s12552_s0 }
0x124d   :  { %10546 = vrcp.f32 %v2578_v35 }
0x124f   :  { %v2972_v32 = vpop.xlane.xlu1 %2971  ;;  %v2778_v37 = vpop.xlane.xlu0 %2777 }
0x1250   :  { %10548 = vrcp.f32 %v2972_v32  ;;  %3795 = vrot.lane.b32.xlu1 %v11411_v14, %s12546_s17  ;;  %s12587_s17 = sld [smem:[#allocation17_spill]] }
0x1251   :  { %10550 = vrcp.f32 %v2778_v37 }
0x1253   :  { %v2975_v57 = vpop.xlane.xlu0 %2974  ;;  %v2981_v61 = vpop.permute.xlu1 %2980 }
0x1254   :  { %10552 = vrcp.f32 %v2975_v57 }
0x1255   :  { %3598 = vrot.lane.b32.xlu0 %v11411_v14, %s12550_s9  ;;  %v10543_v33 = vpop.eup %10542 }
0x1256   :  { %v2585_v48 = vmul.f32 %v10543_v33, %v11517_v21 }
0x1257   :  { %v3172_v43 = vpop.xlane.xlu0 %3171 }
0x1258   :  { %10554 = vrcp.f32 %v3172_v43 }
0x1259   :  { %v10545_v56 = vpop.eup %10544 }
0x125a   :  { %v10547_v23 = vpop.eup %10546  ;;  %v2781_v53 = vmul.f32 %v10545_v56, %v11523_v17 }
0x125b   :  { %v2784_v40 = vpop.permute.xlu0 %2783  ;;  %v2584_v42 = vmul.f32 %v10547_v23, %v11521_v16 }
0x125c   :  { %9985 = vmatprep.subr.mxu1 %v2784_v40 }
0x125d   :  { %v10549_v52 = vpop.eup %10548  ;;  %9977 = vmatprep.mubr.msk.f32.mxu1 %vm404_vm3, %v2584_v42 }
0x125e   :  { %v10551_v60 = vpop.eup %10550  ;;  %9978 = vmatmul.mubr.msk.f32.vlgmr.msra.gmra.mxu1 %vm404_vm3, %v2585_v48  ;;  %v2978_v16 = vmul.f32 %v10549_v52, %v11531_v59 }
0x125f   :  { %9986 = vmatpush3.msra.mxu1 %v2784_v40  ;;  %9987 = vmatprep.mubr.msk.f32.mxu1 %vm404_vm3, %v2781_v53  ;;  %v2782_v62 = vmul.f32 %v10551_v60, %v11525_v55 }
0x1260   :  { %9995 = vmatprep.subr.mxu1 %v2981_v61 }
0x1261   :  { %v10553_v34 = vpop.eup %10552 }
0x1262   :  { %9988 = vmatmul.mubr.msk.f32.vlgmr.msra.gmra.mxu1 %vm404_vm3, %v2782_v62  ;;  %v2979_v21 = vmul.f32 %v10553_v34, %v11537_v38  ;;  %v4108_v62 = vld [vmem:[%s12578_s24 + $0x10] sm:$0xff] }
0x1263   :  { %9996 = vmatpush3.msra.mxu1 %v2981_v61  ;;  %9997 = vmatprep.mubr.msk.f32.mxu1 %vm404_vm3, %v2978_v16  ;;  %v4109_v61 = vld [vmem:[%s12578_s24 + $0x18] sm:$0xff] }
0x1264   :  { %10050 = vmatprep.subr.mxu0 %v4109_v61 }
0x1265   :  { %v10555_v59 = vpop.eup %10554  ;;  %10051 = vmatpush3.msra.mxu0 %v4109_v61 }
0x1266   :  { %9998 = vmatmul.mubr.msk.f32.vlgmr.msra.gmra.mxu1 %vm404_vm3, %v2979_v21  ;;  %v3176_v0 = vmul.f32 %v10555_v59, %v11541_v31  ;;  %10052 = vmatprep.subr.mxu0 %v4108_v62 }
0x1267   :  { %10053 = vmatpush3.msra.mxu0 %v4108_v62 }
0x1284   :  { %v3169_v17 = vpop.xlane.xlu1 %3168 }
0x1285   :  { %10556 = vrcp.f32 %v3169_v17 }
0x1288   :  { %v3178_v26 = vpop.permute.xlu1 %3177 }
0x1289   :  { %10005 = vmatprep.subr.mxu1 %v3178_v26 }
0x128a   :  { %10006 = vmatpush3.msra.mxu1 %v3178_v26 }
0x128c   :  { %v3381_v55 = vpop.xlane.xlu0 %3380 }
0x128d   :  { %v3385_v41 = vsub.f32 %v11559_v36, %v3381_v55 }
0x128f   :  { %v3387_v63 = vmul.f32 1.442695, %v3385_v41 }
0x1291   :  { %10558 = vpow2.f32 %v3387_v63 }
0x1292   :  { %v10557_v50 = vpop.eup %10556 }
0x1293   :  { %v3175_v38 = vmul.f32 %v10557_v50, %v11550_v44 }
0x1295   :  { %10007 = vmatprep.mubr.msk.f32.mxu1 %vm404_vm3, %v3175_v38  ;;  %v4107_v38 = vld [vmem:[%s12578_s24 + $0x8] sm:$0xff] }
0x1296   :  { %10008 = vmatmul.mubr.msk.f32.vlgmr.msra.gmra.mxu1 %vm404_vm3, %v3176_v0  ;;  %10054 = vmatprep.subr.mxu0 %v4107_v38  ;;  %v4106_v0 = vld [vmem:[%s12578_s24] sm:$0xff] }
0x1297   :  { %10055 = vmatpush3.msra.mxu0 %v4107_v38 }
0x1298   :  { %10056 = vmatprep.subr.mxu0 %v4106_v0 }
0x1299   :  { %10057 = vmatpush3.msra.mxu0 %v4106_v0 }
0x129e   :  { %v11623_v18 = vpop.eup %10558 }
0x129f   :  { %v3391_v29 = vsel %vm404_vm3, %v11623_v18, 0.0 }
0x12a0   :  { %3392 = vadd.xlane.f32.xlu1 %v3391_v29 }
0x12b9   :  { %v3384_v3 = vpop.xlane.xlu1 %3383 }
0x12ba   :  { %v3386_v36 = vsub.f32 %v11566_v47, %v3384_v3 }
0x12bc   :  { %v3389_v4 = vmul.f32 1.442695, %v3386_v36  ;;  %v3578_v5 = vpop.xlane.xlu0 %3577 }
0x12bd   :  { %v3582_v7 = vsub.f32 %v11571_v1, %v3578_v5 }
0x12be   :  { %10560 = vpow2.f32 %v3389_v4 }
0x12bf   :  { %v3584_v44 = vmul.f32 1.442695, %v3582_v7 }
0x12c0   :  { %v3775_v31 = vpop.xlane.xlu1 %3774  ;;  %v3581_v24 = vpop.xlane.xlu0 %3580 }
0x12c1   :  { %10562 = vpow2.f32 %v3584_v44  ;;  %v3779_v9 = vsub.f32 %v11579_v6, %v3775_v31  ;;  %v3583_v10 = vsub.f32 %v11574_v2, %v3581_v24 }
0x12c3   :  { %v3781_v27 = vmul.f32 1.442695, %v3779_v9  ;;  %v3586_v30 = vmul.f32 1.442695, %v3583_v10 }
0x12c4   :  { %v3972_v15 = vpop.xlane.xlu1 %3971  ;;  %v3778_v19 = vpop.xlane.xlu0 %3777 }
0x12c5   :  { %10564 = vpow2.f32 %v3781_v27  ;;  %v3976_v47 = vsub.f32 %v11589_v25, %v3972_v15  ;;  %v3780_v20 = vsub.f32 %v11584_v8, %v3778_v19 }
0x12c6   :  { %10566 = vpow2.f32 %v3586_v30 }
0x12c7   :  { %v3978_v1 = vmul.f32 1.442695, %v3976_v47  ;;  %v3783_v22 = vmul.f32 1.442695, %v3780_v20 }
0x12c8   :  { %v3402_v35 = vpop.permute.xlu1 %3401  ;;  %v3975_v32 = vpop.xlane.xlu0 %3974 }
0x12c9   :  { %10568 = vpow2.f32 %v3978_v1  ;;  %v3977_v37 = vsub.f32 %v11592_v12, %v3975_v32  ;;  %10015 = vmatprep.subr.mxu1 %v3402_v35 }
0x12ca   :  { %10570 = vpow2.f32 %v3783_v22  ;;  %10016 = vmatpush3.msra.mxu1 %v3402_v35 }
0x12cb   :  { %v11634_v2 = vpop.eup %10560  ;;  %v3980_v6 = vmul.f32 1.442695, %v3977_v37 }
0x12cc   :  { %v11636_v57 = vpop.permute.xlu0 %3598  ;;  %v3394_v25 = vsel %vm404_vm3, %v11634_v2, 0.0  ;;  %v3796_v26 = vpop.permute.xlu1 %3795 }
0x12cd   :  { %10572 = vpow2.f32 %v3980_v6  ;;  %3395 = vadd.xlane.f32.xlu0 %v3394_v25  ;;  %10025 = vmatprep.subr.mxu1 %v11636_v57 }
0x12ce   :  { %v11641_v8 = vpop.eup %10562 }
0x12cf   :  { %v3588_v12 = vsel %vm404_vm3, %v11641_v8, 0.0 }
0x12d0   :  { %3589 = vadd.xlane.f32.xlu1 %v3588_v12 }
0x12d2   :  { %v11645_v43 = vpop.eup %10564 }
0x12d3   :  { %v11647_v33 = vpop.eup %10566  ;;  %v3785_v56 = vsel %vm404_vm3, %v11645_v43, 0.0 }
0x12d4   :  { %3786 = vadd.xlane.f32.xlu1 %v3785_v56  ;;  %v3591_v23 = vsel %vm404_vm3, %v11647_v33, 0.0 }
0x12d5   :  { %3592 = vadd.xlane.f32.xlu0 %v3591_v23 }
0x12d6   :  { %v11653_v40 = vpop.eup %10568 }
0x12d7   :  { %v11655_v42 = vpop.eup %10570  ;;  %v3982_v48 = vsel %vm404_vm3, %v11653_v40, 0.0 }
0x12d8   :  { %3983 = vadd.xlane.f32.xlu1 %v3982_v48  ;;  %v3788_v52 = vsel %vm404_vm3, %v11655_v42, 0.0 }
0x12d9   :  { %3789 = vadd.xlane.f32.xlu0 %v3788_v52 }
0x12da   :  { %v11661_v53 = vpop.eup %10572 }
0x12db   :  { %v3985_v60 = vsel %vm404_vm3, %v11661_v53, 0.0 }
0x12dd   :  { %3986 = vadd.xlane.f32.xlu0 %v3985_v60 }
0x131e   :  { %v11667_v34 = vpop.f32.mrf.mxu1 }
0x1320   :  { %v11669_v16 = vpop.f32.mrf.mxu1 }
0x1322   :  { %v9989_v21 = vpop.f32.mrf.mxu1 }
0x1323   :  { %3265 = vrot.lane.b32.xlu0 %v9989_v21, %s12573_s15 }
0x1324   :  { %v2858_v17 = vpop.f32.mrf.mxu1 }
0x1325   :  { %3263 = vrot.lane.b32.xlu1 %v2858_v17, %s12573_s15 }
0x1326   :  { %v9999_v55 = vpop.f32.mrf.mxu1 }
0x1327   :  { %3273 = vrot.lane.b32.xlu0 %v9999_v55, %s12574_s26 }
0x1328   :  { %v3055_v41 = vpop.f32.mrf.mxu1 }
0x1329   :  { %3271 = vrot.lane.b32.xlu1 %v3055_v41, %s12574_s26  ;;  %v3393_v63 = vpop.xlane.xlu1 %3392 }
0x132a   :  { %10574 = vrcp.f32 %v3393_v63 }
0x1337   :  { %v10575_v59 = vpop.eup %10574 }
0x1338   :  { %v3399_v50 = vmul.f32 %v10575_v59, %v11623_v18 }
0x133a   :  { %10017 = vmatprep.mubr.msk.f32.mxu1 %vm404_vm3, %v3399_v50 }
0x1356   :  { %v10009_v29 = vpop.f32.mrf.mxu1  ;;  %v3396_v3 = vpop.xlane.xlu0 %3395 }
0x1357   :  { %10576 = vrcp.f32 %v3396_v3  ;;  %3281 = vrot.lane.b32.xlu0 %v10009_v29, %s12575_s27 }
0x1358   :  { %v3252_v36 = vpop.f32.mrf.mxu1 }
0x1359   :  { %3279 = vrot.lane.b32.xlu1 %v3252_v36, %s12575_s27  ;;  %v3590_v4 = vpop.xlane.xlu1 %3589 }
0x135a   :  { %10578 = vrcp.f32 %v3590_v4 }
0x135d   :  { %3992 = vrot.lane.b32.xlu1 %v11411_v14, %s12536_s22  ;;  %v3787_v18 = vpop.xlane.xlu1 %3786  ;;  %s12582_s22 = sld [smem:[#allocation15_spill]] }
0x135e   :  { %10580 = vrcp.f32 %v3787_v18  ;;  %v3593_v5 = vpop.xlane.xlu0 %3592 }
0x135f   :  { %10582 = vrcp.f32 %v3593_v5 }
0x1361   :  { %v3984_v7 = vpop.xlane.xlu1 %3983 }
0x1362   :  { %10584 = vrcp.f32 %v3984_v7  ;;  %v3790_v44 = vpop.xlane.xlu0 %3789 }
0x1363   :  { %10586 = vrcp.f32 %v3790_v44 }
0x1364   :  { %v10577_v31 = vpop.eup %10576 }
0x1365   :  { %v3400_v24 = vmul.f32 %v10577_v31, %v11634_v2 }
0x1366   :  { %v3987_v22 = vpop.xlane.xlu0 %3986 }
0x1367   :  { %v10579_v9 = vpop.eup %10578  ;;  %10018 = vmatmul.mubr.msk.f32.vlgmr.msra.gmra.mxu1 %vm404_vm3, %v3400_v24  ;;  %10588 = vrcp.f32 %v3987_v22  ;;  %v4294_v22 = vld [vmem:[%s12580_s11 + $0x10] sm:$0xff] }
0x1368   :  { %10026 = vmatpush3.msra.mxu1 %v11636_v57  ;;  %v3596_v10 = vmul.f32 %v10579_v9, %v11641_v8 }
0x1369   :  { %10035 = vmatprep.subr.mxu1 %v3796_v26 }
0x136a   :  { %10027 = vmatprep.mubr.msk.f32.mxu1 %vm404_vm3, %v3596_v10 }
0x136b   :  { %v10581_v14 = vpop.eup %10580 }
0x136c   :  { %v10583_v27 = vpop.eup %10582  ;;  %v3793_v30 = vmul.f32 %v10581_v14, %v11645_v43 }
0x136d   :  { %v3597_v15 = vmul.f32 %v10583_v27, %v11647_v33 }
0x136f   :  { %v10585_v19 = vpop.eup %10584  ;;  %10028 = vmatmul.mubr.msk.f32.vlgmr.msra.gmra.mxu1 %vm404_vm3, %v3597_v15 }
0x1370   :  { %v10587_v47 = vpop.eup %10586  ;;  %10036 = vmatpush3.msra.mxu1 %v3796_v26  ;;  %10037 = vmatprep.mubr.msk.f32.mxu1 %vm404_vm3, %v3793_v30  ;;  %v3990_v20 = vmul.f32 %v10585_v19, %v11653_v40  ;;  %v9246_v26 = vld [vmem:[%s12579_s20] ss:$0 sm:$0xff] }
0x1371   :  { %v3794_v1 = vmul.f32 %v10587_v47, %v11655_v42 }
0x1373   :  { %10038 = vmatmul.mubr.msk.f32.vlgmr.msra.gmra.mxu1 %vm404_vm3, %v3794_v1  ;;  %v4295_v1 = vld [vmem:[%s12580_s11 + $0x18] sm:$0xff] }
0x1374   :  { %10047 = vmatprep.mubr.msk.f32.mxu1 %vm404_vm3, %v3990_v20  ;;  %v10589_v56 = vpop.eup %10588 }
0x1375   :  { %v3991_v42 = vmul.f32 %v10589_v56, %v11661_v53 }
0x1395   :  { %v3266_v35 = vpop.permute.xlu0 %3265 }
0x1396   :  { %v3286_v25 = vsel %vm404_vm3, %v11667_v34, %v3266_v35  ;;  %v4293_v35 = vld [vmem:[%s12580_s11 + $0x8] sm:$0xff] }
0x1397   :  { %v3264_v32 = vpop.permute.xlu1 %3263 }
0x1398   :  { %v3285_v6 = vsel %vm404_vm3, %v11669_v16, %v3264_v32  ;;  %v4292_v32 = vld [vmem:[%s12580_s11] sm:$0xff] }
0x1399   :  { %v3274_v37 = vpop.permute.xlu0 %3273 }
0x139a   :  { %v3288_v43 = vsel %vm492_vm9, %v3286_v25, %v3274_v37 }
0x139b   :  { %v3272_v2 = vpop.permute.xlu1 %3271 }
0x139c   :  { %v3287_v8 = vsel %vm492_vm9, %v3285_v6, %v3272_v2 }
0x13c9   :  { %v3282_v57 = vpop.permute.xlu0 %3281 }
0x13ca   :  { %v3290_v23 = vsel %vm1242_vm13, %v3288_v43, %v3282_v57 }
0x13cb   :  { %v3280_v12 = vpop.permute.xlu1 %3279 }
0x13cc   :  { %v3289_v33 = vsel %vm1242_vm13, %v3287_v8, %v3280_v12 }
0x13cd   :  { %10058 = vmatprep.mubr.msk.f32.mxu0 %vm300_vm2, %v3289_v33 }
0x13ce   :  { %10059 = vmatmul.mubr.msk.f32.vlgmr.msra.gmra.mxu0 %vm300_vm2, %v3290_v23 }
0x13cf   :  { %v3993_v40 = vpop.permute.xlu1 %3992 }
0x13d0   :  { %10045 = vmatprep.subr.mxu1 %v3993_v40 }
0x13d1   :  { %10046 = vmatpush3.msra.mxu1 %v3993_v40 }
0x13d2   :  { %10048 = vmatmul.mubr.msk.f32.vlgmr.msra.gmra.mxu1 %vm404_vm3, %v3991_v42  ;;  %10064 = vmatprep.subr.mxu1 %v4295_v1 }
0x13d3   :  { %10065 = vmatpush3.msra.mxu1 %v4295_v1 }
0x13d4   :  { %10066 = vmatprep.subr.mxu1 %v4294_v22 }
0x13d5   :  { %10067 = vmatpush3.msra.mxu1 %v4294_v22 }
0x13d6   :  { %10068 = vmatprep.subr.mxu1 %v4293_v35 }
0x13d7   :  { %10069 = vmatpush3.msra.mxu1 %v4293_v35 }
0x13d8   :  { %10070 = vmatprep.subr.mxu1 %v4292_v32 }
0x13d9   :  { %10071 = vmatpush3.msra.mxu1 %v4292_v32 }
0x1427   :  { %v10019_v48 = vpop.f32.mrf.mxu1 }
0x1429   :  { %v3476_v52 = vpop.f32.mrf.mxu1 }
0x142f   :  { %v10029_v60 = vpop.f32.mrf.mxu1 }
0x1430   :  { %4080 = vrot.lane.b32.xlu1 %v10029_v60, %s12573_s15  ;;  %v11741_v60 = vld [vmem:[%s12582_s22] ss:$0 sm:$0xff] }
0x1431   :  { %v3673_v61 = vpop.f32.mrf.mxu1 }
0x1432   :  { %4078 = vrot.lane.b32.xlu0 %v3673_v61, %s12573_s15 }
0x1433   :  { %v10039_v62 = vpop.f32.mrf.mxu1 }
0x1434   :  { %4088 = vrot.lane.b32.xlu1 %v10039_v62, %s12574_s26  ;;  %v4411_v62 = vld [vmem:[%s12583_s12 + $0x38] sm:$0xff] }
0x1435   :  { %v3870_v34 = vpop.f32.mrf.mxu1  ;;  %10078 = vmatprep.subr.mxu0 %v4411_v62 }
0x1436   :  { %4086 = vrot.lane.b32.xlu0 %v3870_v34, %s12574_s26  ;;  %v4410_v34 = vld [vmem:[%s12583_s12 + $0x30] sm:$0xff]  ;;  %10079 = vmatpush3.msra.mxu0 %v4411_v62 }
0x1437   :  { %10080 = vmatprep.subr.mxu0 %v4410_v34 }
0x1438   :  { %10081 = vmatpush3.msra.mxu0 %v4410_v34 }
0x148e   :  { %v10060_v21 = vpop.f32.mrf.mxu0 }
0x148f   :  { %v4201_v41 = vadd.f32 %v10060_v21, %v9246_v26 }
0x1490   :  { %v4195_v17 = vpop.f32.mrf.mxu0 }
0x1491   :  { %v4196_v55 = vadd.f32 %v9246_v26, %v4195_v17  ;;  %v4215_v59 = vadd.f32 %v4201_v41, %v11406_v28  ;;  %v4409_v17 = vld [vmem:[%s12583_s12 + $0x28] sm:$0xff] }
0x1492   :  { %v10049_v16 = vpop.f32.mrf.mxu1  ;;  %10082 = vmatprep.subr.mxu0 %v4409_v17 }
0x1493   :  { %4096 = vrot.lane.b32.xlu1 %v10049_v16, %s12575_s27  ;;  %v4214_v63 = vadd.f32 %v4196_v55, %v11402_v11  ;;  %v4223_v38 = vsel %vm300_vm2, %v4215_v59, 0.0  ;;  %v4408_v55 = vld [vmem:[%s12583_s12 + $0x20] sm:$0xff]  ;;  %10083 = vmatpush3.msra.mxu0 %v4409_v17 }
0x1494   :  { %v4067_v53 = vpop.f32.mrf.mxu1  ;;  %10084 = vmatprep.subr.mxu0 %v4408_v55 }
0x1495   :  { %4094 = vrot.lane.b32.xlu0 %v4067_v53, %s12575_s27  ;;  %v4220_v50 = vsel %vm300_vm2, %v4214_v63, 0.0  ;;  %10085 = vmatpush3.msra.mxu0 %v4408_v55 }
0x14a2   :  { %v4081_v0 = vpop.permute.xlu1 %4080 }
0x14a3   :  { %v4101_v5 = vsel %vm404_vm3, %v10019_v48, %v4081_v0 }
0x14a4   :  { %v4079_v29 = vpop.permute.xlu0 %4078 }
0x14a5   :  { %v4100_v4 = vsel %vm404_vm3, %v3476_v52, %v4079_v29  ;;  %v11738_v52 = vld [vmem:[%s12581_s5] ss:$0 sm:$0xff] }
0x14a6   :  { %v4089_v3 = vpop.permute.xlu1 %4088 }
0x14a7   :  { %v4103_v28 = vsel %vm492_vm9, %v4101_v5, %v4089_v3 }
0x14a8   :  { %v4087_v36 = vpop.permute.xlu0 %4086 }
0x14a9   :  { %v4102_v7 = vsel %vm492_vm9, %v4100_v4, %v4087_v36 }
0x14b4   :  { %4221 = vadd.xlane.f32.xlu0 %v4220_v50  ;;  %v4405_v50 = vld [vmem:[%s12583_s12 + $0x8] sm:$0xff] }
0x14b7   :  { %4224 = vadd.xlane.f32.xlu1 %v4223_v38  ;;  %v4404_v38 = vld [vmem:[%s12583_s12] sm:$0xff] }
0x1505   :  { %v4097_v18 = vpop.permute.xlu1 %4096 }
0x1506   :  { %v4105_v31 = vsel %vm1242_vm13, %v4103_v28, %v4097_v18 }
0x1507   :  { %v4095_v11 = vpop.permute.xlu0 %4094 }
0x1508   :  { %v4104_v44 = vsel %vm1242_vm13, %v4102_v7, %v4095_v11 }
0x1509   :  { %10061 = vmatprep.mubr.msk.f32.mxu0 %vm300_vm2, %v4104_v44  ;;  %v9253_v44 = vld [vmem:[%s12584_s10] ss:$0 sm:$0xff] }
0x150a   :  { %10062 = vmatmul.mubr.msk.f32.gmra.mxu0 %vm300_vm2, %v4105_v31 }
0x153d   :  { %v4222_v24 = vpop.xlane.xlu0 %4221 }
0x153e   :  { %v4232_v9 = vmul.f32 0.03125, %v4222_v24 }
0x1540   :  { %v4236_v10 = vsub.f32 %v4214_v63, %v4232_v9  ;;  %v4225_v14 = vpop.xlane.xlu1 %4224  ;;  %v4407_v63 = vld [vmem:[%s12583_s12 + $0x18] sm:$0xff] }
0x1541   :  { %v4233_v27 = vmul.f32 0.03125, %v4225_v14  ;;  %10086 = vmatprep.subr.mxu0 %v4407_v63 }
0x1542   :  { %v4240_v30 = vmul.f32 %v4236_v10, %v4236_v10  ;;  %10087 = vmatpush3.msra.mxu0 %v4407_v63 }
0x1543   :  { %v4237_v15 = vsub.f32 %v4215_v59, %v4233_v27  ;;  %v4406_v59 = vld [vmem:[%s12583_s12 + $0x10] sm:$0xff] }
0x1544   :  { %v4244_v19 = vsel %vm300_vm2, %v4240_v30, 0.0  ;;  %10088 = vmatprep.subr.mxu0 %v4406_v59 }
0x1545   :  { %4245 = vadd.xlane.f32.xlu0 %v4244_v19  ;;  %v4241_v47 = vmul.f32 %v4237_v15, %v4237_v15  ;;  %10089 = vmatpush3.msra.mxu0 %v4406_v59 }
0x1546   :  { %10090 = vmatprep.subr.mxu0 %v4405_v50 }
0x1547   :  { %v4247_v20 = vsel %vm300_vm2, %v4241_v47, 0.0  ;;  %10091 = vmatpush3.msra.mxu0 %v4405_v50  ;;  %v9268_v50 = vld [vmem:[%s10877_s29 + $0x38] sm:$0xff] }
0x1548   :  { %10092 = vmatprep.subr.mxu0 %v4404_v38  ;;  %10100 = vmatprep.subr.mxu1 %v9268_v50 }
0x1549   :  { %4248 = vadd.xlane.f32.xlu0 %v4247_v20  ;;  %10093 = vmatpush3.msra.mxu0 %v4404_v38  ;;  %v9267_v38 = vld [vmem:[%s10877_s29 + $0x30] sm:$0xff] }
0x15ca   :  { %v10063_v37 = vpop.f32.mrf.mxu0 }
0x15cb   :  { %v4211_v2 = vadd.f32 %v10063_v37, %v9246_v26 }
0x15cc   :  { %v4205_v6 = vpop.f32.mrf.mxu0 }
0x15cd   :  { %v4217_v57 = vadd.f32 %v4211_v2, %v11447_v45  ;;  %v4206_v25 = vadd.f32 %v9246_v26, %v4205_v6 }
0x15ce   :  { %v4246_v8 = vpop.xlane.xlu0 %4245 }
0x15cf   :  { %v4216_v12 = vadd.f32 %v4206_v25, %v11445_v46  ;;  %v4256_v43 = vmul.f32 0.03125, %v4246_v8  ;;  %v4229_v33 = vsel %vm300_vm2, %v4217_v57, 0.0  ;;  %v9258_v8 = vld [vmem:[%s12585_s6] ss:$0 sm:$0xff] }
0x15d0   :  { %4230 = vadd.xlane.f32.xlu0 %v4229_v33 }
0x15d1   :  { %v4260_v56 = vadd.f32 1e-05, %v4256_v43  ;;  %v4226_v23 = vsel %vm300_vm2, %v4216_v12, 0.0 }
0x15d2   :  { %4227 = vadd.xlane.f32.xlu1 %v4226_v23  ;;  %v4249_v40 = vpop.xlane.xlu0 %4248 }
0x15d3   :  { %10590 = vrsqrt.f32 %v4260_v56  ;;  %v4257_v45 = vmul.f32 0.03125, %v4249_v40 }
0x15d5   :  { %v4261_v42 = vadd.f32 1e-05, %v4257_v45 }
0x15d7   :  { %10592 = vrsqrt.f32 %v4261_v42 }
0x15e0   :  { %v10591_v48 = vpop.eup %10590 }
0x15e1   :  { %v4268_v46 = vmul.f32 %v10591_v48, %v4236_v10 }
0x15e3   :  { %v4278_v61 = vmul.f32 %v11738_v52, %v4268_v46 }
0x15e4   :  { %v10593_v16 = vpop.eup %10592 }
0x15e5   :  { %v11747_v53 = vadd.f32 %v11741_v60, %v4278_v61  ;;  %v4269_v21 = vmul.f32 %v10593_v16, %v4237_v15 }
0x15e7   :  { %10072 = vmatprep.mubr.msk.f32.mxu1 %vm300_vm2, %v11747_v53  ;;  %v4279_v26 = vmul.f32 %v11738_v52, %v4269_v21 }
0x15e9   :  { %v4289_v41 = vadd.f32 %v11741_v60, %v4279_v26 }
0x15eb   :  { %10073 = vmatmul.mubr.msk.f32.vlgmr.msra.gmra.mxu1 %vm300_vm2, %v4289_v41 }
0x15ec   :  { %10101 = vmatpush3.msra.mxu1 %v9268_v50 }
0x15ed   :  { %10102 = vmatprep.subr.mxu1 %v9267_v38 }
0x15ee   :  { %10103 = vmatpush3.msra.mxu1 %v9267_v38 }
0x1659   :  { %v4231_v0 = vpop.xlane.xlu0 %4230 }
0x165a   :  { %v4235_v29 = vmul.f32 0.03125, %v4231_v0  ;;  %v9266_v0 = vld [vmem:[%s10877_s29 + $0x28] sm:$0xff] }
0x165b   :  { %v4228_v3 = vpop.xlane.xlu1 %4227  ;;  %10104 = vmatprep.subr.mxu1 %v9266_v0 }
0x165c   :  { %v4239_v36 = vsub.f32 %v4217_v57, %v4235_v29  ;;  %v4234_v4 = vmul.f32 0.03125, %v4228_v3  ;;  %v9265_v29 = vld [vmem:[%s10877_s29 + $0x20] sm:$0xff]  ;;  %10105 = vmatpush3.msra.mxu1 %v9266_v0  ;;  %s12588_s29 = smov 80  }
0x165d   :  { %10106 = vmatprep.subr.mxu1 %v9265_v29 }
0x165e   :  { %v4238_v18 = vsub.f32 %v4216_v12, %v4234_v4  ;;  %v4243_v5 = vmul.f32 %v4239_v36, %v4239_v36  ;;  %10107 = vmatpush3.msra.mxu1 %v9265_v29 }
0x1660   :  { %v4253_v7 = vsel %vm300_vm2, %v4243_v5, 0.0  ;;  %v4242_v11 = vmul.f32 %v4238_v18, %v4238_v18 }
0x1661   :  { %4254 = vadd.xlane.f32.xlu0 %v4253_v7 }
0x1662   :  { %v4250_v28 = vsel %vm300_vm2, %v4242_v11, 0.0 }
0x1663   :  { %4251 = vadd.xlane.f32.xlu1 %v4250_v28 }
0x16ab   :  { %v10074_v31 = vpop.f32.mrf.mxu1 }
0x16ac   :  { %v4387_v24 = vadd.f32 %v10074_v31, %v9253_v44 }
0x16ad   :  { %v4381_v9 = vpop.f32.mrf.mxu1 }
0x16ae   :  { %v4382_v10 = vadd.f32 %v9253_v44, %v4381_v9  ;;  %v4401_v27 = vmax.f32 %v4387_v24, 0.0 }
0x16b0   :  { %v4400_v14 = vmax.f32 %v4382_v10, 0.0 }
0x16b2   :  { %10094 = vmatprep.mubr.msk.f32.mxu0 %vm4419_vm0, %v4400_v14 }
0x16b3   :  { %10095 = vmatmul.mubr.msk.f32.vlgmr.msra.gmra.mxu0 %vm4419_vm0, %v4401_v27 }
0x16ea   :  { %v4255_v30 = vpop.xlane.xlu0 %4254 }
0x16eb   :  { %v4259_v15 = vmul.f32 0.03125, %v4255_v30 }
0x16ec   :  { %v4252_v19 = vpop.xlane.xlu1 %4251 }
0x16ed   :  { %v4263_v47 = vadd.f32 1e-05, %v4259_v15  ;;  %v4258_v20 = vmul.f32 0.03125, %v4252_v19  ;;  %v9263_v15 = vld [vmem:[%s12586_s21] ss:$0 sm:$0xff]  ;;  %s12598_s21 = smov 120  }
0x16ef   :  { %10594 = vrsqrt.f32 %v4263_v47  ;;  %v4262_v1 = vadd.f32 1e-05, %v4258_v20 }
0x16f1   :  { %10596 = vrsqrt.f32 %v4262_v1  ;;  %v9264_v1 = vld [vmem:[%s12587_s17] ss:$0 sm:$0xff]  ;;  %s12597_s17 = smov 88  }
0x16fc   :  { %v10595_v22 = vpop.eup %10594 }
0x16fd   :  { %v4271_v35 = vmul.f32 %v10595_v22, %v4239_v36 }
0x16fe   :  { %v10597_v32 = vpop.eup %10596 }
0x16ff   :  { %v4270_v37 = vmul.f32 %v10597_v32, %v4238_v18  ;;  %v4281_v2 = vmul.f32 %v11738_v52, %v4271_v35 }
0x1701   :  { %v4280_v6 = vmul.f32 %v11738_v52, %v4270_v37  ;;  %v4291_v25 = vadd.f32 %v11741_v60, %v4281_v2 }
0x1703   :  { %v4290_v57 = vadd.f32 %v11741_v60, %v4280_v6 }
0x1705   :  { %10075 = vmatprep.mubr.msk.f32.mxu1 %vm300_vm2, %v4290_v57 }
0x1706   :  { %10076 = vmatmul.mubr.msk.f32.gmra.mxu1 %vm300_vm2, %v4291_v25 }
0x1773   :  { %v10096_v12 = vpop.f32.mrf.mxu0 }
0x1774   :  { %v4504_v43 = vadd.f32 %v10096_v12, %v9258_v8 }
0x1775   :  { %v4498_v33 = vpop.f32.mrf.mxu0 }
0x1776   :  { %v4518_v56 = vadd.f32 %v4504_v43, %v4289_v41  ;;  %v4499_v23 = vadd.f32 %v9258_v8, %v4498_v33 }
0x1778   :  { %v4517_v40 = vadd.f32 %v4499_v23, %v11747_v53  ;;  %v4526_v45 = vsel %vm300_vm2, %v4518_v56, 0.0  ;;  %v11798_v23 = vld [vmem:[%s10883_s3 + $0x1] ss:$0 sm:$0xff]  ;;  %s12589_s3 = smov 112  }
0x1779   :  { %4527 = vadd.xlane.f32.xlu0 %v4526_v45 }
0x177a   :  { %v4523_v42 = vsel %vm300_vm2, %v4517_v40, 0.0 }
0x177b   :  { %4524 = vadd.xlane.f32.xlu1 %v4523_v42 }
0x17c6   :  { %v10077_v48 = vpop.f32.mrf.mxu1 }
0x17c7   :  { %v4397_v52 = vadd.f32 %v10077_v48, %v9253_v44 }
0x17c8   :  { %v4391_v46 = vpop.f32.mrf.mxu1 }
0x17c9   :  { %v4392_v60 = vadd.f32 %v9253_v44, %v4391_v46  ;;  %v4403_v62 = vmax.f32 %v4397_v52, 0.0 }
0x17cb   :  { %v4402_v61 = vmax.f32 %v4392_v60, 0.0 }
0x17cd   :  { %10097 = vmatprep.mubr.msk.f32.mxu0 %vm4419_vm0, %v4402_v61 }
0x17ce   :  { %10098 = vmatmul.mubr.msk.f32.gmra.mxu0 %vm4419_vm0, %v4403_v62 }
0x1802   :  { %v4528_v34 = vpop.xlane.xlu0 %4527 }
0x1803   :  { %v4536_v16 = vmul.f32 0.03125, %v4528_v34 }
0x1804   :  { %v4525_v53 = vpop.xlane.xlu1 %4524 }
0x1805   :  { %v4540_v21 = vsub.f32 %v4518_v56, %v4536_v16  ;;  %v4535_v17 = vmul.f32 0.03125, %v4525_v53 }
0x1807   :  { %v4539_v26 = vsub.f32 %v4517_v40, %v4535_v17  ;;  %v4544_v55 = vmul.f32 %v4540_v21, %v4540_v21 }
0x1809   :  { %v4550_v41 = vsel %vm300_vm2, %v4544_v55, 0.0  ;;  %v4543_v63 = vmul.f32 %v4539_v26, %v4539_v26 }
0x180a   :  { %4551 = vadd.xlane.f32.xlu0 %v4550_v41 }
0x180b   :  { %v4547_v59 = vsel %vm300_vm2, %v4543_v63, 0.0 }
0x180c   :  { %4548 = vadd.xlane.f32.xlu1 %v4547_v59 }
0x188e   :  { %v10099_v3 = vpop.f32.mrf.mxu0 }
0x188f   :  { %v4514_v36 = vadd.f32 %v10099_v3, %v9258_v8 }
0x1890   :  { %v4508_v4 = vpop.f32.mrf.mxu0 }
0x1891   :  { %v4520_v18 = vadd.f32 %v4514_v36, %v4291_v25  ;;  %v4509_v5 = vadd.f32 %v9258_v8, %v4508_v4 }
0x1893   :  { %v4519_v7 = vadd.f32 %v4509_v5, %v4290_v57  ;;  %v4552_v11 = vpop.xlane.xlu0 %4551  ;;  %v4532_v28 = vsel %vm300_vm2, %v4520_v18, 0.0 }
0x1894   :  { %v4560_v44 = vmul.f32 0.03125, %v4552_v11  ;;  %4533 = vadd.xlane.f32.xlu0 %v4532_v28 }
0x1895   :  { %v4549_v31 = vpop.xlane.xlu1 %4548  ;;  %v4529_v24 = vsel %vm300_vm2, %v4519_v7, 0.0 }
0x1896   :  { %v4564_v9 = vadd.f32 1e-05, %v4560_v44  ;;  %v4559_v10 = vmul.f32 0.03125, %v4549_v31  ;;  %4530 = vadd.xlane.f32.xlu1 %v4529_v24 }
0x1898   :  { %10598 = vrsqrt.f32 %v4564_v9  ;;  %v4563_v14 = vadd.f32 1e-05, %v4559_v10 }
0x189a   :  { %10600 = vrsqrt.f32 %v4563_v14 }
0x18a5   :  { %v10599_v27 = vpop.eup %10598 }
0x18a6   :  { %v4572_v30 = vmul.f32 %v10599_v27, %v4540_v21 }
0x18a7   :  { %v10601_v19 = vpop.eup %10600 }
0x18a8   :  { %v4571_v47 = vmul.f32 %v10601_v19, %v4539_v26  ;;  %v4582_v20 = vmul.f32 %v9263_v15, %v4572_v30 }
0x18aa   :  { %v4581_v22 = vmul.f32 %v9263_v15, %v4571_v47  ;;  %v11789_v32 = vadd.f32 %v9264_v1, %v4582_v20 }
0x18ac   :  { %v11787_v35 = vadd.f32 %v9264_v1, %v4581_v22 }
0x18ae   :  { %10108 = vmatprep.mubr.msk.f32.mxu1 %vm300_vm2, %v11787_v35 }
0x18af   :  { %10109 = vmatmul.mubr.msk.f32.vlgmr.msra.gmra.mxu1 %vm300_vm2, %v11789_v32 }
0x191d   :  { %v4534_v37 = vpop.xlane.xlu0 %4533 }
0x191e   :  { %v4538_v2 = vmul.f32 0.03125, %v4534_v37 }
0x191f   :  { %v4531_v6 = vpop.xlane.xlu1 %4530 }
0x1920   :  { %v4542_v57 = vsub.f32 %v4520_v18, %v4538_v2  ;;  %v4537_v25 = vmul.f32 0.03125, %v4531_v6 }
0x1922   :  { %v4541_v8 = vsub.f32 %v4519_v7, %v4537_v25  ;;  %v4546_v12 = vmul.f32 %v4542_v57, %v4542_v57 }
0x1924   :  { %v4556_v43 = vsel %vm300_vm2, %v4546_v12, 0.0  ;;  %v4545_v33 = vmul.f32 %v4541_v8, %v4541_v8 }
0x1925   :  { %4557 = vadd.xlane.f32.xlu0 %v4556_v43 }
0x1926   :  { %v4553_v56 = vsel %vm300_vm2, %v4545_v33, 0.0 }
0x1927   :  { %4554 = vadd.xlane.f32.xlu1 %v4553_v56 }
0x196f   :  { %v10110_v40 = vpop.f32.mrf.mxu1 }
0x1970   :  { %v11801_v45 = vadd.f32 %v10110_v40, %v11798_v23 }
0x1971   :  { %v4686_v42 = vpop.f32.mrf.mxu1 }
0x1972   :  { %4709 = vrot.lane.b32.xlu1 %v11801_v45, %s12552_s0  ;;  %4913 = vrot.lane.b32.xlu0 %v11801_v45, %s12550_s9  ;;  %v11808_v48 = vadd.f32 %v11798_v23, %v4686_v42 }
0x1976   :  { %4707 = vrot.lane.b32.xlu1 %v11808_v48, %s12552_s0  ;;  %4907 = vrot.lane.b32.xlu0 %v11808_v48, %s12548_s13  ;;  %s12592_s0 = smov 48  }
0x197a   :  { %4911 = vrot.lane.b32.xlu1 %v11808_v48, %s12550_s9  ;;  %4909 = vrot.lane.b32.xlu0 %v11801_v45, %s12548_s13  ;;  %s12590_s13 = smov 64   ;;  %s12591_s9 = smov 56  }
0x197e   :  { %5117 = vrot.lane.b32.xlu1 %v11801_v45, %s12588_s29  ;;  %5111 = vrot.lane.b32.xlu0 %v11808_v48, %s12589_s3 }
0x1982   :  { %5115 = vrot.lane.b32.xlu1 %v11808_v48, %s12588_s29 }
0x1986   :  { %5113 = vrot.lane.b32.xlu1 %v11801_v45, %s12589_s3 }
0x19ae   :  { %v4558_v52 = vpop.xlane.xlu0 %4557 }
0x19af   :  { %v4562_v46 = vmul.f32 0.03125, %v4558_v52 }
0x19b0   :  { %v4555_v60 = vpop.xlane.xlu1 %4554 }
0x19b1   :  { %v4566_v61 = vadd.f32 1e-05, %v4562_v46  ;;  %v4561_v62 = vmul.f32 0.03125, %v4555_v60 }
0x19b3   :  { %10602 = vrsqrt.f32 %v4566_v61  ;;  %v4565_v34 = vadd.f32 1e-05, %v4561_v62 }
0x19b5   :  { %10604 = vrsqrt.f32 %v4565_v34 }
0x19c0   :  { %v10603_v16 = vpop.eup %10602 }
0x19c1   :  { %v4574_v53 = vmul.f32 %v10603_v16, %v4542_v57 }
0x19c2   :  { %v10605_v21 = vpop.eup %10604 }
0x19c3   :  { %v4573_v17 = vmul.f32 %v10605_v21, %v4541_v8  ;;  %v4584_v26 = vmul.f32 %v9263_v15, %v4574_v53 }
0x19c5   :  { %v4583_v55 = vmul.f32 %v9263_v15, %v4573_v17  ;;  %v11828_v63 = vadd.f32 %v9264_v1, %v4584_v26 }
0x19c7   :  { %v11826_v41 = vadd.f32 %v9264_v1, %v4583_v55 }
0x19c9   :  { %10111 = vmatprep.mubr.msk.f32.mxu1 %vm300_vm2, %v11826_v41 }
0x19ca   :  { %10112 = vmatmul.mubr.msk.f32.gmra.mxu1 %vm300_vm2, %v11828_v63 }
0x19cb   :  { %10118 = vmatprep.mubr.msk.f32.mxu1 %vm404_vm3, %v11808_v48 }
0x19e4   :  { %v4710_v59 = vpop.permute.xlu1 %4709  ;;  %v4914_v50 = vpop.permute.xlu0 %4913 }
0x19e5   :  { %10114 = vmatprep.subr.msk.mxu1 %vm404_vm3, %v4710_v59  ;;  %10128 = vmatprep.subr.msk.mxu0 %vm404_vm3, %v4914_v50 }
0x19e6   :  { %10115 = vmatpush3.xpose.msk.msra.mxu1 %vm404_vm3, %v4710_v59  ;;  %10129 = vmatpush3.xpose.msk.msra.mxu0 %vm404_vm3, %v4914_v50 }
0x19e8   :  { %v4708_v38 = vpop.permute.xlu1 %4707  ;;  %v4908_v0 = vpop.permute.xlu0 %4907 }
0x19e9   :  { %10116 = vmatprep.subr.msk.mxu1 %vm404_vm3, %v4708_v38  ;;  %10132 = vmatprep.mubr.msk.f32.mxu0 %vm404_vm3, %v4908_v0 }
0x19ea   :  { %10117 = vmatpush3.xpose.msk.msra.mxu1 %vm404_vm3, %v4708_v38 }
0x19ec   :  { %v4912_v29 = vpop.permute.xlu1 %4911  ;;  %v4910_v3 = vpop.permute.xlu0 %4909 }
0x19ed   :  { %10119 = vmatmul.mubr.msk.f32.vlgmr.msra.gmra.mxu1 %vm404_vm3, %v11801_v45  ;;  %10130 = vmatprep.subr.msk.mxu0 %vm404_vm3, %v4912_v29 }
0x19ee   :  { %10131 = vmatpush3.xpose.msk.msra.mxu0 %vm404_vm3, %v4912_v29 }
0x19f0   :  { %v5118_v36 = vpop.permute.xlu1 %5117  ;;  %v5112_v4 = vpop.permute.xlu0 %5111 }
0x19f1   :  { %10133 = vmatmul.mubr.msk.f32.vlgmr.msra.gmra.mxu0 %vm404_vm3, %v4910_v3  ;;  %10142 = vmatprep.subr.msk.mxu0 %vm404_vm3, %v5118_v36 }
0x19f2   :  { %10143 = vmatpush3.xpose.msk.msra.mxu0 %vm404_vm3, %v5118_v36  ;;  %10146 = vmatprep.mubr.msk.f32.mxu0 %vm404_vm3, %v5112_v4 }
0x19f4   :  { %v5116_v18 = vpop.permute.xlu1 %5115 }
0x19f5   :  { %10144 = vmatprep.subr.msk.mxu0 %vm404_vm3, %v5116_v18 }
0x19f6   :  { %10145 = vmatpush3.xpose.msk.msra.mxu0 %vm404_vm3, %v5116_v18 }
0x19f8   :  { %v5114_v5 = vpop.permute.xlu1 %5113 }
0x19f9   :  { %10147 = vmatmul.mubr.msk.f32.vlgmr.msra.gmra.mxu0 %vm404_vm3, %v5114_v5 }
0x1a8a   :  { %v11854_v7 = vpop.f32.mrf.mxu1 }
0x1a8c   :  { %v11856_v11 = vpop.f32.mrf.mxu1 }
0x1aad   :  { %v10120_v28 = vpop.f32.mrf.mxu1 }
0x1aae   :  { %v4795_v44 = vmul.f32 0.35355338, %v10120_v28 }
0x1aaf   :  { %v4785_v31 = vpop.f32.mrf.mxu1 }
0x1ab0   :  { %v4797_v24 = vadd.f32 %v4795_v44, %v11115_v51  ;;  %v4794_v9 = vmul.f32 0.35355338, %v4785_v31 }
0x1ab1   :  { %v10134_v10 = vpop.f32.mrf.mxu0 }
0x1ab2   :  { %v4796_v14 = vadd.f32 %v4794_v9, %v11118_v54  ;;  %v4801_v27 = vsel %vm492_vm9, %v4797_v24, -inf  ;;  %v4999_v15 = vmul.f32 0.35355338, %v10134_v10 }
0x1ab3   :  { %4802 = vmax.xlane.f32.xlu1 %v4801_v27  ;;  %v4989_v30 = vpop.f32.mrf.mxu0 }
0x1ab4   :  { %v4998_v19 = vmul.f32 0.35355338, %v4989_v30  ;;  %v4798_v47 = vsel %vm492_vm9, %v4796_v14, -inf  ;;  %v5001_v1 = vadd.f32 %v4999_v15, %v11115_v51 }
0x1ab5   :  { %4799 = vmax.xlane.f32.xlu0 %v4798_v47 }
0x1ab6   :  { %v5000_v20 = vadd.f32 %v4998_v19, %v11118_v54  ;;  %v5005_v57 = vsel %vm492_vm9, %v5001_v1, -inf }
0x1ab8   :  { %v5002_v22 = vsel %vm492_vm9, %v5000_v20, -inf }
0x1ab9   :  { %5003 = vmax.xlane.f32.xlu0 %v5002_v22  ;;  %v10148_v37 = vpop.f32.mrf.mxu0 }
0x1aba   :  { %v5203_v2 = vmul.f32 0.35355338, %v10148_v37 }
0x1abb   :  { %v5193_v8 = vpop.f32.mrf.mxu0 }
0x1abc   :  { %v5205_v6 = vadd.f32 %v5203_v2, %v11115_v51  ;;  %v5202_v12 = vmul.f32 0.35355338, %v5193_v8 }
0x1abd   :  { %5006 = vmax.xlane.f32.xlu0 %v5005_v57 }
0x1abe   :  { %v5209_v25 = vsel %vm492_vm9, %v5205_v6, -inf  ;;  %v5204_v43 = vadd.f32 %v5202_v12, %v11118_v54 }
0x1ac0   :  { %v5206_v33 = vsel %vm492_vm9, %v5204_v43, -inf }
0x1ac1   :  { %5210 = vmax.xlane.f32.xlu0 %v5209_v25 }
0x1ac4   :  { %4822 = vrot.lane.b32.xlu1 %v11801_v45, %s12590_s13 }
0x1ac8   :  { %5026 = vrot.lane.b32.xlu1 %v11801_v45, %s12591_s9 }
0x1acc   :  { %5024 = vrot.lane.b32.xlu1 %v11808_v48, %s12591_s9 }
0x1ad7   :  { %4820 = vrot.lane.b32.xlu0 %v11808_v48, %s12590_s13 }
0x1adb   :  { %5230 = vrot.lane.b32.xlu0 %v11801_v45, %s12592_s0 }
0x1af0   :  { %5207 = vmax.xlane.f32.xlu1 %v5206_v33 }
0x1b01   :  { %5228 = vrot.lane.b32.xlu1 %v11808_v48, %s12592_s0 }
0x1b3c   :  { %v4803_v56 = vpop.xlane.xlu1 %4802 }
0x1b3d   :  { %v4805_v40 = vsub.f32 %v4797_v24, %v4803_v56 }
0x1b3e   :  { %v4800_v42 = vpop.xlane.xlu0 %4799 }
0x1b3f   :  { %v4808_v52 = vmul.f32 1.442695, %v4805_v40  ;;  %v4804_v46 = vsub.f32 %v4796_v14, %v4800_v42 }
0x1b40   :  { %v4823_v60 = vpop.permute.xlu1 %4822 }
0x1b41   :  { %10606 = vpow2.f32 %v4808_v52  ;;  %v4806_v61 = vmul.f32 1.442695, %v4804_v46  ;;  %10121 = vmatprep.subr.mxu1 %v4823_v60 }
0x1b42   :  { %10122 = vmatpush3.msra.mxu1 %v4823_v60  ;;  %v5004_v62 = vpop.xlane.xlu0 %5003 }
0x1b43   :  { %10608 = vpow2.f32 %v4806_v61  ;;  %v5008_v34 = vsub.f32 %v5000_v20, %v5004_v62 }
0x1b44   :  { %v5027_v3 = vpop.permute.xlu1 %5026 }
0x1b45   :  { %v5010_v16 = vmul.f32 1.442695, %v5008_v34 }
0x1b46   :  { %v5007_v53 = vpop.xlane.xlu0 %5006 }
0x1b47   :  { %10610 = vpow2.f32 %v5010_v16  ;;  %v5009_v21 = vsub.f32 %v5001_v1, %v5007_v53 }
0x1b48   :  { %v5025_v24 = vpop.permute.xlu1 %5024 }
0x1b49   :  { %v5012_v17 = vmul.f32 1.442695, %v5009_v21 }
0x1b4a   :  { %v5211_v26 = vpop.xlane.xlu0 %5210 }
0x1b4b   :  { %10612 = vpow2.f32 %v5012_v17  ;;  %v5213_v55 = vsub.f32 %v5205_v6, %v5211_v26 }
0x1b4d   :  { %v5216_v59 = vmul.f32 1.442695, %v5213_v55 }
0x1b4e   :  { %v10607_v50 = vpop.eup %10606  ;;  %v4821_v38 = vpop.permute.xlu0 %4820 }
0x1b4f   :  { %10614 = vpow2.f32 %v5216_v59  ;;  %10123 = vmatprep.subr.mxu1 %v4821_v38  ;;  %v4813_v0 = vsel %vm492_vm9, %v10607_v50, 0.0 }
0x1b50   :  { %v10609_v29 = vpop.eup %10608  ;;  %4814 = vadd.xlane.f32.xlu0 %v4813_v0  ;;  %10124 = vmatpush3.msra.mxu1 %v4821_v38 }
0x1b51   :  { %10135 = vmatprep.subr.mxu1 %v5027_v3  ;;  %v4810_v36 = vsel %vm492_vm9, %v10609_v29, 0.0 }
0x1b52   :  { %4811 = vadd.xlane.f32.xlu1 %v4810_v36  ;;  %v5231_v15 = vpop.permute.xlu0 %5230 }
0x1b54   :  { %v10611_v4 = vpop.eup %10610 }
0x1b55   :  { %v5014_v18 = vsel %vm492_vm9, %v10611_v4, 0.0 }
0x1b56   :  { %5015 = vadd.xlane.f32.xlu1 %v5014_v18  ;;  %v11928_v18 = vadd.f32 %v11854_v7, %v11798_v23 }
0x1b58   :  { %v10613_v5 = vpop.eup %10612 }
0x1b59   :  { %v5017_v28 = vsel %vm492_vm9, %v10613_v5, 0.0 }
0x1b5a   :  { %5018 = vadd.xlane.f32.xlu0 %v5017_v28 }
0x1b5c   :  { %v10615_v44 = vpop.eup %10614 }
0x1b5d   :  { %v5221_v31 = vsel %vm492_vm9, %v10615_v44, 0.0 }
0x1b5e   :  { %5222 = vadd.xlane.f32.xlu0 %v5221_v31 }
0x1b67   :  { %5319 = vrot.lane.b32.xlu1 %v11808_v48, %s12593_s18 }
0x1b74   :  { %5321 = vrot.lane.b32.xlu0 %v11801_v45, %s12593_s18 }
0x1b78   :  { %5315 = vrot.lane.b32.xlu0 %v11808_v48, %s12594_s16 }
0x1b79   :  { %v5208_v9 = vpop.xlane.xlu1 %5207 }
0x1b7a   :  { %v5212_v10 = vsub.f32 %v5204_v43, %v5208_v9 }
0x1b7c   :  { %v5214_v14 = vmul.f32 1.442695, %v5212_v10 }
0x1b7d   :  { %v5229_v19 = vpop.permute.xlu1 %5228 }
0x1b7e   :  { %10616 = vpow2.f32 %v5214_v14 }
0x1b8b   :  { %v10617_v27 = vpop.eup %10616 }
0x1b8c   :  { %v5218_v30 = vsel %vm492_vm9, %v10617_v27, 0.0 }
0x1b8d   :  { %5219 = vadd.xlane.f32.xlu1 %v5218_v30 }
0x1b9e   :  { %5317 = vrot.lane.b32.xlu1 %v11801_v45, %s12594_s16 }
0x1bd9   :  { %v4815_v47 = vpop.xlane.xlu0 %4814 }
0x1bda   :  { %10618 = vrcp.f32 %v4815_v47 }
0x1bdb   :  { %v4812_v20 = vpop.xlane.xlu1 %4811 }
0x1bdc   :  { %10620 = vrcp.f32 %v4812_v20 }
0x1bdf   :  { %v5016_v1 = vpop.xlane.xlu1 %5015 }
0x1be0   :  { %10622 = vrcp.f32 %v5016_v1 }
0x1be3   :  { %v5019_v22 = vpop.xlane.xlu0 %5018  ;;  %v5320_v40 = vpop.permute.xlu1 %5319 }
0x1be4   :  { %10624 = vrcp.f32 %v5019_v22 }
0x1be7   :  { %v10619_v37 = vpop.eup %10618  ;;  %v5223_v43 = vpop.xlane.xlu0 %5222 }
0x1be8   :  { %v4819_v57 = vmul.f32 %v10619_v37, %v10607_v50  ;;  %10626 = vrcp.f32 %v5223_v43 }
0x1be9   :  { %v10621_v2 = vpop.eup %10620 }
0x1bea   :  { %v4818_v6 = vmul.f32 %v10621_v2, %v10609_v29 }
0x1beb   :  { %v5322_v56 = vpop.permute.xlu0 %5321 }
0x1bec   :  { %10125 = vmatprep.mubr.msk.f32.mxu1 %vm492_vm9, %v4818_v6 }
0x1bed   :  { %v10623_v25 = vpop.eup %10622  ;;  %10126 = vmatmul.mubr.msk.f32.vlgmr.msra.gmra.mxu1 %vm492_vm9, %v4819_v57 }
0x1bee   :  { %10136 = vmatpush3.msra.mxu1 %v5027_v3  ;;  %v5022_v8 = vmul.f32 %v10623_v25, %v10611_v4 }
0x1bef   :  { %10137 = vmatprep.subr.mxu1 %v5025_v24  ;;  %v5316_v62 = vpop.permute.xlu0 %5315 }
0x1bf0   :  { %10138 = vmatpush3.msra.mxu1 %v5025_v24  ;;  %10139 = vmatprep.mubr.msk.f32.mxu1 %vm492_vm9, %v5022_v8 }
0x1bf1   :  { %v10625_v12 = vpop.eup %10624  ;;  %10149 = vmatprep.subr.mxu1 %v5231_v15 }
0x1bf2   :  { %v5023_v33 = vmul.f32 %v10625_v12, %v10613_v5 }
0x1bf4   :  { %10140 = vmatmul.mubr.msk.f32.vlgmr.msra.gmra.mxu1 %vm492_vm9, %v5023_v33 }
0x1bf5   :  { %10150 = vmatpush3.msra.mxu1 %v5231_v15  ;;  %v10627_v52 = vpop.eup %10626 }
0x1bf6   :  { %10151 = vmatprep.subr.mxu1 %v5229_v19  ;;  %v5227_v61 = vmul.f32 %v10627_v52, %v10615_v44 }
0x1bf7   :  { %10152 = vmatpush3.msra.mxu1 %v5229_v19 }
0x1bf8   :  { %10156 = vmatprep.subr.msk.mxu1 %vm404_vm3, %v5322_v56 }
0x1c16   :  { %v5220_v42 = vpop.xlane.xlu1 %5219 }
0x1c17   :  { %10628 = vrcp.f32 %v5220_v42 }
0x1c1a   :  { %v5318_v34 = vpop.permute.xlu1 %5317 }
0x1c24   :  { %v10629_v46 = vpop.eup %10628 }
0x1c25   :  { %v5226_v60 = vmul.f32 %v10629_v46, %v10617_v27 }
0x1c27   :  { %10153 = vmatprep.mubr.msk.f32.mxu1 %vm492_vm9, %v5226_v60 }
0x1c28   :  { %10154 = vmatmul.mubr.msk.f32.vlgmr.msra.gmra.mxu1 %vm492_vm9, %v5227_v61 }
0x1c29   :  { %10157 = vmatpush3.xpose.msk.msra.mxu1 %vm404_vm3, %v5322_v56  ;;  %10160 = vmatprep.mubr.msk.f32.mxu1 %vm404_vm3, %v5316_v62 }
0x1c2a   :  { %10158 = vmatprep.subr.msk.mxu1 %vm404_vm3, %v5320_v40 }
0x1c2d   :  { %10159 = vmatpush3.xpose.msk.msra.mxu1 %vm404_vm3, %v5320_v40 }
0x1c30   :  { %10161 = vmatmul.mubr.msk.f32.vlgmr.msra.gmra.mxu1 %vm404_vm3, %v5318_v34 }
0x1cad   :  { %v11908_v16 = vpop.f32.mrf.mxu1 }
0x1caf   :  { %v11910_v53 = vpop.f32.mrf.mxu1 }
0x1cb4   :  { %v11912_v21 = vpop.f32.mrf.mxu1 }
0x1cb6   :  { %v11914_v17 = vpop.f32.mrf.mxu1 }
0x1ce8   :  { %v11916_v26 = vpop.f32.mrf.mxu1 }
0x1cea   :  { %v11918_v55 = vpop.f32.mrf.mxu1 }
0x1cf0   :  { %v10162_v59 = vpop.f32.mrf.mxu1 }
0x1cf1   :  { %v5407_v50 = vmul.f32 0.35355338, %v10162_v59 }
0x1cf2   :  { %v5397_v38 = vpop.f32.mrf.mxu1 }
0x1cf3   :  { %v5409_v0 = vadd.f32 %v5407_v50, %v11115_v51  ;;  %v5406_v29 = vmul.f32 0.35355338, %v5397_v38  ;;  %v11934_v51 = vadd.f32 %v11798_v23, %v11856_v11 }
0x1cf5   :  { %v5408_v3 = vadd.f32 %v5406_v29, %v11118_v54  ;;  %v5413_v36 = vsel %vm492_vm9, %v5409_v0, -inf }
0x1cf6   :  { %5414 = vmax.xlane.f32.xlu1 %v5413_v36 }
0x1cf7   :  { %v5410_v4 = vsel %vm492_vm9, %v5408_v3, -inf }
0x1cf8   :  { %5411 = vmax.xlane.f32.xlu0 %v5410_v4 }
0x1d07   :  { %5434 = vrot.lane.b32.xlu1 %v11801_v45, %s12595_s23 }
0x1d0b   :  { %5553 = vrot.lane.b32.xlu1 %v11928_v18, %s12596_s4 }
0x1d0f   :  { %5551 = vrot.lane.b32.xlu1 %v11934_v51, %s12596_s4 }
0x1d7f   :  { %v5415_v54 = vpop.xlane.xlu1 %5414 }
0x1d80   :  { %v5417_v5 = vsub.f32 %v5409_v0, %v5415_v54 }
0x1d81   :  { %v5412_v28 = vpop.xlane.xlu0 %5411 }
0x1d82   :  { %v5420_v44 = vmul.f32 1.442695, %v5417_v5  ;;  %v5416_v31 = vsub.f32 %v5408_v3, %v5412_v28 }
0x1d83   :  { %v5435_v45 = vpop.permute.xlu1 %5434 }
0x1d84   :  { %10630 = vpow2.f32 %v5420_v44  ;;  %v5418_v24 = vmul.f32 1.442695, %v5416_v31  ;;  %10163 = vmatprep.subr.mxu0 %v5435_v45 }
0x1d85   :  { %10164 = vmatpush3.msra.mxu0 %v5435_v45 }
0x1d86   :  { %10632 = vpow2.f32 %v5418_v24 }
0x1d87   :  { %v5554_v30 = vpop.permute.xlu1 %5553 }
0x1d8b   :  { %v5552_v1 = vpop.permute.xlu1 %5551 }
0x1d91   :  { %v10631_v7 = vpop.eup %10630 }
0x1d92   :  { %v5425_v9 = vsel %vm492_vm9, %v10631_v7, 0.0 }
0x1d93   :  { %v10633_v10 = vpop.eup %10632  ;;  %5426 = vadd.xlane.f32.xlu0 %v5425_v9 }
0x1d94   :  { %v5422_v23 = vsel %vm492_vm9, %v10633_v10, 0.0 }
0x1d97   :  { %5423 = vadd.xlane.f32.xlu0 %v5422_v23 }
0x1dad   :  { %5432 = vrot.lane.b32.xlu0 %v11808_v48, %s12595_s23 }
0x1e1c   :  { %v5427_v11 = vpop.xlane.xlu0 %5426 }
0x1e1d   :  { %10634 = vrcp.f32 %v5427_v11 }
0x1e20   :  { %v5424_v14 = vpop.xlane.xlu0 %5423 }
0x1e21   :  { %10636 = vrcp.f32 %v5424_v14 }
0x1e24   :  { %v5433_v27 = vpop.permute.xlu0 %5432 }
0x1e25   :  { %10165 = vmatprep.subr.mxu0 %v5433_v27 }
0x1e26   :  { %10166 = vmatpush3.msra.mxu0 %v5433_v27 }
0x1e27   :  { %10170 = vmatprep.subr.msk.mxu0 %vm404_vm3, %v5554_v30 }
0x1e2a   :  { %v10635_v15 = vpop.eup %10634 }
0x1e2b   :  { %v5431_v20 = vmul.f32 %v10635_v15, %v10631_v7 }
0x1e2e   :  { %v10637_v19 = vpop.eup %10636 }
0x1e2f   :  { %v5430_v47 = vmul.f32 %v10637_v19, %v10633_v10 }
0x1e31   :  { %10167 = vmatprep.mubr.msk.f32.mxu0 %vm492_vm9, %v5430_v47 }
0x1e32   :  { %10168 = vmatmul.mubr.msk.f32.vlgmr.msra.gmra.mxu0 %vm492_vm9, %v5431_v20 }
0x1e33   :  { %10171 = vmatpush3.xpose.msk.msra.mxu0 %vm404_vm3, %v5554_v30  ;;  %10174 = vmatprep.mubr.msk.f32.mxu0 %vm404_vm3, %v11934_v51 }
0x1e34   :  { %10172 = vmatprep.subr.msk.mxu0 %vm404_vm3, %v5552_v1 }
0x1e37   :  { %10173 = vmatpush3.xpose.msk.msra.mxu0 %vm404_vm3, %v5552_v1 }
0x1e3a   :  { %10175 = vmatmul.mubr.msk.f32.vlgmr.msra.gmra.mxu0 %vm404_vm3, %v11928_v18 }
0x1ef2   :  { %v11952_v48 = vpop.f32.mrf.mxu0 }
0x1ef4   :  { %v11954_v22 = vpop.f32.mrf.mxu0 }
0x1efa   :  { %v10176_v37 = vpop.f32.mrf.mxu0 }
0x1efb   :  { %v5639_v2 = vmul.f32 0.35355338, %v10176_v37 }
0x1efc   :  { %v5629_v6 = vpop.f32.mrf.mxu0 }
0x1efd   :  { %v5641_v57 = vadd.f32 %v5639_v2, %v11216_v58  ;;  %v5638_v25 = vmul.f32 0.35355338, %v5629_v6 }
0x1eff   :  { %v5640_v8 = vadd.f32 %v5638_v25, %v11206_v49  ;;  %v5645_v12 = vsel %vm492_vm9, %v5641_v57, -inf }
0x1f00   :  { %5646 = vmax.xlane.f32.xlu1 %v5645_v12 }
0x1f01   :  { %v5642_v43 = vsel %vm492_vm9, %v5640_v8, -inf }
0x1f02   :  { %5643 = vmax.xlane.f32.xlu0 %v5642_v43 }
0x1f11   :  { %5666 = vrot.lane.b32.xlu1 %v11928_v18, %s12590_s13 }
0x1f15   :  { %5757 = vrot.lane.b32.xlu1 %v11928_v18, %s12597_s17 }
0x1f19   :  { %5755 = vrot.lane.b32.xlu1 %v11934_v51, %s12597_s17 }
0x1f1d   :  { %5753 = vrot.lane.b32.xlu1 %v11928_v18, %s12598_s21 }
0x1f89   :  { %v5647_v33 = vpop.xlane.xlu1 %5646 }
0x1f8a   :  { %v5649_v56 = vsub.f32 %v5641_v57, %v5647_v33 }
0x1f8b   :  { %v5644_v40 = vpop.xlane.xlu0 %5643 }
0x1f8c   :  { %v5652_v42 = vmul.f32 1.442695, %v5649_v56  ;;  %v5648_v52 = vsub.f32 %v5640_v8, %v5644_v40 }
0x1f8d   :  { %v5667_v46 = vpop.permute.xlu1 %5666 }
0x1f8e   :  { %10638 = vpow2.f32 %v5652_v42  ;;  %v5650_v60 = vmul.f32 1.442695, %v5648_v52  ;;  %10177 = vmatprep.subr.mxu1 %v5667_v46 }
0x1f8f   :  { %10178 = vmatpush3.msra.mxu1 %v5667_v46 }
0x1f90   :  { %10640 = vpow2.f32 %v5650_v60 }
0x1f91   :  { %v5758_v29 = vpop.permute.xlu1 %5757 }
0x1f95   :  { %v5756_v28 = vpop.permute.xlu1 %5755 }
0x1f99   :  { %v5754_v44 = vpop.permute.xlu1 %5753 }
0x1f9b   :  { %v10639_v61 = vpop.eup %10638 }
0x1f9c   :  { %v5657_v62 = vsel %vm492_vm9, %v10639_v61, 0.0 }
0x1f9d   :  { %v10641_v34 = vpop.eup %10640  ;;  %5658 = vadd.xlane.f32.xlu0 %v5657_v62 }
0x1f9e   :  { %v5654_v59 = vsel %vm492_vm9, %v10641_v34, 0.0 }
0x1fa1   :  { %5655 = vadd.xlane.f32.xlu0 %v5654_v59 }
0x1fb7   :  { %5664 = vrot.lane.b32.xlu0 %v11934_v51, %s12590_s13 }
0x1fbb   :  { %5751 = vrot.lane.b32.xlu0 %v11934_v51, %s12598_s21 }
0x2026   :  { %v5659_v50 = vpop.xlane.xlu0 %5658 }
0x2027   :  { %10642 = vrcp.f32 %v5659_v50 }
0x202a   :  { %v5656_v38 = vpop.xlane.xlu0 %5655 }
0x202b   :  { %10644 = vrcp.f32 %v5656_v38 }
0x202e   :  { %v5665_v0 = vpop.permute.xlu0 %5664 }
0x202f   :  { %10179 = vmatprep.subr.mxu1 %v5665_v0 }
0x2030   :  { %10180 = vmatpush3.msra.mxu1 %v5665_v0 }
0x2031   :  { %10184 = vmatprep.subr.msk.mxu1 %vm404_vm3, %v5758_v29 }
0x2032   :  { %v5752_v5 = vpop.permute.xlu0 %5751 }
0x2034   :  { %v10643_v3 = vpop.eup %10642 }
0x2035   :  { %v5663_v54 = vmul.f32 %v10643_v3, %v10639_v61 }
0x2038   :  { %v10645_v36 = vpop.eup %10644 }
0x2039   :  { %v5662_v4 = vmul.f32 %v10645_v36, %v10641_v34 }
0x203b   :  { %10181 = vmatprep.mubr.msk.f32.mxu1 %vm492_vm9, %v5662_v4 }
0x203c   :  { %10182 = vmatmul.mubr.msk.f32.vlgmr.msra.gmra.mxu1 %vm492_vm9, %v5663_v54 }
0x203d   :  { %10185 = vmatpush3.xpose.msk.msra.mxu1 %vm404_vm3, %v5758_v29  ;;  %10188 = vmatprep.mubr.msk.f32.mxu1 %vm404_vm3, %v5752_v5 }
0x203e   :  { %10186 = vmatprep.subr.msk.mxu1 %vm404_vm3, %v5756_v28 }
0x2041   :  { %10187 = vmatpush3.xpose.msk.msra.mxu1 %vm404_vm3, %v5756_v28 }
0x2044   :  { %10189 = vmatmul.mubr.msk.f32.vlgmr.msra.gmra.mxu1 %vm404_vm3, %v5754_v44 }
0x20fc   :  { %v11982_v31 = vpop.f32.mrf.mxu1 }
0x20fe   :  { %v11984_v45 = vpop.f32.mrf.mxu1 }
0x2104   :  { %v10190_v24 = vpop.f32.mrf.mxu1 }
0x2105   :  { %v5843_v7 = vmul.f32 0.35355338, %v10190_v24 }
0x2106   :  { %v5833_v9 = vpop.f32.mrf.mxu1 }
0x2107   :  { %v5845_v10 = vadd.f32 %v5843_v7, %v11216_v58  ;;  %v5842_v23 = vmul.f32 0.35355338, %v5833_v9 }
0x2109   :  { %v5844_v11 = vadd.f32 %v5842_v23, %v11206_v49  ;;  %v5849_v14 = vsel %vm492_vm9, %v5845_v10, -inf }
0x210a   :  { %5850 = vmax.xlane.f32.xlu1 %v5849_v14 }
0x210b   :  { %v5846_v27 = vsel %vm492_vm9, %v5844_v11, -inf }
0x210c   :  { %5847 = vmax.xlane.f32.xlu0 %v5846_v27 }
0x211b   :  { %5870 = vrot.lane.b32.xlu1 %v11928_v18, %s12591_s9 }
0x211f   :  { %5961 = vrot.lane.b32.xlu1 %v11928_v18, %s12588_s29 }
0x2123   :  { %5959 = vrot.lane.b32.xlu1 %v11934_v51, %s12588_s29 }
0x2127   :  { %5957 = vrot.lane.b32.xlu1 %v11928_v18, %s12589_s3 }
0x2193   :  { %v5851_v30 = vpop.xlane.xlu1 %5850 }
0x2194   :  { %v5853_v15 = vsub.f32 %v5845_v10, %v5851_v30 }
0x2195   :  { %v5848_v19 = vpop.xlane.xlu0 %5847 }
0x2196   :  { %v5856_v47 = vmul.f32 1.442695, %v5853_v15  ;;  %v5852_v20 = vsub.f32 %v5844_v11, %v5848_v19 }
0x2197   :  { %v5871_v1 = vpop.permute.xlu1 %5870 }
0x2198   :  { %10646 = vpow2.f32 %v5856_v47  ;;  %v5854_v37 = vmul.f32 1.442695, %v5852_v20  ;;  %10191 = vmatprep.subr.mxu0 %v5871_v1 }
0x2199   :  { %10192 = vmatpush3.msra.mxu0 %v5871_v1 }
0x219a   :  { %10648 = vpow2.f32 %v5854_v37 }
0x219b   :  { %v5962_v33 = vpop.permute.xlu1 %5961 }
0x219f   :  { %v5960_v60 = vpop.permute.xlu1 %5959 }
0x21a3   :  { %v5958_v61 = vpop.permute.xlu1 %5957 }
0x21a5   :  { %v10647_v2 = vpop.eup %10646 }
0x21a6   :  { %v5861_v6 = vsel %vm492_vm9, %v10647_v2, 0.0 }
0x21a7   :  { %v10649_v57 = vpop.eup %10648  ;;  %5862 = vadd.xlane.f32.xlu0 %v5861_v6 }
0x21a8   :  { %v5858_v25 = vsel %vm492_vm9, %v10649_v57, 0.0 }
0x21ab   :  { %5859 = vadd.xlane.f32.xlu0 %v5858_v25 }
0x21c1   :  { %5868 = vrot.lane.b32.xlu0 %v11934_v51, %s12591_s9 }
0x21c5   :  { %5955 = vrot.lane.b32.xlu0 %v11934_v51, %s12589_s3 }
0x2230   :  { %v5863_v8 = vpop.xlane.xlu0 %5862 }
0x2231   :  { %10650 = vrcp.f32 %v5863_v8 }
0x2234   :  { %v5860_v12 = vpop.xlane.xlu0 %5859 }
0x2235   :  { %10652 = vrcp.f32 %v5860_v12 }
0x2238   :  { %v5869_v43 = vpop.permute.xlu0 %5868 }
0x2239   :  { %10193 = vmatprep.subr.mxu0 %v5869_v43 }
0x223a   :  { %10194 = vmatpush3.msra.mxu0 %v5869_v43 }
0x223b   :  { %10198 = vmatprep.subr.msk.mxu0 %vm404_vm3, %v5962_v33 }
0x223c   :  { %v5956_v46 = vpop.permute.xlu0 %5955 }
0x223e   :  { %v10651_v56 = vpop.eup %10650 }
0x223f   :  { %v5867_v52 = vmul.f32 %v10651_v56, %v10647_v2 }
0x2242   :  { %v10653_v40 = vpop.eup %10652 }
0x2243   :  { %v5866_v42 = vmul.f32 %v10653_v40, %v10649_v57 }
0x2245   :  { %10195 = vmatprep.mubr.msk.f32.mxu0 %vm492_vm9, %v5866_v42 }
0x2246   :  { %10196 = vmatmul.mubr.msk.f32.vlgmr.msra.gmra.mxu0 %vm492_vm9, %v5867_v52 }
0x2247   :  { %10199 = vmatpush3.xpose.msk.msra.mxu0 %vm404_vm3, %v5962_v33  ;;  %10202 = vmatprep.mubr.msk.f32.mxu0 %vm404_vm3, %v5956_v46 }
0x2248   :  { %10200 = vmatprep.subr.msk.mxu0 %vm404_vm3, %v5960_v60 }
0x224b   :  { %10201 = vmatpush3.xpose.msk.msra.mxu0 %vm404_vm3, %v5960_v60 }
0x224e   :  { %10203 = vmatmul.mubr.msk.f32.vlgmr.msra.gmra.mxu0 %vm404_vm3, %v5958_v61 }
0x2306   :  { %v12012_v62 = vpop.f32.mrf.mxu0 }
0x2308   :  { %v12014_v34 = vpop.f32.mrf.mxu0 }
0x230e   :  { %v10204_v59 = vpop.f32.mrf.mxu0 }
0x230f   :  { %v6047_v50 = vmul.f32 0.35355338, %v10204_v59 }
0x2310   :  { %v6037_v38 = vpop.f32.mrf.mxu0 }
0x2311   :  { %v6049_v0 = vadd.f32 %v6047_v50, %v11216_v58  ;;  %v6046_v29 = vmul.f32 0.35355338, %v6037_v38 }
0x2313   :  { %v6048_v3 = vadd.f32 %v6046_v29, %v11206_v49  ;;  %v6053_v36 = vsel %vm492_vm9, %v6049_v0, -inf }
0x2314   :  { %6054 = vmax.xlane.f32.xlu1 %v6053_v36 }
0x2315   :  { %v6050_v4 = vsel %vm492_vm9, %v6048_v3, -inf }
0x2316   :  { %6051 = vmax.xlane.f32.xlu0 %v6050_v4 }
0x2325   :  { %6074 = vrot.lane.b32.xlu1 %v11928_v18, %s12592_s0 }
0x2329   :  { %6165 = vrot.lane.b32.xlu1 %v11928_v18, %s12593_s18 }
0x232d   :  { %6163 = vrot.lane.b32.xlu1 %v11934_v51, %s12593_s18 }
0x2331   :  { %6161 = vrot.lane.b32.xlu1 %v11928_v18, %s12594_s16 }
0x239d   :  { %v6055_v54 = vpop.xlane.xlu1 %6054 }
0x239e   :  { %v6057_v5 = vsub.f32 %v6049_v0, %v6055_v54 }
0x239f   :  { %v6052_v28 = vpop.xlane.xlu0 %6051 }
0x23a0   :  { %v6060_v44 = vmul.f32 1.442695, %v6057_v5  ;;  %v6056_v24 = vsub.f32 %v6048_v3, %v6052_v28  ;;  %v9326_v3 = vld [vmem:[%s10888_s8 + $0x38] sm:$0xff] }
0x23a1   :  { %v6075_v7 = vpop.permute.xlu1 %6074 }
0x23a2   :  { %10654 = vpow2.f32 %v6060_v44  ;;  %v6058_v9 = vmul.f32 1.442695, %v6056_v24  ;;  %10205 = vmatprep.subr.mxu1 %v6075_v7  ;;  %v9325_v24 = vld [vmem:[%s10888_s8 + $0x30] sm:$0xff] }
0x23a3   :  { %10206 = vmatpush3.msra.mxu1 %v6075_v7 }
0x23a4   :  { %10656 = vpow2.f32 %v6058_v9  ;;  %v9324_v9 = vld [vmem:[%s10888_s8 + $0x28] sm:$0xff] }
0x23a5   :  { %v6166_v19 = vpop.permute.xlu1 %6165 }
0x23a9   :  { %v6164_v6 = vpop.permute.xlu1 %6163 }
0x23ad   :  { %v6162_v57 = vpop.permute.xlu1 %6161 }
0x23af   :  { %v10655_v10 = vpop.eup %10654 }
0x23b0   :  { %v6065_v23 = vsel %vm492_vm9, %v10655_v10, 0.0 }
0x23b1   :  { %v10657_v11 = vpop.eup %10656  ;;  %6066 = vadd.xlane.f32.xlu0 %v6065_v23 }
0x23b2   :  { %v6062_v14 = vsel %vm492_vm9, %v10657_v11, 0.0 }
0x23b5   :  { %6063 = vadd.xlane.f32.xlu0 %v6062_v14 }
0x23cb   :  { %6072 = vrot.lane.b32.xlu0 %v11934_v51, %s12592_s0 }
0x23cf   :  { %6159 = vrot.lane.b32.xlu0 %v11934_v51, %s12594_s16 }
0x243a   :  { %v6067_v27 = vpop.xlane.xlu0 %6066 }
0x243b   :  { %10658 = vrcp.f32 %v6067_v27 }
0x243e   :  { %v6064_v30 = vpop.xlane.xlu0 %6063 }
0x243f   :  { %10660 = vrcp.f32 %v6064_v30 }
0x2442   :  { %v6073_v15 = vpop.permute.xlu0 %6072 }
0x2443   :  { %10207 = vmatprep.subr.mxu1 %v6073_v15 }
0x2444   :  { %10208 = vmatpush3.msra.mxu1 %v6073_v15 }
0x2445   :  { %10212 = vmatprep.subr.msk.mxu1 %vm404_vm3, %v6166_v19 }
0x2446   :  { %v6160_v2 = vpop.permute.xlu0 %6159 }
0x2448   :  { %v10659_v47 = vpop.eup %10658 }
0x2449   :  { %v6071_v37 = vmul.f32 %v10659_v47, %v10655_v10  ;;  %v9323_v10 = vld [vmem:[%s10888_s8 + $0x20] sm:$0xff]  ;;  %s12600_s8 = sld [smem:[#allocation17_spill]] }
0x244a   :  { %v9328_v47 = vld [vmem:[%s10893_s14 + $0x1] ss:$0 sm:$0xff]  ;;  %s12601_s14 = sld [smem:[#allocation20_spill]] }
0x244c   :  { %v10661_v20 = vpop.eup %10660 }
0x244d   :  { %v6070_v1 = vmul.f32 %v10661_v20, %v10657_v11 }
0x244f   :  { %10209 = vmatprep.mubr.msk.f32.mxu1 %vm492_vm9, %v6070_v1 }
0x2450   :  { %10210 = vmatmul.mubr.msk.f32.vlgmr.msra.gmra.mxu1 %vm492_vm9, %v6071_v37 }
0x2451   :  { %10213 = vmatpush3.xpose.msk.msra.mxu1 %vm404_vm3, %v6166_v19  ;;  %10216 = vmatprep.mubr.msk.f32.mxu1 %vm404_vm3, %v6160_v2 }
0x2452   :  { %10214 = vmatprep.subr.msk.mxu1 %vm404_vm3, %v6164_v6 }
0x2455   :  { %10215 = vmatpush3.xpose.msk.msra.mxu1 %vm404_vm3, %v6164_v6 }
0x2458   :  { %10217 = vmatmul.mubr.msk.f32.vlgmr.msra.gmra.mxu1 %vm404_vm3, %v6162_v57 }
0x2510   :  { %v10211_v25 = vpop.f32.mrf.mxu1 }
0x2512   :  { %v6150_v8 = vpop.f32.mrf.mxu1 }
0x2518   :  { %v10218_v12 = vpop.f32.mrf.mxu1 }
0x2519   :  { %v6251_v43 = vmul.f32 0.35355338, %v10218_v12 }
0x251a   :  { %v6241_v33 = vpop.f32.mrf.mxu1 }
0x251b   :  { %v6253_v56 = vadd.f32 %v6251_v43, %v11216_v58  ;;  %v6250_v40 = vmul.f32 0.35355338, %v6241_v33 }
0x251d   :  { %v6252_v42 = vadd.f32 %v6250_v40, %v11206_v49  ;;  %v6257_v52 = vsel %vm492_vm9, %v6253_v56, -inf }
0x251e   :  { %6258 = vmax.xlane.f32.xlu1 %v6257_v52 }
0x251f   :  { %v6254_v46 = vsel %vm492_vm9, %v6252_v42, -inf }
0x2520   :  { %6255 = vmax.xlane.f32.xlu0 %v6254_v46  ;;  %v10766_v46 = vld [vmem:[%s10872_s25] sm:$0xff] }
0x252f   :  { %6278 = vrot.lane.b32.xlu1 %v11928_v18, %s12595_s23 }
0x2533   :  { %5521 = vrot.lane.b32.xlu1 %v11914_v17, %s12573_s15 }
0x2537   :  { %5523 = vrot.lane.b32.xlu1 %v11912_v21, %s12573_s15 }
0x253b   :  { %5531 = vrot.lane.b32.xlu1 %v11916_v26, %s12574_s26 }
0x253f   :  { %5539 = vrot.lane.b32.xlu1 %v11952_v48, %s12575_s27 }
0x2543   :  { %6367 = vrot.lane.b32.xlu1 %v12012_v62, %s12573_s15 }
0x2547   :  { %6375 = vrot.lane.b32.xlu1 %v10211_v25, %s12574_s26 }
0x25a7   :  { %v6259_v49 = vpop.xlane.xlu1 %6258 }
0x25a8   :  { %v6261_v58 = vsub.f32 %v6253_v56, %v6259_v49 }
0x25a9   :  { %v6256_v18 = vpop.xlane.xlu0 %6255 }
0x25aa   :  { %v6264_v60 = vmul.f32 1.442695, %v6261_v58  ;;  %v6260_v61 = vsub.f32 %v6252_v42, %v6256_v18 }
0x25ab   :  { %v6279_v17 = vpop.permute.xlu1 %6278 }
0x25ac   :  { %10662 = vpow2.f32 %v6264_v60  ;;  %v6262_v59 = vmul.f32 1.442695, %v6260_v61  ;;  %10219 = vmatprep.subr.mxu0 %v6279_v17 }
0x25ad   :  { %10220 = vmatpush3.msra.mxu0 %v6279_v17 }
0x25ae   :  { %10664 = vpow2.f32 %v6262_v59 }
0x25af   :  { %v5522_v0 = vpop.permute.xlu1 %5521 }
0x25b0   :  { %v5543_v54 = vsel %vm404_vm3, %v11910_v53, %v5522_v0 }
0x25b9   :  { %v10663_v21 = vpop.eup %10662 }
0x25ba   :  { %v6269_v26 = vsel %vm492_vm9, %v10663_v21, 0.0 }
0x25bb   :  { %v10665_v48 = vpop.eup %10664  ;;  %6270 = vadd.xlane.f32.xlu0 %v6269_v26 }
0x25bc   :  { %v6266_v62 = vsel %vm492_vm9, %v10665_v48, 0.0 }
0x25bf   :  { %6267 = vadd.xlane.f32.xlu0 %v6266_v62 }
0x25d5   :  { %6276 = vrot.lane.b32.xlu0 %v11934_v51, %s12595_s23  ;;  %v5524_v51 = vpop.permute.xlu1 %5523 }
0x25d6   :  { %v5544_v23 = vsel %vm404_vm3, %v11908_v16, %v5524_v51 }
0x25d9   :  { %5529 = vrot.lane.b32.xlu0 %v11918_v55, %s12574_s26  ;;  %v5532_v5 = vpop.permute.xlu1 %5531 }
0x25da   :  { %v5546_v11 = vsel %vm492_vm9, %v5544_v23, %v5532_v5  ;;  %v9350_v5 = vld [vmem:[%s10908_s1 + $0x38] sm:$0xff]  ;;  %v9337_v23 = vld [vmem:[%s10898_s19 + $0x20] sm:$0xff] }
0x25dd   :  { %5537 = vrot.lane.b32.xlu0 %v11954_v22, %s12575_s27  ;;  %v5540_v53 = vpop.permute.xlu1 %5539 }
0x25de   :  { %v5548_v14 = vsel %vm1242_vm13, %v5546_v11, %v5540_v53  ;;  %v9338_v53 = vld [vmem:[%s10898_s19 + $0x28] sm:$0xff] }
0x25e1   :  { %6365 = vrot.lane.b32.xlu0 %v12014_v34, %s12573_s15  ;;  %v6368_v57 = vpop.permute.xlu1 %6367 }
0x25e5   :  { %6373 = vrot.lane.b32.xlu0 %v6150_v8, %s12574_s26  ;;  %v6376_v8 = vpop.permute.xlu1 %6375 }
0x2644   :  { %v6271_v50 = vpop.xlane.xlu0 %6270 }
0x2645   :  { %10666 = vrcp.f32 %v6271_v50 }
0x2648   :  { %v6268_v38 = vpop.xlane.xlu0 %6267 }
0x2649   :  { %10668 = vrcp.f32 %v6268_v38 }
0x264c   :  { %v6277_v29 = vpop.permute.xlu0 %6276 }
0x264d   :  { %10221 = vmatprep.subr.mxu0 %v6277_v29 }
0x264e   :  { %10222 = vmatpush3.msra.mxu0 %v6277_v29 }
0x264f   :  { %10226 = vmatprep.subr.mxu0 %v9326_v3 }
0x2650   :  { %v5530_v55 = vpop.permute.xlu0 %5529 }
0x2651   :  { %v5545_v44 = vsel %vm492_vm9, %v5543_v54, %v5530_v55 }
0x2652   :  { %v10667_v22 = vpop.eup %10666 }
0x2653   :  { %v6275_v28 = vmul.f32 %v10667_v22, %v10663_v21 }
0x2654   :  { %v5538_v34 = vpop.permute.xlu0 %5537 }
0x2655   :  { %v5547_v7 = vsel %vm1242_vm13, %v5545_v44, %v5538_v34  ;;  %v12115_v34 = vld [vmem:[%s10954_s30 + $0x1] ss:$0 sm:$0xff]  ;;  %v9348_v44 = vld [vmem:[%s10908_s1 + $0x28] sm:$0xff]  ;;  %s12605_s30 = sld [smem:[#allocation22_spill]] }
0x2656   :  { %v10669_v36 = vpop.eup %10668 }
0x2657   :  { %v6274_v4 = vmul.f32 %v10669_v36, %v10665_v48  ;;  %v12112_v36 = vld [vmem:[%s10949_s28 + $0x1] ss:$0 sm:$0xff]  ;;  %s12604_s28 = sld [smem:[#allocation21_spill]] }
0x2658   :  { %v6366_v25 = vpop.permute.xlu0 %6365 }
0x2659   :  { %10223 = vmatprep.mubr.msk.f32.mxu0 %vm492_vm9, %v6274_v4  ;;  %v6387_v43 = vsel %vm404_vm3, %v11984_v45, %v6366_v25 }
0x265a   :  { %10224 = vmatmul.mubr.msk.f32.vlgmr.msra.gmra.mxu0 %vm492_vm9, %v6275_v28  ;;  %v9349_v28 = vld [vmem:[%s10908_s1 + $0x30] sm:$0xff] }
0x265b   :  { %10227 = vmatpush3.msra.mxu0 %v9326_v3  ;;  %10234 = vmatprep.mubr.msk.f32.mxu0 %vm300_vm2, %v5547_v7  ;;  %v10767_v7 = vld [vmem:[%s10872_s25 + $0x8] sm:$0xff]  ;;  %s12599_s25 = sld [smem:[#allocation16_spill]] }
0x265c   :  { %10228 = vmatprep.subr.mxu0 %v9325_v24  ;;  %v6374_v12 = vpop.permute.xlu0 %6373 }
0x265d   :  { %10229 = vmatpush3.msra.mxu0 %v9325_v24  ;;  %v9347_v24 = vld [vmem:[%s10908_s1 + $0x20] sm:$0xff]  ;;  %s12603_s1 = sld [smem:[#allocation19_spill]] }
0x265e   :  { %10230 = vmatprep.subr.mxu0 %v9324_v9 }
0x265f   :  { %10231 = vmatpush3.msra.mxu0 %v9324_v9  ;;  %v9340_v9 = vld [vmem:[%s10898_s19 + $0x38] sm:$0xff] }
0x2660   :  { %10232 = vmatprep.subr.mxu0 %v9323_v10  ;;  %10240 = vmatprep.subr.mxu1 %v9340_v9 }
0x2661   :  { %10233 = vmatpush3.msra.mxu0 %v9323_v10  ;;  %10241 = vmatpush3.msra.mxu1 %v9340_v9  ;;  %v9339_v10 = vld [vmem:[%s10898_s19 + $0x30] sm:$0xff]  ;;  %s12602_s19 = sld [smem:[#allocation18_spill]] }
0x2662   :  { %10235 = vmatmul.mubr.msk.f32.vlgmr.msra.gmra.mxu0 %vm300_vm2, %v5548_v14  ;;  %10254 = vmatprep.subr.mxu0 %v9350_v5 }
0x2663   :  { %10255 = vmatpush3.msra.mxu0 %v9350_v5  ;;  %10242 = vmatprep.subr.mxu1 %v9339_v10 }
0x2664   :  { %10256 = vmatprep.subr.mxu0 %v9349_v28  ;;  %10243 = vmatpush3.msra.mxu1 %v9339_v10 }
0x2665   :  { %10257 = vmatpush3.msra.mxu0 %v9349_v28  ;;  %10244 = vmatprep.subr.mxu1 %v9338_v53 }
0x2666   :  { %10258 = vmatprep.subr.mxu0 %v9348_v44  ;;  %10245 = vmatpush3.msra.mxu1 %v9338_v53 }
0x2667   :  { %10259 = vmatpush3.msra.mxu0 %v9348_v44  ;;  %10246 = vmatprep.subr.mxu1 %v9337_v23 }
0x2668   :  { %10260 = vmatprep.subr.mxu0 %v9347_v24  ;;  %10247 = vmatpush3.msra.mxu1 %v9337_v23 }
0x2669   :  { %10261 = vmatpush3.msra.mxu0 %v9347_v24 }
0x271a   :  { %v10225_v27 = vpop.f32.mrf.mxu0 }
0x271b   :  { %6383 = vrot.lane.b32.xlu1 %v10225_v27, %s12575_s27 }
0x271c   :  { %v6354_v30 = vpop.f32.mrf.mxu0 }
0x271d   :  { %6381 = vrot.lane.b32.xlu0 %v6354_v30, %s12575_s27 }
0x2722   :  { %v10236_v15 = vpop.f32.mrf.mxu0 }
0x2723   :  { %v6490_v16 = vadd.f32 %v10236_v15, %v9328_v47 }
0x2724   :  { %v6484_v19 = vpop.f32.mrf.mxu0 }
0x2725   :  { %v6485_v20 = vadd.f32 %v9328_v47, %v6484_v19  ;;  %v6504_v37 = vadd.f32 %v6490_v16, %v11789_v32  ;;  %v6389_v32 = vsel %vm492_vm9, %v6387_v43, %v6374_v12 }
0x2727   :  { %v6503_v1 = vadd.f32 %v6485_v20, %v11787_v35  ;;  %v6514_v6 = vsel %vm300_vm2, %v6504_v37, 0.0  ;;  %v6388_v35 = vsel %vm404_vm3, %v11982_v31, %v6368_v57 }
0x2728   :  { %v6390_v40 = vsel %vm492_vm9, %v6388_v35, %v6376_v8 }
0x2729   :  { %v6511_v2 = vsel %vm300_vm2, %v6503_v1, 0.0 }
0x273c   :  { %6512 = vadd.xlane.f32.xlu0 %v6511_v2 }
0x273f   :  { %6515 = vadd.xlane.f32.xlu1 %v6514_v6 }
0x278d   :  { %v6384_v33 = vpop.permute.xlu1 %6383 }
0x278e   :  { %v6392_v52 = vsel %vm1242_vm13, %v6390_v40, %v6384_v33  ;;  %v9352_v33 = vld [vmem:[%s12576_s2 + $0x1] ss:$0 sm:$0xff] }
0x278f   :  { %v6382_v56 = vpop.permute.xlu0 %6381 }
0x2790   :  { %v6391_v42 = vsel %vm1242_vm13, %v6389_v32, %v6382_v56 }
0x2791   :  { %10237 = vmatprep.mubr.msk.f32.mxu0 %vm300_vm2, %v6391_v42 }
0x2792   :  { %10238 = vmatmul.mubr.msk.f32.gmra.mxu0 %vm300_vm2, %v6392_v52 }
0x2793   :  { %10262 = vmatprep.mubr.msk.f32.mxu0 %vm300_vm2, %v10766_v46 }
0x2796   :  { %10263 = vmatmul.mubr.msk.f32.vlgmr.msra.gmra.mxu0 %vm300_vm2, %v10767_v7 }
0x27c5   :  { %v6513_v45 = vpop.xlane.xlu0 %6512 }
0x27c6   :  { %v6523_v49 = vmul.f32 0.03125, %v6513_v45 }
0x27c8   :  { %v6527_v58 = vsub.f32 %v6503_v1, %v6523_v49  ;;  %v6516_v60 = vpop.xlane.xlu1 %6515 }
0x27c9   :  { %v6524_v59 = vmul.f32 0.03125, %v6516_v60 }
0x27ca   :  { %v6531_v31 = vmul.f32 %v6527_v58, %v6527_v58 }
0x27cb   :  { %v6528_v38 = vsub.f32 %v6504_v37, %v6524_v59 }
0x27cc   :  { %v6535_v18 = vsel %vm300_vm2, %v6531_v31, 0.0 }
0x27cd   :  { %6536 = vadd.xlane.f32.xlu1 %v6535_v18  ;;  %v6532_v51 = vmul.f32 %v6528_v38, %v6528_v38 }
0x27cf   :  { %v6538_v22 = vsel %vm300_vm2, %v6532_v51, 0.0 }
0x2852   :  { %v10239_v61 = vpop.f32.mrf.mxu0 }
0x2853   :  { %v6500_v21 = vadd.f32 %v10239_v61, %v9328_v47 }
0x2854   :  { %v6494_v17 = vpop.f32.mrf.mxu0 }
0x2855   :  { %v6495_v26 = vadd.f32 %v9328_v47, %v6494_v17  ;;  %v6506_v0 = vadd.f32 %v6500_v21, %v11828_v63 }
0x2856   :  { %v6537_v48 = vpop.xlane.xlu1 %6536  ;;  %v10264_v43 = vpop.f32.mrf.mxu0 }
0x2857   :  { %v6505_v62 = vadd.f32 %v6495_v26, %v11826_v41  ;;  %v6547_v50 = vmul.f32 0.03125, %v6537_v48  ;;  %v6520_v55 = vsel %vm300_vm2, %v6506_v0, 0.0  ;;  %v12142_v35 = vadd.f32 %v10264_v43, %v9352_v33  ;;  %v9342_v48 = vld [vmem:[%s12577_s7 + $0x1] ss:$0 sm:$0xff] }
0x2858   :  { %v6772_v32 = vpop.f32.mrf.mxu0 }
0x2859   :  { %v6551_v29 = vadd.f32 1e-05, %v6547_v50  ;;  %v6517_v3 = vsel %vm300_vm2, %v6505_v62, 0.0  ;;  %v12144_v56 = vadd.f32 %v9352_v33, %v6772_v32 }
0x285a   :  { %6518 = vadd.xlane.f32.xlu0 %v6517_v3 }
0x285b   :  { %10670 = vrsqrt.f32 %v6551_v29  ;;  %10265 = vmatprep.subr.msk.mxu1 %vm404_vm3, %v12144_v56 }
0x285e   :  { %6521 = vadd.xlane.f32.xlu0 %v6520_v55 }
0x2862   :  { %6539 = vadd.xlane.f32.xlu0 %v6538_v22 }
0x2868   :  { %v10671_v41 = vpop.eup %10670 }
0x2869   :  { %v6559_v63 = vmul.f32 %v10671_v41, %v6527_v58 }
0x286b   :  { %v6569_v4 = vmul.f32 %v12112_v36, %v6559_v63 }
0x286d   :  { %v12119_v54 = vadd.f32 %v12115_v34, %v6569_v4 }
0x286f   :  { %10248 = vmatprep.mubr.msk.f32.mxu1 %vm300_vm2, %v12119_v54 }
0x28e3   :  { %v6519_v11 = vpop.xlane.xlu0 %6518 }
0x28e4   :  { %v6525_v14 = vmul.f32 0.03125, %v6519_v11 }
0x28e6   :  { %v6529_v27 = vsub.f32 %v6505_v62, %v6525_v14 }
0x28e7   :  { %v6522_v30 = vpop.xlane.xlu0 %6521 }
0x28e8   :  { %v6526_v15 = vmul.f32 0.03125, %v6522_v30  ;;  %v6533_v19 = vmul.f32 %v6529_v27, %v6529_v27 }
0x28ea   :  { %v6530_v47 = vsub.f32 %v6506_v0, %v6526_v15  ;;  %v6541_v20 = vsel %vm300_vm2, %v6533_v19, 0.0 }
0x28eb   :  { %6542 = vadd.xlane.f32.xlu1 %v6541_v20  ;;  %v6540_v16 = vpop.xlane.xlu0 %6539 }
0x28ec   :  { %v6548_v1 = vmul.f32 0.03125, %v6540_v16  ;;  %v6534_v37 = vmul.f32 %v6530_v47, %v6530_v47 }
0x28ee   :  { %v6552_v2 = vadd.f32 1e-05, %v6548_v1  ;;  %v6544_v6 = vsel %vm300_vm2, %v6534_v37, 0.0 }
0x28ef   :  { %6545 = vadd.xlane.f32.xlu0 %v6544_v6 }
0x28f0   :  { %10672 = vrsqrt.f32 %v6552_v2 }
0x28fc   :  { %6979 = vrot.lane.b32.xlu1 %v12144_v56, %s12598_s21 }
0x28fd   :  { %v10673_v57 = vpop.eup %10672 }
0x28fe   :  { %v6560_v25 = vmul.f32 %v10673_v57, %v6528_v38 }
0x2900   :  { %v6570_v8 = vmul.f32 %v12112_v36, %v6560_v25  ;;  %7176 = vrot.lane.b32.xlu1 %v12144_v56, %s12589_s3 }
0x2902   :  { %v12137_v12 = vadd.f32 %v12115_v34, %v6570_v8 }
0x2904   :  { %10249 = vmatmul.mubr.msk.f32.vlgmr.msra.gmra.mxu1 %vm300_vm2, %v12137_v12 }
0x2905   :  { %7373 = vrot.lane.b32.xlu0 %v12144_v56, %s12594_s16  ;;  %10266 = vmatpush3.xpose.msk.msra.mxu1 %vm404_vm3, %v12144_v56 }
0x2974   :  { %v6543_v40 = vpop.xlane.xlu1 %6542 }
0x2975   :  { %v6549_v42 = vmul.f32 0.03125, %v6543_v40 }
0x2977   :  { %v6553_v52 = vadd.f32 1e-05, %v6549_v42 }
0x2978   :  { %v6546_v46 = vpop.xlane.xlu0 %6545  ;;  %v6980_v26 = vpop.permute.xlu1 %6979 }
0x2979   :  { %10674 = vrsqrt.f32 %v6553_v52  ;;  %v6550_v45 = vmul.f32 0.03125, %v6546_v46  ;;  %10275 = vmatprep.subr.msk.mxu1 %vm404_vm3, %v6980_v26 }
0x297b   :  { %v6554_v49 = vadd.f32 1e-05, %v6550_v45 }
0x297c   :  { %v7177_v29 = vpop.permute.xlu1 %7176  ;;  %v7374_v3 = vpop.permute.xlu0 %7373 }
0x297d   :  { %10676 = vrsqrt.f32 %v6554_v49 }
0x2986   :  { %v10675_v58 = vpop.eup %10674 }
0x2987   :  { %v6561_v31 = vmul.f32 %v10675_v58, %v6529_v27 }
0x2989   :  { %v6571_v18 = vmul.f32 %v12112_v36, %v6561_v31 }
0x298a   :  { %v10677_v60 = vpop.eup %10676 }
0x298b   :  { %v12158_v61 = vadd.f32 %v12115_v34, %v6571_v18  ;;  %v6562_v17 = vmul.f32 %v10677_v60, %v6530_v47 }
0x298d   :  { %10251 = vmatprep.mubr.msk.f32.mxu1 %vm300_vm2, %v12158_v61  ;;  %v6572_v59 = vmul.f32 %v12112_v36, %v6562_v17 }
0x298f   :  { %v12164_v21 = vadd.f32 %v12115_v34, %v6572_v59 }
0x2991   :  { %10252 = vmatmul.mubr.msk.f32.gmra.mxu1 %vm300_vm2, %v12164_v21 }
0x29c4   :  { %v10250_v62 = vpop.f32.mrf.mxu1 }
0x29c5   :  { %v6680_v50 = vadd.f32 %v10250_v62, %v9342_v48 }
0x29c6   :  { %v6674_v38 = vpop.f32.mrf.mxu1 }
0x29c7   :  { %v6675_v0 = vadd.f32 %v9342_v48, %v6674_v38  ;;  %6977 = vrot.lane.b32.xlu1 %v6680_v50, %s12598_s21 }
0x29c9   :  { %6975 = vrot.lane.b32.xlu0 %v6675_v0, %s12598_s21  ;;  %10267 = vmatprep.mubr.msk.f32.mxu1 %vm404_vm3, %v6675_v0 }
0x29ca   :  { %10268 = vmatmul.mubr.msk.f32.vlgmr.msra.gmra.mxu1 %vm404_vm3, %v6680_v50 }
0x29cb   :  { %7174 = vrot.lane.b32.xlu1 %v6680_v50, %s12589_s3  ;;  %10276 = vmatpush3.xpose.msk.msra.mxu1 %vm404_vm3, %v6980_v26 }
0x29cc   :  { %10285 = vmatprep.subr.msk.mxu1 %vm404_vm3, %v7177_v29 }
0x29cd   :  { %7172 = vrot.lane.b32.xlu0 %v6675_v0, %s12589_s3 }
0x29cf   :  { %7369 = vrot.lane.b32.xlu1 %v6675_v0, %s12594_s16 }
0x29d1   :  { %7371 = vrot.lane.b32.xlu0 %v6680_v50, %s12594_s16 }
0x29d3   :  { %7794 = vrot.lane.b32.xlu1 %v12142_v35, %s12598_s21 }
0x29d5   :  { %7991 = vrot.lane.b32.xlu0 %v12142_v35, %s12589_s3 }
0x2a39   :  { %v6978_v55 = vpop.permute.xlu1 %6977 }
0x2a3b   :  { %v6976_v51 = vpop.permute.xlu0 %6975 }
0x2a3c   :  { %10277 = vmatprep.mubr.msk.f32.mxu1 %vm404_vm3, %v6976_v51 }
0x2a3d   :  { %v7175_v22 = vpop.permute.xlu1 %7174  ;;  %10278 = vmatmul.mubr.msk.f32.vlgmr.msra.gmra.mxu1 %vm404_vm3, %v6978_v55 }
0x2a3e   :  { %10286 = vmatpush3.xpose.msk.msra.mxu1 %vm404_vm3, %v7177_v29 }
0x2a3f   :  { %10295 = vmatprep.subr.msk.mxu1 %vm404_vm3, %v7374_v3  ;;  %v7173_v41 = vpop.permute.xlu0 %7172 }
0x2a40   :  { %10287 = vmatprep.mubr.msk.f32.mxu1 %vm404_vm3, %v7173_v41 }
0x2a41   :  { %v7370_v36 = vpop.permute.xlu1 %7369  ;;  %10288 = vmatmul.mubr.msk.f32.vlgmr.msra.gmra.mxu1 %vm404_vm3, %v7175_v22 }
0x2a42   :  { %10296 = vmatpush3.xpose.msk.msra.mxu1 %vm404_vm3, %v7374_v3  ;;  %10297 = vmatprep.mubr.msk.f32.mxu1 %vm404_vm3, %v7370_v36 }
0x2a43   :  { %10305 = vmatprep.subr.msk.mxu1 %vm404_vm3, %v12142_v35  ;;  %v7372_v63 = vpop.permute.xlu0 %7371 }
0x2a45   :  { %v7795_v34 = vpop.permute.xlu1 %7794  ;;  %10298 = vmatmul.mubr.msk.f32.vlgmr.msra.gmra.mxu1 %vm404_vm3, %v7372_v63 }
0x2a46   :  { %10306 = vmatpush3.xpose.msk.msra.mxu1 %vm404_vm3, %v12142_v35 }
0x2a47   :  { %10315 = vmatprep.subr.msk.mxu1 %vm404_vm3, %v7795_v34  ;;  %v7992_v24 = vpop.permute.xlu0 %7991 }
0x2a51   :  { %v10253_v4 = vpop.f32.mrf.mxu1 }
0x2a52   :  { %v6690_v5 = vadd.f32 %v10253_v4, %v9342_v48 }
0x2a53   :  { %v6684_v28 = vpop.f32.mrf.mxu1 }
0x2a54   :  { %v6685_v44 = vadd.f32 %v9342_v48, %v6684_v28  ;;  %7792 = vrot.lane.b32.xlu1 %v6690_v5, %s12598_s21 }
0x2a56   :  { %7790 = vrot.lane.b32.xlu0 %v6685_v44, %s12598_s21  ;;  %10307 = vmatprep.mubr.msk.f32.mxu1 %vm404_vm3, %v6685_v44 }
0x2a57   :  { %10308 = vmatmul.mubr.msk.f32.vlgmr.msra.gmra.mxu1 %vm404_vm3, %v6690_v5 }
0x2a58   :  { %10316 = vmatpush3.xpose.msk.msra.mxu1 %vm404_vm3, %v7795_v34  ;;  %7987 = vrot.lane.b32.xlu1 %v6685_v44, %s12589_s3 }
0x2a59   :  { %10325 = vmatprep.subr.msk.mxu1 %vm404_vm3, %v7992_v24 }
0x2a5a   :  { %7989 = vrot.lane.b32.xlu0 %v6690_v5, %s12589_s3 }
0x2a5c   :  { %8188 = vrot.lane.b32.xlu1 %v12142_v35, %s12594_s16 }
0x2a5e   :  { %8184 = vrot.lane.b32.xlu0 %v6685_v44, %s12594_s16 }
0x2a60   :  { %8186 = vrot.lane.b32.xlu1 %v6690_v5, %s12594_s16 }
0x2a8a   :  { %v10269_v7 = vpop.f32.mrf.mxu1 }
0x2a8b   :  { %v6866_v9 = vmul.f32 0.35355338, %v10269_v7 }
0x2a8c   :  { %v6856_v10 = vpop.f32.mrf.mxu1 }
0x2a8d   :  { %v6868_v53 = vadd.f32 %v6866_v9, %v11485_v13  ;;  %v6865_v23 = vmul.f32 0.35355338, %v6856_v10 }
0x2a8f   :  { %v6867_v11 = vadd.f32 %v6865_v23, %v11485_v13  ;;  %v6872_v14 = vsel %vm404_vm3, %v6868_v53, -inf }
0x2a90   :  { %6873 = vmax.xlane.f32.xlu1 %v6872_v14 }
0x2a91   :  { %v6869_v27 = vsel %vm404_vm3, %v6867_v11, -inf }
0x2a92   :  { %6870 = vmax.xlane.f32.xlu0 %v6869_v27 }
0x2ac6   :  { %v7793_v30 = vpop.permute.xlu1 %7792 }
0x2ac8   :  { %v7791_v15 = vpop.permute.xlu0 %7790 }
0x2ac9   :  { %10317 = vmatprep.mubr.msk.f32.mxu1 %vm404_vm3, %v7791_v15 }
0x2aca   :  { %v7988_v19 = vpop.permute.xlu1 %7987  ;;  %10318 = vmatmul.mubr.msk.f32.vlgmr.msra.gmra.mxu1 %vm404_vm3, %v7793_v30 }
0x2acb   :  { %10326 = vmatpush3.xpose.msk.msra.mxu1 %vm404_vm3, %v7992_v24  ;;  %10327 = vmatprep.mubr.msk.f32.mxu1 %vm404_vm3, %v7988_v19 }
0x2acc   :  { %v7990_v47 = vpop.permute.xlu0 %7989 }
0x2ace   :  { %v8189_v20 = vpop.permute.xlu1 %8188  ;;  %10328 = vmatmul.mubr.msk.f32.vlgmr.msra.gmra.mxu1 %vm404_vm3, %v7990_v47 }
0x2acf   :  { %10335 = vmatprep.subr.msk.mxu1 %vm404_vm3, %v8189_v20 }
0x2ad0   :  { %10336 = vmatpush3.xpose.msk.msra.mxu1 %vm404_vm3, %v8189_v20  ;;  %v8185_v16 = vpop.permute.xlu0 %8184 }
0x2ad1   :  { %10337 = vmatprep.mubr.msk.f32.mxu1 %vm404_vm3, %v8185_v16 }
0x2ad2   :  { %v8187_v1 = vpop.permute.xlu1 %8186 }
0x2ad3   :  { %10338 = vmatmul.mubr.msk.f32.vlgmr.msra.gmra.mxu1 %vm404_vm3, %v8187_v1 }
0x2afd   :  { %v10279_v37 = vpop.f32.mrf.mxu1 }
0x2afe   :  { %v7063_v2 = vmul.f32 0.35355338, %v10279_v37 }
0x2aff   :  { %v7053_v6 = vpop.f32.mrf.mxu1 }
0x2b00   :  { %v7065_v57 = vadd.f32 %v7063_v2, %v11485_v13  ;;  %v7062_v25 = vmul.f32 0.35355338, %v7053_v6 }
0x2b01   :  { %v10289_v8 = vpop.f32.mrf.mxu1 }
0x2b02   :  { %v7064_v43 = vadd.f32 %v7062_v25, %v11485_v13  ;;  %v7260_v33 = vmul.f32 0.35355338, %v10289_v8  ;;  %v7069_v32 = vsel %vm404_vm3, %v7065_v57, -inf }
0x2b03   :  { %7070 = vmax.xlane.f32.xlu0 %v7069_v32  ;;  %v7250_v40 = vpop.f32.mrf.mxu1 }
0x2b04   :  { %v7259_v42 = vmul.f32 0.35355338, %v7250_v40  ;;  %v7262_v46 = vadd.f32 %v7260_v33, %v11485_v13  ;;  %v7066_v58 = vsel %vm404_vm3, %v7064_v43, -inf }
0x2b05   :  { %v10299_v52 = vpop.f32.mrf.mxu1 }
0x2b06   :  { %v12228_v45 = vadd.f32 %v7259_v42, %v11485_v13  ;;  %v7457_v49 = vmul.f32 0.35355338, %v10299_v52  ;;  %v7266_v26 = vsel %vm404_vm3, %v7262_v46, -inf }
0x2b07   :  { %7067 = vmax.xlane.f32.xlu0 %v7066_v58  ;;  %v7447_v31 = vpop.f32.mrf.mxu1 }
0x2b08   :  { %v7456_v18 = vmul.f32 0.35355338, %v7447_v31  ;;  %v7263_v60 = vsel %vm404_vm3, %v12228_v45, -inf  ;;  %v7459_v17 = vadd.f32 %v7457_v49, %v11485_v13 }
0x2b09   :  { %7264 = vmax.xlane.f32.xlu1 %v7263_v60 }
0x2b0a   :  { %v12235_v59 = vadd.f32 %v7456_v18, %v11485_v13  ;;  %v7463_v62 = vsel %vm404_vm3, %v7459_v17, -inf }
0x2b0b   :  { %7267 = vmax.xlane.f32.xlu0 %v7266_v26 }
0x2b0c   :  { %v7460_v48 = vsel %vm404_vm3, %v12235_v59, -inf }
0x2b0d   :  { %7461 = vmax.xlane.f32.xlu1 %v7460_v48 }
0x2b0f   :  { %7464 = vmax.xlane.f32.xlu0 %v7463_v62 }
0x2b17   :  { %v10309_v13 = vpop.f32.mrf.mxu1 }
0x2b18   :  { %v7681_v51 = vmul.f32 0.35355338, %v10309_v13 }
0x2b19   :  { %v6874_v50 = vpop.xlane.xlu1 %6873  ;;  %v7671_v5 = vpop.f32.mrf.mxu1 }
0x2b1a   :  { %v6876_v38 = vsub.f32 %v6868_v53, %v6874_v50  ;;  %v12244_v41 = vadd.f32 %v7681_v51, %v11556_v39  ;;  %v7680_v52 = vmul.f32 0.35355338, %v7671_v5 }
0x2b1b   :  { %v6871_v0 = vpop.xlane.xlu0 %6870 }
0x2b1c   :  { %v6879_v29 = vmul.f32 1.442695, %v6876_v38  ;;  %v6875_v3 = vsub.f32 %v6867_v11, %v6871_v0  ;;  %v7687_v4 = vsel %vm404_vm3, %v12244_v41, -inf  ;;  %v12277_v18 = vadd.f32 %v7680_v52, %v11556_v39 }
0x2b1e   :  { %10678 = vpow2.f32 %v6879_v29  ;;  %v6877_v55 = vmul.f32 1.442695, %v6875_v3  ;;  %v7684_v48 = vsel %vm404_vm3, %v12277_v18, -inf }
0x2b20   :  { %10680 = vpow2.f32 %v6877_v55 }
0x2b2b   :  { %v12241_v22 = vpop.eup %10678 }
0x2b2c   :  { %v6884_v36 = vsel %vm404_vm3, %v12241_v22, 0.0 }
0x2b2d   :  { %v12248_v63 = vpop.eup %10680  ;;  %6885 = vadd.xlane.f32.xlu0 %v6884_v36 }
0x2b2e   :  { %v6881_v34 = vsel %vm404_vm3, %v12248_v63, 0.0 }
0x2b2f   :  { %6882 = vadd.xlane.f32.xlu1 %v6881_v34 }
0x2b31   :  { %7688 = vmax.xlane.f32.xlu0 %v7687_v4 }
0x2b8a   :  { %v10319_v28 = vpop.f32.mrf.mxu1 }
0x2b8b   :  { %v7878_v44 = vmul.f32 0.35355338, %v10319_v28 }
0x2b8c   :  { %v7868_v24 = vpop.f32.mrf.mxu1  ;;  %v7071_v7 = vpop.xlane.xlu0 %7070 }
0x2b8d   :  { %v12255_v9 = vadd.f32 %v7878_v44, %v11556_v39  ;;  %v7073_v10 = vsub.f32 %v7065_v57, %v7071_v7  ;;  %v7877_v60 = vmul.f32 0.35355338, %v7868_v24 }
0x2b8e   :  { %v10329_v53 = vpop.f32.mrf.mxu1 }
0x2b8f   :  { %v7076_v23 = vmul.f32 1.442695, %v7073_v10  ;;  %v8075_v11 = vmul.f32 0.35355338, %v10329_v53  ;;  %v7884_v14 = vsel %vm404_vm3, %v12255_v9, -inf  ;;  %v12287_v62 = vadd.f32 %v7877_v60, %v11556_v39 }
0x2b90   :  { %7885 = vmax.xlane.f32.xlu0 %v7884_v14  ;;  %v8065_v27 = vpop.f32.mrf.mxu1  ;;  %v7068_v30 = vpop.xlane.xlu0 %7067 }
0x2b91   :  { %10682 = vpow2.f32 %v7076_v23  ;;  %v12260_v15 = vadd.f32 %v8075_v11, %v11556_v39  ;;  %v7072_v19 = vsub.f32 %v7064_v43, %v7068_v30  ;;  %v8074_v50 = vmul.f32 0.35355338, %v8065_v27 }
0x2b92   :  { %v7265_v25 = vpop.xlane.xlu1 %7264  ;;  %v7881_v3 = vsel %vm404_vm3, %v12287_v62, -inf }
0x2b93   :  { %v7074_v47 = vmul.f32 1.442695, %v7072_v19  ;;  %v10339_v20 = vpop.f32.mrf.mxu1  ;;  %v8081_v16 = vsel %vm404_vm3, %v12260_v15, -inf  ;;  %v7269_v32 = vsub.f32 %v12228_v45, %v7265_v25  ;;  %v12294_v29 = vadd.f32 %v8074_v50, %v11556_v39 }
0x2b94   :  { %v8272_v1 = vmul.f32 0.35355338, %v10339_v20  ;;  %8082 = vmax.xlane.f32.xlu0 %v8081_v16  ;;  %v7268_v37 = vpop.xlane.xlu0 %7267 }
0x2b95   :  { %10684 = vpow2.f32 %v7074_v47  ;;  %v7270_v2 = vsub.f32 %v7262_v46, %v7268_v37  ;;  %v7271_v46 = vmul.f32 1.442695, %v7269_v32  ;;  %v8262_v13 = vpop.f32.mrf.mxu1  ;;  %v8078_v36 = vsel %vm404_vm3, %v12294_v29, -inf }
0x2b96   :  { %v12265_v6 = vadd.f32 %v8272_v1, %v11556_v39  ;;  %v7462_v58 = vpop.xlane.xlu1 %7461  ;;  %v8271_v51 = vmul.f32 0.35355338, %v8262_v13 }
0x2b97   :  { %v7273_v57 = vmul.f32 1.442695, %v7270_v2  ;;  %v7466_v45 = vsub.f32 %v12235_v59, %v7462_v58 }
0x2b98   :  { %v7465_v8 = vpop.xlane.xlu0 %7464  ;;  %v8278_v33 = vsel %vm404_vm3, %v12265_v6, -inf  ;;  %v12305_v4 = vadd.f32 %v8271_v51, %v11556_v39 }
0x2b99   :  { %10686 = vpow2.f32 %v7273_v57  ;;  %v7467_v43 = vsub.f32 %v7459_v17, %v7465_v8  ;;  %8279 = vmax.xlane.f32.xlu0 %v8278_v33  ;;  %v7468_v38 = vmul.f32 1.442695, %v7466_v45 }
0x2b9a   :  { %v8275_v28 = vsel %vm404_vm3, %v12305_v4, -inf }
0x2b9b   :  { %v7470_v40 = vmul.f32 1.442695, %v7467_v43 }
0x2b9d   :  { %10688 = vpow2.f32 %v7470_v40 }
0x2b9e   :  { %v12270_v42 = vpop.eup %10682  ;;  %10690 = vpow2.f32 %v7271_v46 }
0x2b9f   :  { %v7081_v49 = vsel %vm404_vm3, %v12270_v42, 0.0  ;;  %10692 = vpow2.f32 %v7468_v38 }
0x2ba0   :  { %7082 = vadd.xlane.f32.xlu0 %v7081_v49 }
0x2ba2   :  { %v12274_v31 = vpop.eup %10684 }
0x2ba3   :  { %v7078_v17 = vsel %vm404_vm3, %v12274_v31, 0.0 }
0x2ba4   :  { %7079 = vadd.xlane.f32.xlu1 %v7078_v17 }
0x2ba6   :  { %v12282_v26 = vpop.eup %10686 }
0x2ba7   :  { %v7278_v0 = vsel %vm404_vm3, %v12282_v26, 0.0 }
0x2ba8   :  { %7685 = vmax.xlane.f32.xlu1 %v7684_v48  ;;  %7279 = vadd.xlane.f32.xlu0 %v7278_v0 }
0x2baa   :  { %v12291_v59 = vpop.eup %10688 }
0x2bab   :  { %v7475_v55 = vsel %vm404_vm3, %v12291_v59, 0.0  ;;  %v12302_v34 = vpop.eup %10690 }
0x2bac   :  { %7882 = vmax.xlane.f32.xlu1 %v7881_v3  ;;  %7476 = vadd.xlane.f32.xlu0 %v7475_v55  ;;  %v7275_v5 = vsel %vm404_vm3, %v12302_v34, 0.0  ;;  %v12311_v44 = vpop.eup %10692 }
0x2bad   :  { %v7472_v7 = vsel %vm404_vm3, %v12311_v44, 0.0 }
0x2bb0   :  { %8079 = vmax.xlane.f32.xlu1 %v8078_v36 }
0x2bb4   :  { %7276 = vadd.xlane.f32.xlu1 %v7275_v5 }
0x2bb6   :  { %v6886_v10 = vpop.xlane.xlu0 %6885 }
0x2bb8   :  { %v6883_v24 = vpop.xlane.xlu1 %6882  ;;  %8276 = vmax.xlane.f32.xlu1 %v8275_v28 }
0x2bb9   :  { %10694 = vrcp.f32 %v6883_v24 }
0x2bba   :  { %v7689_v39 = vpop.xlane.xlu0 %7688 }
0x2bbb   :  { %v7691_v11 = vsub.f32 %v12244_v41, %v7689_v39 }
0x2bbc   :  { %7473 = vadd.xlane.f32.xlu1 %v7472_v7 }
0x2bbd   :  { %v7694_v14 = vmul.f32 1.442695, %v7691_v11 }
0x2bbf   :  { %10696 = vpow2.f32 %v7694_v14 }
0x2bc2   :  { %7088 = vrot.lane.b32.xlu0 %v12144_v56, %s12597_s17 }
0x2bc6   :  { %v10695_v53 = vpop.eup %10694 }
0x2bc7   :  { %v6889_v23 = vmul.f32 %v10695_v53, %v12248_v63 }
0x2bc9   :  { %10272 = vmatprep.mubr.msk.f32.mxu0 %vm404_vm3, %v6889_v23 }
0x2bcc   :  { %v12328_v27 = vpop.eup %10696 }
0x2bcd   :  { %6891 = vrot.lane.b32.xlu1 %v12144_v56, %s12596_s4  ;;  %v7699_v41 = vsel %vm404_vm3, %v12328_v27, 0.0 }
0x2bd1   :  { %7285 = vrot.lane.b32.xlu1 %v12144_v56, %s12588_s29 }
0x2bd5   :  { %7482 = vrot.lane.b32.xlu1 %v12144_v56, %s12593_s18 }
0x2bd9   :  { %7706 = vrot.lane.b32.xlu1 %v12142_v35, %s12596_s4 }
0x2bdd   :  { %7903 = vrot.lane.b32.xlu1 %v12142_v35, %s12597_s17 }
0x2be1   :  { %7700 = vadd.xlane.f32.xlu0 %v7699_v41 }
0x2c19   :  { %v7886_v63 = vpop.xlane.xlu0 %7885 }
0x2c1a   :  { %v7888_v30 = vsub.f32 %v12255_v9, %v7886_v63 }
0x2c1c   :  { %v7891_v19 = vmul.f32 1.442695, %v7888_v30 }
0x2c1d   :  { %v8083_v47 = vpop.xlane.xlu0 %8082 }
0x2c1e   :  { %10698 = vpow2.f32 %v7891_v19  ;;  %v8085_v56 = vsub.f32 %v12260_v15, %v8083_v47 }
0x2c20   :  { %v8088_v20 = vmul.f32 1.442695, %v8085_v56 }
0x2c22   :  { %10700 = vpow2.f32 %v8088_v20  ;;  %v8280_v16 = vpop.xlane.xlu0 %8279 }
0x2c23   :  { %v8282_v1 = vsub.f32 %v12265_v6, %v8280_v16 }
0x2c25   :  { %v8285_v37 = vmul.f32 1.442695, %v8282_v1 }
0x2c27   :  { %10702 = vpow2.f32 %v8285_v37 }
0x2c29   :  { %v7083_v46 = vpop.xlane.xlu0 %7082 }
0x2c2b   :  { %v12337_v2 = vpop.eup %10698 }
0x2c2c   :  { %v7896_v57 = vsel %vm404_vm3, %v12337_v2, 0.0 }
0x2c2d   :  { %v7080_v25 = vpop.xlane.xlu1 %7079  ;;  %7897 = vadd.xlane.f32.xlu0 %v7896_v57 }
0x2c2f   :  { %v12341_v9 = vpop.eup %10700 }
0x2c30   :  { %v8093_v8 = vsel %vm404_vm3, %v12341_v9, 0.0 }
0x2c31   :  { %v7686_v15 = vpop.xlane.xlu1 %7685  ;;  %8094 = vadd.xlane.f32.xlu0 %v8093_v8 }
0x2c32   :  { %v7690_v33 = vsub.f32 %v12277_v18, %v7686_v15  ;;  %v7280_v18 = vpop.xlane.xlu0 %7279 }
0x2c34   :  { %v12346_v43 = vpop.eup %10702  ;;  %v7692_v6 = vmul.f32 1.442695, %v7690_v33 }
0x2c35   :  { %v7883_v32 = vpop.xlane.xlu1 %7882  ;;  %v8290_v40 = vsel %vm404_vm3, %v12346_v43, 0.0 }
0x2c36   :  { %10704 = vpow2.f32 %v7692_v6  ;;  %v7887_v52 = vsub.f32 %v12287_v62, %v7883_v32  ;;  %8291 = vadd.xlane.f32.xlu0 %v8290_v40  ;;  %v7477_v50 = vpop.xlane.xlu0 %7476 }
0x2c37   :  { %10706 = vrcp.f32 %v6886_v10 }
0x2c38   :  { %v7889_v49 = vmul.f32 1.442695, %v7887_v52 }
0x2c39   :  { %v8080_v58 = vpop.xlane.xlu1 %8079 }
0x2c3a   :  { %10708 = vpow2.f32 %v7889_v49  ;;  %v8084_v60 = vsub.f32 %v12294_v29, %v8080_v58  ;;  %v7089_v7 = vpop.permute.xlu0 %7088 }
0x2c3b   :  { %10710 = vrcp.f32 %v7080_v25 }
0x2c3c   :  { %v8086_v45 = vmul.f32 1.442695, %v8084_v60  ;;  %10712 = vrcp.f32 %v7083_v46 }
0x2c3d   :  { %v7277_v17 = vpop.xlane.xlu1 %7276 }
0x2c3e   :  { %10714 = vpow2.f32 %v8086_v45 }
0x2c3f   :  { %10716 = vrcp.f32 %v7277_v17 }
0x2c40   :  { %10718 = vrcp.f32 %v7280_v18 }
0x2c41   :  { %v8277_v48 = vpop.xlane.xlu1 %8276  ;;  %10720 = vrcp.f32 %v7477_v50  ;;  %v9398_v50 = vld [vmem:[%s12578_s24 + $0x38] sm:$0xff] }
0x2c42   :  { %v8281_v62 = vsub.f32 %v12305_v4, %v8277_v48  ;;  %10345 = vmatprep.subr.mxu1 %v9398_v50 }
0x2c43   :  { %v12353_v38 = vpop.eup %10704  ;;  %10346 = vmatpush3.msra.mxu1 %v9398_v50 }
0x2c44   :  { %v8283_v0 = vmul.f32 1.442695, %v8281_v62  ;;  %v7696_v3 = vsel %vm404_vm3, %v12353_v38, 0.0  ;;  %v10707_v55 = vpop.eup %10706 }
0x2c45   :  { %7697 = vadd.xlane.f32.xlu1 %v7696_v3  ;;  %v7474_v29 = vpop.xlane.xlu1 %7473  ;;  %v6890_v28 = vmul.f32 %v10707_v55, %v12241_v22  ;;  %v9395_v3 = vld [vmem:[%s12578_s24 + $0x20] sm:$0xff] }
0x2c46   :  { %10722 = vpow2.f32 %v8283_v0 }
0x2c47   :  { %v12357_v13 = vpop.eup %10708  ;;  %10724 = vrcp.f32 %v7474_v29 }
0x2c48   :  { %v7893_v51 = vsel %vm404_vm3, %v12357_v13, 0.0  ;;  %v10711_v36 = vpop.eup %10710 }
0x2c49   :  { %7894 = vadd.xlane.f32.xlu1 %v7893_v51  ;;  %v6892_v4 = vpop.permute.xlu1 %6891  ;;  %v10713_v5 = vpop.eup %10712  ;;  %v7086_v53 = vmul.f32 %v10711_v36, %v12274_v31 }
0x2c4a   :  { %10270 = vmatprep.subr.mxu0 %v6892_v4  ;;  %v7087_v22 = vmul.f32 %v10713_v5, %v12270_v42 }
0x2c4b   :  { %v12362_v24 = vpop.eup %10714  ;;  %10271 = vmatpush3.msra.mxu0 %v6892_v4 }
0x2c4c   :  { %v10717_v10 = vpop.eup %10716  ;;  %10273 = vmatmul.mubr.msk.f32.vlgmr.msra.gmra.mxu0 %vm404_vm3, %v6890_v28  ;;  %10280 = vmatprep.subr.mxu0 %v7089_v7  ;;  %v8090_v39 = vsel %vm404_vm3, %v12362_v24, 0.0 }
0x2c4d   :  { %8091 = vadd.xlane.f32.xlu1 %v8090_v39  ;;  %v7286_v23 = vpop.permute.xlu1 %7285  ;;  %10281 = vmatpush3.msra.mxu0 %v7089_v7  ;;  %v10719_v11 = vpop.eup %10718  ;;  %v7283_v14 = vmul.f32 %v10717_v10, %v12302_v34 }
0x2c4e   :  { %10282 = vmatprep.mubr.msk.f32.mxu0 %vm404_vm3, %v7086_v53  ;;  %10290 = vmatprep.subr.mxu0 %v7286_v23  ;;  %v10721_v63 = vpop.eup %10720  ;;  %v7284_v31 = vmul.f32 %v10719_v11, %v12282_v26 }
0x2c4f   :  { %v7481_v56 = vmul.f32 %v10721_v63, %v12291_v59 }
0x2c50   :  { %10283 = vmatmul.mubr.msk.f32.vlgmr.msra.gmra.mxu0 %vm404_vm3, %v7087_v22 }
0x2c51   :  { %10291 = vmatpush3.msra.mxu0 %v7286_v23  ;;  %v7483_v41 = vpop.permute.xlu1 %7482  ;;  %10292 = vmatprep.mubr.msk.f32.mxu0 %vm404_vm3, %v7283_v14 }
0x2c52   :  { %10300 = vmatprep.subr.mxu0 %v7483_v41 }
0x2c53   :  { %v10723_v30 = vpop.eup %10722 }
0x2c54   :  { %v10725_v19 = vpop.eup %10724  ;;  %10293 = vmatmul.mubr.msk.f32.vlgmr.msra.gmra.mxu0 %vm404_vm3, %v7284_v31  ;;  %v8287_v47 = vsel %vm404_vm3, %v10723_v30, 0.0 }
0x2c55   :  { %10301 = vmatpush3.msra.mxu0 %v7483_v41  ;;  %v7707_v42 = vpop.permute.xlu1 %7706  ;;  %8288 = vadd.xlane.f32.xlu0 %v8287_v47  ;;  %v7480_v34 = vmul.f32 %v10725_v19, %v12311_v44 }
0x2c56   :  { %10310 = vmatprep.subr.mxu0 %v7707_v42 }
0x2c57   :  { %10302 = vmatprep.mubr.msk.f32.mxu0 %vm404_vm3, %v7480_v34 }
0x2c58   :  { %10303 = vmatmul.mubr.msk.f32.vlgmr.msra.gmra.mxu0 %vm404_vm3, %v7481_v56 }
0x2c59   :  { %10311 = vmatpush3.msra.mxu0 %v7707_v42  ;;  %v7904_v26 = vpop.permute.xlu1 %7903 }
0x2c5a   :  { %10320 = vmatprep.subr.mxu0 %v7904_v26 }
0x2c5e   :  { %8297 = vrot.lane.b32.xlu1 %v12142_v35, %s12593_s18 }
0x2c6a   :  { %v7701_v20 = vpop.xlane.xlu0 %7700 }
0x2c6b   :  { %8100 = vrot.lane.b32.xlu0 %v12142_v35, %s12588_s29  ;;  %10726 = vrcp.f32 %v7701_v20 }
0x2c78   :  { %v10727_v25 = vpop.eup %10726 }
0x2c79   :  { %v7705_v35 = vmul.f32 %v10727_v25, %v12328_v27 }
0x2cb6   :  { %v7898_v16 = vpop.xlane.xlu0 %7897 }
0x2cba   :  { %v8095_v1 = vpop.xlane.xlu0 %8094 }
0x2cbf   :  { %v8292_v57 = vpop.xlane.xlu0 %8291 }
0x2cce   :  { %v7698_v44 = vpop.xlane.xlu1 %7697 }
0x2ccf   :  { %10728 = vrcp.f32 %v7698_v44 }
0x2cd0   :  { %10730 = vrcp.f32 %v7898_v16 }
0x2cd2   :  { %v7895_v59 = vpop.xlane.xlu1 %7894 }
0x2cd3   :  { %10732 = vrcp.f32 %v7895_v59 }
0x2cd4   :  { %10734 = vrcp.f32 %v8095_v1 }
0x2cd6   :  { %v8092_v37 = vpop.xlane.xlu1 %8091 }
0x2cd7   :  { %10736 = vrcp.f32 %v8092_v37 }
0x2cd8   :  { %10738 = vrcp.f32 %v8292_v57 }
0x2cda   :  { %v8298_v27 = vpop.permute.xlu1 %8297 }
0x2cdc   :  { %v10729_v8 = vpop.eup %10728 }
0x2cdd   :  { %v7704_v15 = vmul.f32 %v10729_v8, %v12353_v38  ;;  %v10731_v6 = vpop.eup %10730  ;;  %v9396_v38 = vld [vmem:[%s12578_s24 + $0x28] sm:$0xff] }
0x2cde   :  { %v8289_v33 = vpop.xlane.xlu0 %8288  ;;  %v7902_v46 = vmul.f32 %v10731_v6, %v12337_v2 }
0x2cdf   :  { %10740 = vrcp.f32 %v8289_v33  ;;  %10312 = vmatprep.mubr.msk.f32.mxu0 %vm404_vm3, %v7704_v15  ;;  %v9400_v33 = vld [vmem:[%s12579_s20 + $0x1] ss:$0 sm:$0xff] }
0x2ce0   :  { %v10733_v32 = vpop.eup %10732  ;;  %10313 = vmatmul.mubr.msk.f32.vlgmr.msra.gmra.mxu0 %vm404_vm3, %v7705_v35 }
0x2ce1   :  { %10321 = vmatpush3.msra.mxu0 %v7904_v26  ;;  %v7901_v40 = vmul.f32 %v10733_v32, %v12357_v13  ;;  %v10735_v49 = vpop.eup %10734 }
0x2ce2   :  { %v8101_v52 = vpop.permute.xlu0 %8100  ;;  %v8099_v18 = vmul.f32 %v10735_v49, %v12341_v9  ;;  %v9397_v9 = vld [vmem:[%s12578_s24 + $0x30] sm:$0xff] }
0x2ce3   :  { %10322 = vmatprep.mubr.msk.f32.mxu0 %vm404_vm3, %v7901_v40  ;;  %10330 = vmatprep.subr.mxu0 %v8101_v52 }
0x2ce4   :  { %v10737_v58 = vpop.eup %10736  ;;  %10323 = vmatmul.mubr.msk.f32.vlgmr.msra.gmra.mxu0 %vm404_vm3, %v7902_v46  ;;  %10347 = vmatprep.subr.mxu1 %v9397_v9 }
0x2ce5   :  { %10331 = vmatpush3.msra.mxu0 %v8101_v52  ;;  %v8098_v60 = vmul.f32 %v10737_v58, %v12362_v24  ;;  %v10739_v2 = vpop.eup %10738  ;;  %10348 = vmatpush3.msra.mxu1 %v9397_v9 }
0x2ce6   :  { %10340 = vmatprep.subr.mxu0 %v8298_v27  ;;  %v8296_v48 = vmul.f32 %v10739_v2, %v12346_v43  ;;  %10349 = vmatprep.subr.mxu1 %v9396_v38 }
0x2ce7   :  { %10332 = vmatprep.mubr.msk.f32.mxu0 %vm404_vm3, %v8098_v60  ;;  %10350 = vmatpush3.msra.mxu1 %v9396_v38 }
0x2ce8   :  { %10333 = vmatmul.mubr.msk.f32.vlgmr.msra.gmra.mxu0 %vm404_vm3, %v8099_v18  ;;  %10351 = vmatprep.subr.mxu1 %v9395_v3 }
0x2ce9   :  { %10341 = vmatpush3.msra.mxu0 %v8298_v27  ;;  %10352 = vmatpush3.msra.mxu1 %v9395_v3 }
0x2cec   :  { %v10741_v45 = vpop.eup %10740 }
0x2ced   :  { %v8295_v17 = vmul.f32 %v10741_v45, %v10723_v30 }
0x2cef   :  { %10342 = vmatprep.mubr.msk.f32.mxu0 %vm404_vm3, %v8295_v17 }
0x2cf0   :  { %10343 = vmatmul.mubr.msk.f32.vlgmr.msra.gmra.mxu0 %vm404_vm3, %v8296_v48 }
0x2d0c   :  { %v10274_v62 = vpop.f32.mrf.mxu0 }
0x2d0e   :  { %v6966_v0 = vpop.f32.mrf.mxu0 }
0x2d10   :  { %v10284_v29 = vpop.f32.mrf.mxu0 }
0x2d11   :  { %7570 = vrot.lane.b32.xlu1 %v10284_v29, %s12573_s15 }
0x2d12   :  { %v7163_v43 = vpop.f32.mrf.mxu0 }
0x2d13   :  { %7568 = vrot.lane.b32.xlu0 %v7163_v43, %s12573_s15 }
0x2d14   :  { %v10294_v55 = vpop.f32.mrf.mxu0 }
0x2d15   :  { %7578 = vrot.lane.b32.xlu1 %v10294_v55, %s12574_s26 }
0x2d16   :  { %v7360_v13 = vpop.f32.mrf.mxu0 }
0x2d17   :  { %7576 = vrot.lane.b32.xlu0 %v7360_v13, %s12574_s26  ;;  %v9412_v13 = vld [vmem:[%s12580_s11 + $0x38] sm:$0xff] }
0x2d18   :  { %v10304_v51 = vpop.f32.mrf.mxu0  ;;  %10359 = vmatprep.subr.mxu0 %v9412_v13 }
0x2d19   :  { %7586 = vrot.lane.b32.xlu1 %v10304_v51, %s12575_s27  ;;  %10360 = vmatpush3.msra.mxu0 %v9412_v13  ;;  %v9411_v51 = vld [vmem:[%s12580_s11 + $0x30] sm:$0xff] }
0x2d1a   :  { %v7557_v36 = vpop.f32.mrf.mxu0  ;;  %10361 = vmatprep.subr.mxu0 %v9411_v51 }
0x2d1b   :  { %7584 = vrot.lane.b32.xlu0 %v7557_v36, %s12575_s27  ;;  %v9410_v36 = vld [vmem:[%s12580_s11 + $0x28] sm:$0xff]  ;;  %10362 = vmatpush3.msra.mxu0 %v9411_v51  ;;  %v9428_v51 = vld [vmem:[%s12585_s6 + $0x1] ss:$0 sm:$0xff] }
0x2d1c   :  { %10363 = vmatprep.subr.mxu0 %v9410_v36 }
0x2d1d   :  { %10364 = vmatpush3.msra.mxu0 %v9410_v36 }
0x2d83   :  { %v7571_v4 = vpop.permute.xlu1 %7570 }
0x2d84   :  { %v7591_v39 = vsel %vm404_vm3, %v10274_v62, %v7571_v4 }
0x2d85   :  { %v7569_v5 = vpop.permute.xlu0 %7568 }
0x2d86   :  { %v7590_v7 = vsel %vm404_vm3, %v6966_v0, %v7569_v5 }
0x2d87   :  { %v7579_v28 = vpop.permute.xlu1 %7578 }
0x2d88   :  { %v7593_v22 = vsel %vm492_vm9, %v7591_v39, %v7579_v28 }
0x2d89   :  { %v7577_v24 = vpop.permute.xlu0 %7576 }
0x2d8a   :  { %v7592_v53 = vsel %vm492_vm9, %v7590_v7, %v7577_v24 }
0x2d8b   :  { %v7587_v10 = vpop.permute.xlu1 %7586 }
0x2d8c   :  { %v7595_v14 = vsel %vm1242_vm13, %v7593_v22, %v7587_v10 }
0x2d8d   :  { %v7585_v23 = vpop.permute.xlu0 %7584 }
0x2d8e   :  { %v7594_v11 = vsel %vm1242_vm13, %v7592_v53, %v7585_v23 }
0x2d8f   :  { %10353 = vmatprep.mubr.msk.f32.mxu1 %vm300_vm2, %v7594_v11 }
0x2d90   :  { %10354 = vmatmul.mubr.msk.f32.vlgmr.msra.gmra.mxu1 %vm300_vm2, %v7595_v14 }
0x2da0   :  { %v10314_v41 = vpop.f32.mrf.mxu0 }
0x2da2   :  { %v7781_v63 = vpop.f32.mrf.mxu0 }
0x2da4   :  { %v10324_v31 = vpop.f32.mrf.mxu0 }
0x2da5   :  { %8385 = vrot.lane.b32.xlu1 %v10324_v31, %s12573_s15 }
0x2da6   :  { %v7978_v30 = vpop.f32.mrf.mxu0 }
0x2da7   :  { %8383 = vrot.lane.b32.xlu0 %v7978_v30, %s12573_s15 }
0x2da8   :  { %v10334_v19 = vpop.f32.mrf.mxu0 }
0x2da9   :  { %8393 = vrot.lane.b32.xlu1 %v10334_v19, %s12574_s26  ;;  %v9407_v19 = vld [vmem:[%s12581_s5 + $0x1] ss:$0 sm:$0xff] }
0x2daa   :  { %v8175_v47 = vpop.f32.mrf.mxu0 }
0x2dab   :  { %8391 = vrot.lane.b32.xlu0 %v8175_v47, %s12574_s26 }
0x2db0   :  { %v10344_v42 = vpop.f32.mrf.mxu0 }
0x2db1   :  { %8401 = vrot.lane.b32.xlu1 %v10344_v42, %s12575_s27  ;;  %v9408_v42 = vld [vmem:[%s12582_s22 + $0x1] ss:$0 sm:$0xff] }
0x2db2   :  { %v8372_v34 = vpop.f32.mrf.mxu0 }
0x2db3   :  { %8399 = vrot.lane.b32.xlu0 %v8372_v34, %s12575_s27 }
0x2e17   :  { %v8386_v56 = vpop.permute.xlu1 %8385 }
0x2e18   :  { %v8406_v1 = vsel %vm404_vm3, %v10314_v41, %v8386_v56 }
0x2e19   :  { %v8384_v26 = vpop.permute.xlu0 %8383 }
0x2e1a   :  { %v8405_v44 = vsel %vm404_vm3, %v7781_v63, %v8384_v26 }
0x2e1b   :  { %v8394_v20 = vpop.permute.xlu1 %8393 }
0x2e1c   :  { %v8408_v25 = vsel %vm492_vm9, %v8406_v1, %v8394_v20  ;;  %v9425_v1 = vld [vmem:[%s12583_s12 + $0x70] sm:$0xff] }
0x2e1d   :  { %v8392_v16 = vpop.permute.xlu0 %8391 }
0x2e1e   :  { %v8407_v37 = vsel %vm492_vm9, %v8405_v44, %v8392_v16 }
0x2e23   :  { %v8402_v59 = vpop.permute.xlu1 %8401 }
0x2e24   :  { %v8410_v15 = vsel %vm1242_vm13, %v8408_v25, %v8402_v59  ;;  %v9426_v59 = vld [vmem:[%s12583_s12 + $0x78] sm:$0xff] }
0x2e25   :  { %v8400_v57 = vpop.permute.xlu0 %8399  ;;  %10373 = vmatprep.subr.mxu1 %v9426_v59  ;;  %v9422_v25 = vld [vmem:[%s12583_s12 + $0x58] sm:$0xff] }
0x2e26   :  { %v8409_v8 = vsel %vm1242_vm13, %v8407_v37, %v8400_v57  ;;  %10374 = vmatpush3.msra.mxu1 %v9426_v59  ;;  %v9424_v37 = vld [vmem:[%s12583_s12 + $0x68] sm:$0xff]  ;;  %v9423_v57 = vld [vmem:[%s12583_s12 + $0x60] sm:$0xff] }
0x2e27   :  { %10356 = vmatprep.mubr.msk.f32.mxu1 %vm300_vm2, %v8409_v8  ;;  %10375 = vmatprep.subr.mxu1 %v9425_v1  ;;  %v9421_v8 = vld [vmem:[%s12583_s12 + $0x50] sm:$0xff] }
0x2e28   :  { %10357 = vmatmul.mubr.msk.f32.gmra.mxu1 %vm300_vm2, %v8410_v15  ;;  %v9420_v15 = vld [vmem:[%s12583_s12 + $0x48] sm:$0xff] }
0x2e29   :  { %10376 = vmatpush3.msra.mxu1 %v9425_v1 }
0x2e2a   :  { %10377 = vmatprep.subr.mxu1 %v9424_v37 }
0x2e2b   :  { %10378 = vmatpush3.msra.mxu1 %v9424_v37 }
0x2e2c   :  { %10379 = vmatprep.subr.mxu1 %v9423_v57 }
0x2e2d   :  { %10380 = vmatpush3.msra.mxu1 %v9423_v57 }
0x2e2e   :  { %10381 = vmatprep.subr.mxu1 %v9422_v25 }
0x2e2f   :  { %10382 = vmatpush3.msra.mxu1 %v9422_v25 }
0x2e30   :  { %10383 = vmatprep.subr.mxu1 %v9421_v8 }
0x2e31   :  { %10384 = vmatpush3.msra.mxu1 %v9421_v8 }
0x2e32   :  { %10385 = vmatprep.subr.mxu1 %v9420_v15 }
0x2e33   :  { %10386 = vmatpush3.msra.mxu1 %v9420_v15 }
0x2e50   :  { %v10355_v35 = vpop.f32.mrf.mxu1 }
0x2e51   :  { %v8508_v6 = vadd.f32 %v10355_v35, %v9400_v33 }
0x2e52   :  { %v8502_v32 = vpop.f32.mrf.mxu1 }
0x2e53   :  { %v8522_v40 = vadd.f32 %v8508_v6, %v12137_v12  ;;  %v8503_v52 = vadd.f32 %v9400_v33, %v8502_v32 }
0x2e55   :  { %v8521_v46 = vadd.f32 %v8503_v52, %v12119_v54  ;;  %v8532_v49 = vsel %vm300_vm2, %v8522_v40, 0.0 }
0x2e56   :  { %8533 = vadd.xlane.f32.xlu1 %v8532_v49 }
0x2e57   :  { %v8529_v58 = vsel %vm300_vm2, %v8521_v46, 0.0 }
0x2e58   :  { %8530 = vadd.xlane.f32.xlu0 %v8529_v58 }
0x2edf   :  { %v8534_v45 = vpop.xlane.xlu1 %8533 }
0x2ee0   :  { %v8542_v50 = vmul.f32 0.03125, %v8534_v45 }
0x2ee1   :  { %v8531_v27 = vpop.xlane.xlu0 %8530 }
0x2ee2   :  { %v8541_v60 = vmul.f32 0.03125, %v8531_v27  ;;  %v8546_v38 = vsub.f32 %v8522_v40, %v8542_v50 }
0x2ee4   :  { %v8545_v18 = vsub.f32 %v8521_v46, %v8541_v60  ;;  %v8550_v43 = vmul.f32 %v8546_v38, %v8546_v38 }
0x2ee6   :  { %v8549_v2 = vmul.f32 %v8545_v18, %v8545_v18  ;;  %v8556_v55 = vsel %vm300_vm2, %v8550_v43, 0.0 }
0x2ee8   :  { %v10358_v17 = vpop.f32.mrf.mxu1  ;;  %v8553_v48 = vsel %vm300_vm2, %v8549_v2, 0.0 }
0x2ee9   :  { %8554 = vadd.xlane.f32.xlu1 %v8553_v48  ;;  %v8518_v54 = vadd.f32 %v10358_v17, %v9400_v33  ;;  %v9414_v48 = vld [vmem:[%s12584_s10 + $0x1] ss:$0 sm:$0xff] }
0x2eea   :  { %v8512_v12 = vpop.f32.mrf.mxu1 }
0x2eeb   :  { %v8513_v9 = vadd.f32 %v9400_v33, %v8512_v12  ;;  %v8524_v0 = vadd.f32 %v8518_v54, %v12164_v21  ;;  %v9419_v33 = vld [vmem:[%s12583_s12 + $0x40] sm:$0xff] }
0x2eec   :  { %10387 = vmatprep.subr.mxu1 %v9419_v33 }
0x2eed   :  { %v8523_v62 = vadd.f32 %v8513_v9, %v12158_v61  ;;  %v8538_v29 = vsel %vm300_vm2, %v8524_v0, 0.0  ;;  %v9409_v61 = vld [vmem:[%s12580_s11 + $0x20] sm:$0xff]  ;;  %10388 = vmatpush3.msra.mxu1 %v9419_v33 }
0x2eee   :  { %10365 = vmatprep.subr.mxu0 %v9409_v61 }
0x2eef   :  { %v8535_v3 = vsel %vm300_vm2, %v8523_v62, 0.0  ;;  %10366 = vmatpush3.msra.mxu0 %v9409_v61 }
0x2ef0   :  { %8536 = vadd.xlane.f32.xlu0 %v8535_v3 }
0x2ef4   :  { %8539 = vadd.xlane.f32.xlu0 %v8538_v29 }
0x2ef8   :  { %8557 = vadd.xlane.f32.xlu0 %v8556_v55 }
0x2f72   :  { %v8555_v21 = vpop.xlane.xlu1 %8554 }
0x2f73   :  { %v8565_v4 = vmul.f32 0.03125, %v8555_v21 }
0x2f75   :  { %v8569_v5 = vadd.f32 1e-05, %v8565_v4 }
0x2f77   :  { %10742 = vrsqrt.f32 %v8569_v5 }
0x2f79   :  { %v8537_v28 = vpop.xlane.xlu0 %8536 }
0x2f7a   :  { %v8543_v24 = vmul.f32 0.03125, %v8537_v28 }
0x2f7c   :  { %v8547_v7 = vsub.f32 %v8523_v62, %v8543_v24 }
0x2f7d   :  { %v8540_v10 = vpop.xlane.xlu0 %8539 }
0x2f7e   :  { %v8544_v39 = vmul.f32 0.03125, %v8540_v10  ;;  %v8551_v53 = vmul.f32 %v8547_v7, %v8547_v7 }
0x2f80   :  { %v8548_v23 = vsub.f32 %v8524_v0, %v8544_v39  ;;  %v8559_v22 = vsel %vm300_vm2, %v8551_v53, 0.0 }
0x2f81   :  { %8560 = vadd.xlane.f32.xlu1 %v8559_v22  ;;  %v8558_v11 = vpop.xlane.xlu0 %8557 }
0x2f82   :  { %v8566_v14 = vmul.f32 0.03125, %v8558_v11  ;;  %v8552_v41 = vmul.f32 %v8548_v23, %v8548_v23 }
0x2f84   :  { %v10743_v63 = vpop.eup %10742  ;;  %v8570_v31 = vadd.f32 1e-05, %v8566_v14  ;;  %v8562_v30 = vsel %vm300_vm2, %v8552_v41, 0.0 }
0x2f85   :  { %8563 = vadd.xlane.f32.xlu0 %v8562_v30  ;;  %v8577_v47 = vmul.f32 %v10743_v63, %v8545_v18 }
0x2f86   :  { %10744 = vrsqrt.f32 %v8570_v31 }
0x2f87   :  { %v8587_v34 = vmul.f32 %v9407_v19, %v8577_v47 }
0x2f89   :  { %v12450_v56 = vadd.f32 %v9408_v42, %v8587_v34 }
0x2f8b   :  { %10367 = vmatprep.mubr.msk.f32.mxu0 %vm300_vm2, %v12450_v56 }
0x2f93   :  { %v10745_v26 = vpop.eup %10744 }
0x2f94   :  { %v8578_v20 = vmul.f32 %v10745_v26, %v8546_v38 }
0x2f96   :  { %v8588_v16 = vmul.f32 %v9407_v19, %v8578_v20 }
0x2f98   :  { %v12454_v44 = vadd.f32 %v9408_v42, %v8588_v16 }
0x2f9a   :  { %10368 = vmatmul.mubr.msk.f32.vlgmr.msra.gmra.mxu0 %vm300_vm2, %v12454_v44 }
0x300a   :  { %v8561_v35 = vpop.xlane.xlu1 %8560 }
0x300b   :  { %v8567_v6 = vmul.f32 0.03125, %v8561_v35 }
0x300d   :  { %v8571_v32 = vadd.f32 1e-05, %v8567_v6 }
0x300e   :  { %v8564_v40 = vpop.xlane.xlu0 %8563 }
0x300f   :  { %10746 = vrsqrt.f32 %v8571_v32  ;;  %v8568_v52 = vmul.f32 0.03125, %v8564_v40 }
0x3011   :  { %v8572_v46 = vadd.f32 1e-05, %v8568_v52 }
0x3013   :  { %10748 = vrsqrt.f32 %v8572_v46 }
0x301c   :  { %v10747_v49 = vpop.eup %10746 }
0x301d   :  { %v8579_v58 = vmul.f32 %v10747_v49, %v8547_v7 }
0x301f   :  { %v8589_v27 = vmul.f32 %v9407_v19, %v8579_v58  ;;  %v9435_v58 = vld [vmem:[%s12599_s25 + $0x1] ss:$0 sm:$0xff] }
0x3020   :  { %v10749_v60 = vpop.eup %10748 }
0x3021   :  { %v8599_v18 = vadd.f32 %v9408_v42, %v8589_v27  ;;  %v8580_v2 = vmul.f32 %v10749_v60, %v8548_v23 }
0x3023   :  { %10370 = vmatprep.mubr.msk.f32.mxu0 %vm300_vm2, %v8599_v18  ;;  %v8590_v45 = vmul.f32 %v9407_v19, %v8580_v2 }
0x3025   :  { %v8600_v17 = vadd.f32 %v9408_v42, %v8590_v45 }
0x3027   :  { %10371 = vmatmul.mubr.msk.f32.gmra.mxu0 %vm300_vm2, %v8600_v17 }
0x305a   :  { %v10369_v12 = vpop.f32.mrf.mxu0 }
0x305b   :  { %v8698_v50 = vadd.f32 %v10369_v12, %v9414_v48 }
0x305c   :  { %v8692_v54 = vpop.f32.mrf.mxu0 }
0x305d   :  { %v8693_v9 = vadd.f32 %v9414_v48, %v8692_v54  ;;  %v8712_v38 = vmax.f32 %v8698_v50, 0.0 }
0x305f   :  { %v8711_v62 = vmax.f32 %v8693_v9, 0.0 }
0x3061   :  { %10389 = vmatprep.mubr.msk.f32.mxu1 %vm4419_vm0, %v8711_v62 }
0x3062   :  { %10390 = vmatmul.mubr.msk.f32.vlgmr.msra.gmra.mxu1 %vm4419_vm0, %v8712_v38 }
0x30e7   :  { %v10372_v0 = vpop.f32.mrf.mxu0 }
0x30e8   :  { %v8708_v3 = vadd.f32 %v10372_v0, %v9414_v48 }
0x30e9   :  { %v8702_v29 = vpop.f32.mrf.mxu0 }
0x30ea   :  { %v8703_v43 = vadd.f32 %v9414_v48, %v8702_v29  ;;  %v8714_v13 = vmax.f32 %v8708_v3, 0.0 }
0x30ec   :  { %v8713_v55 = vmax.f32 %v8703_v43, 0.0 }
0x30ee   :  { %10392 = vmatprep.mubr.msk.f32.mxu1 %vm4419_vm0, %v8713_v55 }
0x30ef   :  { %10393 = vmatmul.mubr.msk.f32.gmra.mxu1 %vm4419_vm0, %v8714_v13 }
0x3122   :  { %v10391_v36 = vpop.f32.mrf.mxu1 }
0x3123   :  { %v8816_v61 = vadd.f32 %v10391_v36, %v9428_v51 }
0x3124   :  { %v8810_v21 = vpop.f32.mrf.mxu1 }
0x3125   :  { %v8830_v4 = vadd.f32 %v8816_v61, %v12454_v44  ;;  %v8811_v5 = vadd.f32 %v9428_v51, %v8810_v21 }
0x3127   :  { %v8829_v28 = vadd.f32 %v8811_v5, %v12450_v56  ;;  %v8840_v24 = vsel %vm300_vm2, %v8830_v4, 0.0 }
0x3128   :  { %8841 = vadd.xlane.f32.xlu0 %v8840_v24 }
0x3129   :  { %v8837_v7 = vsel %vm300_vm2, %v8829_v28, 0.0 }
0x312a   :  { %8838 = vadd.xlane.f32.xlu1 %v8837_v7 }
0x31af   :  { %v10394_v10 = vpop.f32.mrf.mxu1 }
0x31b0   :  { %v8826_v39 = vadd.f32 %v10394_v10, %v9428_v51 }
0x31b1   :  { %v8820_v53 = vpop.f32.mrf.mxu1  ;;  %v8842_v23 = vpop.xlane.xlu0 %8841 }
0x31b2   :  { %v8832_v22 = vadd.f32 %v8826_v39, %v8600_v17  ;;  %v8821_v11 = vadd.f32 %v9428_v51, %v8820_v53  ;;  %v8850_v14 = vmul.f32 0.03125, %v8842_v23 }
0x31b3   :  { %v8839_v41 = vpop.xlane.xlu1 %8838 }
0x31b4   :  { %v8831_v63 = vadd.f32 %v8821_v11, %v8599_v18  ;;  %v8854_v31 = vsub.f32 %v8830_v4, %v8850_v14  ;;  %v8849_v30 = vmul.f32 0.03125, %v8839_v41  ;;  %v8846_v19 = vsel %vm300_vm2, %v8832_v22, 0.0  ;;  %v9436_v18 = vld [vmem:[%s12600_s8 + $0x1] ss:$0 sm:$0xff] }
0x31b5   :  { %8847 = vadd.xlane.f32.xlu0 %v8846_v19  ;;  %v8983_v19 = vld [vmem:[%s12601_s14] sm:$0xff] }
0x31b6   :  { %v8853_v47 = vsub.f32 %v8829_v28, %v8849_v30  ;;  %v8843_v42 = vsel %vm300_vm2, %v8831_v63, 0.0  ;;  %v8858_v34 = vmul.f32 %v8854_v31, %v8854_v31  ;;  %v8984_v30 = vld [vmem:[%s12601_s14 + $0x8] sm:$0xff] }
0x31b7   :  { %8844 = vadd.xlane.f32.xlu1 %v8843_v42 }
0x31b8   :  { %v8864_v56 = vsel %vm300_vm2, %v8858_v34, 0.0  ;;  %v8857_v26 = vmul.f32 %v8853_v47, %v8853_v47 }
0x31b9   :  { %8865 = vadd.xlane.f32.xlu0 %v8864_v56 }
0x31ba   :  { %v8861_v20 = vsel %vm300_vm2, %v8857_v26, 0.0 }
0x31bb   :  { %8862 = vadd.xlane.f32.xlu1 %v8861_v20 }
0x323e   :  { %v8848_v16 = vpop.xlane.xlu0 %8847 }
0x323f   :  { %v8852_v44 = vmul.f32 0.03125, %v8848_v16 }
0x3240   :  { %v8845_v59 = vpop.xlane.xlu1 %8844 }
0x3241   :  { %v8856_v1 = vsub.f32 %v8832_v22, %v8852_v44  ;;  %v8851_v37 = vmul.f32 0.03125, %v8845_v59 }
0x3242   :  { %v8866_v57 = vpop.xlane.xlu0 %8865 }
0x3243   :  { %v8855_v25 = vsub.f32 %v8831_v63, %v8851_v37  ;;  %v8874_v8 = vmul.f32 0.03125, %v8866_v57  ;;  %v8860_v15 = vmul.f32 %v8856_v1, %v8856_v1  ;;  %v8986_v63 = vld [vmem:[%s12601_s14 + $0x18] sm:$0xff] }
0x3244   :  { %v8863_v33 = vpop.xlane.xlu1 %8862  ;;  %10395 = vmatprep.subr.mxu0 %v8986_v63 }
0x3245   :  { %v8878_v35 = vadd.f32 1e-05, %v8874_v8  ;;  %v8873_v6 = vmul.f32 0.03125, %v8863_v33  ;;  %v8870_v32 = vsel %vm300_vm2, %v8860_v15, 0.0  ;;  %v8859_v40 = vmul.f32 %v8855_v25, %v8855_v25  ;;  %10396 = vmatpush3.msra.mxu0 %v8986_v63 }
0x3246   :  { %8871 = vadd.xlane.f32.xlu0 %v8870_v32  ;;  %v9437_v32 = vld [vmem:[%s12602_s19] ss:$0 sm:$0xff] }
0x3247   :  { %10750 = vrsqrt.f32 %v8878_v35  ;;  %v8877_v52 = vadd.f32 1e-05, %v8873_v6  ;;  %v8867_v46 = vsel %vm300_vm2, %v8859_v40, 0.0 }
0x3248   :  { %8868 = vadd.xlane.f32.xlu1 %v8867_v46 }
0x3249   :  { %10752 = vrsqrt.f32 %v8877_v52 }
0x3254   :  { %v10751_v49 = vpop.eup %10750 }
0x3255   :  { %v8886_v27 = vmul.f32 %v10751_v49, %v8854_v31  ;;  %v8985_v31 = vld [vmem:[%s12601_s14 + $0x10] sm:$0xff]  ;;  %v9438_v49 = vld [vmem:[%s12603_s1] ss:$0 sm:$0xff] }
0x3256   :  { %v10753_v60 = vpop.eup %10752  ;;  %10397 = vmatprep.subr.mxu0 %v8985_v31 }
0x3257   :  { %v8896_v2 = vmul.f32 %v9435_v58, %v8886_v27  ;;  %v8885_v45 = vmul.f32 %v10753_v60, %v8853_v47  ;;  %10398 = vmatpush3.msra.mxu0 %v8985_v31 }
0x3258   :  { %10399 = vmatprep.subr.mxu0 %v8984_v30 }
0x3259   :  { %v8906_v17 = vadd.f32 %v9436_v18, %v8896_v2  ;;  %v8895_v48 = vmul.f32 %v9435_v58, %v8885_v45  ;;  %10400 = vmatpush3.msra.mxu0 %v8984_v30 }
0x325a   :  { %10401 = vmatprep.subr.mxu0 %v8983_v19 }
0x325b   :  { %v8914_v12 = vsel %vm300_vm2, %v8906_v17, 0.0  ;;  %v8905_v50 = vadd.f32 %v9436_v18, %v8895_v48  ;;  %10402 = vmatpush3.msra.mxu0 %v8983_v19 }
0x325c   :  { %8915 = vadd.xlane.f32.xlu0 %v8914_v12 }
0x325d   :  { %v8911_v54 = vsel %vm300_vm2, %v8905_v50, 0.0 }
0x325e   :  { %8912 = vadd.xlane.f32.xlu1 %v8911_v54 }
0x32cf   :  { %v8872_v9 = vpop.xlane.xlu0 %8871 }
0x32d0   :  { %v8876_v62 = vmul.f32 0.03125, %v8872_v9 }
0x32d1   :  { %v8869_v38 = vpop.xlane.xlu1 %8868 }
0x32d2   :  { %v8880_v0 = vadd.f32 1e-05, %v8876_v62  ;;  %v8875_v3 = vmul.f32 0.03125, %v8869_v38 }
0x32d4   :  { %10754 = vrsqrt.f32 %v8880_v0  ;;  %v8879_v29 = vadd.f32 1e-05, %v8875_v3 }
0x32d6   :  { %10756 = vrsqrt.f32 %v8879_v29 }
0x32e1   :  { %v10755_v43 = vpop.eup %10754 }
0x32e2   :  { %v8888_v55 = vmul.f32 %v10755_v43, %v8856_v1  ;;  %v9439_v43 = vld [vmem:[%s12604_s28] ss:$0 sm:$0xff] }
0x32e3   :  { %v10757_v13 = vpop.eup %10756 }
0x32e4   :  { %v8898_v51 = vmul.f32 %v9435_v58, %v8888_v55  ;;  %v8887_v36 = vmul.f32 %v10757_v13, %v8855_v25 }
0x32e5   :  { %v8916_v61 = vpop.xlane.xlu0 %8915 }
0x32e6   :  { %v8924_v21 = vmul.f32 0.03125, %v8916_v61  ;;  %v8908_v4 = vadd.f32 %v9436_v18, %v8898_v51  ;;  %v8897_v5 = vmul.f32 %v9435_v58, %v8887_v36 }
0x32e7   :  { %v8913_v28 = vpop.xlane.xlu1 %8912 }
0x32e8   :  { %v8928_v24 = vsub.f32 %v8906_v17, %v8924_v21  ;;  %v8923_v7 = vmul.f32 0.03125, %v8913_v28  ;;  %v8920_v10 = vsel %vm300_vm2, %v8908_v4, 0.0  ;;  %v8907_v39 = vadd.f32 %v9436_v18, %v8897_v5 }
0x32e9   :  { %8921 = vadd.xlane.f32.xlu0 %v8920_v10 }
0x32ea   :  { %v8927_v53 = vsub.f32 %v8905_v50, %v8923_v7  ;;  %v8917_v23 = vsel %vm300_vm2, %v8907_v39, 0.0  ;;  %v8932_v22 = vmul.f32 %v8928_v24, %v8928_v24 }
0x32eb   :  { %8918 = vadd.xlane.f32.xlu1 %v8917_v23 }
0x32ec   :  { %v8938_v11 = vsel %vm300_vm2, %v8932_v22, 0.0  ;;  %v8931_v14 = vmul.f32 %v8927_v53, %v8927_v53 }
0x32ed   :  { %8939 = vadd.xlane.f32.xlu0 %v8938_v11 }
0x32ee   :  { %v8935_v41 = vsel %vm300_vm2, %v8931_v14, 0.0 }
0x32ef   :  { %8936 = vadd.xlane.f32.xlu1 %v8935_v41 }
0x3372   :  { %v8922_v47 = vpop.xlane.xlu0 %8921 }
0x3373   :  { %v8926_v42 = vmul.f32 0.03125, %v8922_v47 }
0x3374   :  { %v8919_v34 = vpop.xlane.xlu1 %8918 }
0x3375   :  { %v8930_v56 = vsub.f32 %v8908_v4, %v8926_v42  ;;  %v8925_v26 = vmul.f32 0.03125, %v8919_v34 }
0x3376   :  { %v8940_v20 = vpop.xlane.xlu0 %8939 }
0x3377   :  { %v8929_v16 = vsub.f32 %v8907_v39, %v8925_v26  ;;  %v8948_v44 = vmul.f32 0.03125, %v8940_v20  ;;  %v8934_v59 = vmul.f32 %v8930_v56, %v8930_v56 }
0x3378   :  { %v8937_v1 = vpop.xlane.xlu1 %8936 }
0x3379   :  { %v8952_v37 = vadd.f32 1e-05, %v8948_v44  ;;  %v8947_v57 = vmul.f32 0.03125, %v8937_v1  ;;  %v8944_v25 = vsel %vm300_vm2, %v8934_v59, 0.0  ;;  %v8933_v8 = vmul.f32 %v8929_v16, %v8929_v16 }
0x337a   :  { %8945 = vadd.xlane.f32.xlu0 %v8944_v25 }
0x337b   :  { %10758 = vrsqrt.f32 %v8952_v37  ;;  %v8951_v15 = vadd.f32 1e-05, %v8947_v57  ;;  %v8941_v33 = vsel %vm300_vm2, %v8933_v8, 0.0 }
0x337c   :  { %8942 = vadd.xlane.f32.xlu1 %v8941_v33 }
0x337d   :  { %10760 = vrsqrt.f32 %v8951_v15 }
0x3388   :  { %v10759_v35 = vpop.eup %10758 }
0x3389   :  { %v8960_v6 = vmul.f32 %v10759_v35, %v8928_v24 }
0x338a   :  { %v10761_v40 = vpop.eup %10760 }
0x338b   :  { %v8959_v52 = vmul.f32 %v10761_v40, %v8927_v53  ;;  %v8970_v46 = vmul.f32 %v9437_v32, %v8960_v6 }
0x338d   :  { %v8969_v58 = vmul.f32 %v9437_v32, %v8959_v52  ;;  %v8980_v60 = vadd.f32 %v9438_v49, %v8970_v46 }
0x338f   :  { %v8979_v27 = vadd.f32 %v9438_v49, %v8969_v58 }
0x3391   :  { %10403 = vmatprep.mubr.msk.f32.mxu0 %vm300_vm2, %v8979_v27 }
0x3392   :  { %10404 = vmatmul.mubr.msk.f32.vlgmr.msra.gmra.mxu0 %vm300_vm2, %v8980_v60 }
0x3403   :  { %v8946_v18 = vpop.xlane.xlu0 %8945 }
0x3404   :  { %v8950_v2 = vmul.f32 0.03125, %v8946_v18 }
0x3405   :  { %v8943_v45 = vpop.xlane.xlu1 %8942 }
0x3406   :  { %v8954_v17 = vadd.f32 1e-05, %v8950_v2  ;;  %v8949_v48 = vmul.f32 0.03125, %v8943_v45 }
0x3408   :  { %10762 = vrsqrt.f32 %v8954_v17  ;;  %v8953_v12 = vadd.f32 1e-05, %v8949_v48 }
0x340a   :  { %10764 = vrsqrt.f32 %v8953_v12 }
0x3415   :  { %v10763_v50 = vpop.eup %10762 }
0x3416   :  { %v8962_v54 = vmul.f32 %v10763_v50, %v8930_v56 }
0x3417   :  { %v10765_v9 = vpop.eup %10764 }
0x3418   :  { %v8961_v62 = vmul.f32 %v10765_v9, %v8929_v16  ;;  %v8972_v38 = vmul.f32 %v9437_v32, %v8962_v54 }
0x341a   :  { %v8971_v0 = vmul.f32 %v9437_v32, %v8961_v62  ;;  %v8982_v29 = vadd.f32 %v9438_v49, %v8972_v38 }
0x341c   :  { %v8981_v3 = vadd.f32 %v9438_v49, %v8971_v0 }
0x341e   :  { %10406 = vmatprep.mubr.msk.f32.mxu0 %vm300_vm2, %v8981_v3 }
0x341f   :  { %10407 = vmatmul.mubr.msk.f32.gmra.mxu0 %vm300_vm2, %v8982_v29 }
0x3452   :  { %v10405_v55 = vpop.f32.mrf.mxu0 }
0x3453   :  { %v9078_v13 = vadd.f32 %v10405_v55, %v9439_v43 }
0x3454   :  { %v9072_v51 = vpop.f32.mrf.mxu0 }
0x3455   :  { %9092 = vst.msk [vmem:[%s12605_s30 + $0x8] sm:$0xff] %vm148_vm1, %v9078_v13  ;;  %v9073_v36 = vadd.f32 %v9439_v43, %v9072_v51 }
0x3457   :  { %9091 = vst.msk [vmem:[%s12605_s30] sm:$0xff] %vm148_vm1, %v9073_v36 }
0x34df   :  { %v10408_v61 = vpop.f32.mrf.mxu0 }
0x34e0   :  { %v9088_v21 = vadd.f32 %v10408_v61, %v9439_v43 }
0x34e1   :  { %v9082_v4 = vpop.f32.mrf.mxu0 }
0x34e2   :  { %9094 = vst.msk [vmem:[%s12605_s30 + $0x18] sm:$0xff] %vm148_vm1, %v9088_v21  ;;  %v9083_v5 = vadd.f32 %v9439_v43, %v9082_v4 }
0x34e4   :  { %9093 = vst.msk [vmem:[%s12605_s30 + $0x10] sm:$0xff] %vm148_vm1, %v9083_v5 }

</bundles_post_ra>
